<compile_context>
chip_gen: v7x
topology: tpu7x:2x2x1
jax: 0.10.0
libtpu: 0.0.40
codegen_flags: <defaults>
</compile_context>

<pallas_src>
import numpy as np
import jax
import jax.numpy as jnp
from jax.experimental import pallas as pl
from jax.experimental.pallas import tpu as pltpu

EPS = 1e-5
NEG_SLOPE = 0.2
Z_DIM = 32
OUT_LANES = 128          # lane-dense output slab width (>= 2 * Z_DIM)
KSIZE = 4
STRIDE = 2


# ------------------------------ Pallas kernel ------------------------------ #

def _fused_encoder_kernel(p1_ref, w1_ref, g1_ref, be1_ref,
                          s2_ref, w2_ref, g2_ref, be2_ref,
                          s3_ref, w3_ref, b3_ref, out_ref):
    """Entire encoder forward in one kernel body; all intermediates stay in VMEM."""

    def bn_lrelu(y, n_rows, g, be):
        # Batch-stats BatchNorm (biased variance, PyTorch training mode) + LeakyReLU.
        inv_n = 1.0 / n_rows
        mean = jnp.sum(y, axis=0, keepdims=True) * inv_n
        var = jnp.sum(y * y, axis=0, keepdims=True) * inv_n - mean * mean
        var = jnp.maximum(var, 0.0)
        yn = (y - mean) * jax.lax.rsqrt(var + EPS) * g + be
        return jnp.maximum(yn, NEG_SLOPE * yn)

    # -------- layer 1: conv (im2col matmul) + BN + LeakyReLU --------
    y1 = jnp.dot(p1_ref[...], w1_ref[...], preferred_element_type=jnp.float32)
    h1 = bn_lrelu(y1, y1.shape[0], g1_ref[...], be1_ref[...])            # (M1, 16)

    # -------- layer 2: conv via selection-matmul gather + BN + LeakyReLU --------
    # z2[:, t*C2:(t+1)*C2] = h1 @ W2_tap_t ;  y2 = sum_t S2[t] @ z2_tap_t
    taps = s2_ref.shape[0]
    m2 = s2_ref.shape[1]
    c2 = g2_ref.shape[1]
    z2 = jnp.dot(h1, w2_ref[...], preferred_element_type=jnp.float32)    # (M1, taps*C2)
    y2 = jnp.zeros((m2, c2), jnp.float32)
    for t in range(taps):
        y2 = y2 + jnp.dot(s2_ref[t], z2[:, t * c2:(t + 1) * c2],
                          preferred_element_type=jnp.float32)
    h2 = bn_lrelu(y2, m2, g2_ref[...], be2_ref[...])                     # (M2, 32)

    # -------- layer 3: conv (+bias, no BN), exp on sigma lanes, lane-dense store ----
    mb = s3_ref.shape[1]                 # batch rows
    co = out_ref.shape[1]                # 128 (weight columns zero-padded to 128)
    z3 = jnp.dot(h2, w3_ref[...], preferred_element_type=jnp.float32)    # (M2, taps*128)
    y3 = jnp.zeros((mb, co), jnp.float32)
    for t in range(taps):
        y3 = y3 + jnp.dot(s3_ref[t], z3[:, t * co:(t + 1) * co],
                          preferred_element_type=jnp.float32)
    y3 = y3 + b3_ref[...]
    # lanes [0,32): mu ; lanes [32,64): exp(logvar) ; lanes [64,128): stay zero.
    lane = jax.lax.broadcasted_iota(jnp.int32, y3.shape, 1)
    out_ref[...] = jnp.where((lane >= Z_DIM) & (lane < 2 * Z_DIM), jnp.exp(y3), y3)


# -------------------------------- host glue -------------------------------- #

def _conv_out(n, k=KSIZE, s=STRIDE):
    return (n - k) // s + 1


def _im2col_input(x, k=KSIZE, s=STRIDE):
    """x: (B, C, H, W) -> patches (B*Ho*Wo, k*k*C); rows ordered (b, ho, wo),
    K ordered (i, j, c). Only used once, for the network input (layer 1)."""
    B, C, H, W = x.shape
    Ho, Wo = _conv_out(H), _conv_out(W)
    cols = [x[:, :, i:i + s * Ho:s, j:j + s * Wo:s]
            for i in range(k) for j in range(k)]            # each (B, C, Ho, Wo)
    p = jnp.stack(cols, axis=-1)                            # (B, C, Ho, Wo, k*k)
    p = p.transpose(0, 2, 3, 4, 1)                          # (B, Ho, Wo, k*k, C)
    return p.reshape(B * Ho * Wo, k * k * C)


def _selection_matrices(B, Hin, Win, k=KSIZE, s=STRIDE):
    """Constant 0/1 matrices S of shape (k*k, M_out, M_in): (S[t] @ H)[m] picks the
    input row feeding kernel tap t = i*k + j of output position m (stride-s conv)."""
    Ho, Wo = _conv_out(Hin), _conv_out(Win)
    S = np.zeros((k * k, B * Ho * Wo, B * Hin * Win), np.float32)
    for b in range(B):
        for ho in range(Ho):
            for wo in range(Wo):
                m = (b * Ho + ho) * Wo + wo
                for i in range(k):
                    for j in range(k):
                        r = (b * Hin + s * ho + i) * Win + (s * wo + j)
                        S[i * k + j, m, r] = 1.0
    return S


def _prep_weights(params):
    w1, w2, w3 = params["w1"], params["w2"], params["w3"]
    c1, c3 = w1.shape[0], w3.shape[0]
    # layer 1: (Cout, Cin, kh, kw) -> (kh*kw*Cin, Cout)
    w1m = jnp.transpose(w1, (2, 3, 1, 0)).reshape(-1, c1)
    # layer 2: (Cout, Cin, kh, kw) -> (Cin, kh*kw*Cout); column = tap*Cout + co
    w2cat = jnp.transpose(w2, (1, 2, 3, 0)).reshape(w2.shape[1], -1)
    # layer 3: same, but Cout padded to OUT_LANES for a lane-dense final store
    w3p = jnp.transpose(w3, (1, 2, 3, 0))
    w3p = jnp.pad(w3p, ((0, 0), (0, 0), (0, 0), (0, OUT_LANES - c3)))
    w3cat = w3p.reshape(w3.shape[1], -1)
    b3p = jnp.pad(params["b3"].reshape(1, -1), ((0, 0), (0, OUT_LANES - c3)))
    return w1m, w2cat, w3cat, b3p


def _full_spec(shape):
    return pl.BlockSpec(shape, lambda i: (0,) * len(shape))


@jax.jit
def encoder_forward(x, params):
    """x: (B, 1, 28, 28) NCHW float32 -> (mu (B, 32), sigma (B, 32))."""
    B, _, H, W = x.shape
    H1, W1 = _conv_out(H), _conv_out(W)      # 13, 13
    H2, W2 = _conv_out(H1), _conv_out(W1)    # 5, 5
    assert _conv_out(H2) == 1 and _conv_out(W2) == 1, "final layer must be 1x1 spatial"

    p1 = _im2col_input(x)                                    # (B*13*13, 16)
    s2 = jnp.asarray(_selection_matrices(B, H1, W1))         # (16, B*25, B*169)
    s3 = jnp.asarray(_selection_matrices(B, H2, W2))         # (16, B,    B*25)
    w1m, w2cat, w3cat, b3p = _prep_weights(params)
    g1, be1 = params["g1"].reshape(1, -1), params["be1"].reshape(1, -1)
    g2, be2 = params["g2"].reshape(1, -1), params["be2"].reshape(1, -1)

    # NOTE: conv biases b1/b2 are intentionally not passed to the kernel:
    # batch-stats BatchNorm cancels a per-channel constant bias exactly.
    operands = (p1, w1m, g1, be1, s2, w2cat, g2, be2, s3, w3cat, b3p)

    enc = pl.pallas_call(
        _fused_encoder_kernel,
        out_shape=jax.ShapeDtypeStruct((B, OUT_LANES), jnp.float32),
        grid=(1,),
        in_specs=[_full_spec(op.shape) for op in operands],
        out_specs=_full_spec((B, OUT_LANES)),
        compiler_params=pltpu.CompilerParams(dimension_semantics=("arbitrary",)),
        # TODO(synk): for large batches, tile the row dimension over a "parallel"
        # grid axis (merging BN sums across tiles) to engage both TCs on v7x.
    )(*operands)

    mu = enc[:, :Z_DIM]
    sigma = enc[:, Z_DIM:2 * Z_DIM]
    return mu, sigma


# --------------------------- reference & params ----------------------------- #

def _reference_forward(x, params):
    """Pure-JAX/XLA reference of the PyTorch module (training-mode BN)."""
    def conv(h, w, b):
        y = jax.lax.conv_general_dilated(
            h, w, window_strides=(STRIDE, STRIDE), padding="VALID",
            dimension_numbers=("NCHW", "OIHW", "NCHW"))
        return y + b.reshape(1, -1, 1, 1)

    def bn_lrelu(y, g, be):
        mean = jnp.mean(y, axis=(0, 2, 3), keepdims=True)
        var = jnp.var(y, axis=(0, 2, 3), keepdims=True)          # biased
        yn = (y - mean) * jax.lax.rsqrt(var + EPS) * g.reshape(1, -1, 1, 1) \
             + be.reshape(1, -1, 1, 1)
        return jnp.maximum(yn, NEG_SLOPE * yn)

    h = bn_lrelu(conv(x, params["w1"], params["b1"]), params["g1"], params["be1"])
    h = bn_lrelu(conv(h, params["w2"], params["b2"]), params["g2"], params["be2"])
    y = conv(h, params["w3"], params["b3"])
    enc = y.reshape(y.shape[0], -1)
    return enc[:, :Z_DIM], jnp.exp(enc[:, Z_DIM:])


def init_params(key, im_chan=1, output_chan=32, hidden_dim=16):
    ks = jax.random.split(key, 6)
    return {
        # Conv weights in PyTorch layout (Cout, Cin, kH, kW)
        "w1": 0.08 * jax.random.normal(ks[0], (hidden_dim, im_chan, 4, 4), jnp.float32),
        "b1": 0.02 * jax.random.normal(ks[1], (hidden_dim,), jnp.float32),
        "g1": jnp.ones((hidden_dim,), jnp.float32),
        "be1": jnp.zeros((hidden_dim,), jnp.float32),
        "w2": 0.05 * jax.random.normal(ks[2], (hidden_dim * 2, hidden_dim, 4, 4), jnp.float32),
        "b2": 0.02 * jax.random.normal(ks[3], (hidden_dim * 2,), jnp.float32),
        "g2": jnp.ones((hidden_dim * 2,), jnp.float32),
        "be2": jnp.zeros((hidden_dim * 2,), jnp.float32),
        "w3": 0.04 * jax.random.normal(ks[4], (output_chan * 2, hidden_dim * 2, 4, 4), jnp.float32),
        "b3": 0.02 * jax.random.normal(ks[5], (output_chan * 2,), jnp.float32),
    }


if __name__ == "__main__":
    key = jax.random.PRNGKey(0)
    # MNIST-like input implied by the module: batch=2, 1 channel, 28x28
    x = jax.random.normal(key, (2, 1, 28, 28), jnp.float32)
    params = init_params(jax.random.PRNGKey(42))

    mu, sigma = jax.block_until_ready(encoder_forward(x, params))

    assert mu.shape == (2, Z_DIM) and sigma.shape == (2, Z_DIM)
    assert bool(jnp.all(sigma > 0))                     # exp() output must be positive
    assert bool(jnp.all(jnp.isfinite(mu))) and bool(jnp.all(jnp.isfinite(sigma)))

    # Numerical check against the pure-JAX reference of the PyTorch module.
    mu_ref, sigma_ref = _reference_forward(x, params)
    assert bool(jnp.allclose(mu, mu_ref, rtol=1e-2, atol=1e-2)), "mu mismatch"
    assert bool(jnp.allclose(sigma, sigma_ref, rtol=1e-2, atol=1e-2)), "sigma mismatch"

    print("KERNEL_OK")
</pallas_src>

<mosaic_0001>
module attributes {stable_mosaic.version = 11 : i64} {
  func.func @_fused_encoder_kernel(%arg0: i32, %arg1: memref<338x16xf32, #tpu.memory_space<vmem>>, %arg2: memref<16x16xf32, #tpu.memory_space<vmem>>, %arg3: memref<1x16xf32, #tpu.memory_space<vmem>>, %arg4: memref<1x16xf32, #tpu.memory_space<vmem>>, %arg5: memref<16x50x338xf32, #tpu.memory_space<vmem>>, %arg6: memref<16x512xf32, #tpu.memory_space<vmem>>, %arg7: memref<1x32xf32, #tpu.memory_space<vmem>>, %arg8: memref<1x32xf32, #tpu.memory_space<vmem>>, %arg9: memref<16x2x50xf32, #tpu.memory_space<vmem>>, %arg10: memref<32x2048xf32, #tpu.memory_space<vmem>>, %arg11: memref<1x128xf32, #tpu.memory_space<vmem>>, %arg12: memref<2x128xf32, #tpu.memory_space<vmem>>) attributes {dimension_semantics = [#tpu.dimension_semantics<arbitrary>], iteration_bounds = array<i64: 1>, scalar_prefetch = 0 : i64, scratch_operands = 0 : i64, tpu.core_type = #tpu.core_type<tc>, window_params = [{pipeline_mode = #tpu.pipeline_mode<synchronous>, transform_indices = @transform_0, window_bounds = array<i64: 338, 16>}, {pipeline_mode = #tpu.pipeline_mode<synchronous>, transform_indices = @transform_1, window_bounds = array<i64: 16, 16>}, {pipeline_mode = #tpu.pipeline_mode<synchronous>, transform_indices = @transform_2, window_bounds = array<i64: 1, 16>}, {pipeline_mode = #tpu.pipeline_mode<synchronous>, transform_indices = @transform_3, window_bounds = array<i64: 1, 16>}, {pipeline_mode = #tpu.pipeline_mode<synchronous>, transform_indices = @transform_4, window_bounds = array<i64: 16, 50, 338>}, {pipeline_mode = #tpu.pipeline_mode<synchronous>, transform_indices = @transform_5, window_bounds = array<i64: 16, 512>}, {pipeline_mode = #tpu.pipeline_mode<synchronous>, transform_indices = @transform_6, window_bounds = array<i64: 1, 32>}, {pipeline_mode = #tpu.pipeline_mode<synchronous>, transform_indices = @transform_7, window_bounds = array<i64: 1, 32>}, {pipeline_mode = #tpu.pipeline_mode<synchronous>, transform_indices = @transform_8, window_bounds = array<i64: 16, 2, 50>}, {pipeline_mode = #tpu.pipeline_mode<synchronous>, transform_indices = @transform_9, window_bounds = array<i64: 32, 2048>}, {pipeline_mode = #tpu.pipeline_mode<synchronous>, transform_indices = @transform_10, window_bounds = array<i64: 1, 128>}, {pipeline_mode = #tpu.pipeline_mode<synchronous>, transform_indices = @transform_11, window_bounds = array<i64: 2, 128>}]} {
    %c0 = arith.constant 0 : index
    %c0_0 = arith.constant 0 : index
    %0 = vector.load %arg1[%c0, %c0_0] : memref<338x16xf32, #tpu.memory_space<vmem>>, vector<338x16xf32>
    %c0_1 = arith.constant 0 : index
    %c0_2 = arith.constant 0 : index
    %1 = vector.load %arg2[%c0_1, %c0_2] : memref<16x16xf32, #tpu.memory_space<vmem>>, vector<16x16xf32>
    %cst = arith.constant dense<0.000000e+00> : vector<338x16xf32>
    %2 = tpu.matmul %0, %1, %cst {dimension_numbers = #tpu.dot_dimension_numbers<[1], [0], [0], [1], [0, 0, 1, 1], [], []>} : vector<338x16xf32>, vector<16x16xf32>, vector<338x16xf32> -> vector<338x16xf32>
    %c0_3 = arith.constant 0 : index
    %c0_4 = arith.constant 0 : index
    %3 = vector.load %arg3[%c0_3, %c0_4] : memref<1x16xf32, #tpu.memory_space<vmem>>, vector<1x16xf32>
    %c0_5 = arith.constant 0 : index
    %c0_6 = arith.constant 0 : index
    %4 = vector.load %arg4[%c0_5, %c0_6] : memref<1x16xf32, #tpu.memory_space<vmem>>, vector<1x16xf32>
    %cst_7 = arith.constant dense<0.000000e+00> : vector<16xf32>
    %5 = vector.multi_reduction <add>, %2, %cst_7 [0] : vector<338x16xf32> to vector<16xf32>
    %6 = vector.shape_cast %5 : vector<16xf32> to vector<1x16xf32>
    %cst_8 = arith.constant 2.958580e-03 : f32
    %7 = vector.broadcast %cst_8 : f32 to vector<1x16xf32>
    %8 = arith.mulf %6, %7 : vector<1x16xf32>
    %9 = arith.mulf %2, %2 : vector<338x16xf32>
    %cst_9 = arith.constant dense<0.000000e+00> : vector<16xf32>
    %10 = vector.multi_reduction <add>, %9, %cst_9 [0] : vector<338x16xf32> to vector<16xf32>
    %11 = vector.shape_cast %10 : vector<16xf32> to vector<1x16xf32>
    %cst_10 = arith.constant 2.958580e-03 : f32
    %12 = vector.broadcast %cst_10 : f32 to vector<1x16xf32>
    %13 = arith.mulf %11, %12 : vector<1x16xf32>
    %14 = arith.mulf %8, %8 : vector<1x16xf32>
    %15 = arith.subf %13, %14 : vector<1x16xf32>
    %cst_11 = arith.constant 0.000000e+00 : f32
    %16 = vector.broadcast %cst_11 : f32 to vector<1x16xf32>
    %17 = arith.maximumf %15, %16 : vector<1x16xf32>
    %18 = vector.broadcast %8 : vector<1x16xf32> to vector<338x16xf32>
    %19 = arith.subf %2, %18 : vector<338x16xf32>
    %cst_12 = arith.constant 9.99999974E-6 : f32
    %20 = vector.broadcast %cst_12 : f32 to vector<1x16xf32>
    %21 = arith.addf %17, %20 : vector<1x16xf32>
    %22 = math.rsqrt %21 : vector<1x16xf32>
    %23 = vector.broadcast %22 : vector<1x16xf32> to vector<338x16xf32>
    %24 = arith.mulf %19, %23 : vector<338x16xf32>
    %25 = vector.broadcast %3 : vector<1x16xf32> to vector<338x16xf32>
    %26 = arith.mulf %24, %25 : vector<338x16xf32>
    %27 = vector.broadcast %4 : vector<1x16xf32> to vector<338x16xf32>
    %28 = arith.addf %26, %27 : vector<338x16xf32>
    %cst_13 = arith.constant 2.000000e-01 : f32
    %29 = vector.broadcast %cst_13 : f32 to vector<338x16xf32>
    %30 = arith.mulf %29, %28 : vector<338x16xf32>
    %31 = arith.maximumf %28, %30 : vector<338x16xf32>
    %c0_14 = arith.constant 0 : index
    %c0_15 = arith.constant 0 : index
    %32 = vector.load %arg6[%c0_14, %c0_15] : memref<16x512xf32, #tpu.memory_space<vmem>>, vector<16x512xf32>
    %cst_16 = arith.constant dense<0.000000e+00> : vector<338x512xf32>
    %33 = tpu.matmul %31, %32, %cst_16 {dimension_numbers = #tpu.dot_dimension_numbers<[1], [0], [0], [1], [0, 0, 1, 1], [], []>} : vector<338x16xf32>, vector<16x512xf32>, vector<338x512xf32> -> vector<338x512xf32>
    %cst_17 = arith.constant 0.000000e+00 : f32
    %34 = vector.broadcast %cst_17 : f32 to vector<50x32xf32>
    %c0_18 = arith.constant 0 : index
    %c0_19 = arith.constant 0 : index
    %c0_20 = arith.constant 0 : index
    %35 = vector.load %arg5[%c0_18, %c0_19, %c0_20] : memref<16x50x338xf32, #tpu.memory_space<vmem>>, vector<1x50x338xf32>
    %36 = vector.shape_cast %35 : vector<1x50x338xf32> to vector<50x338xf32>
    %37 = vector.extract_strided_slice %33 {offsets = [0, 0], sizes = [338, 32], strides = [1, 1]} : vector<338x512xf32> to vector<338x32xf32>
    %cst_21 = arith.constant dense<0.000000e+00> : vector<50x32xf32>
    %38 = tpu.matmul %36, %37, %cst_21 {dimension_numbers = #tpu.dot_dimension_numbers<[1], [0], [0], [1], [0, 0, 1, 1], [], []>} : vector<50x338xf32>, vector<338x32xf32>, vector<50x32xf32> -> vector<50x32xf32>
    %39 = arith.addf %34, %38 : vector<50x32xf32>
    %c1 = arith.constant 1 : index
    %c0_22 = arith.constant 0 : index
    %c0_23 = arith.constant 0 : index
    %40 = vector.load %arg5[%c1, %c0_22, %c0_23] : memref<16x50x338xf32, #tpu.memory_space<vmem>>, vector<1x50x338xf32>
    %41 = vector.shape_cast %40 : vector<1x50x338xf32> to vector<50x338xf32>
    %42 = vector.extract_strided_slice %33 {offsets = [0, 32], sizes = [338, 32], strides = [1, 1]} : vector<338x512xf32> to vector<338x32xf32>
    %cst_24 = arith.constant dense<0.000000e+00> : vector<50x32xf32>
    %43 = tpu.matmul %41, %42, %cst_24 {dimension_numbers = #tpu.dot_dimension_numbers<[1], [0], [0], [1], [0, 0, 1, 1], [], []>} : vector<50x338xf32>, vector<338x32xf32>, vector<50x32xf32> -> vector<50x32xf32>
    %44 = arith.addf %39, %43 : vector<50x32xf32>
    %c2 = arith.constant 2 : index
    %c0_25 = arith.constant 0 : index
    %c0_26 = arith.constant 0 : index
    %45 = vector.load %arg5[%c2, %c0_25, %c0_26] : memref<16x50x338xf32, #tpu.memory_space<vmem>>, vector<1x50x338xf32>
    %46 = vector.shape_cast %45 : vector<1x50x338xf32> to vector<50x338xf32>
    %47 = vector.extract_strided_slice %33 {offsets = [0, 64], sizes = [338, 32], strides = [1, 1]} : vector<338x512xf32> to vector<338x32xf32>
    %cst_27 = arith.constant dense<0.000000e+00> : vector<50x32xf32>
    %48 = tpu.matmul %46, %47, %cst_27 {dimension_numbers = #tpu.dot_dimension_numbers<[1], [0], [0], [1], [0, 0, 1, 1], [], []>} : vector<50x338xf32>, vector<338x32xf32>, vector<50x32xf32> -> vector<50x32xf32>
    %49 = arith.addf %44, %48 : vector<50x32xf32>
    %c3 = arith.constant 3 : index
    %c0_28 = arith.constant 0 : index
    %c0_29 = arith.constant 0 : index
    %50 = vector.load %arg5[%c3, %c0_28, %c0_29] : memref<16x50x338xf32, #tpu.memory_space<vmem>>, vector<1x50x338xf32>
    %51 = vector.shape_cast %50 : vector<1x50x338xf32> to vector<50x338xf32>
    %52 = vector.extract_strided_slice %33 {offsets = [0, 96], sizes = [338, 32], strides = [1, 1]} : vector<338x512xf32> to vector<338x32xf32>
    %cst_30 = arith.constant dense<0.000000e+00> : vector<50x32xf32>
    %53 = tpu.matmul %51, %52, %cst_30 {dimension_numbers = #tpu.dot_dimension_numbers<[1], [0], [0], [1], [0, 0, 1, 1], [], []>} : vector<50x338xf32>, vector<338x32xf32>, vector<50x32xf32> -> vector<50x32xf32>
    %54 = arith.addf %49, %53 : vector<50x32xf32>
    %c4 = arith.constant 4 : index
    %c0_31 = arith.constant 0 : index
    %c0_32 = arith.constant 0 : index
    %55 = vector.load %arg5[%c4, %c0_31, %c0_32] : memref<16x50x338xf32, #tpu.memory_space<vmem>>, vector<1x50x338xf32>
    %56 = vector.shape_cast %55 : vector<1x50x338xf32> to vector<50x338xf32>
    %57 = vector.extract_strided_slice %33 {offsets = [0, 128], sizes = [338, 32], strides = [1, 1]} : vector<338x512xf32> to vector<338x32xf32>
    %cst_33 = arith.constant dense<0.000000e+00> : vector<50x32xf32>
    %58 = tpu.matmul %56, %57, %cst_33 {dimension_numbers = #tpu.dot_dimension_numbers<[1], [0], [0], [1], [0, 0, 1, 1], [], []>} : vector<50x338xf32>, vector<338x32xf32>, vector<50x32xf32> -> vector<50x32xf32>
    %59 = arith.addf %54, %58 : vector<50x32xf32>
    %c5 = arith.constant 5 : index
    %c0_34 = arith.constant 0 : index
    %c0_35 = arith.constant 0 : index
    %60 = vector.load %arg5[%c5, %c0_34, %c0_35] : memref<16x50x338xf32, #tpu.memory_space<vmem>>, vector<1x50x338xf32>
    %61 = vector.shape_cast %60 : vector<1x50x338xf32> to vector<50x338xf32>
    %62 = vector.extract_strided_slice %33 {offsets = [0, 160], sizes = [338, 32], strides = [1, 1]} : vector<338x512xf32> to vector<338x32xf32>
    %cst_36 = arith.constant dense<0.000000e+00> : vector<50x32xf32>
    %63 = tpu.matmul %61, %62, %cst_36 {dimension_numbers = #tpu.dot_dimension_numbers<[1], [0], [0], [1], [0, 0, 1, 1], [], []>} : vector<50x338xf32>, vector<338x32xf32>, vector<50x32xf32> -> vector<50x32xf32>
    %64 = arith.addf %59, %63 : vector<50x32xf32>
    %c6 = arith.constant 6 : index
    %c0_37 = arith.constant 0 : index
    %c0_38 = arith.constant 0 : index
    %65 = vector.load %arg5[%c6, %c0_37, %c0_38] : memref<16x50x338xf32, #tpu.memory_space<vmem>>, vector<1x50x338xf32>
    %66 = vector.shape_cast %65 : vector<1x50x338xf32> to vector<50x338xf32>
    %67 = vector.extract_strided_slice %33 {offsets = [0, 192], sizes = [338, 32], strides = [1, 1]} : vector<338x512xf32> to vector<338x32xf32>
    %cst_39 = arith.constant dense<0.000000e+00> : vector<50x32xf32>
    %68 = tpu.matmul %66, %67, %cst_39 {dimension_numbers = #tpu.dot_dimension_numbers<[1], [0], [0], [1], [0, 0, 1, 1], [], []>} : vector<50x338xf32>, vector<338x32xf32>, vector<50x32xf32> -> vector<50x32xf32>
    %69 = arith.addf %64, %68 : vector<50x32xf32>
    %c7 = arith.constant 7 : index
    %c0_40 = arith.constant 0 : index
    %c0_41 = arith.constant 0 : index
    %70 = vector.load %arg5[%c7, %c0_40, %c0_41] : memref<16x50x338xf32, #tpu.memory_space<vmem>>, vector<1x50x338xf32>
    %71 = vector.shape_cast %70 : vector<1x50x338xf32> to vector<50x338xf32>
    %72 = vector.extract_strided_slice %33 {offsets = [0, 224], sizes = [338, 32], strides = [1, 1]} : vector<338x512xf32> to vector<338x32xf32>
    %cst_42 = arith.constant dense<0.000000e+00> : vector<50x32xf32>
    %73 = tpu.matmul %71, %72, %cst_42 {dimension_numbers = #tpu.dot_dimension_numbers<[1], [0], [0], [1], [0, 0, 1, 1], [], []>} : vector<50x338xf32>, vector<338x32xf32>, vector<50x32xf32> -> vector<50x32xf32>
    %74 = arith.addf %69, %73 : vector<50x32xf32>
    %c8 = arith.constant 8 : index
    %c0_43 = arith.constant 0 : index
    %c0_44 = arith.constant 0 : index
    %75 = vector.load %arg5[%c8, %c0_43, %c0_44] : memref<16x50x338xf32, #tpu.memory_space<vmem>>, vector<1x50x338xf32>
    %76 = vector.shape_cast %75 : vector<1x50x338xf32> to vector<50x338xf32>
    %77 = vector.extract_strided_slice %33 {offsets = [0, 256], sizes = [338, 32], strides = [1, 1]} : vector<338x512xf32> to vector<338x32xf32>
    %cst_45 = arith.constant dense<0.000000e+00> : vector<50x32xf32>
    %78 = tpu.matmul %76, %77, %cst_45 {dimension_numbers = #tpu.dot_dimension_numbers<[1], [0], [0], [1], [0, 0, 1, 1], [], []>} : vector<50x338xf32>, vector<338x32xf32>, vector<50x32xf32> -> vector<50x32xf32>
    %79 = arith.addf %74, %78 : vector<50x32xf32>
    %c9 = arith.constant 9 : index
    %c0_46 = arith.constant 0 : index
    %c0_47 = arith.constant 0 : index
    %80 = vector.load %arg5[%c9, %c0_46, %c0_47] : memref<16x50x338xf32, #tpu.memory_space<vmem>>, vector<1x50x338xf32>
    %81 = vector.shape_cast %80 : vector<1x50x338xf32> to vector<50x338xf32>
    %82 = vector.extract_strided_slice %33 {offsets = [0, 288], sizes = [338, 32], strides = [1, 1]} : vector<338x512xf32> to vector<338x32xf32>
    %cst_48 = arith.constant dense<0.000000e+00> : vector<50x32xf32>
    %83 = tpu.matmul %81, %82, %cst_48 {dimension_numbers = #tpu.dot_dimension_numbers<[1], [0], [0], [1], [0, 0, 1, 1], [], []>} : vector<50x338xf32>, vector<338x32xf32>, vector<50x32xf32> -> vector<50x32xf32>
    %84 = arith.addf %79, %83 : vector<50x32xf32>
    %c10 = arith.constant 10 : index
    %c0_49 = arith.constant 0 : index
    %c0_50 = arith.constant 0 : index
    %85 = vector.load %arg5[%c10, %c0_49, %c0_50] : memref<16x50x338xf32, #tpu.memory_space<vmem>>, vector<1x50x338xf32>
    %86 = vector.shape_cast %85 : vector<1x50x338xf32> to vector<50x338xf32>
    %87 = vector.extract_strided_slice %33 {offsets = [0, 320], sizes = [338, 32], strides = [1, 1]} : vector<338x512xf32> to vector<338x32xf32>
    %cst_51 = arith.constant dense<0.000000e+00> : vector<50x32xf32>
    %88 = tpu.matmul %86, %87, %cst_51 {dimension_numbers = #tpu.dot_dimension_numbers<[1], [0], [0], [1], [0, 0, 1, 1], [], []>} : vector<50x338xf32>, vector<338x32xf32>, vector<50x32xf32> -> vector<50x32xf32>
    %89 = arith.addf %84, %88 : vector<50x32xf32>
    %c11 = arith.constant 11 : index
    %c0_52 = arith.constant 0 : index
    %c0_53 = arith.constant 0 : index
    %90 = vector.load %arg5[%c11, %c0_52, %c0_53] : memref<16x50x338xf32, #tpu.memory_space<vmem>>, vector<1x50x338xf32>
    %91 = vector.shape_cast %90 : vector<1x50x338xf32> to vector<50x338xf32>
    %92 = vector.extract_strided_slice %33 {offsets = [0, 352], sizes = [338, 32], strides = [1, 1]} : vector<338x512xf32> to vector<338x32xf32>
    %cst_54 = arith.constant dense<0.000000e+00> : vector<50x32xf32>
    %93 = tpu.matmul %91, %92, %cst_54 {dimension_numbers = #tpu.dot_dimension_numbers<[1], [0], [0], [1], [0, 0, 1, 1], [], []>} : vector<50x338xf32>, vector<338x32xf32>, vector<50x32xf32> -> vector<50x32xf32>
    %94 = arith.addf %89, %93 : vector<50x32xf32>
    %c12 = arith.constant 12 : index
    %c0_55 = arith.constant 0 : index
    %c0_56 = arith.constant 0 : index
    %95 = vector.load %arg5[%c12, %c0_55, %c0_56] : memref<16x50x338xf32, #tpu.memory_space<vmem>>, vector<1x50x338xf32>
    %96 = vector.shape_cast %95 : vector<1x50x338xf32> to vector<50x338xf32>
    %97 = vector.extract_strided_slice %33 {offsets = [0, 384], sizes = [338, 32], strides = [1, 1]} : vector<338x512xf32> to vector<338x32xf32>
    %cst_57 = arith.constant dense<0.000000e+00> : vector<50x32xf32>
    %98 = tpu.matmul %96, %97, %cst_57 {dimension_numbers = #tpu.dot_dimension_numbers<[1], [0], [0], [1], [0, 0, 1, 1], [], []>} : vector<50x338xf32>, vector<338x32xf32>, vector<50x32xf32> -> vector<50x32xf32>
    %99 = arith.addf %94, %98 : vector<50x32xf32>
    %c13 = arith.constant 13 : index
    %c0_58 = arith.constant 0 : index
    %c0_59 = arith.constant 0 : index
    %100 = vector.load %arg5[%c13, %c0_58, %c0_59] : memref<16x50x338xf32, #tpu.memory_space<vmem>>, vector<1x50x338xf32>
    %101 = vector.shape_cast %100 : vector<1x50x338xf32> to vector<50x338xf32>
    %102 = vector.extract_strided_slice %33 {offsets = [0, 416], sizes = [338, 32], strides = [1, 1]} : vector<338x512xf32> to vector<338x32xf32>
    %cst_60 = arith.constant dense<0.000000e+00> : vector<50x32xf32>
    %103 = tpu.matmul %101, %102, %cst_60 {dimension_numbers = #tpu.dot_dimension_numbers<[1], [0], [0], [1], [0, 0, 1, 1], [], []>} : vector<50x338xf32>, vector<338x32xf32>, vector<50x32xf32> -> vector<50x32xf32>
    %104 = arith.addf %99, %103 : vector<50x32xf32>
    %c14 = arith.constant 14 : index
    %c0_61 = arith.constant 0 : index
    %c0_62 = arith.constant 0 : index
    %105 = vector.load %arg5[%c14, %c0_61, %c0_62] : memref<16x50x338xf32, #tpu.memory_space<vmem>>, vector<1x50x338xf32>
    %106 = vector.shape_cast %105 : vector<1x50x338xf32> to vector<50x338xf32>
    %107 = vector.extract_strided_slice %33 {offsets = [0, 448], sizes = [338, 32], strides = [1, 1]} : vector<338x512xf32> to vector<338x32xf32>
    %cst_63 = arith.constant dense<0.000000e+00> : vector<50x32xf32>
    %108 = tpu.matmul %106, %107, %cst_63 {dimension_numbers = #tpu.dot_dimension_numbers<[1], [0], [0], [1], [0, 0, 1, 1], [], []>} : vector<50x338xf32>, vector<338x32xf32>, vector<50x32xf32> -> vector<50x32xf32>
    %109 = arith.addf %104, %108 : vector<50x32xf32>
    %c15 = arith.constant 15 : index
    %c0_64 = arith.constant 0 : index
    %c0_65 = arith.constant 0 : index
    %110 = vector.load %arg5[%c15, %c0_64, %c0_65] : memref<16x50x338xf32, #tpu.memory_space<vmem>>, vector<1x50x338xf32>
    %111 = vector.shape_cast %110 : vector<1x50x338xf32> to vector<50x338xf32>
    %112 = vector.extract_strided_slice %33 {offsets = [0, 480], sizes = [338, 32], strides = [1, 1]} : vector<338x512xf32> to vector<338x32xf32>
    %cst_66 = arith.constant dense<0.000000e+00> : vector<50x32xf32>
    %113 = tpu.matmul %111, %112, %cst_66 {dimension_numbers = #tpu.dot_dimension_numbers<[1], [0], [0], [1], [0, 0, 1, 1], [], []>} : vector<50x338xf32>, vector<338x32xf32>, vector<50x32xf32> -> vector<50x32xf32>
    %114 = arith.addf %109, %113 : vector<50x32xf32>
    %c0_67 = arith.constant 0 : index
    %c0_68 = arith.constant 0 : index
    %115 = vector.load %arg7[%c0_67, %c0_68] : memref<1x32xf32, #tpu.memory_space<vmem>>, vector<1x32xf32>
    %c0_69 = arith.constant 0 : index
    %c0_70 = arith.constant 0 : index
    %116 = vector.load %arg8[%c0_69, %c0_70] : memref<1x32xf32, #tpu.memory_space<vmem>>, vector<1x32xf32>
    %cst_71 = arith.constant dense<0.000000e+00> : vector<32xf32>
    %117 = vector.multi_reduction <add>, %114, %cst_71 [0] : vector<50x32xf32> to vector<32xf32>
    %118 = vector.shape_cast %117 : vector<32xf32> to vector<1x32xf32>
    %cst_72 = arith.constant 2.000000e-02 : f32
    %119 = vector.broadcast %cst_72 : f32 to vector<1x32xf32>
    %120 = arith.mulf %118, %119 : vector<1x32xf32>
    %121 = arith.mulf %114, %114 : vector<50x32xf32>
    %cst_73 = arith.constant dense<0.000000e+00> : vector<32xf32>
    %122 = vector.multi_reduction <add>, %121, %cst_73 [0] : vector<50x32xf32> to vector<32xf32>
    %123 = vector.shape_cast %122 : vector<32xf32> to vector<1x32xf32>
    %cst_74 = arith.constant 2.000000e-02 : f32
    %124 = vector.broadcast %cst_74 : f32 to vector<1x32xf32>
    %125 = arith.mulf %123, %124 : vector<1x32xf32>
    %126 = arith.mulf %120, %120 : vector<1x32xf32>
    %127 = arith.subf %125, %126 : vector<1x32xf32>
    %cst_75 = arith.constant 0.000000e+00 : f32
    %128 = vector.broadcast %cst_75 : f32 to vector<1x32xf32>
    %129 = arith.maximumf %127, %128 : vector<1x32xf32>
    %130 = vector.broadcast %120 : vector<1x32xf32> to vector<50x32xf32>
    %131 = arith.subf %114, %130 : vector<50x32xf32>
    %cst_76 = arith.constant 9.99999974E-6 : f32
    %132 = vector.broadcast %cst_76 : f32 to vector<1x32xf32>
    %133 = arith.addf %129, %132 : vector<1x32xf32>
    %134 = math.rsqrt %133 : vector<1x32xf32>
    %135 = vector.broadcast %134 : vector<1x32xf32> to vector<50x32xf32>
    %136 = arith.mulf %131, %135 : vector<50x32xf32>
    %137 = vector.broadcast %115 : vector<1x32xf32> to vector<50x32xf32>
    %138 = arith.mulf %136, %137 : vector<50x32xf32>
    %139 = vector.broadcast %116 : vector<1x32xf32> to vector<50x32xf32>
    %140 = arith.addf %138, %139 : vector<50x32xf32>
    %cst_77 = arith.constant 2.000000e-01 : f32
    %141 = vector.broadcast %cst_77 : f32 to vector<50x32xf32>
    %142 = arith.mulf %141, %140 : vector<50x32xf32>
    %143 = arith.maximumf %140, %142 : vector<50x32xf32>
    %c0_78 = arith.constant 0 : index
    %c0_79 = arith.constant 0 : index
    %144 = vector.load %arg10[%c0_78, %c0_79] : memref<32x2048xf32, #tpu.memory_space<vmem>>, vector<32x2048xf32>
    %cst_80 = arith.constant dense<0.000000e+00> : vector<50x2048xf32>
    %145 = tpu.matmul %143, %144, %cst_80 {dimension_numbers = #tpu.dot_dimension_numbers<[1], [0], [0], [1], [0, 0, 1, 1], [], []>} : vector<50x32xf32>, vector<32x2048xf32>, vector<50x2048xf32> -> vector<50x2048xf32>
    %cst_81 = arith.constant 0.000000e+00 : f32
    %146 = vector.broadcast %cst_81 : f32 to vector<2x128xf32>
    %c0_82 = arith.constant 0 : index
    %c0_83 = arith.constant 0 : index
    %c0_84 = arith.constant 0 : index
    %147 = vector.load %arg9[%c0_82, %c0_83, %c0_84] : memref<16x2x50xf32, #tpu.memory_space<vmem>>, vector<1x2x50xf32>
    %148 = vector.shape_cast %147 : vector<1x2x50xf32> to vector<2x50xf32>
    %149 = vector.extract_strided_slice %145 {offsets = [0, 0], sizes = [50, 128], strides = [1, 1]} : vector<50x2048xf32> to vector<50x128xf32>
    %cst_85 = arith.constant dense<0.000000e+00> : vector<2x128xf32>
    %150 = tpu.matmul %148, %149, %cst_85 {dimension_numbers = #tpu.dot_dimension_numbers<[1], [0], [0], [1], [0, 0, 1, 1], [], []>} : vector<2x50xf32>, vector<50x128xf32>, vector<2x128xf32> -> vector<2x128xf32>
    %151 = arith.addf %146, %150 : vector<2x128xf32>
    %c1_86 = arith.constant 1 : index
    %c0_87 = arith.constant 0 : index
    %c0_88 = arith.constant 0 : index
    %152 = vector.load %arg9[%c1_86, %c0_87, %c0_88] : memref<16x2x50xf32, #tpu.memory_space<vmem>>, vector<1x2x50xf32>
    %153 = vector.shape_cast %152 : vector<1x2x50xf32> to vector<2x50xf32>
    %154 = vector.extract_strided_slice %145 {offsets = [0, 128], sizes = [50, 128], strides = [1, 1]} : vector<50x2048xf32> to vector<50x128xf32>
    %cst_89 = arith.constant dense<0.000000e+00> : vector<2x128xf32>
    %155 = tpu.matmul %153, %154, %cst_89 {dimension_numbers = #tpu.dot_dimension_numbers<[1], [0], [0], [1], [0, 0, 1, 1], [], []>} : vector<2x50xf32>, vector<50x128xf32>, vector<2x128xf32> -> vector<2x128xf32>
    %156 = arith.addf %151, %155 : vector<2x128xf32>
    %c2_90 = arith.constant 2 : index
    %c0_91 = arith.constant 0 : index
    %c0_92 = arith.constant 0 : index
    %157 = vector.load %arg9[%c2_90, %c0_91, %c0_92] : memref<16x2x50xf32, #tpu.memory_space<vmem>>, vector<1x2x50xf32>
    %158 = vector.shape_cast %157 : vector<1x2x50xf32> to vector<2x50xf32>
    %159 = vector.extract_strided_slice %145 {offsets = [0, 256], sizes = [50, 128], strides = [1, 1]} : vector<50x2048xf32> to vector<50x128xf32>
    %cst_93 = arith.constant dense<0.000000e+00> : vector<2x128xf32>
    %160 = tpu.matmul %158, %159, %cst_93 {dimension_numbers = #tpu.dot_dimension_numbers<[1], [0], [0], [1], [0, 0, 1, 1], [], []>} : vector<2x50xf32>, vector<50x128xf32>, vector<2x128xf32> -> vector<2x128xf32>
    %161 = arith.addf %156, %160 : vector<2x128xf32>
    %c3_94 = arith.constant 3 : index
    %c0_95 = arith.constant 0 : index
    %c0_96 = arith.constant 0 : index
    %162 = vector.load %arg9[%c3_94, %c0_95, %c0_96] : memref<16x2x50xf32, #tpu.memory_space<vmem>>, vector<1x2x50xf32>
    %163 = vector.shape_cast %162 : vector<1x2x50xf32> to vector<2x50xf32>
    %164 = vector.extract_strided_slice %145 {offsets = [0, 384], sizes = [50, 128], strides = [1, 1]} : vector<50x2048xf32> to vector<50x128xf32>
    %cst_97 = arith.constant dense<0.000000e+00> : vector<2x128xf32>
    %165 = tpu.matmul %163, %164, %cst_97 {dimension_numbers = #tpu.dot_dimension_numbers<[1], [0], [0], [1], [0, 0, 1, 1], [], []>} : vector<2x50xf32>, vector<50x128xf32>, vector<2x128xf32> -> vector<2x128xf32>
    %166 = arith.addf %161, %165 : vector<2x128xf32>
    %c4_98 = arith.constant 4 : index
    %c0_99 = arith.constant 0 : index
    %c0_100 = arith.constant 0 : index
    %167 = vector.load %arg9[%c4_98, %c0_99, %c0_100] : memref<16x2x50xf32, #tpu.memory_space<vmem>>, vector<1x2x50xf32>
    %168 = vector.shape_cast %167 : vector<1x2x50xf32> to vector<2x50xf32>
    %169 = vector.extract_strided_slice %145 {offsets = [0, 512], sizes = [50, 128], strides = [1, 1]} : vector<50x2048xf32> to vector<50x128xf32>
    %cst_101 = arith.constant dense<0.000000e+00> : vector<2x128xf32>
    %170 = tpu.matmul %168, %169, %cst_101 {dimension_numbers = #tpu.dot_dimension_numbers<[1], [0], [0], [1], [0, 0, 1, 1], [], []>} : vector<2x50xf32>, vector<50x128xf32>, vector<2x128xf32> -> vector<2x128xf32>
    %171 = arith.addf %166, %170 : vector<2x128xf32>
    %c5_102 = arith.constant 5 : index
    %c0_103 = arith.constant 0 : index
    %c0_104 = arith.constant 0 : index
    %172 = vector.load %arg9[%c5_102, %c0_103, %c0_104] : memref<16x2x50xf32, #tpu.memory_space<vmem>>, vector<1x2x50xf32>
    %173 = vector.shape_cast %172 : vector<1x2x50xf32> to vector<2x50xf32>
    %174 = vector.extract_strided_slice %145 {offsets = [0, 640], sizes = [50, 128], strides = [1, 1]} : vector<50x2048xf32> to vector<50x128xf32>
    %cst_105 = arith.constant dense<0.000000e+00> : vector<2x128xf32>
    %175 = tpu.matmul %173, %174, %cst_105 {dimension_numbers = #tpu.dot_dimension_numbers<[1], [0], [0], [1], [0, 0, 1, 1], [], []>} : vector<2x50xf32>, vector<50x128xf32>, vector<2x128xf32> -> vector<2x128xf32>
    %176 = arith.addf %171, %175 : vector<2x128xf32>
    %c6_106 = arith.constant 6 : index
    %c0_107 = arith.constant 0 : index
    %c0_108 = arith.constant 0 : index
    %177 = vector.load %arg9[%c6_106, %c0_107, %c0_108] : memref<16x2x50xf32, #tpu.memory_space<vmem>>, vector<1x2x50xf32>
    %178 = vector.shape_cast %177 : vector<1x2x50xf32> to vector<2x50xf32>
    %179 = vector.extract_strided_slice %145 {offsets = [0, 768], sizes = [50, 128], strides = [1, 1]} : vector<50x2048xf32> to vector<50x128xf32>
    %cst_109 = arith.constant dense<0.000000e+00> : vector<2x128xf32>
    %180 = tpu.matmul %178, %179, %cst_109 {dimension_numbers = #tpu.dot_dimension_numbers<[1], [0], [0], [1], [0, 0, 1, 1], [], []>} : vector<2x50xf32>, vector<50x128xf32>, vector<2x128xf32> -> vector<2x128xf32>
    %181 = arith.addf %176, %180 : vector<2x128xf32>
    %c7_110 = arith.constant 7 : index
    %c0_111 = arith.constant 0 : index
    %c0_112 = arith.constant 0 : index
    %182 = vector.load %arg9[%c7_110, %c0_111, %c0_112] : memref<16x2x50xf32, #tpu.memory_space<vmem>>, vector<1x2x50xf32>
    %183 = vector.shape_cast %182 : vector<1x2x50xf32> to vector<2x50xf32>
    %184 = vector.extract_strided_slice %145 {offsets = [0, 896], sizes = [50, 128], strides = [1, 1]} : vector<50x2048xf32> to vector<50x128xf32>
    %cst_113 = arith.constant dense<0.000000e+00> : vector<2x128xf32>
    %185 = tpu.matmul %183, %184, %cst_113 {dimension_numbers = #tpu.dot_dimension_numbers<[1], [0], [0], [1], [0, 0, 1, 1], [], []>} : vector<2x50xf32>, vector<50x128xf32>, vector<2x128xf32> -> vector<2x128xf32>
    %186 = arith.addf %181, %185 : vector<2x128xf32>
    %c8_114 = arith.constant 8 : index
    %c0_115 = arith.constant 0 : index
    %c0_116 = arith.constant 0 : index
    %187 = vector.load %arg9[%c8_114, %c0_115, %c0_116] : memref<16x2x50xf32, #tpu.memory_space<vmem>>, vector<1x2x50xf32>
    %188 = vector.shape_cast %187 : vector<1x2x50xf32> to vector<2x50xf32>
    %189 = vector.extract_strided_slice %145 {offsets = [0, 1024], sizes = [50, 128], strides = [1, 1]} : vector<50x2048xf32> to vector<50x128xf32>
    %cst_117 = arith.constant dense<0.000000e+00> : vector<2x128xf32>
    %190 = tpu.matmul %188, %189, %cst_117 {dimension_numbers = #tpu.dot_dimension_numbers<[1], [0], [0], [1], [0, 0, 1, 1], [], []>} : vector<2x50xf32>, vector<50x128xf32>, vector<2x128xf32> -> vector<2x128xf32>
    %191 = arith.addf %186, %190 : vector<2x128xf32>
    %c9_118 = arith.constant 9 : index
    %c0_119 = arith.constant 0 : index
    %c0_120 = arith.constant 0 : index
    %192 = vector.load %arg9[%c9_118, %c0_119, %c0_120] : memref<16x2x50xf32, #tpu.memory_space<vmem>>, vector<1x2x50xf32>
    %193 = vector.shape_cast %192 : vector<1x2x50xf32> to vector<2x50xf32>
    %194 = vector.extract_strided_slice %145 {offsets = [0, 1152], sizes = [50, 128], strides = [1, 1]} : vector<50x2048xf32> to vector<50x128xf32>
    %cst_121 = arith.constant dense<0.000000e+00> : vector<2x128xf32>
    %195 = tpu.matmul %193, %194, %cst_121 {dimension_numbers = #tpu.dot_dimension_numbers<[1], [0], [0], [1], [0, 0, 1, 1], [], []>} : vector<2x50xf32>, vector<50x128xf32>, vector<2x128xf32> -> vector<2x128xf32>
    %196 = arith.addf %191, %195 : vector<2x128xf32>
    %c10_122 = arith.constant 10 : index
    %c0_123 = arith.constant 0 : index
    %c0_124 = arith.constant 0 : index
    %197 = vector.load %arg9[%c10_122, %c0_123, %c0_124] : memref<16x2x50xf32, #tpu.memory_space<vmem>>, vector<1x2x50xf32>
    %198 = vector.shape_cast %197 : vector<1x2x50xf32> to vector<2x50xf32>
    %199 = vector.extract_strided_slice %145 {offsets = [0, 1280], sizes = [50, 128], strides = [1, 1]} : vector<50x2048xf32> to vector<50x128xf32>
    %cst_125 = arith.constant dense<0.000000e+00> : vector<2x128xf32>
    %200 = tpu.matmul %198, %199, %cst_125 {dimension_numbers = #tpu.dot_dimension_numbers<[1], [0], [0], [1], [0, 0, 1, 1], [], []>} : vector<2x50xf32>, vector<50x128xf32>, vector<2x128xf32> -> vector<2x128xf32>
    %201 = arith.addf %196, %200 : vector<2x128xf32>
    %c11_126 = arith.constant 11 : index
    %c0_127 = arith.constant 0 : index
    %c0_128 = arith.constant 0 : index
    %202 = vector.load %arg9[%c11_126, %c0_127, %c0_128] : memref<16x2x50xf32, #tpu.memory_space<vmem>>, vector<1x2x50xf32>
    %203 = vector.shape_cast %202 : vector<1x2x50xf32> to vector<2x50xf32>
    %204 = vector.extract_strided_slice %145 {offsets = [0, 1408], sizes = [50, 128], strides = [1, 1]} : vector<50x2048xf32> to vector<50x128xf32>
    %cst_129 = arith.constant dense<0.000000e+00> : vector<2x128xf32>
    %205 = tpu.matmul %203, %204, %cst_129 {dimension_numbers = #tpu.dot_dimension_numbers<[1], [0], [0], [1], [0, 0, 1, 1], [], []>} : vector<2x50xf32>, vector<50x128xf32>, vector<2x128xf32> -> vector<2x128xf32>
    %206 = arith.addf %201, %205 : vector<2x128xf32>
    %c12_130 = arith.constant 12 : index
    %c0_131 = arith.constant 0 : index
    %c0_132 = arith.constant 0 : index
    %207 = vector.load %arg9[%c12_130, %c0_131, %c0_132] : memref<16x2x50xf32, #tpu.memory_space<vmem>>, vector<1x2x50xf32>
    %208 = vector.shape_cast %207 : vector<1x2x50xf32> to vector<2x50xf32>
    %209 = vector.extract_strided_slice %145 {offsets = [0, 1536], sizes = [50, 128], strides = [1, 1]} : vector<50x2048xf32> to vector<50x128xf32>
    %cst_133 = arith.constant dense<0.000000e+00> : vector<2x128xf32>
    %210 = tpu.matmul %208, %209, %cst_133 {dimension_numbers = #tpu.dot_dimension_numbers<[1], [0], [0], [1], [0, 0, 1, 1], [], []>} : vector<2x50xf32>, vector<50x128xf32>, vector<2x128xf32> -> vector<2x128xf32>
    %211 = arith.addf %206, %210 : vector<2x128xf32>
    %c13_134 = arith.constant 13 : index
    %c0_135 = arith.constant 0 : index
    %c0_136 = arith.constant 0 : index
    %212 = vector.load %arg9[%c13_134, %c0_135, %c0_136] : memref<16x2x50xf32, #tpu.memory_space<vmem>>, vector<1x2x50xf32>
    %213 = vector.shape_cast %212 : vector<1x2x50xf32> to vector<2x50xf32>
    %214 = vector.extract_strided_slice %145 {offsets = [0, 1664], sizes = [50, 128], strides = [1, 1]} : vector<50x2048xf32> to vector<50x128xf32>
    %cst_137 = arith.constant dense<0.000000e+00> : vector<2x128xf32>
    %215 = tpu.matmul %213, %214, %cst_137 {dimension_numbers = #tpu.dot_dimension_numbers<[1], [0], [0], [1], [0, 0, 1, 1], [], []>} : vector<2x50xf32>, vector<50x128xf32>, vector<2x128xf32> -> vector<2x128xf32>
    %216 = arith.addf %211, %215 : vector<2x128xf32>
    %c14_138 = arith.constant 14 : index
    %c0_139 = arith.constant 0 : index
    %c0_140 = arith.constant 0 : index
    %217 = vector.load %arg9[%c14_138, %c0_139, %c0_140] : memref<16x2x50xf32, #tpu.memory_space<vmem>>, vector<1x2x50xf32>
    %218 = vector.shape_cast %217 : vector<1x2x50xf32> to vector<2x50xf32>
    %219 = vector.extract_strided_slice %145 {offsets = [0, 1792], sizes = [50, 128], strides = [1, 1]} : vector<50x2048xf32> to vector<50x128xf32>
    %cst_141 = arith.constant dense<0.000000e+00> : vector<2x128xf32>
    %220 = tpu.matmul %218, %219, %cst_141 {dimension_numbers = #tpu.dot_dimension_numbers<[1], [0], [0], [1], [0, 0, 1, 1], [], []>} : vector<2x50xf32>, vector<50x128xf32>, vector<2x128xf32> -> vector<2x128xf32>
    %221 = arith.addf %216, %220 : vector<2x128xf32>
    %c15_142 = arith.constant 15 : index
    %c0_143 = arith.constant 0 : index
    %c0_144 = arith.constant 0 : index
    %222 = vector.load %arg9[%c15_142, %c0_143, %c0_144] : memref<16x2x50xf32, #tpu.memory_space<vmem>>, vector<1x2x50xf32>
    %223 = vector.shape_cast %222 : vector<1x2x50xf32> to vector<2x50xf32>
    %224 = vector.extract_strided_slice %145 {offsets = [0, 1920], sizes = [50, 128], strides = [1, 1]} : vector<50x2048xf32> to vector<50x128xf32>
    %cst_145 = arith.constant dense<0.000000e+00> : vector<2x128xf32>
    %225 = tpu.matmul %223, %224, %cst_145 {dimension_numbers = #tpu.dot_dimension_numbers<[1], [0], [0], [1], [0, 0, 1, 1], [], []>} : vector<2x50xf32>, vector<50x128xf32>, vector<2x128xf32> -> vector<2x128xf32>
    %226 = arith.addf %221, %225 : vector<2x128xf32>
    %c0_146 = arith.constant 0 : index
    %c0_147 = arith.constant 0 : index
    %227 = vector.load %arg11[%c0_146, %c0_147] : memref<1x128xf32, #tpu.memory_space<vmem>>, vector<1x128xf32>
    %228 = vector.broadcast %227 : vector<1x128xf32> to vector<2x128xf32>
    %229 = arith.addf %226, %228 : vector<2x128xf32>
    %230 = tpu.iota {dimensions = array<i32: 1>} : vector<2x128xi32>
    %c32_i32 = arith.constant 32 : i32
    %231 = vector.broadcast %c32_i32 : i32 to vector<2x128xi32>
    %232 = arith.cmpi sge, %230, %231 : vector<2x128xi32>
    %c64_i32 = arith.constant 64 : i32
    %233 = vector.broadcast %c64_i32 : i32 to vector<2x128xi32>
    %234 = arith.cmpi slt, %230, %233 : vector<2x128xi32>
    %235 = arith.andi %232, %234 : vector<2x128xi1>
    %236 = math.exp %229 : vector<2x128xf32>
    %237 = arith.select %235, %236, %229 : vector<2x128xi1>, vector<2x128xf32>
    %c0_148 = arith.constant 0 : index
    %c0_149 = arith.constant 0 : index
    %238 = vector.load %arg12[%c0_148, %c0_149] : memref<2x128xf32, #tpu.memory_space<vmem>>, vector<2x128xf32>
    tpu.vector_store %arg12[%c0_148, %c0_149], %237 {strides = array<i32>} : memref<2x128xf32, #tpu.memory_space<vmem>>, vector<2x128xf32>,
    return
  }
  func.func @transform_0(%arg0: i32) -> (i32, i32) {
    %c0_i32 = arith.constant 0 : i32
    %c0_i32_0 = arith.constant 0 : i32
    %c0_i32_1 = arith.constant 0 : i32
    return %c0_i32, %c0_i32_0 : i32, i32
  }
  func.func @transform_1(%arg0: i32) -> (i32, i32) {
    %c0_i32 = arith.constant 0 : i32
    %c0_i32_0 = arith.constant 0 : i32
    %c0_i32_1 = arith.constant 0 : i32
    return %c0_i32, %c0_i32_0 : i32, i32
  }
  func.func @transform_2(%arg0: i32) -> (i32, i32) {
    %c0_i32 = arith.constant 0 : i32
    %c0_i32_0 = arith.constant 0 : i32
    %c0_i32_1 = arith.constant 0 : i32
    return %c0_i32, %c0_i32_0 : i32, i32
  }
  func.func @transform_3(%arg0: i32) -> (i32, i32) {
    %c0_i32 = arith.constant 0 : i32
    %c0_i32_0 = arith.constant 0 : i32
    %c0_i32_1 = arith.constant 0 : i32
    return %c0_i32, %c0_i32_0 : i32, i32
  }
  func.func @transform_4(%arg0: i32) -> (i32, i32, i32) {
    %c0_i32 = arith.constant 0 : i32
    %c0_i32_0 = arith.constant 0 : i32
    %c0_i32_1 = arith.constant 0 : i32
    %c0_i32_2 = arith.constant 0 : i32
    return %c0_i32, %c0_i32_0, %c0_i32_1 : i32, i32, i32
  }
  func.func @transform_5(%arg0: i32) -> (i32, i32) {
    %c0_i32 = arith.constant 0 : i32
    %c0_i32_0 = arith.constant 0 : i32
    %c0_i32_1 = arith.constant 0 : i32
    return %c0_i32, %c0_i32_0 : i32, i32
  }
  func.func @transform_6(%arg0: i32) -> (i32, i32) {
    %c0_i32 = arith.constant 0 : i32
    %c0_i32_0 = arith.constant 0 : i32
    %c0_i32_1 = arith.constant 0 : i32
    return %c0_i32, %c0_i32_0 : i32, i32
  }
  func.func @transform_7(%arg0: i32) -> (i32, i32) {
    %c0_i32 = arith.constant 0 : i32
    %c0_i32_0 = arith.constant 0 : i32
    %c0_i32_1 = arith.constant 0 : i32
    return %c0_i32, %c0_i32_0 : i32, i32
  }
  func.func @transform_8(%arg0: i32) -> (i32, i32, i32) {
    %c0_i32 = arith.constant 0 : i32
    %c0_i32_0 = arith.constant 0 : i32
    %c0_i32_1 = arith.constant 0 : i32
    %c0_i32_2 = arith.constant 0 : i32
    return %c0_i32, %c0_i32_0, %c0_i32_1 : i32, i32, i32
  }
  func.func @transform_9(%arg0: i32) -> (i32, i32) {
    %c0_i32 = arith.constant 0 : i32
    %c0_i32_0 = arith.constant 0 : i32
    %c0_i32_1 = arith.constant 0 : i32
    return %c0_i32, %c0_i32_0 : i32, i32
  }
  func.func @transform_10(%arg0: i32) -> (i32, i32) {
    %c0_i32 = arith.constant 0 : i32
    %c0_i32_0 = arith.constant 0 : i32
    %c0_i32_1 = arith.constant 0 : i32
    return %c0_i32, %c0_i32_0 : i32, i32
  }
  func.func @transform_11(%arg0: i32) -> (i32, i32) {
    %c0_i32 = arith.constant 0 : i32
    %c0_i32_0 = arith.constant 0 : i32
    %c0_i32_1 = arith.constant 0 : i32
    return %c0_i32, %c0_i32_0 : i32, i32
  }
}

</mosaic_0001>

<bundles_post_ra>
// kernel: encoder_forward.1
= control target key start
LH: loop header
LB: loop body
LE: loop exit
PB: predicated region body
PF: predicated region fallthrough
CT: control target
= control target key end

     0   :  { %v21627_v0 = vmov 0.0|0.0   ;;  %vm15492_vm0 = vmmov 0   ;;  %v21629_v3 = vmov 0.0   ;;  %vm83_vm1 = vcmask 130048   ;;  %s15495_s25 = smov 64   ;;  %s21615_s1 = inlined_call_operand.vmem [shape: f32[16,16], index: 1, kind: input, shape index: {}]   ;;  %s21616_s0 = inlined_call_operand.vmem [shape: f32[338,16], index: 0, kind: input, shape index: {}]   ;;  %s21617_s5 = inlined_call_operand.vmem [shape: f32[16,512], index: 5, kind: input, shape index: {}]   ;;  %s21618_s2 = inlined_call_operand.vmem [shape: f32[1,16], index: 2, kind: input, shape index: {}]   ;;  %s21619_s3 = inlined_call_operand.vmem [shape: f32[1,16], index: 3, kind: input, shape index: {}]   ;;  %s21620_s4 = inlined_call_operand.vmem [shape: f32[16,50,338], index: 4, kind: input, shape index: {}]   ;;  %s21621_s9 = inlined_call_operand.vmem [shape: f32[32,2048], index: 9, kind: input, shape index: {}]   ;;  %s21622_s6 = inlined_call_operand.vmem [shape: f32[1,32], index: 6, kind: input, shape index: {}]   ;;  %s21623_s7 = inlined_call_operand.vmem [shape: f32[1,32], index: 7, kind: input, shape index: {}]   ;;  %s21624_s8 = inlined_call_operand.vmem [shape: f32[16,2,50], index: 8, kind: input, shape index: {}]   ;;  %s21625_s10 = inlined_call_operand.vmem [shape: f32[1,128], index: 10, kind: input, shape index: {}]   ;;  %s21626_s11 = inlined_call_operand.vmem [shape: f32[2,128], index: 11, kind: output, shape index: {}]  }
   0x1   :  { %12924 = vmatprep.subr.bf16.mxu0 %v21627_v0  ;;  %v81_v1 = vld [vmem:[%s21615_s1] sm:$0xff]  ;;  %v82_v2 = vld [vmem:[%s21615_s1 + $0x8] sm:$0xff]  ;;  %11835 = vmatprep.mubr.msk.f32.mxu0 %vm15492_vm0, %v21629_v3  ;;  %v40_v7 = vld [vmem:[%s21616_s0 + $0x10] sm:$0xff]  ;;  %vm578_vm2 = vcmask 123904   ;;  %vm2017_vm3 = vcmask 1041408   ;;  %vm1995_vm4 = vcmask 670720  }
   0x2   :  { %v12925_v4 = vpack.c.bf16 %v82_v2, %v81_v1  ;;  %13895 = vmatprep.subr.bf16.mxu1 %v21627_v0  ;;  %11961 = vmatprep.mubr.msk.f32.mxu1 %vm15492_vm0, %v21629_v3  ;;  %v38_v5 = vld [vmem:[%s21616_s0] sm:$0xff]  ;;  %v39_v6 = vld [vmem:[%s21616_s0 + $0x8] sm:$0xff]  ;;  %v41_v8 = vld [vmem:[%s21616_s0 + $0x18] sm:$0xff]  ;;  %vm7510_vm5 = vcmask 261120   ;;  %vm7522_vm6 = vcmask 254976   ;;  %vm8562_vm7 = vcmask 408576  }
   0x3   :  { %v42_v9 = vld [vmem:[%s21616_s0 + $0x20] sm:$0xff]  ;;  %v43_v10 = vld [vmem:[%s21616_s0 + $0x28] sm:$0xff]  ;;  %v44_v11 = vld [vmem:[%s21616_s0 + $0x30] sm:$0xff] }
   0x4   :  { %12926 = vmatpush3.bf16.msra.mxu0 %v12925_v4  ;;  %13896 = vmatpush3.bf16.msra.mxu1 %v12925_v4  ;;  %v45_v12 = vld [vmem:[%s21616_s0 + $0x38] sm:$0xff]  ;;  %v46_v13 = vld [vmem:[%s21616_s0 + $0x40] sm:$0xff]  ;;  %v47_v14 = vld [vmem:[%s21616_s0 + $0x48] sm:$0xff] }
   0x5   :  { %v80_v15 = vld [vmem:[%s21616_s0 + $0x150] sm:$0x3]  ;;  %v49_v17 = vld [vmem:[%s21616_s0 + $0x58] sm:$0xff]  ;;  %v50_v18 = vld [vmem:[%s21616_s0 + $0x60] sm:$0xff] }
   0x6   :  { %v48_v16 = vld [vmem:[%s21616_s0 + $0x50] sm:$0xff]  ;;  %v51_v19 = vld [vmem:[%s21616_s0 + $0x68] sm:$0xff]  ;;  %v53_v21 = vld [vmem:[%s21616_s0 + $0x78] sm:$0xff] }
   0x7   :  { %11836 = vmatmul.mubr.msk.f32.vlgmr.msra.gmra.mrb[0].mxu0 %vm83_vm1, %v38_v5  ;;  %11962 = vmatmul.mubr.msk.f32.vlgmr.msra.gmra.mrb[0].mxu1 %vm83_vm1, %v80_v15  ;;  %v52_v20 = vld [vmem:[%s21616_s0 + $0x70] sm:$0xff]  ;;  %v54_v22 = vld [vmem:[%s21616_s0 + $0x80] sm:$0xff]  ;;  %v55_v23 = vld [vmem:[%s21616_s0 + $0x88] sm:$0xff] }
   0x8   :  { %11838 = vmatprep.mubr.msk.f32.mxu0 %vm15492_vm0, %v21629_v3  ;;  %1199 = vmatprep.mubr.f32.mxu1 %v21629_v3  ;;  %v56_v24 = vld [vmem:[%s21616_s0 + $0x90] sm:$0xff]  ;;  %v57_v25 = vld [vmem:[%s21616_s0 + $0x98] sm:$0xff]  ;;  %v58_v26 = vld [vmem:[%s21616_s0 + $0xa0] sm:$0xff] }
   0x9   :  { %v59_v27 = vld [vmem:[%s21616_s0 + $0xa8] sm:$0xff]  ;;  %v60_v28 = vld [vmem:[%s21616_s0 + $0xb0] sm:$0xff]  ;;  %v61_v29 = vld [vmem:[%s21616_s0 + $0xb8] sm:$0xff] }
   0xa   :  { %v62_v30 = vld [vmem:[%s21616_s0 + $0xc0] sm:$0xff]  ;;  %v63_v31 = vld [vmem:[%s21616_s0 + $0xc8] sm:$0xff]  ;;  %v64_v32 = vld [vmem:[%s21616_s0 + $0xd0] sm:$0xff] }
   0xb   :  { %11839 = vmatmul.mubr.msk.f32.gmra.mrb[2].mxu0 %vm83_vm1, %v39_v6  ;;  %v65_v33 = vld [vmem:[%s21616_s0 + $0xd8] sm:$0xff]  ;;  %v66_v34 = vld [vmem:[%s21616_s0 + $0xe0] sm:$0xff]  ;;  %v67_v35 = vld [vmem:[%s21616_s0 + $0xe8] sm:$0xff] }
   0xc   :  { %11841 = vmatprep.mubr.msk.f32.mxu0 %vm15492_vm0, %v21629_v3  ;;  %v68_v36 = vld [vmem:[%s21616_s0 + $0xf0] sm:$0xff]  ;;  %v69_v37 = vld [vmem:[%s21616_s0 + $0xf8] sm:$0xff]  ;;  %v70_v38 = vld [vmem:[%s21616_s0 + $0x100] sm:$0xff] }
   0xd   :  { %v71_v39 = vld [vmem:[%s21616_s0 + $0x108] sm:$0xff]  ;;  %v72_v40 = vld [vmem:[%s21616_s0 + $0x110] sm:$0xff]  ;;  %v73_v41 = vld [vmem:[%s21616_s0 + $0x118] sm:$0xff] }
   0xe   :  { %v74_v42 = vld [vmem:[%s21616_s0 + $0x120] sm:$0xff]  ;;  %v75_v43 = vld [vmem:[%s21616_s0 + $0x128] sm:$0xff]  ;;  %v76_v44 = vld [vmem:[%s21616_s0 + $0x130] sm:$0xff] }
   0xf   :  { %11842 = vmatmul.mubr.msk.f32.gmra.mrb[4].mxu0 %vm83_vm1, %v40_v7  ;;  %v77_v45 = vld [vmem:[%s21616_s0 + $0x138] sm:$0xff]  ;;  %v78_v46 = vld [vmem:[%s21616_s0 + $0x140] sm:$0xff]  ;;  %v79_v47 = vld [vmem:[%s21616_s0 + $0x148] sm:$0xff]  ;;  %s15496_s0 = smov 32  }
  0x10   :  { %11844 = vmatprep.mubr.msk.f32.mxu0 %vm15492_vm0, %v21629_v3 }
  0x13   :  { %11845 = vmatmul.mubr.msk.f32.gmra.mrb[6].mxu0 %vm83_vm1, %v41_v8 }
  0x14   :  { %11847 = vmatprep.mubr.msk.f32.mxu0 %vm15492_vm0, %v21629_v3 }
  0x17   :  { %11848 = vmatmul.mubr.msk.f32.gmra.mrb[8].mxu0 %vm83_vm1, %v42_v9 }
  0x18   :  { %11850 = vmatprep.mubr.msk.f32.mxu0 %vm15492_vm0, %v21629_v3 }
  0x1b   :  { %11851 = vmatmul.mubr.msk.f32.gmra.mrb[10].mxu0 %vm83_vm1, %v43_v10 }
  0x1c   :  { %11853 = vmatprep.mubr.msk.f32.mxu0 %vm15492_vm0, %v21629_v3 }
  0x1f   :  { %11854 = vmatmul.mubr.msk.f32.gmra.mrb[12].mxu0 %vm83_vm1, %v44_v11 }
  0x20   :  { %11856 = vmatprep.mubr.msk.f32.mxu0 %vm15492_vm0, %v21629_v3 }
  0x23   :  { %11857 = vmatmul.mubr.msk.f32.gmra.mrb[14].mxu0 %vm83_vm1, %v45_v12 }
  0x24   :  { %11859 = vmatprep.mubr.msk.f32.mxu0 %vm15492_vm0, %v21629_v3 }
  0x27   :  { %11860 = vmatmul.mubr.msk.f32.gmra.mrb[16].mxu0 %vm83_vm1, %v46_v13 }
  0x28   :  { %11862 = vmatprep.mubr.msk.f32.mxu0 %vm15492_vm0, %v21629_v3 }
  0x2b   :  { %11863 = vmatmul.mubr.msk.f32.gmra.mrb[18].mxu0 %vm83_vm1, %v47_v14 }
  0x2c   :  { %11865 = vmatprep.mubr.msk.f32.mxu0 %vm15492_vm0, %v21629_v3 }
  0x2f   :  { %11866 = vmatmul.mubr.msk.f32.gmra.mrb[20].mxu0 %vm83_vm1, %v48_v16 }
  0x30   :  { %11868 = vmatprep.mubr.msk.f32.mxu0 %vm15492_vm0, %v21629_v3 }
  0x33   :  { %11869 = vmatmul.mubr.msk.f32.gmra.mrb[22].mxu0 %vm83_vm1, %v49_v17 }
  0x34   :  { %11871 = vmatprep.mubr.msk.f32.mxu0 %vm15492_vm0, %v21629_v3 }
  0x37   :  { %11872 = vmatmul.mubr.msk.f32.gmra.mrb[24].mxu0 %vm83_vm1, %v50_v18 }
  0x38   :  { %11874 = vmatprep.mubr.msk.f32.mxu0 %vm15492_vm0, %v21629_v3 }
  0x3b   :  { %11875 = vmatmul.mubr.msk.f32.gmra.mrb[26].mxu0 %vm83_vm1, %v51_v19 }
  0x3c   :  { %11877 = vmatprep.mubr.msk.f32.mxu0 %vm15492_vm0, %v21629_v3 }
  0x3f   :  { %11878 = vmatmul.mubr.msk.f32.gmra.mrb[28].mxu0 %vm83_vm1, %v52_v20 }
  0x40   :  { %11880 = vmatprep.mubr.msk.f32.mxu0 %vm15492_vm0, %v21629_v3 }
  0x43   :  { %11881 = vmatmul.mubr.msk.f32.gmra.mrb[30].mxu0 %vm83_vm1, %v53_v21 }
  0x44   :  { %11883 = vmatprep.mubr.msk.f32.mxu0 %vm15492_vm0, %v21629_v3 }
  0x47   :  { %11884 = vmatmul.mubr.msk.f32.gmra.mrb[32].mxu0 %vm83_vm1, %v54_v22 }
  0x48   :  { %11886 = vmatprep.mubr.msk.f32.mxu0 %vm15492_vm0, %v21629_v3 }
  0x4b   :  { %11887 = vmatmul.mubr.msk.f32.gmra.mrb[34].mxu0 %vm83_vm1, %v55_v23 }
  0x4c   :  { %11889 = vmatprep.mubr.msk.f32.mxu0 %vm15492_vm0, %v21629_v3 }
  0x4f   :  { %11890 = vmatmul.mubr.msk.f32.gmra.mrb[36].mxu0 %vm83_vm1, %v56_v24 }
  0x50   :  { %11892 = vmatprep.mubr.msk.f32.mxu0 %vm15492_vm0, %v21629_v3 }
  0x53   :  { %11893 = vmatmul.mubr.msk.f32.gmra.mrb[38].mxu0 %vm83_vm1, %v57_v25 }
  0x54   :  { %11895 = vmatprep.mubr.msk.f32.mxu0 %vm15492_vm0, %v21629_v3 }
  0x57   :  { %11896 = vmatmul.mubr.msk.f32.gmra.mrb[40].mxu0 %vm83_vm1, %v58_v26 }
  0x58   :  { %11898 = vmatprep.mubr.msk.f32.mxu0 %vm15492_vm0, %v21629_v3 }
  0x5b   :  { %11899 = vmatmul.mubr.msk.f32.gmra.mrb[42].mxu0 %vm83_vm1, %v59_v27 }
  0x5c   :  { %11901 = vmatprep.mubr.msk.f32.mxu0 %vm15492_vm0, %v21629_v3 }
  0x5f   :  { %11902 = vmatmul.mubr.msk.f32.gmra.mrb[44].mxu0 %vm83_vm1, %v60_v28 }
  0x60   :  { %11904 = vmatprep.mubr.msk.f32.mxu0 %vm15492_vm0, %v21629_v3 }
  0x63   :  { %11905 = vmatmul.mubr.msk.f32.gmra.mrb[46].mxu0 %vm83_vm1, %v61_v29 }
  0x64   :  { %11907 = vmatprep.mubr.msk.f32.mxu0 %vm15492_vm0, %v21629_v3 }
  0x67   :  { %11908 = vmatmul.mubr.msk.f32.gmra.mrb[48].mxu0 %vm83_vm1, %v62_v30 }
  0x68   :  { %11910 = vmatprep.mubr.msk.f32.mxu0 %vm15492_vm0, %v21629_v3 }
  0x6b   :  { %11911 = vmatmul.mubr.msk.f32.gmra.mrb[50].mxu0 %vm83_vm1, %v63_v31 }
  0x6c   :  { %11913 = vmatprep.mubr.msk.f32.mxu0 %vm15492_vm0, %v21629_v3 }
  0x6f   :  { %11914 = vmatmul.mubr.msk.f32.gmra.mrb[52].mxu0 %vm83_vm1, %v64_v32 }
  0x70   :  { %11916 = vmatprep.mubr.msk.f32.mxu0 %vm15492_vm0, %v21629_v3 }
  0x73   :  { %11917 = vmatmul.mubr.msk.f32.gmra.mrb[54].mxu0 %vm83_vm1, %v65_v33 }
  0x74   :  { %11919 = vmatprep.mubr.msk.f32.mxu0 %vm15492_vm0, %v21629_v3 }
  0x77   :  { %11920 = vmatmul.mubr.msk.f32.gmra.mrb[56].mxu0 %vm83_vm1, %v66_v34 }
  0x78   :  { %11922 = vmatprep.mubr.msk.f32.mxu0 %vm15492_vm0, %v21629_v3 }
  0x7b   :  { %11923 = vmatmul.mubr.msk.f32.gmra.mrb[58].mxu0 %vm83_vm1, %v67_v35 }
  0x7c   :  { %11925 = vmatprep.mubr.msk.f32.mxu0 %vm15492_vm0, %v21629_v3 }
  0x7f   :  { %11926 = vmatmul.mubr.msk.f32.gmra.mrb[60].mxu0 %vm83_vm1, %v68_v36 }
  0x80   :  { %11928 = vmatprep.mubr.msk.f32.mxu0 %vm15492_vm0, %v21629_v3 }
  0x83   :  { %11929 = vmatmul.mubr.msk.f32.gmra.mrb[62].mxu0 %vm83_vm1, %v69_v37 }
  0x84   :  { %11931 = vmatprep.mubr.msk.f32.mxu0 %vm15492_vm0, %v21629_v3 }
  0x87   :  { %11932 = vmatmul.mubr.msk.f32.gmra.mrb[64].mxu0 %vm83_vm1, %v70_v38 }
  0x88   :  { %11934 = vmatprep.mubr.msk.f32.mxu0 %vm15492_vm0, %v21629_v3 }
  0x8b   :  { %11935 = vmatmul.mubr.msk.f32.gmra.mrb[66].mxu0 %vm83_vm1, %v71_v39 }
  0x8c   :  { %11937 = vmatprep.mubr.msk.f32.mxu0 %vm15492_vm0, %v21629_v3 }
  0x8f   :  { %11938 = vmatmul.mubr.msk.f32.gmra.mrb[68].mxu0 %vm83_vm1, %v72_v40 }
  0x90   :  { %11940 = vmatprep.mubr.msk.f32.mxu0 %vm15492_vm0, %v21629_v3 }
  0x93   :  { %11941 = vmatmul.mubr.msk.f32.gmra.mrb[70].mxu0 %vm83_vm1, %v73_v41 }
  0x94   :  { %11943 = vmatprep.mubr.msk.f32.mxu0 %vm15492_vm0, %v21629_v3 }
  0x97   :  { %11944 = vmatmul.mubr.msk.f32.gmra.mrb[72].mxu0 %vm83_vm1, %v74_v42 }
  0x98   :  { %11946 = vmatprep.mubr.msk.f32.mxu0 %vm15492_vm0, %v21629_v3 }
  0x9b   :  { %11947 = vmatmul.mubr.msk.f32.gmra.mrb[74].mxu0 %vm83_vm1, %v75_v43 }
  0x9c   :  { %11949 = vmatprep.mubr.msk.f32.mxu0 %vm15492_vm0, %v21629_v3 }
  0x9f   :  { %11950 = vmatmul.mubr.msk.f32.gmra.mrb[76].mxu0 %vm83_vm1, %v76_v44 }
  0xa0   :  { %11952 = vmatprep.mubr.msk.f32.mxu0 %vm15492_vm0, %v21629_v3 }
  0xa3   :  { %11953 = vmatmul.mubr.msk.f32.gmra.mrb[78].mxu0 %vm83_vm1, %v77_v45 }
  0xa4   :  { %11955 = vmatprep.mubr.msk.f32.mxu0 %vm15492_vm0, %v21629_v3 }
  0xa7   :  { %11956 = vmatmul.mubr.msk.f32.gmra.mrb[80].mxu0 %vm83_vm1, %v78_v46 }
  0xa8   :  { %11958 = vmatprep.mubr.msk.f32.mxu0 %vm15492_vm0, %v21629_v3 }
  0xab   :  { %11959 = vmatmul.mubr.msk.f32.gmra.mrb[82].mxu0 %vm83_vm1, %v79_v47 }
  0xac   :  { %1522 = vmatprep.mubr.f32.mxu0 %v21629_v3 }
  0xda   :  { %v15825_v48 = vpop.f32.mrb[0].mxu0 }
  0xdb   :  { %v11837_v49 = vpop.f32.mrb[1].mxu0  ;;  %v588_v50 = vmul.f32 %v15825_v48, %v15825_v48  ;;  %v495_v52 = vsel %vm83_vm1, %v15825_v48, 0.0 }
  0xdd   :  { %v631_v57 = vsel %vm83_vm1, %v588_v50, 0.0 }
  0xde   :  { %v15829_v51 = vpop.f32.mrb[2].mxu0 }
  0xdf   :  { %v496_v53 = vsel %vm83_vm1, %v15829_v51, 0.0  ;;  %v589_v54 = vmul.f32 %v15829_v51, %v15829_v51  ;;  %v11840_v55 = vpop.f32.mrb[3].mxu0 }
  0xe0   :  { %v497_v56 = vadd.f32 %v496_v53, %v495_v52  ;;  %v15894_v53 = vpop.f32.mrb[0].mxu1 }
  0xe1   :  { %v632_v58 = vsel %vm83_vm1, %v589_v54, 0.0  ;;  %v11963_v55 = vpop.f32.mrb[1].mxu1 }
  0xe2   :  { %v633_v59 = vadd.f32 %v632_v58, %v631_v57  ;;  %v15839_v60 = vpop.f32.mrb[4].mxu0 }
  0xe3   :  { %v498_v61 = vsel %vm83_vm1, %v15839_v60, 0.0  ;;  %v590_v62 = vmul.f32 %v15839_v60, %v15839_v60  ;;  %v11843_v63 = vpop.f32.mrb[5].mxu0 }
  0xe4   :  { %v499_v1 = vadd.f32 %v498_v61, %v497_v56 }
  0xe5   :  { %v634_v2 = vsel %vm83_vm1, %v590_v62, 0.0 }
  0xe6   :  { %v635_v4 = vadd.f32 %v634_v2, %v633_v59  ;;  %v15846_v5 = vpop.f32.mrb[6].mxu0 }
  0xe7   :  { %v500_v6 = vsel %vm83_vm1, %v15846_v5, 0.0  ;;  %v591_v7 = vmul.f32 %v15846_v5, %v15846_v5  ;;  %v11846_v8 = vpop.f32.mrb[7].mxu0 }
  0xe8   :  { %v501_v9 = vadd.f32 %v500_v6, %v499_v1 }
  0xe9   :  { %v636_v10 = vsel %vm83_vm1, %v591_v7, 0.0 }
  0xea   :  { %v637_v11 = vadd.f32 %v636_v10, %v635_v4  ;;  %v15853_v12 = vpop.f32.mrb[8].mxu0 }
  0xeb   :  { %v502_v13 = vsel %vm83_vm1, %v15853_v12, 0.0  ;;  %v592_v14 = vmul.f32 %v15853_v12, %v15853_v12  ;;  %v11849_v15 = vpop.f32.mrb[9].mxu0 }
  0xec   :  { %v503_v16 = vadd.f32 %v502_v13, %v501_v9 }
  0xed   :  { %v638_v17 = vsel %vm83_vm1, %v592_v14, 0.0 }
  0xee   :  { %v639_v18 = vadd.f32 %v638_v17, %v637_v11  ;;  %v15860_v19 = vpop.f32.mrb[10].mxu0 }
  0xef   :  { %v504_v20 = vsel %vm83_vm1, %v15860_v19, 0.0  ;;  %v593_v21 = vmul.f32 %v15860_v19, %v15860_v19  ;;  %v11852_v22 = vpop.f32.mrb[11].mxu0 }
  0xf0   :  { %v505_v23 = vadd.f32 %v504_v20, %v503_v16 }
  0xf1   :  { %v640_v24 = vsel %vm83_vm1, %v593_v21, 0.0 }
  0xf2   :  { %v641_v25 = vadd.f32 %v640_v24, %v639_v18  ;;  %v15867_v26 = vpop.f32.mrb[12].mxu0 }
  0xf3   :  { %v506_v27 = vsel %vm83_vm1, %v15867_v26, 0.0  ;;  %v594_v28 = vmul.f32 %v15867_v26, %v15867_v26  ;;  %v11855_v29 = vpop.f32.mrb[13].mxu0 }
  0xf4   :  { %v507_v30 = vadd.f32 %v506_v27, %v505_v23 }
  0xf5   :  { %v642_v31 = vsel %vm83_vm1, %v594_v28, 0.0 }
  0xf6   :  { %v643_v32 = vadd.f32 %v642_v31, %v641_v25  ;;  %v15874_v33 = vpop.f32.mrb[14].mxu0 }
  0xf7   :  { %v508_v34 = vsel %vm83_vm1, %v15874_v33, 0.0  ;;  %v595_v35 = vmul.f32 %v15874_v33, %v15874_v33  ;;  %v11858_v36 = vpop.f32.mrb[15].mxu0 }
  0xf8   :  { %v509_v37 = vadd.f32 %v508_v34, %v507_v30 }
  0xf9   :  { %v644_v38 = vsel %vm83_vm1, %v595_v35, 0.0 }
  0xfa   :  { %v645_v39 = vadd.f32 %v644_v38, %v643_v32  ;;  %v15881_v40 = vpop.f32.mrb[16].mxu0 }
  0xfb   :  { %v510_v41 = vsel %vm83_vm1, %v15881_v40, 0.0  ;;  %v596_v42 = vmul.f32 %v15881_v40, %v15881_v40  ;;  %v11861_v43 = vpop.f32.mrb[17].mxu0 }
  0xfc   :  { %v511_v44 = vadd.f32 %v510_v41, %v509_v37 }
  0xfd   :  { %v646_v45 = vsel %vm83_vm1, %v596_v42, 0.0 }
  0xfe   :  { %v647_v46 = vadd.f32 %v646_v45, %v645_v39  ;;  %v15888_v47 = vpop.f32.mrb[18].mxu0 }
  0xff   :  { %v512_v49 = vsel %vm83_vm1, %v15888_v47, 0.0  ;;  %v597_v50 = vmul.f32 %v15888_v47, %v15888_v47  ;;  %v11864_v52 = vpop.f32.mrb[19].mxu0 }
 0x100   :  { %v513_v54 = vadd.f32 %v512_v49, %v511_v44 }
 0x101   :  { %v648_v56 = vsel %vm83_vm1, %v597_v50, 0.0 }
 0x102   :  { %v649_v57 = vadd.f32 %v648_v56, %v647_v46  ;;  %v15897_v58 = vpop.f32.mrb[20].mxu0 }
 0x103   :  { %v514_v59 = vsel %vm83_vm1, %v15897_v58, 0.0  ;;  %v598_v61 = vmul.f32 %v15897_v58, %v15897_v58  ;;  %v11867_v62 = vpop.f32.mrb[21].mxu0 }
 0x104   :  { %v515_v63 = vadd.f32 %v514_v59, %v513_v54 }
 0x105   :  { %v650_v1 = vsel %vm83_vm1, %v598_v61, 0.0 }
 0x106   :  { %v651_v2 = vadd.f32 %v650_v1, %v649_v57  ;;  %v15904_v4 = vpop.f32.mrb[22].mxu0 }
 0x107   :  { %v516_v6 = vsel %vm83_vm1, %v15904_v4, 0.0  ;;  %v599_v7 = vmul.f32 %v15904_v4, %v15904_v4  ;;  %v11870_v8 = vpop.f32.mrb[23].mxu0 }
 0x108   :  { %v517_v9 = vadd.f32 %v516_v6, %v515_v63 }
 0x109   :  { %v652_v10 = vsel %vm83_vm1, %v599_v7, 0.0 }
 0x10a   :  { %v653_v11 = vadd.f32 %v652_v10, %v651_v2  ;;  %v15911_v13 = vpop.f32.mrb[24].mxu0 }
 0x10b   :  { %v518_v14 = vsel %vm83_vm1, %v15911_v13, 0.0  ;;  %v600_v15 = vmul.f32 %v15911_v13, %v15911_v13  ;;  %v11873_v16 = vpop.f32.mrb[25].mxu0 }
 0x10c   :  { %v519_v17 = vadd.f32 %v518_v14, %v517_v9 }
 0x10d   :  { %v654_v18 = vsel %vm83_vm1, %v600_v15, 0.0 }
 0x10e   :  { %v655_v20 = vadd.f32 %v654_v18, %v653_v11  ;;  %v15918_v21 = vpop.f32.mrb[26].mxu0 }
 0x10f   :  { %v520_v22 = vsel %vm83_vm1, %v15918_v21, 0.0  ;;  %v601_v23 = vmul.f32 %v15918_v21, %v15918_v21  ;;  %v11876_v24 = vpop.f32.mrb[27].mxu0 }
 0x110   :  { %v521_v25 = vadd.f32 %v520_v22, %v519_v17 }
 0x111   :  { %v656_v27 = vsel %vm83_vm1, %v601_v23, 0.0 }
 0x112   :  { %v657_v28 = vadd.f32 %v656_v27, %v655_v20  ;;  %v15925_v29 = vpop.f32.mrb[28].mxu0 }
 0x113   :  { %v522_v30 = vsel %vm83_vm1, %v15925_v29, 0.0  ;;  %v602_v31 = vmul.f32 %v15925_v29, %v15925_v29  ;;  %v11879_v32 = vpop.f32.mrb[29].mxu0 }
 0x114   :  { %v523_v34 = vadd.f32 %v522_v30, %v521_v25 }
 0x115   :  { %v658_v35 = vsel %vm83_vm1, %v602_v31, 0.0 }
 0x116   :  { %v659_v36 = vadd.f32 %v658_v35, %v657_v28  ;;  %v15932_v37 = vpop.f32.mrb[30].mxu0 }
 0x117   :  { %v524_v38 = vsel %vm83_vm1, %v15932_v37, 0.0  ;;  %v603_v39 = vmul.f32 %v15932_v37, %v15932_v37  ;;  %v11882_v41 = vpop.f32.mrb[31].mxu0 }
 0x118   :  { %v525_v42 = vadd.f32 %v524_v38, %v523_v34  ;;  %v1003_v41 = vld [vmem:[%s21617_s5 + $0x28] sm:$0xff] }
 0x119   :  { %v660_v43 = vsel %vm83_vm1, %v603_v39, 0.0  ;;  %v999_v39 = vld [vmem:[%s21617_s5 + $0x8] sm:$0xff] }
 0x11a   :  { %v661_v44 = vadd.f32 %v660_v43, %v659_v36  ;;  %v15939_v45 = vpop.f32.mrb[32].mxu0 }
 0x11b   :  { %v526_v46 = vsel %vm83_vm1, %v15939_v45, 0.0  ;;  %v604_v49 = vmul.f32 %v15939_v45, %v15939_v45  ;;  %v11885_v50 = vpop.f32.mrb[33].mxu0 }
 0x11c   :  { %v527_v52 = vadd.f32 %v526_v46, %v525_v42  ;;  %v1001_v42 = vld [vmem:[%s21617_s5 + $0x18] sm:$0xff]  ;;  %v1002_v50 = vld [vmem:[%s21617_s5 + $0x20] sm:$0xff] }
 0x11d   :  { %v662_v54 = vsel %vm83_vm1, %v604_v49, 0.0  ;;  %v1005_v46 = vld [vmem:[%s21617_s5 + $0x38] sm:$0xff]  ;;  %v998_v49 = vld [vmem:[%s21617_s5] sm:$0xff] }
 0x11e   :  { %v663_v55 = vadd.f32 %v662_v54, %v661_v44  ;;  %v15946_v56 = vpop.f32.mrb[34].mxu0  ;;  %v12927_v44 = vpack.c.bf16 %v1003_v41, %v999_v39 }
 0x11f   :  { %v528_v57 = vsel %vm83_vm1, %v15946_v56, 0.0  ;;  %v605_v59 = vmul.f32 %v15946_v56, %v15946_v56  ;;  %v11888_v61 = vpop.f32.mrb[35].mxu0 }
 0x120   :  { %v529_v62 = vadd.f32 %v528_v57, %v527_v52  ;;  %v12929_v57 = vpack.c.bf16 %v1002_v50, %v998_v49  ;;  %v1004_v61 = vld [vmem:[%s21617_s5 + $0x30] sm:$0xff]  ;;  %12928 = vmatprep.subr.bf16.mxu1 %v12927_v44 }
 0x121   :  { %v664_v63 = vsel %vm83_vm1, %v605_v59, 0.0  ;;  %v1000_v59 = vld [vmem:[%s21617_s5 + $0x10] sm:$0xff] }
 0x122   :  { %v665_v1 = vadd.f32 %v664_v63, %v663_v55  ;;  %v15953_v2 = vpop.f32.mrb[36].mxu0  ;;  %v12931_v55 = vpack.c.bf16 %v1005_v46, %v1001_v42  ;;  %12930 = vmatpush1.bf16.msra.mxu1 %v12929_v57 }
 0x123   :  { %v530_v6 = vsel %vm83_vm1, %v15953_v2, 0.0  ;;  %v606_v7 = vmul.f32 %v15953_v2, %v15953_v2  ;;  %v11891_v8 = vpop.f32.mrb[37].mxu0 }
 0x124   :  { %v531_v9 = vadd.f32 %v530_v6, %v529_v62  ;;  %v12933_v6 = vpack.c.bf16 %v1004_v61, %v1000_v59  ;;  %12932 = vmatprep.subr.bf16.mxu0 %v12931_v55 }
 0x125   :  { %v666_v10 = vsel %vm83_vm1, %v606_v7, 0.0 }
 0x126   :  { %v667_v11 = vadd.f32 %v666_v10, %v665_v1  ;;  %v15960_v14 = vpop.f32.mrb[38].mxu0  ;;  %12934 = vmatpush1.bf16.msra.mxu0 %v12933_v6 }
 0x127   :  { %v532_v15 = vsel %vm83_vm1, %v15960_v14, 0.0  ;;  %v607_v16 = vmul.f32 %v15960_v14, %v15960_v14  ;;  %v11894_v17 = vpop.f32.mrb[39].mxu0 }
 0x128   :  { %v533_v18 = vadd.f32 %v532_v15, %v531_v9 }
 0x129   :  { %v668_v20 = vsel %vm83_vm1, %v607_v16, 0.0 }
 0x12a   :  { %v669_v22 = vadd.f32 %v668_v20, %v667_v11  ;;  %v15967_v23 = vpop.f32.mrb[40].mxu0 }
 0x12b   :  { %v534_v24 = vsel %vm83_vm1, %v15967_v23, 0.0  ;;  %v608_v25 = vmul.f32 %v15967_v23, %v15967_v23  ;;  %v11897_v27 = vpop.f32.mrb[41].mxu0 }
 0x12c   :  { %v535_v28 = vadd.f32 %v534_v24, %v533_v18 }
 0x12d   :  { %v670_v30 = vsel %vm83_vm1, %v608_v25, 0.0 }
 0x12e   :  { %v671_v31 = vadd.f32 %v670_v30, %v669_v22  ;;  %v15974_v32 = vpop.f32.mrb[42].mxu0 }
 0x12f   :  { %v536_v34 = vsel %vm83_vm1, %v15974_v32, 0.0  ;;  %v609_v35 = vmul.f32 %v15974_v32, %v15974_v32  ;;  %v11900_v36 = vpop.f32.mrb[43].mxu0 }
 0x130   :  { %v537_v38 = vadd.f32 %v536_v34, %v535_v28 }
 0x131   :  { %v672_v43 = vsel %vm83_vm1, %v609_v35, 0.0 }
 0x132   :  { %v673_v52 = vadd.f32 %v672_v43, %v671_v31  ;;  %v15999_v54 = vpop.f32.mrb[44].mxu0 }
 0x133   :  { %v538_v62 = vsel %vm83_vm1, %v15999_v54, 0.0  ;;  %v610_v63 = vmul.f32 %v15999_v54, %v15999_v54  ;;  %v11903_v1 = vpop.f32.mrb[45].mxu0 }
 0x134   :  { %v539_v7 = vadd.f32 %v538_v62, %v537_v38 }
 0x135   :  { %v674_v8 = vsel %vm83_vm1, %v610_v63, 0.0 }
 0x136   :  { %v675_v9 = vadd.f32 %v674_v8, %v673_v52  ;;  %v16012_v10 = vpop.f32.mrb[46].mxu0 }
 0x137   :  { %v540_v11 = vsel %vm83_vm1, %v16012_v10, 0.0  ;;  %v611_v15 = vmul.f32 %v16012_v10, %v16012_v10  ;;  %v11906_v16 = vpop.f32.mrb[47].mxu0 }
 0x138   :  { %v541_v17 = vadd.f32 %v540_v11, %v539_v7 }
 0x139   :  { %v676_v18 = vsel %vm83_vm1, %v611_v15, 0.0 }
 0x13a   :  { %v677_v20 = vadd.f32 %v676_v18, %v675_v9  ;;  %v16019_v22 = vpop.f32.mrb[48].mxu0 }
 0x13b   :  { %v542_v24 = vsel %vm83_vm1, %v16019_v22, 0.0  ;;  %v612_v25 = vmul.f32 %v16019_v22, %v16019_v22  ;;  %v11909_v27 = vpop.f32.mrb[49].mxu0 }
 0x13c   :  { %v543_v28 = vadd.f32 %v542_v24, %v541_v17 }
 0x13d   :  { %v678_v30 = vsel %vm83_vm1, %v612_v25, 0.0 }
 0x13e   :  { %v679_v31 = vadd.f32 %v678_v30, %v677_v20  ;;  %v16026_v34 = vpop.f32.mrb[50].mxu0 }
 0x13f   :  { %v544_v35 = vsel %vm83_vm1, %v16026_v34, 0.0  ;;  %v613_v36 = vmul.f32 %v16026_v34, %v16026_v34  ;;  %v11912_v38 = vpop.f32.mrb[51].mxu0 }
 0x140   :  { %v545_v39 = vadd.f32 %v544_v35, %v543_v28 }
 0x141   :  { %v680_v41 = vsel %vm83_vm1, %v613_v36, 0.0 }
 0x142   :  { %v681_v42 = vadd.f32 %v680_v41, %v679_v31  ;;  %v16033_v43 = vpop.f32.mrb[52].mxu0 }
 0x143   :  { %v546_v44 = vsel %vm83_vm1, %v16033_v43, 0.0  ;;  %v614_v46 = vmul.f32 %v16033_v43, %v16033_v43  ;;  %v11915_v49 = vpop.f32.mrb[53].mxu0 }
 0x144   :  { %v547_v50 = vadd.f32 %v546_v44, %v545_v39 }
 0x145   :  { %v682_v52 = vsel %vm83_vm1, %v614_v46, 0.0 }
 0x146   :  { %v683_v55 = vadd.f32 %v682_v52, %v681_v42  ;;  %v16040_v57 = vpop.f32.mrb[54].mxu0 }
 0x147   :  { %v548_v59 = vsel %vm83_vm1, %v16040_v57, 0.0  ;;  %v615_v61 = vmul.f32 %v16040_v57, %v16040_v57  ;;  %v11918_v62 = vpop.f32.mrb[55].mxu0 }
 0x148   :  { %v549_v63 = vadd.f32 %v548_v59, %v547_v50 }
 0x149   :  { %v684_v1 = vsel %vm83_vm1, %v615_v61, 0.0 }
 0x14a   :  { %v685_v6 = vadd.f32 %v684_v1, %v683_v55  ;;  %v16047_v7 = vpop.f32.mrb[56].mxu0 }
 0x14b   :  { %v550_v8 = vsel %vm83_vm1, %v16047_v7, 0.0  ;;  %v616_v9 = vmul.f32 %v16047_v7, %v16047_v7  ;;  %v11921_v11 = vpop.f32.mrb[57].mxu0 }
 0x14c   :  { %v551_v15 = vadd.f32 %v550_v8, %v549_v63 }
 0x14d   :  { %v686_v16 = vsel %vm83_vm1, %v616_v9, 0.0 }
 0x14e   :  { %v687_v17 = vadd.f32 %v686_v16, %v685_v6  ;;  %v16054_v18 = vpop.f32.mrb[58].mxu0 }
 0x14f   :  { %v552_v20 = vsel %vm83_vm1, %v16054_v18, 0.0  ;;  %v617_v24 = vmul.f32 %v16054_v18, %v16054_v18  ;;  %v11924_v25 = vpop.f32.mrb[59].mxu0 }
 0x150   :  { %v553_v27 = vadd.f32 %v552_v20, %v551_v15 }
 0x151   :  { %v688_v28 = vsel %vm83_vm1, %v617_v24, 0.0 }
 0x152   :  { %v689_v30 = vadd.f32 %v688_v28, %v687_v17  ;;  %v16061_v31 = vpop.f32.mrb[60].mxu0 }
 0x153   :  { %v554_v35 = vsel %vm83_vm1, %v16061_v31, 0.0  ;;  %v618_v36 = vmul.f32 %v16061_v31, %v16061_v31  ;;  %v11927_v38 = vpop.f32.mrb[61].mxu0 }
 0x154   :  { %v555_v39 = vadd.f32 %v554_v35, %v553_v27 }
 0x155   :  { %v690_v41 = vsel %vm83_vm1, %v618_v36, 0.0 }
 0x156   :  { %v691_v42 = vadd.f32 %v690_v41, %v689_v30  ;;  %v16068_v44 = vpop.f32.mrb[62].mxu0 }
 0x157   :  { %v556_v46 = vsel %vm83_vm1, %v16068_v44, 0.0  ;;  %v619_v49 = vmul.f32 %v16068_v44, %v16068_v44  ;;  %v11930_v50 = vpop.f32.mrb[63].mxu0 }
 0x158   :  { %v557_v52 = vadd.f32 %v556_v46, %v555_v39 }
 0x159   :  { %v692_v55 = vsel %vm83_vm1, %v619_v49, 0.0 }
 0x15a   :  { %v693_v59 = vadd.f32 %v692_v55, %v691_v42  ;;  %v16075_v61 = vpop.f32.mrb[64].mxu0 }
 0x15b   :  { %v558_v62 = vsel %vm83_vm1, %v16075_v61, 0.0  ;;  %v620_v63 = vmul.f32 %v16075_v61, %v16075_v61  ;;  %v11933_v1 = vpop.f32.mrb[65].mxu0 }
 0x15c   :  { %v559_v6 = vadd.f32 %v558_v62, %v557_v52 }
 0x15d   :  { %v694_v8 = vsel %vm83_vm1, %v620_v63, 0.0 }
 0x15e   :  { %v695_v9 = vadd.f32 %v694_v8, %v693_v59  ;;  %v16082_v11 = vpop.f32.mrb[66].mxu0 }
 0x15f   :  { %v560_v15 = vsel %vm83_vm1, %v16082_v11, 0.0  ;;  %v621_v16 = vmul.f32 %v16082_v11, %v16082_v11  ;;  %v11936_v17 = vpop.f32.mrb[67].mxu0 }
 0x160   :  { %v561_v20 = vadd.f32 %v560_v15, %v559_v6 }
 0x161   :  { %v696_v24 = vsel %vm83_vm1, %v621_v16, 0.0 }
 0x162   :  { %v697_v25 = vadd.f32 %v696_v24, %v695_v9  ;;  %v16089_v27 = vpop.f32.mrb[68].mxu0 }
 0x163   :  { %v562_v28 = vsel %vm83_vm1, %v16089_v27, 0.0  ;;  %v622_v30 = vmul.f32 %v16089_v27, %v16089_v27  ;;  %v11939_v35 = vpop.f32.mrb[69].mxu0 }
 0x164   :  { %v563_v36 = vadd.f32 %v562_v28, %v561_v20 }
 0x165   :  { %v698_v38 = vsel %vm83_vm1, %v622_v30, 0.0 }
 0x166   :  { %v699_v39 = vadd.f32 %v698_v38, %v697_v25  ;;  %v16096_v41 = vpop.f32.mrb[70].mxu0 }
 0x167   :  { %v564_v42 = vsel %vm83_vm1, %v16096_v41, 0.0  ;;  %v623_v46 = vmul.f32 %v16096_v41, %v16096_v41  ;;  %v11942_v49 = vpop.f32.mrb[71].mxu0 }
 0x168   :  { %v565_v50 = vadd.f32 %v564_v42, %v563_v36 }
 0x169   :  { %v700_v52 = vsel %vm83_vm1, %v623_v46, 0.0 }
 0x16a   :  { %v701_v55 = vadd.f32 %v700_v52, %v699_v39  ;;  %v16103_v59 = vpop.f32.mrb[72].mxu0 }
 0x16b   :  { %v566_v62 = vsel %vm83_vm1, %v16103_v59, 0.0  ;;  %v624_v63 = vmul.f32 %v16103_v59, %v16103_v59  ;;  %v11945_v1 = vpop.f32.mrb[73].mxu0 }
 0x16c   :  { %v567_v6 = vadd.f32 %v566_v62, %v565_v50 }
 0x16d   :  { %v702_v8 = vsel %vm83_vm1, %v624_v63, 0.0 }
 0x16e   :  { %v703_v9 = vadd.f32 %v702_v8, %v701_v55  ;;  %v16110_v15 = vpop.f32.mrb[74].mxu0 }
 0x16f   :  { %v568_v16 = vsel %vm83_vm1, %v16110_v15, 0.0  ;;  %v625_v17 = vmul.f32 %v16110_v15, %v16110_v15  ;;  %v11948_v20 = vpop.f32.mrb[75].mxu0 }
 0x170   :  { %v569_v24 = vadd.f32 %v568_v16, %v567_v6 }
 0x171   :  { %v704_v25 = vsel %vm83_vm1, %v625_v17, 0.0 }
 0x172   :  { %v705_v28 = vadd.f32 %v704_v25, %v703_v9  ;;  %v16117_v30 = vpop.f32.mrb[76].mxu0 }
 0x173   :  { %v570_v35 = vsel %vm83_vm1, %v16117_v30, 0.0  ;;  %v626_v36 = vmul.f32 %v16117_v30, %v16117_v30  ;;  %v11951_v38 = vpop.f32.mrb[77].mxu0 }
 0x174   :  { %v571_v39 = vadd.f32 %v570_v35, %v569_v24  ;;  %v630_v24 = vmul.f32 %v15894_v53, %v15894_v53 }
 0x175   :  { %v706_v42 = vsel %vm83_vm1, %v626_v36, 0.0 }
 0x176   :  { %v707_v46 = vadd.f32 %v706_v42, %v705_v28  ;;  %v16124_v49 = vpop.f32.mrb[78].mxu0 }
 0x177   :  { %21849 = vst [vmem:[#allocation2_spill] sm:$0xff] %v16124_v49  ;;  %v572_v50 = vsel %vm83_vm1, %v16124_v49, 0.0  ;;  %v627_v52 = vmul.f32 %v16124_v49, %v16124_v49  ;;  %v11954_v55 = vpop.f32.mrb[79].mxu0 }
 0x178   :  { %v573_v62 = vadd.f32 %v572_v50, %v571_v39  ;;  %v579_v39 = vsel %vm578_vm2, %v15894_v53, 0.0  ;;  %v714_v50 = vsel %vm578_vm2, %v630_v24, 0.0 }
 0x179   :  { %v708_v63 = vsel %vm83_vm1, %v627_v52, 0.0 }
 0x17a   :  { %v709_v1 = vadd.f32 %v708_v63, %v707_v46  ;;  %v16131_v6 = vpop.f32.mrb[80].mxu0 }
 0x17b   :  { %21850 = vst [vmem:[#allocation3_spill] sm:$0xff] %v16131_v6  ;;  %v574_v8 = vsel %vm83_vm1, %v16131_v6, 0.0  ;;  %v628_v9 = vmul.f32 %v16131_v6, %v16131_v6  ;;  %v11957_v16 = vpop.f32.mrb[81].mxu0 }
 0x17c   :  { %v575_v17 = vadd.f32 %v574_v8, %v573_v62 }
 0x17d   :  { %v710_v20 = vsel %vm83_vm1, %v628_v9, 0.0 }
 0x17e   :  { %v16140_v25 = vpop.f32.mrb[82].mxu0  ;;  %v711_v28 = vadd.f32 %v710_v20, %v709_v1 }
 0x17f   :  { %21851 = vst [vmem:[#allocation4_spill] sm:$0xff] %v16140_v25  ;;  %v629_v35 = vmul.f32 %v16140_v25, %v16140_v25  ;;  %v11960_v36 = vpop.f32.mrb[83].mxu0  ;;  %v576_v38 = vsel %vm83_vm1, %v16140_v25, 0.0 }
 0x180   :  { %v577_v42 = vadd.f32 %v576_v38, %v575_v17 }
 0x181   :  { %v712_v46 = vsel %vm83_vm1, %v629_v35, 0.0 }
 0x182   :  { %v580_v52 = vadd.f32 %v579_v39, %v577_v42  ;;  %v713_v55 = vadd.f32 %v712_v46, %v711_v28 }
 0x184   :  { %v581_v62 = vrot.slane %v580_v52, 4  ;;  %v715_v63 = vadd.f32 %v714_v50, %v713_v55 }
 0x186   :  { %v582_v8 = vadd.f32 %v581_v62, %v580_v52  ;;  %v716_v9 = vrot.slane %v715_v63, 4 }
 0x188   :  { %v583_v1 = vrot.slane %v582_v8, 2  ;;  %v717_v16 = vadd.f32 %v716_v9, %v715_v63 }
 0x18a   :  { %v584_v20 = vadd.f32 %v583_v1, %v582_v8  ;;  %v718_v0 = vrot.slane %v717_v16, 2 }
 0x18c   :  { %v585_v36 = vrot.slane %v584_v20, 1  ;;  %v719_v3 = vadd.f32 %v718_v0, %v717_v16 }
 0x18e   :  { %v586_v6 = vadd.f32 %v585_v36, %v584_v20  ;;  %v720_v25 = vrot.slane %v719_v3, 1 }
 0x190   :  { %v16148_v49 = vmul.f32 0.00295858, %v586_v6  ;;  %v721_v17 = vadd.f32 %v720_v25, %v719_v3 }
 0x192   :  { %v722_v38 = vmul.f32 0.00295858, %v721_v17  ;;  %v723_v24 = vmul.f32 %v16148_v49, %v16148_v49  ;;  %v768_v28 = vsub.f32 %v15894_v53, %v16148_v49  ;;  %v726_v35 = vsub.f32 %v15825_v48, %v16148_v49 }
 0x193   :  { %v727_v39 = vsub.f32 %v15829_v51, %v16148_v49  ;;  %v728_v0 = vsub.f32 %v15839_v60, %v16148_v49  ;;  %v729_v6 = vsub.f32 %v15846_v5, %v16148_v49  ;;  %v730_v3 = vsub.f32 %v15853_v12, %v16148_v49 }
 0x194   :  { %v724_v25 = vsub.f32 %v722_v38, %v723_v24  ;;  %v731_v42 = vsub.f32 %v15860_v19, %v16148_v49  ;;  %v732_v53 = vsub.f32 %v15867_v26, %v16148_v49  ;;  %v733_v48 = vsub.f32 %v15874_v33, %v16148_v49 }
 0x195   :  { %v734_v51 = vsub.f32 %v15881_v40, %v16148_v49  ;;  %v735_v60 = vsub.f32 %v15888_v47, %v16148_v49  ;;  %v736_v5 = vsub.f32 %v15897_v58, %v16148_v49  ;;  %v737_v12 = vsub.f32 %v15904_v4, %v16148_v49 }
 0x196   :  { %v725_v46 = vmax.f32 %v724_v25, 0.0  ;;  %v738_v19 = vsub.f32 %v15911_v13, %v16148_v49  ;;  %v739_v26 = vsub.f32 %v15918_v21, %v16148_v49  ;;  %v740_v33 = vsub.f32 %v15925_v29, %v16148_v49 }
 0x197   :  { %v741_v40 = vsub.f32 %v15932_v37, %v16148_v49  ;;  %v742_v47 = vsub.f32 %v15939_v45, %v16148_v49  ;;  %v743_v58 = vsub.f32 %v15946_v56, %v16148_v49  ;;  %v744_v4 = vsub.f32 %v15953_v2, %v16148_v49 }
 0x198   :  { %v769_v50 = vadd.f32 1e-05, %v725_v46  ;;  %v745_v13 = vsub.f32 %v15960_v14, %v16148_v49  ;;  %v746_v21 = vsub.f32 %v15967_v23, %v16148_v49  ;;  %v747_v29 = vsub.f32 %v15974_v32, %v16148_v49 }
 0x199   :  { %v748_v37 = vsub.f32 %v15999_v54, %v16148_v49  ;;  %v749_v45 = vsub.f32 %v16012_v10, %v16148_v49  ;;  %v750_v56 = vsub.f32 %v16019_v22, %v16148_v49  ;;  %v751_v2 = vsub.f32 %v16026_v34, %v16148_v49 }
 0x19a   :  { %15485 = vrsqrt.f32 %v769_v50  ;;  %v752_v14 = vsub.f32 %v16033_v43, %v16148_v49  ;;  %v753_v23 = vsub.f32 %v16040_v57, %v16148_v49  ;;  %v754_v32 = vsub.f32 %v16047_v7, %v16148_v49 }
 0x19b   :  { %v755_v54 = vsub.f32 %v16054_v18, %v16148_v49  ;;  %v756_v10 = vsub.f32 %v16061_v31, %v16148_v49  ;;  %v757_v22 = vsub.f32 %v16068_v44, %v16148_v49  ;;  %v758_v34 = vsub.f32 %v16075_v61, %v16148_v49  ;;  %v21852_v61 = vld [vmem:[#allocation2_spill] sm:$0xff] }
 0x19c   :  { %v759_v43 = vsub.f32 %v16082_v11, %v16148_v49  ;;  %v760_v57 = vsub.f32 %v16089_v27, %v16148_v49  ;;  %v761_v7 = vsub.f32 %v16096_v41, %v16148_v49  ;;  %v762_v18 = vsub.f32 %v16103_v59, %v16148_v49  ;;  %v21853_v11 = vld [vmem:[#allocation3_spill] sm:$0xff]  ;;  %v21854_v27 = vld [vmem:[#allocation4_spill] sm:$0xff]  ;;  %v16241_v41 = vld [vmem:[%s21618_s2] ss:$0 sm:$0xff] }
 0x19d   :  { %v763_v31 = vsub.f32 %v16110_v15, %v16148_v49  ;;  %v764_v44 = vsub.f32 %v16117_v30, %v16148_v49  ;;  %v765_v52 = vsub.f32 %v21852_v61, %v16148_v49  ;;  %v766_v55 = vsub.f32 %v21853_v11, %v16148_v49 }
 0x19e   :  { %v767_v62 = vsub.f32 %v21854_v27, %v16148_v49 }
 0x1a4   :  { %v15486_v63 = vpop.eup %15485 }
 0x1a5   :  { %v813_v59 = vmul.f32 %v15486_v63, %v768_v28  ;;  %v771_v15 = vmul.f32 %v15486_v63, %v726_v35  ;;  %v772_v8 = vmul.f32 %v15486_v63, %v727_v39  ;;  %v773_v9 = vmul.f32 %v15486_v63, %v728_v0 }
 0x1a6   :  { %v774_v30 = vmul.f32 %v15486_v63, %v729_v6  ;;  %v775_v1 = vmul.f32 %v15486_v63, %v730_v3  ;;  %v16243_v16 = vmul.f32 %v15486_v63, %v731_v42  ;;  %v16245_v20 = vmul.f32 %v15486_v63, %v732_v53 }
 0x1a7   :  { %v16248_v36 = vmul.f32 %v16241_v41, %v813_v59  ;;  %v16250_v49 = vmul.f32 %v15486_v63, %v733_v48  ;;  %v16252_v17 = vmul.f32 %v15486_v63, %v734_v51  ;;  %v16254_v38 = vmul.f32 %v15486_v63, %v735_v60 }
 0x1a8   :  { %v16256_v24 = vmul.f32 %v15486_v63, %v736_v5  ;;  %v16258_v28 = vmul.f32 %v15486_v63, %v737_v12  ;;  %v16260_v35 = vmul.f32 %v15486_v63, %v738_v19  ;;  %v16262_v39 = vmul.f32 %v15486_v63, %v739_v26 }
 0x1a9   :  { %v16264_v0 = vmul.f32 %v15486_v63, %v740_v33  ;;  %v16266_v6 = vmul.f32 %v15486_v63, %v741_v40  ;;  %v787_v3 = vmul.f32 %v15486_v63, %v742_v47  ;;  %v788_v25 = vmul.f32 %v15486_v63, %v743_v58 }
 0x1aa   :  { %v789_v42 = vmul.f32 %v15486_v63, %v744_v4  ;;  %v16268_v53 = vmul.f32 %v15486_v63, %v745_v13  ;;  %v16270_v48 = vmul.f32 %v15486_v63, %v746_v21  ;;  %v16272_v51 = vmul.f32 %v15486_v63, %v747_v29 }
 0x1ab   :  { %v16274_v60 = vmul.f32 %v15486_v63, %v748_v37  ;;  %v16276_v5 = vmul.f32 %v15486_v63, %v749_v45  ;;  %v16278_v12 = vmul.f32 %v15486_v63, %v750_v56  ;;  %v16280_v46 = vmul.f32 %v15486_v63, %v751_v2 }
 0x1ac   :  { %v16282_v19 = vmul.f32 %v15486_v63, %v752_v14  ;;  %v16284_v26 = vmul.f32 %v15486_v63, %v753_v23  ;;  %v16286_v33 = vmul.f32 %v15486_v63, %v754_v32  ;;  %v16288_v40 = vmul.f32 %v15486_v63, %v755_v54  ;;  %v16317_v23 = vld [vmem:[%s21619_s3] ss:$0 sm:$0xff]  ;;  %s15494_s3 = smov 96  }
 0x1ad   :  { %v16290_v47 = vmul.f32 %v15486_v63, %v756_v10  ;;  %v16292_v58 = vmul.f32 %v15486_v63, %v757_v22  ;;  %v16294_v4 = vmul.f32 %v15486_v63, %v758_v34  ;;  %v16296_v50 = vmul.f32 %v15486_v63, %v759_v43 }
 0x1ae   :  { %v16298_v13 = vmul.f32 %v15486_v63, %v760_v57  ;;  %v16300_v21 = vmul.f32 %v15486_v63, %v761_v7  ;;  %v16302_v29 = vmul.f32 %v15486_v63, %v762_v18  ;;  %v16304_v37 = vmul.f32 %v15486_v63, %v763_v31 }
 0x1af   :  { %v16306_v45 = vmul.f32 %v15486_v63, %v764_v44  ;;  %v16308_v56 = vmul.f32 %v15486_v63, %v765_v52  ;;  %v16310_v2 = vmul.f32 %v15486_v63, %v766_v55  ;;  %v16312_v14 = vmul.f32 %v15486_v63, %v767_v62 }
 0x1b0   :  { %v820_v32 = vmul.f32 %v16241_v41, %v771_v15  ;;  %v821_v54 = vmul.f32 %v16241_v41, %v772_v8  ;;  %v822_v34 = vmul.f32 %v16241_v41, %v773_v9  ;;  %v823_v31 = vmul.f32 %v16241_v41, %v774_v30 }
 0x1b1   :  { %v21855_v44 = vmov 0.0   ;;  %v824_v61 = vmul.f32 %v16241_v41, %v775_v1  ;;  %v825_v62 = vmul.f32 %v16241_v41, %v16243_v16  ;;  %v836_v15 = vmul.f32 %v16241_v41, %v787_v3 }
 0x1b2   :  { %v869_v10 = vadd.f32 %v16317_v23, %v820_v32  ;;  %v870_v22 = vadd.f32 %v16317_v23, %v821_v54  ;;  %v871_v18 = vadd.f32 %v16317_v23, %v822_v34  ;;  %v872_v55 = vadd.f32 %v16317_v23, %v823_v31 }
 0x1b3   :  { %v873_v27 = vadd.f32 %v16317_v23, %v824_v61  ;;  %v837_v8 = vmul.f32 %v16241_v41, %v788_v25  ;;  %v826_v9 = vmul.f32 %v16241_v41, %v16245_v20  ;;  %v16346_v30 = vadd.f32 %v16317_v23, %v836_v15 }
 0x1b4   :  { %v912_v43 = vmul.f32 0.2, %v869_v10  ;;  %v913_v7 = vmul.f32 0.2, %v870_v22  ;;  %v914_v11 = vmul.f32 0.2, %v871_v18  ;;  %v874_v16 = vadd.f32 %v16317_v23, %v825_v62 }
 0x1b5   :  { %v915_v59 = vmul.f32 0.2, %v872_v55  ;;  %v16349_v1 = vadd.f32 %v16317_v23, %v837_v8  ;;  %v838_v3 = vmul.f32 %v16241_v41, %v789_v42  ;;  %v916_v32 = vmul.f32 0.2, %v873_v27 }
 0x1b6   :  { %v955_v57 = vmax.f32 %v869_v10, %v912_v43  ;;  %v956_v52 = vmax.f32 %v870_v22, %v913_v7  ;;  %v957_v63 = vmax.f32 %v871_v18, %v914_v11  ;;  %v839_v54 = vmul.f32 %v16241_v41, %v16268_v53 }
 0x1b7   :  { %v958_v25 = vmax.f32 %v872_v55, %v915_v59  ;;  %v16358_v20 = vadd.f32 %v16317_v23, %v838_v3  ;;  %v840_v10 = vmul.f32 %v16241_v41, %v16270_v48  ;;  %v841_v22 = vmul.f32 %v16241_v41, %v16272_v51 }
 0x1b8   :  { %9887 = vmatmul.mubr.msk.f32.vlgmr.msra.gmra.mrb[2].mxu1 %vm83_vm1, %v955_v57  ;;  %9930 = vmatmul.mubr.msk.f32.vlgmr.msra.gmra.mrb[84].mxu0 %vm83_vm1, %v955_v57  ;;  %v842_v34 = vmul.f32 %v16241_v41, %v16274_v60  ;;  %v875_v42 = vadd.f32 %v16317_v23, %v826_v9  ;;  %v827_v53 = vmul.f32 %v16241_v41, %v16250_v49  ;;  %v917_v48 = vmul.f32 0.2, %v874_v16 }
 0x1b9   :  { %1205 = vmatprep.mubr.f32.mxu1 %v21855_v44  ;;  %1528 = vmatprep.mubr.f32.mxu0 %v21855_v44  ;;  %v16372_v43 = vadd.f32 %v16317_v23, %v839_v54  ;;  %v16377_v51 = vadd.f32 %v16317_v23, %v840_v10  ;;  %v16380_v60 = vadd.f32 %v16317_v23, %v841_v22 }
 0x1ba   :  { %v16383_v57 = vadd.f32 %v16317_v23, %v842_v34  ;;  %v959_v7 = vmax.f32 %v873_v27, %v916_v32  ;;  %v843_v49 = vmul.f32 %v16241_v41, %v16276_v5  ;;  %v844_v18 = vmul.f32 %v16241_v41, %v16278_v12 }
 0x1bb   :  { %v845_v31 = vmul.f32 %v16241_v41, %v16280_v46  ;;  %v876_v5 = vadd.f32 %v16317_v23, %v827_v53  ;;  %v828_v12 = vmul.f32 %v16241_v41, %v16252_v17  ;;  %v960_v46 = vmax.f32 %v874_v16, %v917_v48 }
 0x1bc   :  { %9888 = vmatmul.mubr.msk.f32.gmra.mrb[4].mxu1 %vm83_vm1, %v956_v52  ;;  %9931 = vmatmul.mubr.msk.f32.gmra.mrb[86].mxu0 %vm83_vm1, %v956_v52  ;;  %v16394_v61 = vadd.f32 %v16317_v23, %v843_v49  ;;  %v16397_v52 = vadd.f32 %v16317_v23, %v844_v18  ;;  %v918_v11 = vmul.f32 0.2, %v875_v42  ;;  %v846_v27 = vmul.f32 %v16241_v41, %v16282_v19 }
 0x1bd   :  { %1211 = vmatprep.mubr.f32.mxu1 %v21855_v44  ;;  %1534 = vmatprep.mubr.f32.mxu0 %v21855_v44  ;;  %v16405_v55 = vadd.f32 %v16317_v23, %v845_v31  ;;  %v847_v62 = vmul.f32 %v16241_v41, %v16284_v26  ;;  %v849_v59 = vmul.f32 %v16241_v41, %v16288_v40  ;;  %v919_v26 = vmul.f32 0.2, %v876_v5 }
 0x1be   :  { %v850_v17 = vmul.f32 %v16241_v41, %v16290_v47  ;;  %v829_v15 = vmul.f32 %v16241_v41, %v16254_v38  ;;  %v16422_v19 = vadd.f32 %v16317_v23, %v846_v27  ;;  %v961_v8 = vmax.f32 %v875_v42, %v918_v11 }
 0x1bf   :  { %v16433_v47 = vadd.f32 %v16317_v23, %v849_v59  ;;  %v877_v38 = vadd.f32 %v16317_v23, %v828_v12  ;;  %v851_v16 = vmul.f32 %v16241_v41, %v16292_v58  ;;  %v852_v3 = vmul.f32 %v16241_v41, %v16294_v4 }
 0x1c0   :  { %9889 = vmatmul.mubr.msk.f32.gmra.mrb[6].mxu1 %vm83_vm1, %v957_v63  ;;  %9932 = vmatmul.mubr.msk.f32.gmra.mrb[88].mxu0 %vm83_vm1, %v957_v63  ;;  %v848_v63 = vmul.f32 %v16241_v41, %v16286_v33  ;;  %v16427_v33 = vadd.f32 %v16317_v23, %v847_v62  ;;  %v16437_v9 = vadd.f32 %v16317_v23, %v850_v17 }
 0x1c1   :  { %1217 = vmatprep.mubr.f32.mxu1 %v21855_v44  ;;  %1540 = vmatprep.mubr.f32.mxu0 %v21855_v44  ;;  %v853_v32 = vmul.f32 %v16241_v41, %v16296_v50  ;;  %v962_v54 = vmax.f32 %v876_v5, %v919_v26  ;;  %v878_v58 = vadd.f32 %v16317_v23, %v829_v15  ;;  %v920_v10 = vmul.f32 0.2, %v877_v38 }
 0x1c2   :  { %v16430_v40 = vadd.f32 %v16317_v23, %v848_v63  ;;  %v830_v4 = vmul.f32 %v16241_v41, %v16256_v24  ;;  %v16456_v22 = vadd.f32 %v16317_v23, %v852_v3  ;;  %v854_v50 = vmul.f32 %v16241_v41, %v16298_v13 }
 0x1c3   :  { %v16459_v34 = vadd.f32 %v16317_v23, %v853_v32  ;;  %v855_v42 = vmul.f32 %v16241_v41, %v16300_v21  ;;  %v856_v53 = vmul.f32 %v16241_v41, %v16302_v29  ;;  %v857_v48 = vmul.f32 %v16241_v41, %v16304_v37 }
 0x1c4   :  { %9890 = vmatmul.mubr.msk.f32.gmra.mrb[8].mxu1 %vm83_vm1, %v958_v25  ;;  %9933 = vmatmul.mubr.msk.f32.gmra.mrb[90].mxu0 %vm83_vm1, %v958_v25  ;;  %v16446_v25 = vadd.f32 %v16317_v23, %v851_v16  ;;  %v831_v24 = vmul.f32 %v16241_v41, %v16258_v28  ;;  %v921_v13 = vmul.f32 0.2, %v878_v58  ;;  %v16478_v21 = vadd.f32 %v16317_v23, %v854_v50 }
 0x1c5   :  { %1223 = vmatprep.mubr.f32.mxu1 %v21855_v44  ;;  %1546 = vmatprep.mubr.f32.mxu0 %v21855_v44  ;;  %v16481_v29 = vadd.f32 %v16317_v23, %v855_v42  ;;  %v16484_v37 = vadd.f32 %v16317_v23, %v856_v53  ;;  %v963_v49 = vmax.f32 %v877_v38, %v920_v10  ;;  %v929_v50 = vmul.f32 0.2, %v16349_v1 }
 0x1c6   :  { %v879_v28 = vadd.f32 %v16317_v23, %v830_v4  ;;  %v16488_v18 = vadd.f32 %v16317_v23, %v857_v48  ;;  %v859_v31 = vmul.f32 %v16241_v41, %v16308_v56  ;;  %v860_v5 = vmul.f32 %v16241_v41, %v16310_v2 }
 0x1c7   :  { %v861_v12 = vmul.f32 %v16241_v41, %v16312_v14  ;;  %v832_v11 = vmul.f32 %v16241_v41, %v16260_v35  ;;  %v964_v56 = vmax.f32 %v878_v58, %v921_v13  ;;  %v16517_v14 = vadd.f32 %v16317_v23, %v16248_v36 }
 0x1c8   :  { %9891 = vmatmul.mubr.msk.f32.gmra.mrb[10].mxu1 %vm83_vm1, %v959_v7  ;;  %9934 = vmatmul.mubr.msk.f32.gmra.mrb[92].mxu0 %vm83_vm1, %v959_v7  ;;  %v858_v7 = vmul.f32 %v16241_v41, %v16306_v45  ;;  %v922_v27 = vmul.f32 0.2, %v879_v28  ;;  %v16507_v62 = vadd.f32 %v16317_v23, %v859_v31  ;;  %v16510_v63 = vadd.f32 %v16317_v23, %v860_v5 }
 0x1c9   :  { %1229 = vmatprep.mubr.f32.mxu1 %v21855_v44  ;;  %1552 = vmatprep.mubr.f32.mxu0 %v21855_v44  ;;  %v16513_v2 = vadd.f32 %v16317_v23, %v861_v12  ;;  %v881_v17 = vadd.f32 %v16317_v23, %v832_v11  ;;  %v833_v15 = vmul.f32 %v16241_v41, %v16262_v39  ;;  %v930_v53 = vmul.f32 0.2, %v16358_v20 }
 0x1ca   :  { %v16491_v45 = vadd.f32 %v16317_v23, %v858_v7  ;;  %v965_v35 = vmax.f32 %v879_v28, %v922_v27  ;;  %v834_v38 = vmul.f32 %v16241_v41, %v16264_v0  ;;  %v835_v32 = vmul.f32 %v16241_v41, %v16266_v6 }
 0x1cb   :  { %v924_v26 = vmul.f32 0.2, %v881_v17  ;;  %v972_v42 = vmax.f32 %v16349_v1, %v929_v50  ;;  %v931_v48 = vmul.f32 0.2, %v16372_v43  ;;  %v933_v7 = vmul.f32 0.2, %v16380_v60 }
 0x1cc   :  { %9892 = vmatmul.mubr.msk.f32.gmra.mrb[12].mxu1 %vm83_vm1, %v960_v46  ;;  %9935 = vmatmul.mubr.msk.f32.gmra.mrb[94].mxu0 %vm83_vm1, %v960_v46  ;;  %v880_v46 = vadd.f32 %v16317_v23, %v831_v24  ;;  %v883_v3 = vadd.f32 %v16317_v23, %v834_v38  ;;  %v884_v58 = vadd.f32 %v16317_v23, %v835_v32  ;;  %v932_v24 = vmul.f32 0.2, %v16377_v51 }
 0x1cd   :  { %1235 = vmatprep.mubr.f32.mxu1 %v21855_v44  ;;  %1558 = vmatprep.mubr.f32.mxu0 %v21855_v44  ;;  %v967_v39 = vmax.f32 %v881_v17, %v924_v26  ;;  %v974_v1 = vmax.f32 %v16372_v43, %v931_v48  ;;  %v976_v43 = vmax.f32 %v16380_v60, %v933_v7  ;;  %v934_v13 = vmul.f32 0.2, %v16383_v57 }
 0x1ce   :  { %v923_v59 = vmul.f32 0.2, %v880_v46  ;;  %v927_v6 = vmul.f32 0.2, %v884_v58  ;;  %v936_v28 = vmul.f32 0.2, %v16397_v52 }
 0x1cf   :  { %v937_v31 = vmul.f32 0.2, %v16405_v55  ;;  %v938_v5 = vmul.f32 0.2, %v16422_v19  ;;  %v939_v12 = vmul.f32 0.2, %v16427_v33 }
 0x1d0   :  { %9893 = vmatmul.mubr.msk.f32.gmra.mrb[14].mxu1 %vm83_vm1, %v961_v8  ;;  %9936 = vmatmul.mubr.msk.f32.gmra.mrb[96].mxu0 %vm83_vm1, %v961_v8  ;;  %v966_v36 = vmax.f32 %v880_v46, %v923_v59  ;;  %v882_v8 = vadd.f32 %v16317_v23, %v833_v15  ;;  %v970_v10 = vmax.f32 %v884_v58, %v927_v6  ;;  %v928_v23 = vmul.f32 0.2, %v16346_v30 }
 0x1d1   :  { %1241 = vmatprep.mubr.f32.mxu1 %v21855_v44  ;;  %1564 = vmatprep.mubr.f32.mxu0 %v21855_v44  ;;  %v940_v46 = vmul.f32 0.2, %v16430_v40  ;;  %v941_v11 = vmul.f32 0.2, %v16433_v47  ;;  %v943_v27 = vmul.f32 0.2, %v16446_v25 }
 0x1d2   :  { %v925_v16 = vmul.f32 0.2, %v882_v8  ;;  %v971_v4 = vmax.f32 %v16346_v30, %v928_v23  ;;  %v973_v30 = vmax.f32 %v16358_v20, %v930_v53  ;;  %v975_v20 = vmax.f32 %v16377_v51, %v932_v24 }
 0x1d3   :  { %v977_v51 = vmax.f32 %v16383_v57, %v934_v13  ;;  %v979_v57 = vmax.f32 %v16397_v52, %v936_v28  ;;  %v981_v52 = vmax.f32 %v16422_v19, %v938_v5  ;;  %v983_v19 = vmax.f32 %v16430_v40, %v940_v46 }
 0x1d4   :  { %9894 = vmatmul.mubr.msk.f32.gmra.mrb[16].mxu1 %vm83_vm1, %v962_v54  ;;  %9937 = vmatmul.mubr.msk.f32.gmra.mrb[98].mxu0 %vm83_vm1, %v962_v54  ;;  %v968_v0 = vmax.f32 %v882_v8, %v925_v16  ;;  %v926_v54 = vmul.f32 0.2, %v883_v3  ;;  %v945_v59 = vmul.f32 0.2, %v16459_v34  ;;  %v946_v17 = vmul.f32 0.2, %v16478_v21 }
 0x1d5   :  { %1247 = vmatprep.mubr.f32.mxu1 %v21855_v44  ;;  %1570 = vmatprep.mubr.f32.mxu0 %v21855_v44  ;;  %v947_v15 = vmul.f32 0.2, %v16481_v29  ;;  %v949_v26 = vmul.f32 0.2, %v16488_v18  ;;  %v950_v8 = vmul.f32 0.2, %v16491_v45 }
 0x1d6   :  { %v969_v41 = vmax.f32 %v883_v3, %v926_v54  ;;  %v951_v38 = vmul.f32 0.2, %v16507_v62  ;;  %v953_v16 = vmul.f32 0.2, %v16513_v2  ;;  %v954_v3 = vmul.f32 0.2, %v16517_v14 }
 0x1d8   :  { %9895 = vmatmul.mubr.msk.f32.gmra.mrb[18].mxu1 %vm83_vm1, %v963_v49  ;;  %9938 = vmatmul.mubr.msk.f32.gmra.mrb[100].mxu0 %vm83_vm1, %v963_v49  ;;  %v935_v49 = vmul.f32 0.2, %v16394_v61 }
 0x1d9   :  { %1253 = vmatprep.mubr.f32.mxu1 %v21855_v44  ;;  %1576 = vmatprep.mubr.f32.mxu0 %v21855_v44 }
 0x1da   :  { %v978_v60 = vmax.f32 %v16394_v61, %v935_v49  ;;  %v980_v61 = vmax.f32 %v16405_v55, %v937_v31  ;;  %v982_v55 = vmax.f32 %v16427_v33, %v939_v12  ;;  %v984_v33 = vmax.f32 %v16433_v47, %v941_v11 }
 0x1db   :  { %v986_v47 = vmax.f32 %v16446_v25, %v943_v27  ;;  %v988_v25 = vmax.f32 %v16459_v34, %v945_v59  ;;  %v990_v34 = vmax.f32 %v16481_v29, %v947_v15  ;;  %v992_v29 = vmax.f32 %v16488_v18, %v949_v26 }
 0x1dc   :  { %9896 = vmatmul.mubr.msk.f32.gmra.mrb[20].mxu1 %vm83_vm1, %v964_v56  ;;  %9939 = vmatmul.mubr.msk.f32.gmra.mrb[102].mxu0 %vm83_vm1, %v964_v56  ;;  %v942_v56 = vmul.f32 0.2, %v16437_v9  ;;  %v994_v18 = vmax.f32 %v16507_v62, %v951_v38  ;;  %v996_v62 = vmax.f32 %v16513_v2, %v953_v16 }
 0x1dd   :  { %1259 = vmatprep.mubr.f32.mxu1 %v21855_v44  ;;  %1582 = vmatprep.mubr.f32.mxu0 %v21855_v44 }
 0x1de   :  { %v985_v40 = vmax.f32 %v16437_v9, %v942_v56 }
 0x1e0   :  { %9897 = vmatmul.mubr.msk.f32.gmra.mrb[22].mxu1 %vm83_vm1, %v965_v35  ;;  %9940 = vmatmul.mubr.msk.f32.gmra.mrb[104].mxu0 %vm83_vm1, %v965_v35  ;;  %v944_v35 = vmul.f32 0.2, %v16456_v22 }
 0x1e1   :  { %1265 = vmatprep.mubr.f32.mxu1 %v21855_v44  ;;  %1588 = vmatprep.mubr.f32.mxu0 %v21855_v44 }
 0x1e2   :  { %v987_v9 = vmax.f32 %v16456_v22, %v944_v35  ;;  %v989_v22 = vmax.f32 %v16478_v21, %v946_v17 }
 0x1e4   :  { %9898 = vmatmul.mubr.msk.f32.gmra.mrb[24].mxu1 %vm83_vm1, %v966_v36  ;;  %9941 = vmatmul.mubr.msk.f32.gmra.mrb[106].mxu0 %vm83_vm1, %v966_v36  ;;  %v948_v36 = vmul.f32 0.2, %v16484_v37 }
 0x1e5   :  { %1271 = vmatprep.mubr.f32.mxu1 %v21855_v44  ;;  %1594 = vmatprep.mubr.f32.mxu0 %v21855_v44 }
 0x1e6   :  { %v991_v21 = vmax.f32 %v16484_v37, %v948_v36  ;;  %v993_v37 = vmax.f32 %v16491_v45, %v950_v8 }
 0x1e8   :  { %9899 = vmatmul.mubr.msk.f32.gmra.mrb[26].mxu1 %vm83_vm1, %v967_v39  ;;  %9942 = vmatmul.mubr.msk.f32.gmra.mrb[108].mxu0 %vm83_vm1, %v967_v39  ;;  %v952_v39 = vmul.f32 0.2, %v16510_v63 }
 0x1e9   :  { %1277 = vmatprep.mubr.f32.mxu1 %v21855_v44  ;;  %1600 = vmatprep.mubr.f32.mxu0 %v21855_v44 }
 0x1ea   :  { %v995_v45 = vmax.f32 %v16510_v63, %v952_v39  ;;  %v997_v63 = vmax.f32 %v16517_v14, %v954_v3 }
 0x1ec   :  { %9900 = vmatmul.mubr.msk.f32.gmra.mrb[28].mxu1 %vm83_vm1, %v968_v0  ;;  %9943 = vmatmul.mubr.msk.f32.gmra.mrb[110].mxu0 %vm83_vm1, %v968_v0 }
 0x1ed   :  { %1283 = vmatprep.mubr.f32.mxu1 %v21855_v44  ;;  %1606 = vmatprep.mubr.f32.mxu0 %v21855_v44 }
 0x1f0   :  { %9901 = vmatmul.mubr.msk.f32.gmra.mrb[30].mxu1 %vm83_vm1, %v969_v41  ;;  %9944 = vmatmul.mubr.msk.f32.gmra.mrb[112].mxu0 %vm83_vm1, %v969_v41 }
 0x1f1   :  { %1289 = vmatprep.mubr.f32.mxu1 %v21855_v44  ;;  %1612 = vmatprep.mubr.f32.mxu0 %v21855_v44 }
 0x1f4   :  { %9902 = vmatmul.mubr.msk.f32.gmra.mrb[32].mxu1 %vm83_vm1, %v970_v10  ;;  %9945 = vmatmul.mubr.msk.f32.gmra.mrb[114].mxu0 %vm83_vm1, %v970_v10 }
 0x1f5   :  { %1295 = vmatprep.mubr.f32.mxu1 %v21855_v44  ;;  %1618 = vmatprep.mubr.f32.mxu0 %v21855_v44 }
 0x1f8   :  { %9903 = vmatmul.mubr.msk.f32.gmra.mrb[34].mxu1 %vm83_vm1, %v971_v4  ;;  %9946 = vmatmul.mubr.msk.f32.gmra.mrb[116].mxu0 %vm83_vm1, %v971_v4 }
 0x1f9   :  { %1301 = vmatprep.mubr.f32.mxu1 %v21855_v44  ;;  %1624 = vmatprep.mubr.f32.mxu0 %v21855_v44 }
 0x1fc   :  { %9904 = vmatmul.mubr.msk.f32.gmra.mrb[36].mxu1 %vm83_vm1, %v972_v42  ;;  %9947 = vmatmul.mubr.msk.f32.gmra.mrb[118].mxu0 %vm83_vm1, %v972_v42 }
 0x1fd   :  { %1307 = vmatprep.mubr.f32.mxu1 %v21855_v44  ;;  %1630 = vmatprep.mubr.f32.mxu0 %v21855_v44 }
 0x200   :  { %9905 = vmatmul.mubr.msk.f32.gmra.mrb[38].mxu1 %vm83_vm1, %v973_v30  ;;  %9948 = vmatmul.mubr.msk.f32.gmra.mrb[120].mxu0 %vm83_vm1, %v973_v30 }
 0x201   :  { %1313 = vmatprep.mubr.f32.mxu1 %v21855_v44  ;;  %1636 = vmatprep.mubr.f32.mxu0 %v21855_v44 }
 0x204   :  { %9906 = vmatmul.mubr.msk.f32.gmra.mrb[40].mxu1 %vm83_vm1, %v974_v1  ;;  %9949 = vmatmul.mubr.msk.f32.gmra.mrb[122].mxu0 %vm83_vm1, %v974_v1 }
 0x205   :  { %1319 = vmatprep.mubr.f32.mxu1 %v21855_v44  ;;  %1642 = vmatprep.mubr.f32.mxu0 %v21855_v44 }
 0x208   :  { %9907 = vmatmul.mubr.msk.f32.gmra.mrb[42].mxu1 %vm83_vm1, %v975_v20  ;;  %9950 = vmatmul.mubr.msk.f32.gmra.mrb[124].mxu0 %vm83_vm1, %v975_v20 }
 0x209   :  { %1325 = vmatprep.mubr.f32.mxu1 %v21855_v44  ;;  %1648 = vmatprep.mubr.f32.mxu0 %v21855_v44 }
 0x20c   :  { %9908 = vmatmul.mubr.msk.f32.gmra.mrb[44].mxu1 %vm83_vm1, %v976_v43  ;;  %9951 = vmatmul.mubr.msk.f32.gmra.mrb[126].mxu0 %vm83_vm1, %v976_v43 }
 0x20d   :  { %1331 = vmatprep.mubr.f32.mxu1 %v21855_v44  ;;  %1654 = vmatprep.mubr.f32.mxu0 %v21855_v44 }
 0x210   :  { %9909 = vmatmul.mubr.msk.f32.gmra.mrb[46].mxu1 %vm83_vm1, %v977_v51  ;;  %9952 = vmatmul.mubr.msk.f32.gmra.mrb[128].mxu0 %vm83_vm1, %v977_v51 }
 0x211   :  { %1337 = vmatprep.mubr.f32.mxu1 %v21855_v44  ;;  %1660 = vmatprep.mubr.f32.mxu0 %v21855_v44 }
 0x214   :  { %9910 = vmatmul.mubr.msk.f32.gmra.mrb[48].mxu1 %vm83_vm1, %v978_v60  ;;  %9953 = vmatmul.mubr.msk.f32.gmra.mrb[130].mxu0 %vm83_vm1, %v978_v60 }
 0x215   :  { %1343 = vmatprep.mubr.f32.mxu1 %v21855_v44  ;;  %1666 = vmatprep.mubr.f32.mxu0 %v21855_v44 }
 0x218   :  { %9911 = vmatmul.mubr.msk.f32.gmra.mrb[50].mxu1 %vm83_vm1, %v979_v57  ;;  %9954 = vmatmul.mubr.msk.f32.gmra.mrb[132].mxu0 %vm83_vm1, %v979_v57 }
 0x219   :  { %1349 = vmatprep.mubr.f32.mxu1 %v21855_v44  ;;  %1672 = vmatprep.mubr.f32.mxu0 %v21855_v44 }
 0x21c   :  { %9912 = vmatmul.mubr.msk.f32.gmra.mrb[52].mxu1 %vm83_vm1, %v980_v61  ;;  %9955 = vmatmul.mubr.msk.f32.gmra.mrb[134].mxu0 %vm83_vm1, %v980_v61 }
 0x21d   :  { %1355 = vmatprep.mubr.f32.mxu1 %v21855_v44  ;;  %1678 = vmatprep.mubr.f32.mxu0 %v21855_v44 }
 0x220   :  { %9913 = vmatmul.mubr.msk.f32.gmra.mrb[54].mxu1 %vm83_vm1, %v981_v52  ;;  %9956 = vmatmul.mubr.msk.f32.gmra.mrb[136].mxu0 %vm83_vm1, %v981_v52 }
 0x221   :  { %1361 = vmatprep.mubr.f32.mxu1 %v21855_v44  ;;  %1684 = vmatprep.mubr.f32.mxu0 %v21855_v44 }
 0x224   :  { %9914 = vmatmul.mubr.msk.f32.gmra.mrb[56].mxu1 %vm83_vm1, %v982_v55  ;;  %9957 = vmatmul.mubr.msk.f32.gmra.mrb[138].mxu0 %vm83_vm1, %v982_v55 }
 0x225   :  { %1367 = vmatprep.mubr.f32.mxu1 %v21855_v44  ;;  %1690 = vmatprep.mubr.f32.mxu0 %v21855_v44 }
 0x228   :  { %9915 = vmatmul.mubr.msk.f32.gmra.mrb[58].mxu1 %vm83_vm1, %v983_v19  ;;  %9958 = vmatmul.mubr.msk.f32.gmra.mrb[140].mxu0 %vm83_vm1, %v983_v19 }
 0x229   :  { %1373 = vmatprep.mubr.f32.mxu1 %v21855_v44  ;;  %1696 = vmatprep.mubr.f32.mxu0 %v21855_v44 }
 0x22c   :  { %9916 = vmatmul.mubr.msk.f32.gmra.mrb[60].mxu1 %vm83_vm1, %v984_v33  ;;  %9959 = vmatmul.mubr.msk.f32.gmra.mrb[142].mxu0 %vm83_vm1, %v984_v33 }
 0x22d   :  { %1379 = vmatprep.mubr.f32.mxu1 %v21855_v44  ;;  %1702 = vmatprep.mubr.f32.mxu0 %v21855_v44 }
 0x230   :  { %9917 = vmatmul.mubr.msk.f32.gmra.mrb[62].mxu1 %vm83_vm1, %v985_v40  ;;  %9960 = vmatmul.mubr.msk.f32.gmra.mrb[144].mxu0 %vm83_vm1, %v985_v40 }
 0x231   :  { %1385 = vmatprep.mubr.f32.mxu1 %v21855_v44  ;;  %1708 = vmatprep.mubr.f32.mxu0 %v21855_v44 }
 0x234   :  { %9918 = vmatmul.mubr.msk.f32.gmra.mrb[64].mxu1 %vm83_vm1, %v986_v47  ;;  %9961 = vmatmul.mubr.msk.f32.gmra.mrb[146].mxu0 %vm83_vm1, %v986_v47 }
 0x235   :  { %1391 = vmatprep.mubr.f32.mxu1 %v21855_v44  ;;  %1714 = vmatprep.mubr.f32.mxu0 %v21855_v44 }
 0x238   :  { %9919 = vmatmul.mubr.msk.f32.gmra.mrb[66].mxu1 %vm83_vm1, %v987_v9  ;;  %9962 = vmatmul.mubr.msk.f32.gmra.mrb[148].mxu0 %vm83_vm1, %v987_v9 }
 0x239   :  { %1397 = vmatprep.mubr.f32.mxu1 %v21855_v44  ;;  %1720 = vmatprep.mubr.f32.mxu0 %v21855_v44 }
 0x23c   :  { %9920 = vmatmul.mubr.msk.f32.gmra.mrb[68].mxu1 %vm83_vm1, %v988_v25  ;;  %9963 = vmatmul.mubr.msk.f32.gmra.mrb[150].mxu0 %vm83_vm1, %v988_v25 }
 0x23d   :  { %1403 = vmatprep.mubr.f32.mxu1 %v21855_v44  ;;  %1726 = vmatprep.mubr.f32.mxu0 %v21855_v44 }
 0x240   :  { %9921 = vmatmul.mubr.msk.f32.gmra.mrb[70].mxu1 %vm83_vm1, %v989_v22  ;;  %9964 = vmatmul.mubr.msk.f32.gmra.mrb[152].mxu0 %vm83_vm1, %v989_v22 }
 0x241   :  { %1409 = vmatprep.mubr.f32.mxu1 %v21855_v44  ;;  %1732 = vmatprep.mubr.f32.mxu0 %v21855_v44 }
 0x244   :  { %9922 = vmatmul.mubr.msk.f32.gmra.mrb[72].mxu1 %vm83_vm1, %v990_v34  ;;  %9965 = vmatmul.mubr.msk.f32.gmra.mrb[154].mxu0 %vm83_vm1, %v990_v34 }
 0x245   :  { %1415 = vmatprep.mubr.f32.mxu1 %v21855_v44  ;;  %1738 = vmatprep.mubr.f32.mxu0 %v21855_v44 }
 0x248   :  { %9923 = vmatmul.mubr.msk.f32.gmra.mrb[74].mxu1 %vm83_vm1, %v991_v21  ;;  %9966 = vmatmul.mubr.msk.f32.gmra.mrb[156].mxu0 %vm83_vm1, %v991_v21 }
 0x249   :  { %1421 = vmatprep.mubr.f32.mxu1 %v21855_v44  ;;  %1744 = vmatprep.mubr.f32.mxu0 %v21855_v44 }
 0x24c   :  { %9924 = vmatmul.mubr.msk.f32.gmra.mrb[76].mxu1 %vm83_vm1, %v992_v29  ;;  %9967 = vmatmul.mubr.msk.f32.gmra.mrb[158].mxu0 %vm83_vm1, %v992_v29 }
 0x24d   :  { %1427 = vmatprep.mubr.f32.mxu1 %v21855_v44  ;;  %1750 = vmatprep.mubr.f32.mxu0 %v21855_v44 }
 0x250   :  { %9925 = vmatmul.mubr.msk.f32.gmra.mrb[78].mxu1 %vm83_vm1, %v993_v37  ;;  %9968 = vmatmul.mubr.msk.f32.gmra.mrb[160].mxu0 %vm83_vm1, %v993_v37 }
 0x251   :  { %1433 = vmatprep.mubr.f32.mxu1 %v21855_v44  ;;  %1756 = vmatprep.mubr.f32.mxu0 %v21855_v44 }
 0x254   :  { %9926 = vmatmul.mubr.msk.f32.gmra.mrb[80].mxu1 %vm83_vm1, %v994_v18  ;;  %9969 = vmatmul.mubr.msk.f32.gmra.mrb[162].mxu0 %vm83_vm1, %v994_v18 }
 0x255   :  { %1439 = vmatprep.mubr.f32.mxu1 %v21855_v44  ;;  %1762 = vmatprep.mubr.f32.mxu0 %v21855_v44 }
 0x258   :  { %9927 = vmatmul.mubr.msk.f32.gmra.mrb[82].mxu1 %vm83_vm1, %v995_v45  ;;  %9970 = vmatmul.mubr.msk.f32.gmra.mrb[164].mxu0 %vm83_vm1, %v995_v45 }
 0x259   :  { %1445 = vmatprep.mubr.f32.mxu1 %v21855_v44  ;;  %1768 = vmatprep.mubr.f32.mxu0 %v21855_v44 }
 0x25c   :  { %9928 = vmatmul.mubr.msk.f32.gmra.mrb[84].mxu1 %vm83_vm1, %v996_v62  ;;  %9971 = vmatmul.mubr.msk.f32.gmra.mrb[166].mxu0 %vm83_vm1, %v996_v62 }
 0x25d   :  { %1451 = vmatprep.mubr.f32.mxu1 %v21855_v44  ;;  %1774 = vmatprep.mubr.f32.mxu0 %v21855_v44 }
 0x260   :  { %9929 = vmatmul.mubr.msk.f32.gmra.mrb[86].mxu1 %vm83_vm1, %v997_v63  ;;  %9972 = vmatmul.mubr.msk.f32.gmra.mrb[168].mxu0 %vm83_vm1, %v997_v63 }
 0x28b   :  { %v16717_v32 = vpop.f32.mrb[2].mxu1  ;;  %v16719_v0 = vpop.f32.mrb[84].mxu0 }
 0x28c   :  { %21856 = vst [vmem:[#allocation2_spill] sm:$0xff] %v16719_v0  ;;  %v16721_v2 = vpop.f32.mrb[3].mxu1  ;;  %v16723_v54 = vpop.f32.mrb[85].mxu0 }
 0x28d   :  { %21857 = vst [vmem:[#allocation3_spill] sm:$0xff] %v16721_v2  ;;  %21858 = vst [vmem:[#allocation4_spill] sm:$0xff] %v16723_v54 }
 0x28f   :  { %v16725_v58 = vpop.f32.mrb[4].mxu1  ;;  %v16727_v41 = vpop.f32.mrb[86].mxu0 }
 0x290   :  { %21859 = vst [vmem:[#allocation5_spill] sm:$0xff] %v16727_v41  ;;  %v16731_v14 = vpop.f32.mrb[5].mxu1  ;;  %v16733_v10 = vpop.f32.mrb[87].mxu0  ;;  %v16737_v23 = vpack.i.bf16 %v16725_v58, %v16717_v32  ;;  %v16747_v42 = vpack.i.bf16 %v16727_v41, %v16719_v0 }
 0x291   :  { %21860 = vst [vmem:[#allocation6_spill] sm:$0xff] %v16731_v14  ;;  %21861 = vst [vmem:[#allocation7_spill] sm:$0xff] %v16733_v10  ;;  %v16741_v4 = vpack.i.bf16 %v16731_v14, %v16721_v2  ;;  %v16757_v1 = vpack.i.bf16 %v16733_v10, %v16723_v54 }
 0x292   :  { %21862 = vst [vmem:[#allocation8_spill] sm:$0xff] %v16747_v42 }
 0x293   :  { %v16751_v30 = vpop.f32.mrb[6].mxu1  ;;  %v16753_v48 = vpop.f32.mrb[88].mxu0  ;;  %21864 = vst [vmem:[#allocation10_spill] sm:$0xff] %v16757_v1 }
 0x294   :  { %21863 = vst [vmem:[#allocation9_spill] sm:$0xff] %v16753_v48  ;;  %v16761_v20 = vpop.f32.mrb[7].mxu1  ;;  %v16763_v7 = vpop.f32.mrb[89].mxu0 }
 0x295   :  { %21865 = vst [vmem:[#allocation11_spill] sm:$0xff] %v16761_v20  ;;  %21866 = vst [vmem:[#allocation12_spill] sm:$0xff] %v16763_v7 }
 0x297   :  { %v16765_v43 = vpop.f32.mrb[8].mxu1  ;;  %v16767_v13 = vpop.f32.mrb[90].mxu0 }
 0x298   :  { %21867 = vst [vmem:[#allocation13_spill] sm:$0xff] %v16767_v13  ;;  %v16771_v49 = vpop.f32.mrb[9].mxu1  ;;  %v16773_v60 = vpop.f32.mrb[91].mxu0  ;;  %v16777_v28 = vpack.i.bf16 %v16765_v43, %v16751_v30  ;;  %v16787_v61 = vpack.i.bf16 %v16767_v13, %v16753_v48 }
 0x299   :  { %21868 = vst [vmem:[#allocation14_spill] sm:$0xff] %v16771_v49  ;;  %21869 = vst [vmem:[#allocation15_spill] sm:$0xff] %v16773_v60  ;;  %v16781_v57 = vpack.i.bf16 %v16771_v49, %v16761_v20  ;;  %v16797_v55 = vpack.i.bf16 %v16773_v60, %v16763_v7 }
 0x29a   :  { %21870 = vst [vmem:[#allocation16_spill] sm:$0xff] %v16787_v61 }
 0x29b   :  { %v16791_v52 = vpop.f32.mrb[10].mxu1  ;;  %v16793_v12 = vpop.f32.mrb[92].mxu0  ;;  %21873 = vst [vmem:[#allocation19_spill] sm:$0xff] %v16797_v55 }
 0x29c   :  { %21871 = vst [vmem:[#allocation17_spill] sm:$0xff] %v16791_v52  ;;  %21872 = vst [vmem:[#allocation18_spill] sm:$0xff] %v16793_v12  ;;  %v16801_v19 = vpop.f32.mrb[11].mxu1  ;;  %v16803_v11 = vpop.f32.mrb[93].mxu0 }
 0x29d   :  { %21874 = vst [vmem:[#allocation20_spill] sm:$0xff] %v16801_v19  ;;  %21875 = vst [vmem:[#allocation21_spill] sm:$0xff] %v16803_v11 }
 0x29f   :  { %v16805_v33 = vpop.f32.mrb[12].mxu1  ;;  %v16807_v56 = vpop.f32.mrb[94].mxu0 }
 0x2a0   :  { %21876 = vst [vmem:[#allocation22_spill] sm:$0xff] %v16807_v56  ;;  %v16811_v27 = vpop.f32.mrb[13].mxu1  ;;  %v16813_v47 = vpop.f32.mrb[95].mxu0  ;;  %v16817_v35 = vpack.i.bf16 %v16805_v33, %v16791_v52  ;;  %v16827_v25 = vpack.i.bf16 %v16807_v56, %v16793_v12 }
 0x2a1   :  { %21877 = vst [vmem:[#allocation23_spill] sm:$0xff] %v16811_v27  ;;  %21878 = vst [vmem:[#allocation24_spill] sm:$0xff] %v16813_v47  ;;  %v16821_v9 = vpack.i.bf16 %v16811_v27, %v16801_v19  ;;  %v16837_v34 = vpack.i.bf16 %v16813_v47, %v16803_v11 }
 0x2a2   :  { %21879 = vst [vmem:[#allocation25_spill] sm:$0xff] %v16827_v25 }
 0x2a3   :  { %v16831_v22 = vpop.f32.mrb[14].mxu1  ;;  %v16833_v15 = vpop.f32.mrb[96].mxu0  ;;  %21882 = vst [vmem:[#allocation28_spill] sm:$0xff] %v16837_v34 }
 0x2a4   :  { %21880 = vst [vmem:[#allocation26_spill] sm:$0xff] %v16831_v22  ;;  %21881 = vst [vmem:[#allocation27_spill] sm:$0xff] %v16833_v15  ;;  %v16841_v21 = vpop.f32.mrb[15].mxu1  ;;  %v16843_v26 = vpop.f32.mrb[97].mxu0 }
 0x2a5   :  { %21883 = vst [vmem:[#allocation29_spill] sm:$0xff] %v16841_v21  ;;  %21884 = vst [vmem:[#allocation30_spill] sm:$0xff] %v16843_v26 }
 0x2a7   :  { %v16845_v29 = vpop.f32.mrb[16].mxu1  ;;  %v16847_v8 = vpop.f32.mrb[98].mxu0 }
 0x2a8   :  { %21885 = vst [vmem:[#allocation31_spill] sm:$0xff] %v16845_v29  ;;  %21886 = vst [vmem:[#allocation32_spill] sm:$0xff] %v16847_v8  ;;  %v16851_v38 = vpop.f32.mrb[17].mxu1  ;;  %v16853_v18 = vpop.f32.mrb[99].mxu0  ;;  %v16857_v39 = vpack.i.bf16 %v16845_v29, %v16831_v22  ;;  %v16867_v62 = vpack.i.bf16 %v16847_v8, %v16833_v15 }
 0x2a9   :  { %21887 = vst [vmem:[#allocation33_spill] sm:$0xff] %v16851_v38  ;;  %21888 = vst [vmem:[#allocation34_spill] sm:$0xff] %v16853_v18  ;;  %v16861_v45 = vpack.i.bf16 %v16851_v38, %v16841_v21  ;;  %v16877_v46 = vpack.i.bf16 %v16853_v18, %v16843_v26 }
 0x2aa   :  { %21889 = vst [vmem:[#allocation35_spill] sm:$0xff] %v16867_v62 }
 0x2ab   :  { %v16871_v63 = vpop.f32.mrb[18].mxu1  ;;  %v16873_v36 = vpop.f32.mrb[100].mxu0  ;;  %21892 = vst [vmem:[#allocation38_spill] sm:$0xff] %v16877_v46 }
 0x2ac   :  { %21890 = vst [vmem:[#allocation36_spill] sm:$0xff] %v16871_v63  ;;  %21891 = vst [vmem:[#allocation37_spill] sm:$0xff] %v16873_v36  ;;  %v16881_v17 = vpop.f32.mrb[19].mxu1  ;;  %v16883_v5 = vpop.f32.mrb[101].mxu0 }
 0x2ad   :  { %21893 = vst [vmem:[#allocation39_spill] sm:$0xff] %v16881_v17  ;;  %21894 = vst [vmem:[#allocation40_spill] sm:$0xff] %v16883_v5 }
 0x2af   :  { %v16885_v53 = vpop.f32.mrb[20].mxu1  ;;  %v16887_v16 = vpop.f32.mrb[102].mxu0 }
 0x2b0   :  { %21895 = vst [vmem:[#allocation41_spill] sm:$0xff] %v16885_v53  ;;  %21896 = vst [vmem:[#allocation42_spill] sm:$0xff] %v16887_v16  ;;  %v16891_v59 = vpop.f32.mrb[21].mxu1  ;;  %v16893_v31 = vpop.f32.mrb[103].mxu0  ;;  %v16897_v50 = vpack.i.bf16 %v16885_v53, %v16871_v63  ;;  %v16907_v40 = vpack.i.bf16 %v16887_v16, %v16873_v36 }
 0x2b1   :  { %21897 = vst [vmem:[#allocation43_spill] sm:$0xff] %v16891_v59  ;;  %21898 = vst [vmem:[#allocation44_spill] sm:$0xff] %v16893_v31  ;;  %v16901_v24 = vpack.i.bf16 %v16891_v59, %v16881_v17  ;;  %v16917_v26 = vpack.i.bf16 %v16893_v31, %v16883_v5 }
 0x2b2   :  { %21899 = vst [vmem:[#allocation45_spill] sm:$0xff] %v16907_v40 }
 0x2b3   :  { %v16911_v51 = vpop.f32.mrb[22].mxu1  ;;  %v16913_v6 = vpop.f32.mrb[104].mxu0  ;;  %21902 = vst [vmem:[#allocation48_spill] sm:$0xff] %v16917_v26 }
 0x2b4   :  { %21900 = vst [vmem:[#allocation46_spill] sm:$0xff] %v16911_v51  ;;  %21901 = vst [vmem:[#allocation47_spill] sm:$0xff] %v16913_v6  ;;  %v16921_v11 = vpop.f32.mrb[23].mxu1  ;;  %v16923_v37 = vpop.f32.mrb[105].mxu0 }
 0x2b5   :  { %21903 = vst [vmem:[#allocation49_spill] sm:$0xff] %v16921_v11  ;;  %21904 = vst [vmem:[#allocation50_spill] sm:$0xff] %v16923_v37 }
 0x2b7   :  { %v16925_v47 = vpop.f32.mrb[24].mxu1  ;;  %v16927_v7 = vpop.f32.mrb[106].mxu0 }
 0x2b8   :  { %21905 = vst [vmem:[#allocation51_spill] sm:$0xff] %v16925_v47  ;;  %21906 = vst [vmem:[#allocation52_spill] sm:$0xff] %v16927_v7  ;;  %v16931_v60 = vpop.f32.mrb[25].mxu1  ;;  %v16933_v54 = vpop.f32.mrb[107].mxu0  ;;  %v16937_v10 = vpack.i.bf16 %v16925_v47, %v16911_v51  ;;  %v16947_v31 = vpack.i.bf16 %v16927_v7, %v16913_v6 }
 0x2b9   :  { %21907 = vst [vmem:[#allocation53_spill] sm:$0xff] %v16931_v60  ;;  %21908 = vst [vmem:[#allocation54_spill] sm:$0xff] %v16933_v54  ;;  %v16941_v18 = vpack.i.bf16 %v16931_v60, %v16921_v11  ;;  %v16957_v34 = vpack.i.bf16 %v16933_v54, %v16923_v37 }
 0x2ba   :  { %21909 = vst [vmem:[#allocation55_spill] sm:$0xff] %v16947_v31 }
 0x2bb   :  { %v16951_v26 = vpop.f32.mrb[26].mxu1  ;;  %v16953_v46 = vpop.f32.mrb[108].mxu0  ;;  %21912 = vst [vmem:[#allocation58_spill] sm:$0xff] %v16957_v34 }
 0x2bc   :  { %21910 = vst [vmem:[#allocation56_spill] sm:$0xff] %v16951_v26  ;;  %21911 = vst [vmem:[#allocation57_spill] sm:$0xff] %v16953_v46  ;;  %v16961_v1 = vpop.f32.mrb[27].mxu1  ;;  %v16963_v5 = vpop.f32.mrb[109].mxu0 }
 0x2bd   :  { %21913 = vst [vmem:[#allocation59_spill] sm:$0xff] %v16961_v1  ;;  %21914 = vst [vmem:[#allocation60_spill] sm:$0xff] %v16963_v5 }
 0x2bf   :  { %v16965_v36 = vpop.f32.mrb[28].mxu1  ;;  %v16967_v16 = vpop.f32.mrb[110].mxu0 }
 0x2c0   :  { %21915 = vst [vmem:[#allocation61_spill] sm:$0xff] %v16965_v36  ;;  %21916 = vst [vmem:[#allocation62_spill] sm:$0xff] %v16967_v16  ;;  %v16971_v6 = vpop.f32.mrb[29].mxu1  ;;  %v16973_v7 = vpop.f32.mrb[111].mxu0  ;;  %v16977_v34 = vpack.i.bf16 %v16965_v36, %v16951_v26  ;;  %v16987_v54 = vpack.i.bf16 %v16967_v16, %v16953_v46 }
 0x2c1   :  { %21917 = vst [vmem:[#allocation63_spill] sm:$0xff] %v16971_v6  ;;  %21918 = vst [vmem:[#allocation64_spill] sm:$0xff] %v16973_v7  ;;  %v16981_v55 = vpack.i.bf16 %v16971_v6, %v16961_v1  ;;  %v16997_v12 = vpack.i.bf16 %v16973_v7, %v16963_v5 }
 0x2c2   :  { %21920 = vst [vmem:[#allocation66_spill] sm:$0xff] %v16987_v54 }
 0x2c3   :  { %21919 = vst [vmem:[#allocation65_spill] sm:$0xff] %v16981_v55  ;;  %v16991_v15 = vpop.f32.mrb[30].mxu1  ;;  %v16993_v8 = vpop.f32.mrb[112].mxu0  ;;  %21923 = vst [vmem:[#allocation69_spill] sm:$0xff] %v16997_v12 }
 0x2c4   :  { %21921 = vst [vmem:[#allocation67_spill] sm:$0xff] %v16991_v15  ;;  %21922 = vst [vmem:[#allocation68_spill] sm:$0xff] %v16993_v8  ;;  %v17001_v48 = vpop.f32.mrb[31].mxu1  ;;  %v17003_v37 = vpop.f32.mrb[113].mxu0 }
 0x2c5   :  { %21924 = vst [vmem:[#allocation70_spill] sm:$0xff] %v17001_v48  ;;  %21925 = vst [vmem:[#allocation71_spill] sm:$0xff] %v17003_v37 }
 0x2c7   :  { %v17005_v13 = vpop.f32.mrb[32].mxu1  ;;  %v17007_v0 = vpop.f32.mrb[114].mxu0 }
 0x2c8   :  { %21926 = vst [vmem:[#allocation72_spill] sm:$0xff] %v17005_v13  ;;  %21927 = vst [vmem:[#allocation73_spill] sm:$0xff] %v17007_v0  ;;  %v17011_v46 = vpop.f32.mrb[33].mxu1  ;;  %v17013_v16 = vpop.f32.mrb[115].mxu0  ;;  %v17017_v12 = vpack.i.bf16 %v17005_v13, %v16991_v15  ;;  %v17027_v7 = vpack.i.bf16 %v17007_v0, %v16993_v8 }
 0x2c9   :  { %21928 = vst [vmem:[#allocation74_spill] sm:$0xff] %v17011_v46  ;;  %21929 = vst [vmem:[#allocation75_spill] sm:$0xff] %v17013_v16  ;;  %v17021_v56 = vpack.i.bf16 %v17011_v46, %v17001_v48  ;;  %v17037_v31 = vpack.i.bf16 %v17013_v16, %v17003_v37 }
 0x2ca   :  { %21931 = vst [vmem:[#allocation77_spill] sm:$0xff] %v17027_v7 }
 0x2cb   :  { %21930 = vst [vmem:[#allocation76_spill] sm:$0xff] %v17021_v56  ;;  %v17031_v41 = vpop.f32.mrb[34].mxu1  ;;  %v17033_v54 = vpop.f32.mrb[116].mxu0  ;;  %21933 = vst [vmem:[#allocation79_spill] sm:$0xff] %v17037_v31 }
 0x2cc   :  { %21932 = vst [vmem:[#allocation78_spill] sm:$0xff] %v17033_v54  ;;  %v17041_v6 = vpop.f32.mrb[35].mxu1  ;;  %v17043_v5 = vpop.f32.mrb[117].mxu0 }
 0x2cd   :  { %21934 = vst [vmem:[#allocation80_spill] sm:$0xff] %v17041_v6  ;;  %21935 = vst [vmem:[#allocation81_spill] sm:$0xff] %v17043_v5 }
 0x2cf   :  { %v17045_v48 = vpop.f32.mrb[36].mxu1  ;;  %v17047_v7 = vpop.f32.mrb[118].mxu0 }
 0x2d0   :  { %21936 = vst [vmem:[#allocation82_spill] sm:$0xff] %v17047_v7  ;;  %v17049_v3 = vpop.f32.mrb[37].mxu1  ;;  %v17051_v8 = vpop.f32.mrb[119].mxu0  ;;  %v17055_v0 = vpack.i.bf16 %v17045_v48, %v17031_v41  ;;  %v17069_v16 = vpack.i.bf16 %v17047_v7, %v17033_v54 }
 0x2d1   :  { %21937 = vst [vmem:[#allocation83_spill] sm:$0xff] %v17049_v3  ;;  %21938 = vst [vmem:[#allocation84_spill] sm:$0xff] %v17051_v8  ;;  %v17061_v1 = vpack.i.bf16 %v17049_v3, %v17041_v6  ;;  %v17079_v11 = vpack.i.bf16 %v17051_v8, %v17043_v5 }
 0x2d2   :  { %14226 = vrot.lane.b32.xlu0 %v17055_v0, %s15494_s3  ;;  %21939 = vst [vmem:[#allocation85_spill] sm:$0xff] %v17069_v16 }
 0x2d3   :  { %v17073_v40 = vpop.f32.mrb[38].mxu1  ;;  %v17075_v31 = vpop.f32.mrb[120].mxu0  ;;  %21941 = vst [vmem:[#allocation87_spill] sm:$0xff] %v17079_v11 }
 0x2d4   :  { %21940 = vst [vmem:[#allocation86_spill] sm:$0xff] %v17075_v31  ;;  %v17083_v60 = vpop.f32.mrb[39].mxu1  ;;  %v17085_v62 = vpop.f32.mrb[121].mxu0 }
 0x2d5   :  { %21942 = vst [vmem:[#allocation88_spill] sm:$0xff] %v17083_v60  ;;  %21943 = vst [vmem:[#allocation89_spill] sm:$0xff] %v17085_v62 }
 0x2d6   :  { %14231 = vrot.lane.b32.xlu0 %v16737_v23, %s15494_s3 }
 0x2d7   :  { %v17089_v61 = vpop.f32.mrb[40].mxu1  ;;  %v17091_v46 = vpop.f32.mrb[122].mxu0 }
 0x2d8   :  { %21944 = vst [vmem:[#allocation90_spill] sm:$0xff] %v17091_v46  ;;  %v17093_v54 = vpop.f32.mrb[41].mxu1  ;;  %v17095_v7 = vpop.f32.mrb[123].mxu0  ;;  %v17099_v11 = vpack.i.bf16 %v17089_v61, %v17073_v40  ;;  %v17113_v17 = vpack.i.bf16 %v17091_v46, %v17075_v31 }
 0x2d9   :  { %21945 = vst [vmem:[#allocation91_spill] sm:$0xff] %v17093_v54  ;;  %21946 = vst [vmem:[#allocation92_spill] sm:$0xff] %v17095_v7  ;;  %v17105_v5 = vpack.i.bf16 %v17093_v54, %v17083_v60  ;;  %v17123_v42 = vpack.i.bf16 %v17095_v7, %v17085_v62 }
 0x2da   :  { %14236 = vrot.lane.b32.xlu1 %v17099_v11, %s15494_s3  ;;  %21947 = vst [vmem:[#allocation93_spill] sm:$0xff] %v17113_v17 }
 0x2db   :  { %v17117_v25 = vpop.f32.mrb[42].mxu1  ;;  %v17119_v37 = vpop.f32.mrb[124].mxu0  ;;  %21949 = vst [vmem:[#allocation95_spill] sm:$0xff] %v17123_v42 }
 0x2dc   :  { %21948 = vst [vmem:[#allocation94_spill] sm:$0xff] %v17119_v37  ;;  %v17127_v21 = vpop.f32.mrb[43].mxu1  ;;  %v17129_v38 = vpop.f32.mrb[125].mxu0 }
 0x2dd   :  { %21950 = vst [vmem:[#allocation96_spill] sm:$0xff] %v17127_v21  ;;  %21951 = vst [vmem:[#allocation97_spill] sm:$0xff] %v17129_v38 }
 0x2de   :  { %14241 = vrot.lane.b32.xlu1 %v16777_v28, %s15494_s3 }
 0x2df   :  { %v17133_v17 = vpop.f32.mrb[44].mxu1  ;;  %v17135_v59 = vpop.f32.mrb[126].mxu0 }
 0x2e0   :  { %21952 = vst [vmem:[#allocation98_spill] sm:$0xff] %v17135_v59  ;;  %v17137_v31 = vpop.f32.mrb[45].mxu1  ;;  %v17139_v46 = vpop.f32.mrb[127].mxu0  ;;  %v17143_v42 = vpack.i.bf16 %v17133_v17, %v17117_v25  ;;  %v17159_v19 = vpack.i.bf16 %v17135_v59, %v17119_v37 }
 0x2e1   :  { %21953 = vst [vmem:[#allocation99_spill] sm:$0xff] %v17137_v31  ;;  %21954 = vst [vmem:[#allocation100_spill] sm:$0xff] %v17139_v46  ;;  %v17149_v62 = vpack.i.bf16 %v17137_v31, %v17127_v21  ;;  %v17169_v7 = vpack.i.bf16 %v17139_v46, %v17129_v38 }
 0x2e2   :  { %14246 = vrot.lane.b32.xlu1 %v16817_v35, %s15494_s3  ;;  %14271 = vrot.lane.b32.xlu0 %v17143_v42, %s15494_s3  ;;  %21955 = vst [vmem:[#allocation101_spill] sm:$0xff] %v17159_v19 }
 0x2e3   :  { %v17161_v27 = vpop.f32.mrb[46].mxu1  ;;  %v17163_v8 = vpop.f32.mrb[128].mxu0  ;;  %21958 = vst [vmem:[#allocation104_spill] sm:$0xff] %v17169_v7 }
 0x2e4   :  { %21956 = vst [vmem:[#allocation102_spill] sm:$0xff] %v17161_v27  ;;  %21957 = vst [vmem:[#allocation103_spill] sm:$0xff] %v17163_v8  ;;  %v17171_v21 = vpop.f32.mrb[47].mxu1  ;;  %v17173_v31 = vpop.f32.mrb[129].mxu0 }
 0x2e5   :  { %21959 = vst [vmem:[#allocation105_spill] sm:$0xff] %v17171_v21  ;;  %21960 = vst [vmem:[#allocation106_spill] sm:$0xff] %v17173_v31 }
 0x2e6   :  { %14251 = vrot.lane.b32.xlu1 %v16857_v39, %s15494_s3 }
 0x2e7   :  { %v17179_v19 = vpop.f32.mrb[48].mxu1  ;;  %v17181_v49 = vpop.f32.mrb[130].mxu0 }
 0x2e8   :  { %21961 = vst [vmem:[#allocation107_spill] sm:$0xff] %v17179_v19  ;;  %21962 = vst [vmem:[#allocation108_spill] sm:$0xff] %v17181_v49  ;;  %v17183_v60 = vpop.f32.mrb[49].mxu1  ;;  %v17185_v16 = vpop.f32.mrb[131].mxu0  ;;  %v17189_v7 = vpack.i.bf16 %v17179_v19, %v17161_v27  ;;  %v17205_v46 = vpack.i.bf16 %v17181_v49, %v17163_v8 }
 0x2e9   :  { %21963 = vst [vmem:[#allocation109_spill] sm:$0xff] %v17183_v60  ;;  %21964 = vst [vmem:[#allocation110_spill] sm:$0xff] %v17185_v16  ;;  %v17195_v20 = vpack.i.bf16 %v17183_v60, %v17171_v21  ;;  %v17215_v38 = vpack.i.bf16 %v17185_v16, %v17173_v31 }
 0x2ea   :  { %14256 = vrot.lane.b32.xlu1 %v16897_v50, %s15494_s3  ;;  %14276 = vrot.lane.b32.xlu0 %v17189_v7, %s15494_s3  ;;  %21965 = vst [vmem:[#allocation111_spill] sm:$0xff] %v17205_v46 }
 0x2eb   :  { %v17207_v59 = vpop.f32.mrb[50].mxu1  ;;  %v17209_v37 = vpop.f32.mrb[132].mxu0  ;;  %21968 = vst [vmem:[#allocation114_spill] sm:$0xff] %v17215_v38 }
 0x2ec   :  { %21966 = vst [vmem:[#allocation112_spill] sm:$0xff] %v17207_v59  ;;  %21967 = vst [vmem:[#allocation113_spill] sm:$0xff] %v17209_v37  ;;  %v17217_v21 = vpop.f32.mrb[51].mxu1  ;;  %v17219_v60 = vpop.f32.mrb[133].mxu0 }
 0x2ed   :  { %21969 = vst [vmem:[#allocation115_spill] sm:$0xff] %v17217_v21  ;;  %21970 = vst [vmem:[#allocation116_spill] sm:$0xff] %v17219_v60 }
 0x2ee   :  { %14261 = vrot.lane.b32.xlu1 %v16937_v10, %s15494_s3 }
 0x2ef   :  { %v17225_v46 = vpop.f32.mrb[52].mxu1  ;;  %v17227_v14 = vpop.f32.mrb[134].mxu0 }
 0x2f0   :  { %21971 = vst [vmem:[#allocation117_spill] sm:$0xff] %v17225_v46  ;;  %21972 = vst [vmem:[#allocation118_spill] sm:$0xff] %v17227_v14  ;;  %v17229_v6 = vpop.f32.mrb[53].mxu1  ;;  %v17231_v54 = vpop.f32.mrb[135].mxu0  ;;  %v17235_v38 = vpack.i.bf16 %v17225_v46, %v17207_v59  ;;  %v17251_v16 = vpack.i.bf16 %v17227_v14, %v17209_v37 }
 0x2f1   :  { %21973 = vst [vmem:[#allocation119_spill] sm:$0xff] %v17229_v6  ;;  %21974 = vst [vmem:[#allocation120_spill] sm:$0xff] %v17231_v54  ;;  %v17241_v2 = vpack.i.bf16 %v17229_v6, %v17217_v21  ;;  %v17261_v31 = vpack.i.bf16 %v17231_v54, %v17219_v60 }
 0x2f2   :  { %14266 = vrot.lane.b32.xlu1 %v16977_v34, %s15494_s3  ;;  %14281 = vrot.lane.b32.xlu0 %v17235_v38, %s15494_s3  ;;  %21975 = vst [vmem:[#allocation121_spill] sm:$0xff] %v17251_v16 }
 0x2f3   :  { %v17253_v49 = vpop.f32.mrb[54].mxu1  ;;  %v17255_v8 = vpop.f32.mrb[136].mxu0  ;;  %21978 = vst [vmem:[#allocation124_spill] sm:$0xff] %v17261_v31 }
 0x2f4   :  { %21976 = vst [vmem:[#allocation122_spill] sm:$0xff] %v17253_v49  ;;  %21977 = vst [vmem:[#allocation123_spill] sm:$0xff] %v17255_v8  ;;  %v17263_v21 = vpop.f32.mrb[55].mxu1  ;;  %v17265_v6 = vpop.f32.mrb[137].mxu0 }
 0x2f5   :  { %21979 = vst [vmem:[#allocation125_spill] sm:$0xff] %v17263_v21  ;;  %21980 = vst [vmem:[#allocation126_spill] sm:$0xff] %v17265_v6 }
 0x2f6   :  { %14301 = vrot.lane.b32.xlu1 %v17017_v12, %s15494_s3 }
 0x2f7   :  { %v17271_v16 = vpop.f32.mrb[56].mxu1  ;;  %v17273_v13 = vpop.f32.mrb[138].mxu0 }
 0x2f8   :  { %21981 = vst [vmem:[#allocation127_spill] sm:$0xff] %v17271_v16  ;;  %21982 = vst [vmem:[#allocation128_spill] sm:$0xff] %v17273_v13  ;;  %v17275_v26 = vpop.f32.mrb[57].mxu1  ;;  %v17277_v3 = vpop.f32.mrb[139].mxu0  ;;  %v17281_v31 = vpack.i.bf16 %v17271_v16, %v17253_v49  ;;  %v17295_v54 = vpack.i.bf16 %v17273_v13, %v17255_v8 }
 0x2f9   :  { %21983 = vst [vmem:[#allocation129_spill] sm:$0xff] %v17275_v26  ;;  %21984 = vst [vmem:[#allocation130_spill] sm:$0xff] %v17277_v3  ;;  %v17287_v15 = vpack.i.bf16 %v17275_v26, %v17263_v21  ;;  %v17305_v56 = vpack.i.bf16 %v17277_v3, %v17265_v6 }
 0x2fa   :  { %14286 = vrot.lane.b32.xlu0 %v17281_v31, %s15494_s3  ;;  %21985 = vst [vmem:[#allocation131_spill] sm:$0xff] %v17295_v54 }
 0x2fb   :  { %v17299_v36 = vpop.f32.mrb[58].mxu1  ;;  %v17301_v37 = vpop.f32.mrb[140].mxu0  ;;  %21988 = vst [vmem:[#allocation134_spill] sm:$0xff] %v17305_v56 }
 0x2fc   :  { %21986 = vst [vmem:[#allocation132_spill] sm:$0xff] %v17299_v36  ;;  %21987 = vst [vmem:[#allocation133_spill] sm:$0xff] %v17301_v37  ;;  %v17309_v21 = vpop.f32.mrb[59].mxu1  ;;  %v17311_v26 = vpop.f32.mrb[141].mxu0 }
 0x2fd   :  { %21989 = vst [vmem:[#allocation135_spill] sm:$0xff] %v17309_v21  ;;  %21990 = vst [vmem:[#allocation136_spill] sm:$0xff] %v17311_v26 }
 0x2ff   :  { %v17313_v51 = vpop.f32.mrb[60].mxu1  ;;  %v17315_v54 = vpop.f32.mrb[142].mxu0 }
 0x300   :  { %21991 = vst [vmem:[#allocation137_spill] sm:$0xff] %v17313_v51  ;;  %21992 = vst [vmem:[#allocation138_spill] sm:$0xff] %v17315_v54  ;;  %v17317_v14 = vpop.f32.mrb[61].mxu1  ;;  %v17319_v8 = vpop.f32.mrb[143].mxu0  ;;  %v17323_v13 = vpack.i.bf16 %v17313_v51, %v17299_v36  ;;  %v17337_v3 = vpack.i.bf16 %v17315_v54, %v17301_v37 }
 0x301   :  { %21993 = vst [vmem:[#allocation139_spill] sm:$0xff] %v17317_v14  ;;  %21994 = vst [vmem:[#allocation140_spill] sm:$0xff] %v17319_v8  ;;  %v17329_v60 = vpack.i.bf16 %v17317_v14, %v17309_v21  ;;  %v17347_v36 = vpack.i.bf16 %v17319_v8, %v17311_v26  ;;  %v9974_v8 = vld [vmem:[%s21620_s4 + $0xb0] sm:$0xff] }
 0x302   :  { %14291 = vrot.lane.b32.xlu0 %v17323_v13, %s15494_s3  ;;  %21996 = vst [vmem:[#allocation142_spill] sm:$0xff] %v17337_v3  ;;  %2084 = vmatprep.mubr.f32.mxu1 %v9974_v8 }
 0x303   :  { %21995 = vst [vmem:[#allocation141_spill] sm:$0xff] %v17329_v60  ;;  %v17341_v49 = vpop.f32.mrb[62].mxu1  ;;  %v17343_v56 = vpop.f32.mrb[144].mxu0  ;;  %21999 = vst [vmem:[#allocation145_spill] sm:$0xff] %v17347_v36 }
 0x304   :  { %21997 = vst [vmem:[#allocation143_spill] sm:$0xff] %v17341_v49  ;;  %21998 = vst [vmem:[#allocation144_spill] sm:$0xff] %v17343_v56  ;;  %v17351_v21 = vpop.f32.mrb[63].mxu1  ;;  %v17353_v14 = vpop.f32.mrb[145].mxu0 }
 0x305   :  { %22000 = vst [vmem:[#allocation146_spill] sm:$0xff] %v17351_v21  ;;  %22001 = vst [vmem:[#allocation147_spill] sm:$0xff] %v17353_v14 }
 0x307   :  { %v17355_v51 = vpop.f32.mrb[64].mxu1  ;;  %v17357_v3 = vpop.f32.mrb[146].mxu0 }
 0x308   :  { %22002 = vst [vmem:[#allocation148_spill] sm:$0xff] %v17355_v51  ;;  %22003 = vst [vmem:[#allocation149_spill] sm:$0xff] %v17357_v3  ;;  %v17359_v47 = vpop.f32.mrb[65].mxu1  ;;  %v17361_v37 = vpop.f32.mrb[147].mxu0  ;;  %v17365_v54 = vpack.i.bf16 %v17355_v51, %v17341_v49  ;;  %v17382_v16 = vpack.i.bf16 %v17357_v3, %v17343_v56 }
 0x309   :  { %22004 = vst [vmem:[#allocation150_spill] sm:$0xff] %v17359_v47  ;;  %22005 = vst [vmem:[#allocation151_spill] sm:$0xff] %v17361_v37  ;;  %v17371_v6 = vpack.i.bf16 %v17359_v47, %v17351_v21  ;;  %v17392_v26 = vpack.i.bf16 %v17361_v37, %v17353_v14 }
 0x30a   :  { %14296 = vrot.lane.b32.xlu0 %v17365_v54, %s15494_s3  ;;  %22007 = vst [vmem:[#allocation153_spill] sm:$0xff] %v17382_v16 }
 0x30b   :  { %22006 = vst [vmem:[#allocation152_spill] sm:$0xff] %v17371_v6  ;;  %v17386_v49 = vpop.f32.mrb[66].mxu1  ;;  %v17388_v51 = vpop.f32.mrb[148].mxu0  ;;  %22010 = vst [vmem:[#allocation156_spill] sm:$0xff] %v17392_v26 }
 0x30c   :  { %22008 = vst [vmem:[#allocation154_spill] sm:$0xff] %v17386_v49  ;;  %22009 = vst [vmem:[#allocation155_spill] sm:$0xff] %v17388_v51  ;;  %v17396_v47 = vpop.f32.mrb[67].mxu1  ;;  %v17398_v6 = vpop.f32.mrb[149].mxu0 }
 0x30d   :  { %22011 = vst [vmem:[#allocation157_spill] sm:$0xff] %v17396_v47  ;;  %22012 = vst [vmem:[#allocation158_spill] sm:$0xff] %v17398_v6 }
 0x30f   :  { %v17400_v16 = vpop.f32.mrb[68].mxu1  ;;  %v17402_v63 = vpop.f32.mrb[150].mxu0 }
 0x310   :  { %22013 = vst [vmem:[#allocation159_spill] sm:$0xff] %v17400_v16  ;;  %22014 = vst [vmem:[#allocation160_spill] sm:$0xff] %v17402_v63  ;;  %v17406_v56 = vpop.f32.mrb[69].mxu1  ;;  %v17408_v8 = vpop.f32.mrb[151].mxu0  ;;  %v17412_v26 = vpack.i.bf16 %v17400_v16, %v17386_v49  ;;  %v17424_v36 = vpack.i.bf16 %v17402_v63, %v17388_v51 }
 0x311   :  { %22015 = vst [vmem:[#allocation161_spill] sm:$0xff] %v17406_v56  ;;  %22016 = vst [vmem:[#allocation162_spill] sm:$0xff] %v17408_v8  ;;  %v17416_v21 = vpack.i.bf16 %v17406_v56, %v17396_v47  ;;  %v17428_v37 = vpack.i.bf16 %v17408_v8, %v17398_v6 }
 0x312   :  { %14306 = vrot.lane.b32.xlu0 %v17412_v26, %s15494_s3  ;;  %22017 = vst [vmem:[#allocation163_spill] sm:$0xff] %v17424_v36 }
 0x313   :  { %22018 = vst [vmem:[#allocation164_spill] sm:$0xff] %v17428_v37  ;;  %v17430_v3 = vpop.f32.mrb[70].mxu1  ;;  %v17432_v49 = vpop.f32.mrb[152].mxu0 }
 0x314   :  { %22019 = vst [vmem:[#allocation165_spill] sm:$0xff] %v17430_v3  ;;  %22020 = vst [vmem:[#allocation166_spill] sm:$0xff] %v17432_v49  ;;  %v17438_v47 = vpop.f32.mrb[71].mxu1  ;;  %v17440_v56 = vpop.f32.mrb[153].mxu0 }
 0x315   :  { %22021 = vst [vmem:[#allocation167_spill] sm:$0xff] %v17438_v47  ;;  %22022 = vst [vmem:[#allocation168_spill] sm:$0xff] %v17440_v56 }
 0x317   :  { %v17442_v53 = vpop.f32.mrb[72].mxu1  ;;  %v17444_v36 = vpop.f32.mrb[154].mxu0 }
 0x318   :  { %22023 = vst [vmem:[#allocation169_spill] sm:$0xff] %v17442_v53  ;;  %22024 = vst [vmem:[#allocation170_spill] sm:$0xff] %v17444_v36  ;;  %v17448_v55 = vpop.f32.mrb[73].mxu1  ;;  %v17450_v59 = vpop.f32.mrb[155].mxu0  ;;  %v17454_v16 = vpack.i.bf16 %v17442_v53, %v17430_v3  ;;  %v17466_v37 = vpack.i.bf16 %v17444_v36, %v17432_v49 }
 0x319   :  { %22025 = vst [vmem:[#allocation171_spill] sm:$0xff] %v17448_v55  ;;  %22026 = vst [vmem:[#allocation172_spill] sm:$0xff] %v17450_v59  ;;  %v17458_v14 = vpack.i.bf16 %v17448_v55, %v17438_v47  ;;  %v17470_v8 = vpack.i.bf16 %v17450_v59, %v17440_v56 }
 0x31a   :  { %14311 = vrot.lane.b32.xlu1 %v17454_v16, %s15494_s3  ;;  %22027 = vst [vmem:[#allocation173_spill] sm:$0xff] %v17466_v37 }
 0x31b   :  { %22028 = vst [vmem:[#allocation174_spill] sm:$0xff] %v17470_v8  ;;  %v17472_v51 = vpop.f32.mrb[74].mxu1  ;;  %v17474_v63 = vpop.f32.mrb[156].mxu0 }
 0x31c   :  { %22029 = vst [vmem:[#allocation175_spill] sm:$0xff] %v17472_v51  ;;  %22030 = vst [vmem:[#allocation176_spill] sm:$0xff] %v17474_v63  ;;  %v17480_v47 = vpop.f32.mrb[75].mxu1  ;;  %v17482_v55 = vpop.f32.mrb[157].mxu0 }
 0x31d   :  { %22031 = vst [vmem:[#allocation177_spill] sm:$0xff] %v17480_v47  ;;  %22032 = vst [vmem:[#allocation178_spill] sm:$0xff] %v17482_v55 }
 0x31f   :  { %v17484_v53 = vpop.f32.mrb[76].mxu1  ;;  %v17486_v37 = vpop.f32.mrb[158].mxu0 }
 0x320   :  { %22033 = vst [vmem:[#allocation179_spill] sm:$0xff] %v17484_v53  ;;  %22034 = vst [vmem:[#allocation180_spill] sm:$0xff] %v17486_v37  ;;  %v17492_v46 = vpack.i.bf16 %v17486_v37, %v17474_v63  ;;  %v17494_v22 = vpop.f32.mrb[77].mxu1  ;;  %v17496_v3 = vpop.f32.mrb[159].mxu0  ;;  %v17514_v36 = vpack.i.bf16 %v17484_v53, %v17472_v51 }
 0x321   :  { %22036 = vst [vmem:[#allocation182_spill] sm:$0xff] %v17494_v22  ;;  %22037 = vst [vmem:[#allocation183_spill] sm:$0xff] %v17496_v3  ;;  %v17502_v56 = vpack.i.bf16 %v17494_v22, %v17480_v47  ;;  %v17508_v8 = vpack.i.bf16 %v17496_v3, %v17482_v55 }
 0x322   :  { %22035 = vst [vmem:[#allocation181_spill] sm:$0xff] %v17492_v46  ;;  %14316 = vrot.lane.b32.xlu0 %v17514_v36, %s15494_s3 }
 0x323   :  { %22038 = vst [vmem:[#allocation184_spill] sm:$0xff] %v17508_v8  ;;  %v17516_v46 = vpop.f32.mrb[78].mxu1  ;;  %v17518_v6 = vpop.f32.mrb[160].mxu0 }
 0x324   :  { %22039 = vst [vmem:[#allocation185_spill] sm:$0xff] %v17516_v46  ;;  %22040 = vst [vmem:[#allocation186_spill] sm:$0xff] %v17518_v6  ;;  %v17520_v63 = vpop.f32.mrb[79].mxu1  ;;  %v17522_v37 = vpop.f32.mrb[161].mxu0 }
 0x325   :  { %22041 = vst [vmem:[#allocation187_spill] sm:$0xff] %v17520_v63  ;;  %22042 = vst [vmem:[#allocation188_spill] sm:$0xff] %v17522_v37 }
 0x327   :  { %v17526_v59 = vpop.f32.mrb[80].mxu1  ;;  %v17528_v8 = vpop.f32.mrb[162].mxu0 }
 0x328   :  { %22043 = vst [vmem:[#allocation189_spill] sm:$0xff] %v17526_v59  ;;  %22044 = vst [vmem:[#allocation190_spill] sm:$0xff] %v17528_v8  ;;  %v17534_v55 = vpack.i.bf16 %v17528_v8, %v17518_v6  ;;  %v17536_v3 = vpop.f32.mrb[81].mxu1  ;;  %v17538_v47 = vpop.f32.mrb[163].mxu0  ;;  %v17556_v29 = vpack.i.bf16 %v17526_v59, %v17516_v46 }
 0x329   :  { %22046 = vst [vmem:[#allocation192_spill] sm:$0xff] %v17536_v3  ;;  %22047 = vst [vmem:[#allocation193_spill] sm:$0xff] %v17538_v47  ;;  %v17544_v51 = vpack.i.bf16 %v17536_v3, %v17520_v63  ;;  %v17550_v49 = vpack.i.bf16 %v17538_v47, %v17522_v37 }
 0x32a   :  { %22045 = vst [vmem:[#allocation191_spill] sm:$0xff] %v17534_v55  ;;  %14321 = vrot.lane.b32.xlu1 %v17556_v29, %s15494_s3 }
 0x32b   :  { %22048 = vst [vmem:[#allocation194_spill] sm:$0xff] %v17550_v49  ;;  %v17558_v60 = vpop.f32.mrb[82].mxu1  ;;  %v17560_v22 = vpop.f32.mrb[164].mxu0 }
 0x32c   :  { %22049 = vst [vmem:[#allocation195_spill] sm:$0xff] %v17558_v60  ;;  %22050 = vst [vmem:[#allocation196_spill] sm:$0xff] %v17560_v22  ;;  %v17562_v6 = vpop.f32.mrb[83].mxu1  ;;  %v17564_v8 = vpop.f32.mrb[165].mxu0 }
 0x32d   :  { %22051 = vst [vmem:[#allocation197_spill] sm:$0xff] %v17562_v6  ;;  %22052 = vst [vmem:[#allocation198_spill] sm:$0xff] %v17564_v8 }
 0x32f   :  { %v17568_v53 = vpop.f32.mrb[84].mxu1  ;;  %v17570_v49 = vpop.f32.mrb[166].mxu0 }
 0x330   :  { %22053 = vst [vmem:[#allocation199_spill] sm:$0xff] %v17568_v53  ;;  %22054 = vst [vmem:[#allocation200_spill] sm:$0xff] %v17570_v49  ;;  %v17576_v37 = vpack.i.bf16 %v17570_v49, %v17560_v22  ;;  %v17578_v47 = vpop.f32.mrb[85].mxu1  ;;  %v17580_v63 = vpop.f32.mrb[167].mxu0  ;;  %v17598_v27 = vpack.i.bf16 %v17568_v53, %v17558_v60 }
 0x331   :  { %22056 = vst [vmem:[#allocation202_spill] sm:$0xff] %v17578_v47  ;;  %22057 = vst [vmem:[#allocation203_spill] sm:$0xff] %v17580_v63  ;;  %v17586_v46 = vpack.i.bf16 %v17578_v47, %v17562_v6  ;;  %v17592_v55 = vpack.i.bf16 %v17580_v63, %v17564_v8 }
 0x332   :  { %22055 = vst [vmem:[#allocation201_spill] sm:$0xff] %v17576_v37  ;;  %14326 = vrot.lane.b32.xlu0 %v17598_v27, %s15494_s3 }
 0x333   :  { %22058 = vst [vmem:[#allocation204_spill] sm:$0xff] %v17592_v55  ;;  %v17600_v19 = vpop.f32.mrb[86].mxu1  ;;  %v17602_v3 = vpop.f32.mrb[168].mxu0 }
 0x334   :  { %22059 = vst [vmem:[#allocation205_spill] sm:$0xff] %v17602_v3  ;;  %1951 = vrot.lane.b32.xlu1 %v17600_v19, %s15494_s3  ;;  %v17606_v22 = vpop.f32.mrb[87].mxu1  ;;  %v17608_v59 = vpop.f32.mrb[169].mxu0 }
 0x335   :  { %22060 = vst [vmem:[#allocation206_spill] sm:$0xff] %v17606_v22  ;;  %22061 = vst [vmem:[#allocation207_spill] sm:$0xff] %v17608_v59 }
 0x336   :  { %14331 = vrot.lane.b32.xlu0 %v17055_v0, %s15495_s25 }
 0x338   :  { %14336 = vrot.lane.b32.xlu1 %v16737_v23, %s15495_s25 }
 0x33a   :  { %14341 = vrot.lane.b32.xlu0 %v17099_v11, %s15495_s25 }
 0x33c   :  { %14346 = vrot.lane.b32.xlu1 %v16777_v28, %s15495_s25 }
 0x33e   :  { %14351 = vrot.lane.b32.xlu0 %v17143_v42, %s15495_s25 }
 0x340   :  { %14356 = vrot.lane.b32.xlu1 %v16817_v35, %s15495_s25 }
 0x342   :  { %14361 = vrot.lane.b32.xlu0 %v17189_v7, %s15495_s25 }
 0x344   :  { %v14227_v37 = vpop.permute.xlu0 %14226  ;;  %14366 = vrot.lane.b32.xlu1 %v16857_v39, %s15495_s25 }
 0x345   :  { %v14229_v8 = vunpack.i.h.bf16 %v14227_v37  ;;  %v14228_v63 = vunpack.i.l.bf16 %v14227_v37 }
 0x346   :  { %14371 = vrot.lane.b32.xlu0 %v17235_v38, %s15495_s25 }
 0x347   :  { %v12935_v59 = vpack.c.bf16 %v14229_v8, %v14228_v63 }
 0x348   :  { %v14232_v49 = vpop.permute.xlu0 %14231  ;;  %14376 = vrot.lane.b32.xlu1 %v16897_v50, %s15495_s25 }
 0x349   :  { %v14234_v55 = vunpack.i.h.bf16 %v14232_v49  ;;  %v14233_v3 = vunpack.i.l.bf16 %v14232_v49  ;;  %12936 = vmatprep.subr.bf16.mxu1 %v12935_v59 }
 0x34a   :  { %14381 = vrot.lane.b32.xlu0 %v17281_v31, %s15495_s25 }
 0x34b   :  { %v12937_v6 = vpack.c.bf16 %v14234_v55, %v14233_v3 }
 0x34c   :  { %v14237_v47 = vpop.permute.xlu1 %14236  ;;  %14386 = vrot.lane.b32.xlu1 %v16937_v10, %s15495_s25 }
 0x34d   :  { %v14239_v37 = vunpack.i.h.bf16 %v14237_v47  ;;  %v14238_v63 = vunpack.i.l.bf16 %v14237_v47  ;;  %12938 = vmatpush3.bf16.msra.mxu1 %v12937_v6 }
 0x34e   :  { %14391 = vrot.lane.b32.xlu0 %v17323_v13, %s15495_s25 }
 0x34f   :  { %v12939_v8 = vpack.c.bf16 %v14239_v37, %v14238_v63 }
 0x350   :  { %v14242_v22 = vpop.permute.xlu1 %14241  ;;  %14396 = vrot.lane.b32.xlu1 %v16977_v34, %s15495_s25 }
 0x351   :  { %v14244_v49 = vunpack.i.h.bf16 %v14242_v22  ;;  %v14243_v55 = vunpack.i.l.bf16 %v14242_v22  ;;  %12940 = vmatprep.subr.bf16.mxu1 %v12939_v8 }
 0x352   :  { %14401 = vrot.lane.b32.xlu0 %v17365_v54, %s15495_s25 }
 0x353   :  { %v12941_v59 = vpack.c.bf16 %v14244_v49, %v14243_v55 }
 0x354   :  { %v14247_v3 = vpop.permute.xlu1 %14246  ;;  %v14272_v60 = vpop.permute.xlu0 %14271  ;;  %14406 = vrot.lane.b32.xlu1 %v17017_v12, %s15495_s25 }
 0x355   :  { %v14249_v6 = vunpack.i.h.bf16 %v14247_v3  ;;  %v14248_v47 = vunpack.i.l.bf16 %v14247_v3  ;;  %v14274_v37 = vunpack.i.h.bf16 %v14272_v60  ;;  %v14273_v63 = vunpack.i.l.bf16 %v14272_v60  ;;  %12942 = vmatpush3.bf16.msra.mxu1 %v12941_v59 }
 0x356   :  { %14411 = vrot.lane.b32.xlu0 %v17412_v26, %s15495_s25 }
 0x357   :  { %v12945_v53 = vpack.c.bf16 %v14249_v6, %v14248_v47  ;;  %v12943_v52 = vpack.c.bf16 %v14274_v37, %v14273_v63 }
 0x358   :  { %14416 = vrot.lane.b32.xlu1 %v17454_v16, %s15495_s25  ;;  %v14252_v22 = vpop.permute.xlu1 %14251 }
 0x359   :  { %12944 = vmatprep.subr.bf16.mxu1 %v12943_v52  ;;  %v14254_v8 = vunpack.i.h.bf16 %v14252_v22  ;;  %v14253_v49 = vunpack.i.l.bf16 %v14252_v22 }
 0x35a   :  { %12946 = vmatpush3.bf16.msra.mxu1 %v12945_v53  ;;  %14421 = vrot.lane.b32.xlu0 %v17514_v36, %s15495_s25 }
 0x35b   :  { %v12949_v6 = vpack.c.bf16 %v14254_v8, %v14253_v49 }
 0x35c   :  { %v14277_v55 = vpop.permute.xlu0 %14276  ;;  %14426 = vrot.lane.b32.xlu1 %v17556_v29, %s15495_s25  ;;  %v14257_v47 = vpop.permute.xlu1 %14256 }
 0x35d   :  { %v14279_v60 = vunpack.i.h.bf16 %v14277_v55  ;;  %v14278_v59 = vunpack.i.l.bf16 %v14277_v55  ;;  %v14259_v53 = vunpack.i.h.bf16 %v14257_v47  ;;  %v14258_v52 = vunpack.i.l.bf16 %v14257_v47 }
 0x35e   :  { %14431 = vrot.lane.b32.xlu0 %v17598_v27, %s15495_s25 }
 0x35f   :  { %v12947_v3 = vpack.c.bf16 %v14279_v60, %v14278_v59  ;;  %v12953_v49 = vpack.c.bf16 %v14259_v53, %v14258_v52 }
 0x360   :  { %14441 = vrot.lane.b32.xlu1 %v16737_v23, %s15496_s0  ;;  %v14262_v23 = vpop.permute.xlu1 %14261 }
 0x361   :  { %12948 = vmatprep.subr.bf16.mxu1 %v12947_v3  ;;  %v14264_v55 = vunpack.i.h.bf16 %v14262_v23  ;;  %v14263_v60 = vunpack.i.l.bf16 %v14262_v23 }
 0x362   :  { %12950 = vmatpush3.bf16.msra.mxu1 %v12949_v6  ;;  %14436 = vrot.lane.b32.xlu0 %v17055_v0, %s15496_s0 }
 0x363   :  { %v12957_v6 = vpack.c.bf16 %v14264_v55, %v14263_v60  ;;  %v9976_v55 = vld [vmem:[%s21620_s4 + $0xc0] sm:$0xff] }
 0x364   :  { %v14282_v37 = vpop.permute.xlu0 %14281  ;;  %14451 = vrot.lane.b32.xlu1 %v17099_v11, %s15496_s0  ;;  %v9980_v60 = vld [vmem:[%s21620_s4 + $0xe0] sm:$0xff] }
 0x365   :  { %v14284_v63 = vunpack.i.h.bf16 %v14282_v37  ;;  %v14283_v22 = vunpack.i.l.bf16 %v14282_v37 }
 0x366   :  { %14446 = vrot.lane.b32.xlu0 %v17412_v26, %s15496_s0 }
 0x367   :  { %v12951_v8 = vpack.c.bf16 %v14284_v63, %v14283_v22 }
 0x368   :  { %14461 = vrot.lane.b32.xlu1 %v17454_v16, %s15496_s0  ;;  %v14267_v16 = vpop.permute.xlu1 %14266 }
 0x369   :  { %12952 = vmatprep.subr.bf16.mxu1 %v12951_v8  ;;  %v14269_v26 = vunpack.i.h.bf16 %v14267_v16  ;;  %v14268_v47 = vunpack.i.l.bf16 %v14267_v16  ;;  %v9986_v16 = vld [vmem:[%s21620_s4 + $0x110] sm:$0xff] }
 0x36a   :  { %12954 = vmatpush3.bf16.msra.mxu1 %v12953_v49  ;;  %14456 = vrot.lane.b32.xlu0 %v16777_v28, %s15496_s0 }
 0x36b   :  { %v12961_v37 = vpack.c.bf16 %v14269_v26, %v14268_v47  ;;  %v9989_v26 = vld [vmem:[%s21620_s4 + $0x128] sm:$0xff] }
 0x36c   :  { %v14287_v59 = vpop.permute.xlu0 %14286  ;;  %14471 = vrot.lane.b32.xlu1 %v16817_v35, %s15496_s0 }
 0x36d   :  { %v14289_v0 = vunpack.i.h.bf16 %v14287_v59  ;;  %v14288_v11 = vunpack.i.l.bf16 %v14287_v59 }
 0x36e   :  { %14466 = vrot.lane.b32.xlu0 %v17143_v42, %s15496_s0 }
 0x36f   :  { %v12955_v3 = vpack.c.bf16 %v14289_v0, %v14288_v11 }
 0x370   :  { %14481 = vrot.lane.b32.xlu1 %v17189_v7, %s15496_s0  ;;  %v14302_v7 = vpop.permute.xlu1 %14301 }
 0x371   :  { %12956 = vmatprep.subr.bf16.mxu1 %v12955_v3  ;;  %v14304_v42 = vunpack.i.h.bf16 %v14302_v7  ;;  %v14303_v63 = vunpack.i.l.bf16 %v14302_v7  ;;  %v9991_v7 = vld [vmem:[%s21620_s4 + $0x138] sm:$0x3] }
 0x372   :  { %12958 = vmatpush3.bf16.msra.mxu1 %v12957_v6  ;;  %14476 = vrot.lane.b32.xlu0 %v17514_v36, %s15496_s0  ;;  %v9982_v6 = vld [vmem:[%s21620_s4 + $0xf0] sm:$0xff] }
 0x373   :  { %v12965_v49 = vpack.c.bf16 %v14304_v42, %v14303_v63 }
 0x374   :  { %v14292_v53 = vpop.permute.xlu0 %14291  ;;  %14491 = vrot.lane.b32.xlu1 %v17556_v29, %s15496_s0 }
 0x375   :  { %v14294_v28 = vunpack.i.h.bf16 %v14292_v53  ;;  %v14293_v35 = vunpack.i.l.bf16 %v14292_v53  ;;  %v9988_v53 = vld [vmem:[%s21620_s4 + $0x120] sm:$0xff] }
 0x376   :  { %14486 = vrot.lane.b32.xlu0 %v16857_v39, %s15496_s0 }
 0x377   :  { %v12959_v52 = vpack.c.bf16 %v14294_v28, %v14293_v35 }
 0x378   :  { %14501 = vrot.lane.b32.xlu1 %v16897_v50, %s15496_s0  ;;  %v9973_v50 = vld [vmem:[%s21620_s4 + $0xa8] sm:$0xff] }
 0x379   :  { %12960 = vmatprep.subr.bf16.mxu1 %v12959_v52  ;;  %v9992_v52 = vld [vmem:[%s21620_s4 + $0x140] sm:$0x3] }
 0x37a   :  { %12962 = vmatpush3.bf16.msra.mxu1 %v12961_v37  ;;  %14496 = vrot.lane.b32.xlu0 %v17235_v38, %s15496_s0  ;;  %v9977_v38 = vld [vmem:[%s21620_s4 + $0xc8] sm:$0xff] }
 0x37c   :  { %v14297_v22 = vpop.permute.xlu0 %14296  ;;  %14511 = vrot.lane.b32.xlu1 %v17281_v31, %s15496_s0  ;;  %v22062_v31 = vmov 0.0|0.0  }
 0x37d   :  { %v14299_v36 = vunpack.i.h.bf16 %v14297_v22  ;;  %v14298_v29 = vunpack.i.l.bf16 %v14297_v22 }
 0x37e   :  { %14506 = vrot.lane.b32.xlu0 %v17598_v27, %s15496_s0 }
 0x37f   :  { %v12963_v8 = vpack.c.bf16 %v14299_v36, %v14298_v29 }
 0x380   :  { %14526 = vrot.lane.b32.xlu1 %v16977_v34, %s15496_s0 }
 0x381   :  { %12964 = vmatprep.subr.bf16.mxu1 %v12963_v8 }
 0x382   :  { %12966 = vmatpush3.bf16.msra.mxu1 %v12965_v49  ;;  %14516 = vrot.lane.b32.xlu0 %v16937_v10, %s15496_s0  ;;  %v10040_v10 = vld [vmem:[%s21620_s4 + $0x200] sm:$0xff] }
 0x383   :  { %12967 = vmatprep.subr.bf16.mxu1 %v22062_v31  ;;  %3060 = vmatprep.mubr.f32.mxu0 %v10040_v10 }
 0x384   :  { %v14307_v39 = vpop.permute.xlu0 %14306  ;;  %14536 = vrot.lane.b32.xlu1 %v17017_v12, %s15496_s0  ;;  %v9979_v12 = vld [vmem:[%s21620_s4 + $0xd8] sm:$0xff] }
 0x385   :  { %v14309_v27 = vunpack.i.h.bf16 %v14307_v39  ;;  %v14308_v34 = vunpack.i.l.bf16 %v14307_v39  ;;  %2085 = vmatmul.mubr.f32.vlgmr.msra.gmra.mrb[88].mxu1 %v9973_v50 }
 0x386   :  { %2089 = vmatprep.mubr.f32.mxu1 %v9977_v38  ;;  %14521 = vrot.lane.b32.xlu0 %v17323_v13, %s15496_s0  ;;  %v9983_v13 = vld [vmem:[%s21620_s4 + $0xf8] sm:$0xff] }
 0x387   :  { %v12968_v23 = vpack.c.bf16 %v14309_v27, %v14308_v34 }
 0x388   :  { %14546 = vrot.lane.b32.xlu1 %v17458_v14, %s15494_s3 }
 0x389   :  { %12969 = vmatpush3.bf16.msra.mxu1 %v12968_v23 }
 0x38a   :  { %12970 = vmatprep.subr.bf16.mxu1 %v22062_v31  ;;  %2090 = vmatmul.mubr.f32.gmra.mrb[90].mxu1 %v9976_v55  ;;  %v9975_v55 = vld [vmem:[%s21620_s4 + $0xb8] sm:$0xff] }
 0x38b   :  { %2094 = vmatprep.mubr.f32.mxu1 %v9980_v60  ;;  %14531 = vrot.lane.b32.xlu0 %v17365_v54, %s15496_s0  ;;  %v9985_v54 = vld [vmem:[%s21620_s4 + $0x108] sm:$0xff]  ;;  %v22063_v60 = vpack.c.bf16 %v17045_v48, %v17031_v41  ;;  %v22065_v41 = vpack.c.bf16 %v17089_v61, %v17073_v40  ;;  %v22067_v40 = vpack.c.bf16 %v17133_v17, %v17117_v25  ;;  %v9984_v25 = vld [vmem:[%s21620_s4 + $0x100] sm:$0xff] }
 0x38c   :  { %v14312_v59 = vpop.permute.xlu1 %14311  ;;  %14556 = vrot.lane.b32.xlu1 %v17502_v56, %s15494_s3  ;;  %v9981_v61 = vld [vmem:[%s21620_s4 + $0xe8] sm:$0xff] }
 0x38d   :  { %v14314_v0 = vunpack.i.h.bf16 %v14312_v59  ;;  %v14313_v11 = vunpack.i.l.bf16 %v14312_v59  ;;  %v22070_v17 = vld [vmem:[#allocation107_spill] sm:$0xff] }
 0x38e   :  { %2095 = vmatmul.mubr.f32.gmra.mrb[92].mxu1 %v9979_v12  ;;  %v22064_v12 = vpack.c.bf16 %v16725_v58, %v16717_v32  ;;  %v22066_v58 = vpack.c.bf16 %v16765_v43, %v16751_v30  ;;  %v22068_v43 = vld [vmem:[#allocation17_spill] sm:$0xff] }
 0x38f   :  { %v12971_v3 = vpack.c.bf16 %v14314_v0, %v14313_v11  ;;  %2099 = vmatprep.mubr.f32.mxu1 %v9983_v13  ;;  %14541 = vrot.lane.b32.xlu0 %v17416_v21, %s15494_s3  ;;  %v9978_v13 = vld [vmem:[%s21620_s4 + $0xd0] sm:$0xff]  ;;  %v22069_v0 = vpack.c.bf16 %v16805_v33, %v22068_v43 }
 0x390   :  { %2549 = vrot.lane.b32.xlu1 %v17600_v19, %s15495_s25  ;;  %v22092_v43 = vld [vmem:[#allocation132_spill] sm:$0xff] }
 0x391   :  { %12972 = vmatpush3.bf16.msra.mxu1 %v12971_v3  ;;  %v22071_v3 = vld [vmem:[#allocation102_spill] sm:$0xff] }
 0x392   :  { %12973 = vmatprep.subr.bf16.mxu1 %v22062_v31  ;;  %2100 = vmatmul.mubr.f32.gmra.mrb[94].mxu1 %v9982_v6  ;;  %v22072_v6 = vpack.c.bf16 %v22070_v17, %v22071_v3  ;;  %v1782_v17 = vld [vmem:[%s21620_s4 + $0x8] sm:$0xff] }
 0x393   :  { %2104 = vmatprep.mubr.f32.mxu1 %v9986_v16  ;;  %14551 = vrot.lane.b32.xlu0 %v17061_v1, %s15494_s3  ;;  %v22073_v16 = vld [vmem:[#allocation141_spill] sm:$0xff] }
 0x394   :  { %14566 = vrot.lane.b32.xlu1 %v17105_v5, %s15494_s3  ;;  %v14317_v47 = vpop.permute.xlu0 %14316 }
 0x395   :  { %v14319_v28 = vunpack.i.h.bf16 %v14317_v47  ;;  %v14318_v35 = vunpack.i.l.bf16 %v14317_v47 }
 0x396   :  { %2105 = vmatmul.mubr.f32.gmra.mrb[96].mxu1 %v9985_v54  ;;  %v22074_v54 = vld [vmem:[#allocation31_spill] sm:$0xff] }
 0x397   :  { %2109 = vmatprep.mubr.f32.mxu1 %v9989_v26  ;;  %14561 = vrot.lane.b32.xlu0 %v16741_v4, %s15494_s3  ;;  %v12974_v37 = vpack.c.bf16 %v14319_v28, %v14318_v35  ;;  %v22075_v26 = vld [vmem:[#allocation26_spill] sm:$0xff]  ;;  %v9987_v28 = vld [vmem:[%s21620_s4 + $0x118] sm:$0xff] }
 0x398   :  { %14576 = vrot.lane.b32.xlu1 %v16781_v57, %s15494_s3  ;;  %v22076_v47 = vpack.c.bf16 %v22074_v54, %v22075_v26  ;;  %v22077_v35 = vld [vmem:[#allocation117_spill] sm:$0xff]  ;;  %v22096_v54 = vld [vmem:[#allocation56_spill] sm:$0xff] }
 0x399   :  { %12975 = vmatpush3.bf16.msra.mxu1 %v12974_v37 }
 0x39a   :  { %2110 = vmatmul.mubr.f32.gmra.mrb[98].mxu1 %v9988_v53  ;;  %12976 = vmatprep.subr.bf16.mxu1 %v22062_v31 }
 0x39b   :  { %2114 = vmatprep.mubr.f32.mxu1 %v9992_v52  ;;  %14571 = vrot.lane.b32.xlu0 %v17544_v51, %s15494_s3  ;;  %v22078_v52 = vld [vmem:[#allocation112_spill] sm:$0xff] }
 0x39c   :  { %14586 = vrot.lane.b32.xlu1 %v17586_v46, %s15494_s3  ;;  %v14322_v42 = vpop.permute.xlu1 %14321  ;;  %v22079_v37 = vpack.c.bf16 %v22077_v35, %v22078_v52  ;;  %v22099_v35 = vld [vmem:[#allocation143_spill] sm:$0xff] }
 0x39d   :  { %v14324_v63 = vunpack.i.h.bf16 %v14322_v42  ;;  %v14323_v22 = vunpack.i.l.bf16 %v14322_v42 }
 0x39e   :  { %2115 = vmatmul.mubr.f32.gmra.mrb[100].mxu1 %v9991_v7  ;;  %v22080_v7 = vld [vmem:[#allocation65_spill] sm:$0xff] }
 0x39f   :  { %11986 = vmatprep.mubr.msk.f32.mxu1 %vm15492_vm0, %v21855_v44  ;;  %14581 = vrot.lane.b32.xlu0 %v17149_v62, %s15494_s3  ;;  %v12977_v36 = vpack.c.bf16 %v14324_v63, %v14323_v22  ;;  %v22081_v63 = vld [vmem:[#allocation41_spill] sm:$0xff]  ;;  %v22082_v22 = vld [vmem:[#allocation36_spill] sm:$0xff] }
 0x3a0   :  { %14596 = vrot.lane.b32.xlu1 %v17195_v20, %s15494_s3 }
 0x3a1   :  { %12978 = vmatpush3.bf16.msra.mxu1 %v12977_v36  ;;  %v22083_v36 = vpack.c.bf16 %v22081_v63, %v22082_v22  ;;  %v22101_v63 = vld [vmem:[#allocation72_spill] sm:$0xff]  ;;  %v22102_v22 = vld [vmem:[#allocation67_spill] sm:$0xff] }
 0x3a2   :  { %12979 = vmatprep.subr.bf16.mxu1 %v22062_v31 }
 0x3a3   :  { %14591 = vrot.lane.b32.xlu0 %v16821_v9, %s15494_s3 }
 0x3a4   :  { %14606 = vrot.lane.b32.xlu1 %v17061_v1, %s15495_s25  ;;  %v14327_v8 = vpop.permute.xlu0 %14326 }
 0x3a5   :  { %v14329_v49 = vunpack.i.h.bf16 %v14327_v8  ;;  %v14328_v50 = vunpack.i.l.bf16 %v14327_v8  ;;  %v9990_v8 = vld [vmem:[%s21620_s4 + $0x130] sm:$0xff] }
 0x3a6   :  { %v1952_v29 = vpop.permute.xlu1 %1951 }
 0x3a7   :  { %14601 = vrot.lane.b32.xlu0 %v16861_v45, %s15494_s3  ;;  %v12980_v38 = vpack.c.bf16 %v14329_v49, %v14328_v50  ;;  %v22084_v49 = vld [vmem:[#allocation127_spill] sm:$0xff]  ;;  %v22085_v50 = vld [vmem:[#allocation122_spill] sm:$0xff] }
 0x3a8   :  { %14611 = vrot.lane.b32.xlu1 %v16741_v4, %s15495_s25  ;;  %v17779_v27 = vpop.permute.xlu0 %14331 }
 0x3a9   :  { %12981 = vmatpush3.bf16.msra.mxu1 %v12980_v38  ;;  %v22086_v38 = vpack.c.bf16 %v22084_v49, %v22085_v50  ;;  %v1781_v49 = vld [vmem:[%s21620_s4] sm:$0xff] }
 0x3aa   :  { %v17777_v39 = vpop.permute.xlu1 %14336  ;;  %11984 = vmatprep.subr.mxu1 %v21855_v44 }
 0x3ab   :  { %14616 = vrot.lane.b32.xlu0 %v17241_v2, %s15494_s3 }
 0x3ac   :  { %2929 = vrot.lane.b32.xlu1 %v17600_v19, %s15496_s0  ;;  %v17788_v23 = vpop.permute.xlu0 %14341 }
 0x3ad   :  { %11985 = vmatpush3.msk.msra.mxu1 %vm2017_vm3, %v1952_v29 }
 0x3ae   :  { %v17786_v34 = vpop.permute.xlu1 %14346  ;;  %12983 = vmatprep.subr.bf16.mxu1 %v22063_v60  ;;  %11987 = vmatmul.mubr.msk.f32.vlgmr.msra.gmra.mrb[102].mxu1 %vm1995_vm4, %v9975_v55  ;;  %v22087_v55 = vld [vmem:[#allocation152_spill] sm:$0xff] }
 0x3af   :  { %14626 = vrot.lane.b32.xlu0 %v17105_v5, %s15495_s25  ;;  %12985 = vmatpush3.bf16.msra.mxu1 %v22064_v12  ;;  %v22088_v12 = vld [vmem:[#allocation51_spill] sm:$0xff] }
 0x3b0   :  { %14621 = vrot.lane.b32.xlu1 %v16901_v24, %s15494_s3  ;;  %v17807_v59 = vpop.permute.xlu0 %14351  ;;  %11989 = vmatprep.mubr.msk.f32.mxu1 %vm15492_vm0, %v21855_v44 }
 0x3b1   :  { %12987 = vmatprep.subr.bf16.mxu1 %v22065_v41 }
 0x3b2   :  { %v17802_v10 = vpop.permute.xlu1 %14356  ;;  %11990 = vmatmul.mubr.msk.f32.gmra.mrb[104].mxu1 %vm1995_vm4, %v9978_v13  ;;  %v22089_v13 = vld [vmem:[#allocation46_spill] sm:$0xff] }
 0x3b3   :  { %14636 = vrot.lane.b32.xlu0 %v17287_v15, %s15494_s3  ;;  %12989 = vmatpush3.bf16.msra.mxu1 %v22066_v58  ;;  %v22090_v41 = vpack.c.bf16 %v22088_v12, %v22089_v13  ;;  %v22105_v12 = vld [vmem:[#allocation154_spill] sm:$0xff] }
 0x3b4   :  { %14631 = vrot.lane.b32.xlu1 %v16781_v57, %s15495_s25  ;;  %v17827_v48 = vpop.permute.xlu0 %14361  ;;  %11992 = vmatprep.mubr.msk.f32.mxu1 %vm15492_vm0, %v21855_v44 }
 0x3b5   :  { %12991 = vmatprep.subr.bf16.mxu1 %v22067_v40  ;;  %v22091_v40 = vld [vmem:[#allocation137_spill] sm:$0xff] }
 0x3b6   :  { %v17822_v32 = vpop.permute.xlu1 %14366  ;;  %11993 = vmatmul.mubr.msk.f32.gmra.mrb[106].mxu1 %vm1995_vm4, %v9981_v61  ;;  %v9993_v61 = vld [vmem:[%s21620_s4 + $0x148] sm:$0x3] }
 0x3b7   :  { %14646 = vrot.lane.b32.xlu0 %v17149_v62, %s15495_s25  ;;  %12993 = vmatpush3.bf16.msra.mxu1 %v22069_v0  ;;  %v22093_v0 = vpack.c.bf16 %v22091_v40, %v22092_v43 }
 0x3b8   :  { %14641 = vrot.lane.b32.xlu1 %v16941_v18, %s15494_s3  ;;  %v17847_v11 = vpop.permute.xlu0 %14371  ;;  %11995 = vmatprep.mubr.msk.f32.mxu1 %vm15492_vm0, %v21855_v44 }
 0x3b9   :  { %12995 = vmatprep.subr.bf16.mxu1 %v22072_v6  ;;  %v22095_v6 = vld [vmem:[#allocation61_spill] sm:$0xff] }
 0x3ba   :  { %v17842_v30 = vpop.permute.xlu1 %14376  ;;  %11996 = vmatmul.mubr.msk.f32.gmra.mrb[108].mxu1 %vm1995_vm4, %v9984_v25  ;;  %v22094_v25 = vld [vmem:[#allocation76_spill] sm:$0xff]  ;;  %v22097_v26 = vpack.c.bf16 %v22095_v6, %v22096_v54  ;;  %v22108_v6 = vld [vmem:[#allocation165_spill] sm:$0xff] }
 0x3bb   :  { %14656 = vrot.lane.b32.xlu0 %v22073_v16, %s15494_s3  ;;  %12997 = vmatpush3.bf16.msra.mxu1 %v22076_v47 }
 0x3bc   :  { %14651 = vrot.lane.b32.xlu1 %v16821_v9, %s15495_s25  ;;  %v17867_v53 = vpop.permute.xlu0 %14381  ;;  %11998 = vmatprep.mubr.msk.f32.mxu1 %vm15492_vm0, %v21855_v44 }
 0x3bd   :  { %12999 = vmatprep.subr.bf16.mxu1 %v22079_v37 }
 0x3be   :  { %v17862_v33 = vpop.permute.xlu1 %14386  ;;  %11999 = vmatmul.mubr.msk.f32.gmra.mrb[110].mxu1 %vm1995_vm4, %v9987_v28  ;;  %v22098_v28 = vld [vmem:[#allocation148_spill] sm:$0xff] }
 0x3bf   :  { %14666 = vrot.lane.b32.xlu0 %v17195_v20, %s15495_s25  ;;  %13001 = vmatpush3.bf16.msra.mxu1 %v22083_v36  ;;  %v22100_v52 = vpack.c.bf16 %v22098_v28, %v22099_v35  ;;  %v22103_v36 = vpack.c.bf16 %v22101_v63, %v22102_v22  ;;  %v1787_v28 = vld [vmem:[%s21620_s4 + $0x30] sm:$0xff] }
 0x3c0   :  { %14661 = vrot.lane.b32.xlu1 %v22080_v7, %s15494_s3  ;;  %v17887_v29 = vpop.permute.xlu0 %14391  ;;  %12001 = vmatprep.mubr.msk.f32.mxu1 %vm15492_vm0, %v21855_v44 }
 0x3c1   :  { %13003 = vmatprep.subr.bf16.mxu1 %v22086_v38  ;;  %v22104_v38 = vld [vmem:[#allocation159_spill] sm:$0xff] }
 0x3c2   :  { %v17882_v42 = vpop.permute.xlu1 %14396  ;;  %12002 = vmatmul.mubr.msk.f32.gmra.mrb[112].mxu1 %vm1995_vm4, %v9990_v8  ;;  %v22106_v13 = vpack.c.bf16 %v22104_v38, %v22105_v12  ;;  %v22110_v38 = vld [vmem:[#allocation179_spill] sm:$0xff] }
 0x3c3   :  { %14676 = vrot.lane.b32.xlu0 %v22087_v55, %s15494_s3  ;;  %13005 = vmatpush3.bf16.msra.mxu1 %v22090_v41  ;;  %v22111_v12 = vld [vmem:[#allocation175_spill] sm:$0xff] }
 0x3c4   :  { %14671 = vrot.lane.b32.xlu1 %v16861_v45, %s15495_s25  ;;  %v17907_v58 = vpop.permute.xlu0 %14401  ;;  %12004 = vmatprep.mubr.msk.f32.mxu1 %vm15492_vm0, %v21855_v44 }
 0x3c5   :  { %13007 = vmatprep.subr.bf16.mxu1 %v22093_v0 }
 0x3c6   :  { %v17902_v60 = vpop.permute.xlu1 %14406  ;;  %12005 = vmatmul.mubr.msk.f32.gmra.mrb[114].mxu1 %vm1995_vm4, %v9993_v61  ;;  %v1784_v61 = vld [vmem:[%s21620_s4 + $0x18] sm:$0xff] }
 0x3c7   :  { %14686 = vrot.lane.b32.xlu0 %v17241_v2, %s15495_s25  ;;  %13009 = vmatpush3.bf16.msra.mxu1 %v22097_v26 }
 0x3c8   :  { %14681 = vrot.lane.b32.xlu1 %v22094_v25, %s15494_s3  ;;  %v17930_v47 = vpop.permute.xlu0 %14411  ;;  %2307 = vmatprep.mubr.f32.mxu1 %v1782_v17  ;;  %v22107_v17 = vld [vmem:[#allocation169_spill] sm:$0xff] }
 0x3c9   :  { %13011 = vmatprep.subr.bf16.mxu1 %v22100_v52  ;;  %v22109_v54 = vpack.c.bf16 %v22107_v17, %v22108_v6 }
 0x3ca   :  { %v17925_v3 = vpop.permute.xlu1 %14416 }
 0x3cb   :  { %14696 = vrot.lane.b32.xlu0 %v17061_v1, %s15496_s0  ;;  %13013 = vmatpush3.bf16.msra.mxu1 %v22103_v36  ;;  %v1785_v1 = vld [vmem:[%s21620_s4 + $0x20] sm:$0xff] }
 0x3cc   :  { %14691 = vrot.lane.b32.xlu1 %v16901_v24, %s15495_s25  ;;  %v17944_v8 = vpop.permute.xlu0 %14421  ;;  %13014 = vmatprep.subr.bf16.mxu1 %v22062_v31 }
 0x3ce   :  { %v17939_v37 = vpop.permute.xlu1 %14426  ;;  %2308 = vmatmul.mubr.f32.vlgmr.msra.gmra.mrb[116].mxu1 %v1781_v49 }
 0x3cf   :  { %14706 = vrot.lane.b32.xlu0 %v16741_v4, %s15496_s0  ;;  %13016 = vmatpush3.bf16.msra.mxu1 %v22106_v13  ;;  %v1788_v4 = vld [vmem:[%s21620_s4 + $0x38] sm:$0xff]  ;;  %v22112_v13 = vpack.c.bf16 %v22110_v38, %v22111_v12 }
 0x3d0   :  { %14701 = vrot.lane.b32.xlu1 %v17287_v15, %s15495_s25  ;;  %v17960_v41 = vpop.permute.xlu0 %14431  ;;  %2312 = vmatprep.mubr.f32.mxu1 %v1785_v1 }
 0x3d1   :  { %13017 = vmatprep.subr.bf16.mxu1 %v22062_v31 }
 0x3d2   :  { %v14442_v50 = vpop.permute.xlu1 %14441  ;;  %2313 = vmatmul.mubr.f32.gmra.mrb[118].mxu1 %v1784_v61 }
 0x3d3   :  { %14716 = vrot.lane.b32.xlu0 %v17105_v5, %s15496_s0  ;;  %v14444_v43 = vunpack.i.h.bf16 %v14442_v50  ;;  %v14443_v0 = vunpack.i.l.bf16 %v14442_v50  ;;  %13019 = vmatpush3.bf16.msra.mxu1 %v22109_v54  ;;  %v1791_v5 = vld [vmem:[%s21620_s4 + $0x50] sm:$0xff] }
 0x3d4   :  { %14711 = vrot.lane.b32.xlu1 %v16941_v18, %s15495_s25  ;;  %v14437_v26 = vpop.permute.xlu0 %14436  ;;  %2317 = vmatprep.mubr.f32.mxu1 %v1788_v4  ;;  %v1790_v4 = vld [vmem:[%s21620_s4 + $0x48] sm:$0xff] }
 0x3d5   :  { %v14439_v63 = vunpack.i.h.bf16 %v14437_v26  ;;  %v14438_v22 = vunpack.i.l.bf16 %v14437_v26  ;;  %13020 = vmatprep.subr.bf16.mxu1 %v22062_v31  ;;  %v13078_v50 = vpack.c.bf16 %v14444_v43, %v14443_v0  ;;  %v22113_v43 = vld [vmem:[#allocation189_spill] sm:$0xff] }
 0x3d6   :  { %v14452_v40 = vpop.permute.xlu1 %14451  ;;  %2318 = vmatmul.mubr.f32.gmra.mrb[120].mxu1 %v1787_v28  ;;  %v22114_v0 = vld [vmem:[#allocation185_spill] sm:$0xff]  ;;  %v1797_v28 = vld [vmem:[%s21620_s4 + $0x80] sm:$0xff] }
 0x3d7   :  { %v14454_v35 = vunpack.i.h.bf16 %v14452_v40  ;;  %v14453_v52 = vunpack.i.l.bf16 %v14452_v40  ;;  %14726 = vrot.lane.b32.xlu0 %v16781_v57, %s15496_s0  ;;  %v13076_v36 = vpack.c.bf16 %v14439_v63, %v14438_v22  ;;  %13022 = vmatpush3.bf16.msra.mxu1 %v22112_v13  ;;  %v1794_v57 = vld [vmem:[%s21620_s4 + $0x68] sm:$0xff]  ;;  %v22115_v17 = vpack.c.bf16 %v22113_v43, %v22114_v0  ;;  %v22119_v43 = vld [vmem:[#allocation206_spill] sm:$0xff]  ;;  %v1800_v0 = vld [vmem:[%s21620_s4 + $0x98] sm:$0x3] }
 0x3d8   :  { %14721 = vrot.lane.b32.xlu1 %v22073_v16, %s15495_s25  ;;  %v17992_v61 = vpop.permute.xlu0 %14446  ;;  %2322 = vmatprep.mubr.f32.mxu1 %v1791_v5  ;;  %v22116_v5 = vld [vmem:[#allocation199_spill] sm:$0xff] }
 0x3d9   :  { %v13080_v1 = vpack.c.bf16 %v14454_v35, %v14453_v52  ;;  %13077 = vmatprep.subr.bf16.mxu0 %v13076_v36  ;;  %13023 = vmatprep.subr.bf16.mxu1 %v22062_v31  ;;  %v14334_v35 = vunpack.i.h.bf16 %v17779_v27  ;;  %v14333_v52 = vunpack.i.l.bf16 %v17779_v27  ;;  %v22117_v36 = vld [vmem:[#allocation195_spill] sm:$0xff] }
 0x3da   :  { %v17987_v49 = vpop.permute.xlu1 %14461  ;;  %13079 = vmatpush3.bf16.msra.mxu0 %v13078_v50  ;;  %2323 = vmatmul.mubr.f32.gmra.mrb[122].mxu1 %v1790_v4 }
 0x3db   :  { %14736 = vrot.lane.b32.xlu0 %v17149_v62, %s15496_s0  ;;  %13081 = vmatprep.subr.bf16.mxu0 %v13080_v1  ;;  %v1793_v62 = vld [vmem:[%s21620_s4 + $0x60] sm:$0xff]  ;;  %v22118_v1 = vpack.c.bf16 %v22116_v5, %v22117_v36 }
 0x3dc   :  { %13025 = vmatpush3.bf16.msra.mxu1 %v22115_v17  ;;  %v14457_v6 = vpop.permute.xlu0 %14456  ;;  %14731 = vrot.lane.b32.xlu1 %v22080_v7, %s15495_s25  ;;  %v13029_v17 = vpack.c.bf16 %v14334_v35, %v14333_v52  ;;  %v14338_v35 = vunpack.i.l.bf16 %v17777_v39 }
 0x3dd   :  { %v14459_v54 = vunpack.i.h.bf16 %v14457_v6  ;;  %v14458_v26 = vunpack.i.l.bf16 %v14457_v6  ;;  %2327 = vmatprep.mubr.f32.mxu1 %v1794_v57  ;;  %13026 = vmatprep.subr.bf16.mxu1 %v22062_v31 }
 0x3de   :  { %v14472_v40 = vpop.permute.xlu1 %14471  ;;  %2328 = vmatmul.mubr.f32.gmra.mrb[124].mxu1 %v1793_v62 }
 0x3df   :  { %14746 = vrot.lane.b32.xlu0 %v16821_v9, %s15496_s0  ;;  %v13082_v63 = vpack.c.bf16 %v14459_v54, %v14458_v26  ;;  %v1796_v9 = vld [vmem:[%s21620_s4 + $0x78] sm:$0xff]  ;;  %v14474_v13 = vunpack.i.h.bf16 %v14472_v40  ;;  %v14473_v4 = vunpack.i.l.bf16 %v14472_v40  ;;  %2332 = vmatprep.mubr.f32.mxu1 %v1797_v28  ;;  %v1799_v54 = vld [vmem:[%s21620_s4 + $0x90] sm:$0x3]  ;;  %v14339_v28 = vunpack.i.h.bf16 %v17777_v39 }
 0x3e0   :  { %13028 = vmatpush3.bf16.msra.mxu1 %v22118_v1  ;;  %v14467_v50 = vpop.permute.xlu0 %14466  ;;  %14741 = vrot.lane.b32.xlu1 %v22087_v55, %s15495_s25  ;;  %v1783_v39 = vld [vmem:[%s21620_s4 + $0x10] sm:$0xff] }
 0x3e1   :  { %v14469_v27 = vunpack.i.h.bf16 %v14467_v50  ;;  %v14468_v57 = vunpack.i.l.bf16 %v14467_v50  ;;  %13083 = vmatpush3.bf16.msra.mxu0 %v13082_v63  ;;  %12027 = vmatprep.subr.mxu1 %v21855_v44  ;;  %v13086_v52 = vpack.c.bf16 %v14474_v13, %v14473_v4  ;;  %v14343_v63 = vunpack.i.l.bf16 %v17788_v23 }
 0x3e2   :  { %v14482_v22 = vpop.permute.xlu1 %14481  ;;  %2333 = vmatmul.mubr.f32.gmra.mrb[126].mxu1 %v1796_v9  ;;  %v13031_v36 = vpack.c.bf16 %v14339_v28, %v14338_v35  ;;  %v14354_v9 = vunpack.i.h.bf16 %v17807_v59  ;;  %v14363_v35 = vunpack.i.l.bf16 %v17827_v48 }
 0x3e3   :  { %v14484_v38 = vunpack.i.h.bf16 %v14482_v22  ;;  %v14483_v12 = vunpack.i.l.bf16 %v14482_v22  ;;  %3604 = vrot.lane.b32.xlu0 %v22119_v43, %s15494_s3  ;;  %v13084_v6 = vpack.c.bf16 %v14469_v27, %v14468_v57  ;;  %2337 = vmatprep.mubr.f32.mxu1 %v1800_v0 }
 0x3e4   :  { %12028 = vmatpush3.msk.msra.mxu1 %vm2017_vm3, %v17600_v19  ;;  %v18037_v40 = vpop.permute.xlu0 %14476  ;;  %14751 = vrot.lane.b32.xlu1 %v22094_v25, %s15495_s25  ;;  %v14344_v19 = vunpack.i.h.bf16 %v17788_v23  ;;  %v14348_v23 = vunpack.i.l.bf16 %v17786_v34 }
 0x3e5   :  { %v13088_v26 = vpack.c.bf16 %v14484_v38, %v14483_v12  ;;  %13030 = vmatprep.subr.bf16.mxu1 %v13029_v17  ;;  %13085 = vmatprep.subr.bf16.mxu0 %v13084_v6  ;;  %v14353_v38 = vunpack.i.l.bf16 %v17807_v59  ;;  %v1786_v59 = vld [vmem:[%s21620_s4 + $0x28] sm:$0xff] }
 0x3e6   :  { %v18033_v62 = vpop.permute.xlu1 %14491  ;;  %2338 = vmatmul.mubr.f32.gmra.mrb[128].mxu1 %v1799_v54  ;;  %13087 = vmatpush3.bf16.msra.mxu0 %v13086_v52  ;;  %v13033_v12 = vpack.c.bf16 %v14344_v19, %v14343_v63  ;;  %v14359_v54 = vunpack.i.h.bf16 %v17802_v10 }
 0x3e7   :  { %14756 = vrot.lane.b32.xlu0 %v17195_v20, %s15496_s0  ;;  %13089 = vmatprep.subr.bf16.mxu0 %v13088_v26  ;;  %v14349_v20 = vunpack.i.h.bf16 %v17786_v34  ;;  %v14358_v26 = vunpack.i.l.bf16 %v17802_v10  ;;  %v13037_v28 = vpack.c.bf16 %v14354_v9, %v14353_v38  ;;  %v14378_v38 = vunpack.i.l.bf16 %v17842_v30 }
 0x3e8   :  { %v14487_v5 = vpop.permute.xlu0 %14486  ;;  %14761 = vrot.lane.b32.xlu1 %v16861_v45, %s15496_s0  ;;  %12029 = vmatprep.mubr.msk.f32.mxu1 %vm15492_vm0, %v21855_v44 }
 0x3e9   :  { %v14489_v1 = vunpack.i.h.bf16 %v14487_v5  ;;  %v14488_v50 = vunpack.i.l.bf16 %v14487_v5  ;;  %v13035_v6 = vpack.c.bf16 %v14349_v20, %v14348_v23  ;;  %v13039_v10 = vpack.c.bf16 %v14359_v54, %v14358_v26 }
 0x3ea   :  { %v14502_v22 = vpop.permute.xlu1 %14501  ;;  %12030 = vmatmul.mubr.msk.f32.vlgmr.msra.gmra.mrb[102].mxu1 %vm1995_vm4, %v1783_v39  ;;  %v14369_v39 = vunpack.i.h.bf16 %v17822_v32  ;;  %v14393_v54 = vunpack.i.l.bf16 %v17887_v29 }
 0x3eb   :  { %14766 = vrot.lane.b32.xlu0 %v17241_v2, %s15496_s0  ;;  %v13090_v45 = vpack.c.bf16 %v14489_v1, %v14488_v50  ;;  %v14504_v4 = vunpack.i.h.bf16 %v14502_v22  ;;  %v14503_v27 = vunpack.i.l.bf16 %v14502_v22  ;;  %13032 = vmatpush3.bf16.msra.mxu1 %v13031_v36  ;;  %v14368_v36 = vunpack.i.l.bf16 %v17822_v32 }
 0x3ec   :  { %v14497_v57 = vpop.permute.xlu0 %14496  ;;  %14771 = vrot.lane.b32.xlu1 %v16901_v24, %s15496_s0  ;;  %13034 = vmatprep.subr.bf16.mxu1 %v13033_v12  ;;  %v14364_v24 = vunpack.i.h.bf16 %v17827_v48  ;;  %v1789_v48 = vld [vmem:[%s21620_s4 + $0x40] sm:$0xff]  ;;  %v14374_v1 = vunpack.i.h.bf16 %v17847_v11  ;;  %v14373_v50 = vunpack.i.l.bf16 %v17847_v11  ;;  %v14379_v11 = vunpack.i.h.bf16 %v17842_v30 }
 0x3ed   :  { %v14499_v2 = vunpack.i.h.bf16 %v14497_v57  ;;  %v14498_v17 = vunpack.i.l.bf16 %v14497_v57  ;;  %13091 = vmatpush3.bf16.msra.mxu0 %v13090_v45  ;;  %12032 = vmatprep.mubr.msk.f32.mxu1 %vm15492_vm0, %v21855_v44  ;;  %v13094_v22 = vpack.c.bf16 %v14504_v4, %v14503_v27  ;;  %v13043_v9 = vpack.c.bf16 %v14369_v39, %v14368_v36  ;;  %v1792_v45 = vld [vmem:[%s21620_s4 + $0x58] sm:$0xff] }
 0x3ee   :  { %v14512_v13 = vpop.permute.xlu1 %14511  ;;  %12033 = vmatmul.mubr.msk.f32.gmra.mrb[104].mxu1 %vm1995_vm4, %v1786_v59  ;;  %v14384_v12 = vunpack.i.h.bf16 %v17867_v53  ;;  %v13045_v27 = vpack.c.bf16 %v14374_v1, %v14373_v50  ;;  %v14398_v39 = vunpack.i.l.bf16 %v17882_v42  ;;  %v14404_v36 = vunpack.i.h.bf16 %v17907_v58 }
 0x3ef   :  { %v14514_v34 = vunpack.i.h.bf16 %v14512_v13  ;;  %v14513_v0 = vunpack.i.l.bf16 %v14512_v13  ;;  %14776 = vrot.lane.b32.xlu0 %v17416_v21, %s15495_s25  ;;  %v13092_v52 = vpack.c.bf16 %v14499_v2, %v14498_v17  ;;  %13036 = vmatpush3.bf16.msra.mxu1 %v13035_v6  ;;  %v14383_v13 = vunpack.i.l.bf16 %v17867_v53  ;;  %v1795_v6 = vld [vmem:[%s21620_s4 + $0x70] sm:$0xff] }
 0x3f0   :  { %v18078_v5 = vpop.permute.xlu0 %14506  ;;  %14781 = vrot.lane.b32.xlu1 %v17287_v15, %s15496_s0  ;;  %13038 = vmatprep.subr.bf16.mxu1 %v13037_v28  ;;  %v13041_v15 = vpack.c.bf16 %v14364_v24, %v14363_v35  ;;  %v13047_v2 = vpack.c.bf16 %v14379_v11, %v14378_v38  ;;  %v14389_v17 = vunpack.i.h.bf16 %v17862_v33  ;;  %v14388_v53 = vunpack.i.l.bf16 %v17862_v33  ;;  %v10039_v11 = vld [vmem:[%s21620_s4 + $0x1f8] sm:$0xff]  ;;  %v22121_v38 = vld [vmem:[#allocation80_spill] sm:$0xff] }
 0x3f1   :  { %v13096_v63 = vpack.c.bf16 %v14514_v34, %v14513_v0  ;;  %13093 = vmatprep.subr.bf16.mxu0 %v13092_v52  ;;  %12035 = vmatprep.mubr.msk.f32.mxu1 %vm15492_vm0, %v21855_v44  ;;  %v13049_v26 = vpack.c.bf16 %v14384_v12, %v14383_v13 }
 0x3f2   :  { %v14527_v19 = vpop.permute.xlu1 %14526  ;;  %13095 = vmatpush3.bf16.msra.mxu0 %v13094_v22  ;;  %12036 = vmatmul.mubr.msk.f32.gmra.mrb[106].mxu1 %vm1995_vm4, %v1789_v48  ;;  %v13051_v22 = vpack.c.bf16 %v14389_v17, %v14388_v53  ;;  %v14403_v48 = vunpack.i.l.bf16 %v17907_v58  ;;  %v14409_v58 = vunpack.i.h.bf16 %v17902_v60 }
 0x3f3   :  { %14786 = vrot.lane.b32.xlu0 %v16941_v18, %s15496_s0  ;;  %13097 = vmatprep.subr.bf16.mxu0 %v13096_v63  ;;  %v14529_v34 = vunpack.i.h.bf16 %v14527_v19  ;;  %v14528_v30 = vunpack.i.l.bf16 %v14527_v19 }
 0x3f4   :  { %13040 = vmatpush3.bf16.msra.mxu1 %v13039_v10  ;;  %v14517_v32 = vpop.permute.xlu0 %14516  ;;  %14791 = vrot.lane.b32.xlu1 %v17458_v14, %s15495_s25  ;;  %v14399_v10 = vunpack.i.h.bf16 %v17882_v42 }
 0x3f5   :  { %13042 = vmatprep.subr.bf16.mxu1 %v13041_v15  ;;  %v14519_v18 = vunpack.i.h.bf16 %v14517_v32  ;;  %v14518_v23 = vunpack.i.l.bf16 %v14517_v32  ;;  %12038 = vmatprep.mubr.msk.f32.mxu1 %vm15492_vm0, %v21855_v44  ;;  %v13102_v33 = vpack.c.bf16 %v14529_v34, %v14528_v30  ;;  %v14408_v32 = vunpack.i.l.bf16 %v17902_v60  ;;  %v22120_v60 = vld [vmem:[#allocation83_spill] sm:$0xff]  ;;  %v10011_v34 = vld [vmem:[%s21620_s4 + $0x158] sm:$0xff]  ;;  %v22123_v30 = vld [vmem:[#allocation6_spill] sm:$0xff] }
 0x3f6   :  { %v18093_v20 = vpop.permute.xlu1 %14536  ;;  %12039 = vmatmul.mubr.msk.f32.gmra.mrb[108].mxu1 %vm1995_vm4, %v1792_v45  ;;  %v22122_v45 = vpack.c.bf16 %v22120_v60, %v22121_v38  ;;  %v22142_v38 = vld [vmem:[#allocation93_spill] sm:$0xff] }
 0x3f7   :  { %14796 = vrot.lane.b32.xlu0 %v22073_v16, %s15496_s0  ;;  %v13098_v4 = vpack.c.bf16 %v14519_v18, %v14518_v23  ;;  %12041 = vmatprep.mubr.msk.f32.mxu1 %vm15492_vm0, %v21855_v44  ;;  %v14539_v52 = vunpack.i.h.bf16 %v18093_v20  ;;  %v14538_v19 = vunpack.i.l.bf16 %v18093_v20  ;;  %v13055_v20 = vpack.c.bf16 %v14399_v10, %v14398_v39  ;;  %v1801_v23 = vld [vmem:[%s21620_s4 + $0xa0] sm:$0x3]  ;;  %v22135_v39 = vld [vmem:[#allocation85_spill] sm:$0xff] }
 0x3f8   :  { %13044 = vmatpush3.bf16.msra.mxu1 %v13043_v9  ;;  %v14522_v0 = vpop.permute.xlu0 %14521  ;;  %14801 = vrot.lane.b32.xlu1 %v22080_v7, %s15496_s0  ;;  %v14394_v7 = vunpack.i.h.bf16 %v17887_v29  ;;  %v13057_v18 = vpack.c.bf16 %v14404_v36, %v14403_v48  ;;  %v13059_v13 = vpack.c.bf16 %v14409_v58, %v14408_v32  ;;  %v10017_v36 = vld [vmem:[%s21620_s4 + $0x188] sm:$0xff]  ;;  %v10046_v48 = vld [vmem:[%s21620_s4 + $0x230] sm:$0xff]  ;;  %v22139_v32 = vld [vmem:[#allocation109_spill] sm:$0xff] }
 0x3f9   :  { %13046 = vmatprep.subr.bf16.mxu1 %v13045_v27  ;;  %v14524_v16 = vunpack.i.h.bf16 %v14522_v0  ;;  %v14523_v59 = vunpack.i.l.bf16 %v14522_v0  ;;  %13099 = vmatpush3.bf16.msra.mxu0 %v13098_v4  ;;  %v14414_v4 = vunpack.i.h.bf16 %v17930_v47  ;;  %v14413_v27 = vunpack.i.l.bf16 %v17930_v47  ;;  %v22124_v0 = vld [vmem:[#allocation3_spill] sm:$0xff]  ;;  %v10043_v47 = vld [vmem:[%s21620_s4 + $0x218] sm:$0xff] }
 0x3fa   :  { %v18109_v57 = vpop.permute.xlu1 %14546  ;;  %12042 = vmatmul.mubr.msk.f32.gmra.mrb[110].mxu1 %vm1995_vm4, %v1795_v6  ;;  %v13053_v1 = vpack.c.bf16 %v14394_v7, %v14393_v54  ;;  %v10010_v6 = vld [vmem:[%s21620_s4 + $0x150] sm:$0xff]  ;;  %v14419_v7 = vunpack.i.h.bf16 %v17925_v3  ;;  %v14418_v54 = vunpack.i.l.bf16 %v17925_v3  ;;  %v10013_v3 = vld [vmem:[%s21620_s4 + $0x168] sm:$0xff] }
 0x3fb   :  { %14806 = vrot.lane.b32.xlu0 %v17502_v56, %s15495_s25  ;;  %v13100_v28 = vpack.c.bf16 %v14524_v16, %v14523_v59  ;;  %12044 = vmatprep.mubr.msk.f32.mxu1 %vm15492_vm0, %v21855_v44  ;;  %v22125_v16 = vpack.c.bf16 %v22123_v30, %v22124_v0  ;;  %v22126_v59 = vld [vmem:[#allocation91_spill] sm:$0xff]  ;;  %v22143_v30 = vld [vmem:[#allocation33_spill] sm:$0xff] }
 0x3fc   :  { %13048 = vmatpush3.bf16.msra.mxu1 %v13047_v2  ;;  %14811 = vrot.lane.b32.xlu1 %v22087_v55, %s15496_s0  ;;  %v1798_v55 = vld [vmem:[%s21620_s4 + $0x88] sm:$0xff]  ;;  %v22127_v2 = vld [vmem:[#allocation88_spill] sm:$0xff]  ;;  %v13065_v10 = vpack.c.bf16 %v14419_v7, %v14418_v54  ;;  %v22144_v0 = vld [vmem:[#allocation29_spill] sm:$0xff] }
 0x3fd   :  { %v14532_v35 = vpop.permute.xlu0 %14531  ;;  %13050 = vmatprep.subr.bf16.mxu1 %v13049_v26  ;;  %13101 = vmatprep.subr.bf16.mxu0 %v13100_v28  ;;  %v22128_v17 = vpack.c.bf16 %v22126_v59, %v22127_v2  ;;  %v10014_v26 = vld [vmem:[%s21620_s4 + $0x170] sm:$0xff]  ;;  %v22129_v28 = vld [vmem:[#allocation14_spill] sm:$0xff]  ;;  %v22147_v59 = vld [vmem:[#allocation119_spill] sm:$0xff] }
 0x3fe   :  { %v18125_v24 = vpop.permute.xlu1 %14556  ;;  %v14534_v63 = vunpack.i.h.bf16 %v14532_v35  ;;  %v14533_v29 = vunpack.i.l.bf16 %v14532_v35  ;;  %13103 = vmatpush3.bf16.msra.mxu0 %v13102_v33  ;;  %12045 = vmatmul.mubr.msk.f32.gmra.mrb[112].mxu1 %vm1995_vm4, %v1798_v55  ;;  %v22130_v33 = vld [vmem:[#allocation11_spill] sm:$0xff]  ;;  %v14423_v55 = vunpack.i.l.bf16 %v17944_v8  ;;  %v22150_v54 = vld [vmem:[#allocation25_spill] sm:$0xff] }
 0x3ff   :  { %14816 = vrot.lane.b32.xlu0 %v22094_v25, %s15496_s0  ;;  %v13106_v25 = vpack.c.bf16 %v14539_v52, %v14538_v19  ;;  %12047 = vmatprep.mubr.msk.f32.mxu1 %vm15492_vm0, %v21855_v44  ;;  %v22131_v35 = vpack.c.bf16 %v22129_v28, %v22130_v33  ;;  %v10042_v19 = vld [vmem:[%s21620_s4 + $0x210] sm:$0xff]  ;;  %v22148_v2 = vld [vmem:[#allocation115_spill] sm:$0xff]  ;;  %v14434_v28 = vunpack.i.h.bf16 %v17960_v41  ;;  %v14433_v33 = vunpack.i.l.bf16 %v17960_v41 }
 0x400   :  { %v13104_v50 = vpack.c.bf16 %v14534_v63, %v14533_v29  ;;  %13052 = vmatpush3.bf16.msra.mxu1 %v13051_v22  ;;  %14821 = vrot.lane.b32.xlu1 %v17544_v51, %s15495_s25  ;;  %v22132_v63 = vld [vmem:[#allocation99_spill] sm:$0xff]  ;;  %v22133_v29 = vld [vmem:[#allocation96_spill] sm:$0xff] }
 0x401   :  { %v18145_v42 = vpop.permute.xlu0 %14541  ;;  %13054 = vmatprep.subr.bf16.mxu1 %v13053_v1  ;;  %v22134_v22 = vpack.c.bf16 %v22132_v63, %v22133_v29  ;;  %v22152_v63 = vld [vmem:[#allocation39_spill] sm:$0xff]  ;;  %v10022_v41 = vld [vmem:[%s21620_s4 + $0x1b0] sm:$0xff] }
 0x402   :  { %v18143_v15 = vpop.permute.xlu1 %2549  ;;  %13105 = vmatprep.subr.bf16.mxu0 %v13104_v50  ;;  %12048 = vmatmul.mubr.msk.f32.gmra.mrb[114].mxu1 %vm1995_vm4, %v1801_v23  ;;  %v22136_v50 = vld [vmem:[#allocation23_spill] sm:$0xff] }
 0x403   :  { %14826 = vrot.lane.b32.xlu0 %v17586_v46, %s15495_s25  ;;  %13107 = vmatpush3.bf16.msra.mxu0 %v13106_v25  ;;  %v22137_v25 = vld [vmem:[#allocation20_spill] sm:$0xff] }
 0x404   :  { %13056 = vmatpush3.bf16.msra.mxu1 %v13055_v20  ;;  %13124 = vmatprep.subr.bf16.mxu0 %v22122_v45  ;;  %v22138_v20 = vpack.c.bf16 %v22136_v50, %v22137_v25  ;;  %v13074_v25 = vpack.c.bf16 %v14434_v28, %v14433_v33  ;;  %v22167_v28 = vld [vmem:[#allocation63_spill] sm:$0xff] }
 0x405   :  { %v18167_v12 = vpop.permute.xlu0 %14551  ;;  %13058 = vmatprep.subr.bf16.mxu1 %v13057_v18  ;;  %14836 = vrot.lane.b32.xlu1 %v17458_v14, %s15496_s0  ;;  %v22140_v18 = vld [vmem:[#allocation105_spill] sm:$0xff]  ;;  %v22168_v33 = vld [vmem:[#allocation59_spill] sm:$0xff] }
 0x406   :  { %v18159_v9 = vpop.permute.xlu1 %14566  ;;  %3061 = vmatmul.mubr.f32.vlgmr.msra.gmra.mrb[170].mxu0 %v10039_v11  ;;  %2680 = vmatprep.mubr.f32.mxu1 %v10011_v34  ;;  %v22141_v23 = vpack.c.bf16 %v22139_v32, %v22140_v18  ;;  %v10045_v11 = vld [vmem:[%s21620_s4 + $0x228] sm:$0xff]  ;;  %v10055_v32 = vld [vmem:[%s21620_s4 + $0x278] sm:$0xff] }
 0x407   :  { %13126 = vmatpush3.bf16.msra.mxu0 %v22125_v16  ;;  %14831 = vrot.lane.b32.xlu0 %v17416_v21, %s15496_s0  ;;  %v13062_v21 = vpack.c.bf16 %v14414_v4, %v14413_v27  ;;  %v10020_v27 = vld [vmem:[%s21620_s4 + $0x1a0] sm:$0xff]  ;;  %v10049_v34 = vld [vmem:[%s21620_s4 + $0x248] sm:$0xff]  ;;  %v22145_v16 = vpack.c.bf16 %v22143_v30, %v22144_v0  ;;  %v22159_v18 = vld [vmem:[#allocation53_spill] sm:$0xff] }
 0x408   :  { %13060 = vmatpush3.bf16.msra.mxu1 %v13059_v13  ;;  %13128 = vmatprep.subr.bf16.mxu0 %v22128_v17  ;;  %v14429_v13 = vunpack.i.h.bf16 %v17939_v37  ;;  %v22149_v17 = vpack.c.bf16 %v22147_v59, %v22148_v2  ;;  %v10054_v0 = vld [vmem:[%s21620_s4 + $0x270] sm:$0xff]  ;;  %v10029_v59 = vld [vmem:[%s21620_s4 + $0x1e8] sm:$0x3] }
 0x409   :  { %v18190_v53 = vpop.permute.xlu0 %14561  ;;  %14846 = vrot.lane.b32.xlu1 %v17544_v51, %s15496_s0  ;;  %13061 = vmatprep.subr.bf16.mxu1 %v22062_v31  ;;  %v10058_v2 = vld [vmem:[%s21620_s4 + $0x290] sm:$0x3] }
 0x40a   :  { %v18182_v14 = vpop.permute.xlu1 %14576  ;;  %3065 = vmatprep.mubr.f32.mxu0 %v10043_v47  ;;  %v22146_v47 = vld [vmem:[#allocation8_spill] sm:$0xff] }
 0x40b   :  { %2681 = vmatmul.mubr.f32.vlgmr.msra.gmra.mrb[130].mxu1 %v10010_v6  ;;  %13130 = vmatpush3.bf16.msra.mxu0 %v22131_v35  ;;  %v10048_v6 = vld [vmem:[%s21620_s4 + $0x240] sm:$0xff]  ;;  %v10023_v35 = vld [vmem:[%s21620_s4 + $0x1b8] sm:$0xff] }
 0x40c   :  { %13063 = vmatpush3.bf16.msra.mxu1 %v13062_v21  ;;  %14841 = vrot.lane.b32.xlu0 %v17502_v56, %s15496_s0  ;;  %v14424_v56 = vunpack.i.h.bf16 %v17944_v8  ;;  %v10016_v8 = vld [vmem:[%s21620_s4 + $0x180] sm:$0xff] }
 0x40d   :  { %v18210_v51 = vpop.permute.xlu0 %14571  ;;  %13132 = vmatprep.subr.bf16.mxu0 %v22134_v22  ;;  %2685 = vmatprep.mubr.f32.mxu1 %v10014_v26  ;;  %v22154_v22 = vld [vmem:[#allocation16_spill] sm:$0xff] }
 0x40e   :  { %v18206_v52 = vpop.permute.xlu1 %14586  ;;  %14856 = vrot.lane.b32.xlu1 %v22135_v39, %s15494_s3  ;;  %13064 = vmatprep.subr.bf16.mxu1 %v22062_v31  ;;  %v13068_v60 = vpack.c.bf16 %v14424_v56, %v14423_v55  ;;  %v22156_v56 = vld [vmem:[#allocation125_spill] sm:$0xff] }
 0x40f   :  { %2686 = vmatmul.mubr.f32.gmra.mrb[132].mxu1 %v10013_v3  ;;  %3066 = vmatmul.mubr.f32.gmra.mrb[172].mxu0 %v10042_v19  ;;  %v10052_v3 = vld [vmem:[%s21620_s4 + $0x260] sm:$0xff]  ;;  %v22151_v19 = vld [vmem:[#allocation43_spill] sm:$0xff] }
 0x410   :  { %13066 = vmatpush3.bf16.msra.mxu1 %v13065_v10  ;;  %13134 = vmatpush3.bf16.msra.mxu0 %v22138_v20  ;;  %v22153_v29 = vpack.c.bf16 %v22151_v19, %v22152_v63  ;;  %v22155_v10 = vld [vmem:[#allocation129_spill] sm:$0xff]  ;;  %v22158_v20 = vld [vmem:[#allocation35_spill] sm:$0xff] }
 0x411   :  { %v18237_v58 = vpop.permute.xlu0 %14581  ;;  %14851 = vrot.lane.b32.xlu0 %v17586_v46, %s15496_s0  ;;  %13136 = vmatprep.subr.bf16.mxu0 %v22141_v23  ;;  %v14428_v46 = vunpack.i.l.bf16 %v17939_v37  ;;  %v10019_v37 = vld [vmem:[%s21620_s4 + $0x198] sm:$0xff]  ;;  %v22157_v55 = vpack.c.bf16 %v22155_v10, %v22156_v56  ;;  %v22170_v63 = vld [vmem:[#allocation111_spill] sm:$0xff]  ;;  %v14448_v56 = vunpack.i.l.bf16 %v17992_v61 }
 0x412   :  { %v18232_v1 = vpop.permute.xlu1 %14596  ;;  %2690 = vmatprep.mubr.f32.mxu1 %v10017_v36  ;;  %3070 = vmatprep.mubr.f32.mxu0 %v10046_v48  ;;  %v10051_v36 = vld [vmem:[%s21620_s4 + $0x258] sm:$0xff] }
 0x413   :  { %14866 = vrot.lane.b32.xlu1 %v22142_v38, %s15494_s3  ;;  %2691 = vmatmul.mubr.f32.gmra.mrb[134].mxu1 %v10016_v8  ;;  %v13071_v7 = vpack.c.bf16 %v14429_v13, %v14428_v46  ;;  %v10026_v8 = vld [vmem:[%s21620_s4 + $0x1d0] sm:$0xff]  ;;  %v22160_v23 = vld [vmem:[#allocation49_spill] sm:$0xff] }
 0x414   :  { %13067 = vmatprep.subr.bf16.mxu1 %v22062_v31  ;;  %3071 = vmatmul.mubr.f32.gmra.mrb[174].mxu0 %v10045_v11  ;;  %v22161_v11 = vpack.c.bf16 %v22159_v18, %v22160_v23  ;;  %v22162_v46 = vld [vmem:[#allocation101_spill] sm:$0xff]  ;;  %v22174_v23 = vld [vmem:[#allocation74_spill] sm:$0xff] }
 0x415   :  { %v18257_v4 = vpop.permute.xlu0 %14591  ;;  %13069 = vmatpush3.bf16.msra.mxu1 %v13068_v60  ;;  %13138 = vmatpush3.bf16.msra.mxu0 %v22145_v16  ;;  %v10025_v60 = vld [vmem:[%s21620_s4 + $0x1c8] sm:$0xff] }
 0x416   :  { %v18252_v45 = vpop.permute.xlu1 %14606  ;;  %14861 = vrot.lane.b32.xlu0 %v22146_v47, %s15494_s3  ;;  %13140 = vmatprep.subr.bf16.mxu0 %v22149_v17 }
 0x417   :  { %2695 = vmatprep.mubr.f32.mxu1 %v10020_v27  ;;  %3075 = vmatprep.mubr.f32.mxu0 %v10049_v34  ;;  %v22163_v27 = vld [vmem:[#allocation139_spill] sm:$0xff] }
 0x418   :  { %14881 = vrot.lane.b32.xlu1 %v22150_v54, %s15494_s3  ;;  %2696 = vmatmul.mubr.f32.gmra.mrb[136].mxu1 %v10019_v37  ;;  %v22164_v34 = vld [vmem:[#allocation135_spill] sm:$0xff]  ;;  %v22166_v37 = vld [vmem:[#allocation45_spill] sm:$0xff] }
 0x419   :  { %v18283_v26 = vpop.permute.xlu0 %14601  ;;  %13070 = vmatprep.subr.bf16.mxu1 %v22062_v31  ;;  %3076 = vmatmul.mubr.f32.gmra.mrb[176].mxu0 %v10048_v6  ;;  %v22165_v30 = vpack.c.bf16 %v22163_v27, %v22164_v34  ;;  %v14554_v6 = vunpack.i.h.bf16 %v18167_v12  ;;  %v22177_v27 = vld [vmem:[#allocation121_spill] sm:$0xff]  ;;  %v10068_v34 = vld [vmem:[%s21620_s4 + $0x2a0] sm:$0xff] }
 0x41a   :  { %v18279_v21 = vpop.permute.xlu1 %14611  ;;  %13072 = vmatpush3.bf16.msra.mxu1 %v13071_v7  ;;  %13142 = vmatpush3.bf16.msra.mxu0 %v22153_v29  ;;  %v14553_v7 = vunpack.i.l.bf16 %v18167_v12  ;;  %v22171_v29 = vld [vmem:[#allocation150_spill] sm:$0xff]  ;;  %v14449_v12 = vunpack.i.h.bf16 %v17992_v61  ;;  %v10069_v61 = vld [vmem:[%s21620_s4 + $0x2a8] sm:$0xff] }
 0x41b   :  { %14871 = vrot.lane.b32.xlu0 %v22154_v22, %s15494_s3  ;;  %13144 = vmatprep.subr.bf16.mxu0 %v22157_v55  ;;  %v14564_v55 = vunpack.i.h.bf16 %v18190_v53 }
 0x41c   :  { %2700 = vmatprep.mubr.f32.mxu1 %v10023_v35  ;;  %3080 = vmatprep.mubr.f32.mxu0 %v10052_v3  ;;  %v22169_v35 = vpack.c.bf16 %v22167_v28, %v22168_v33  ;;  %v10028_v3 = vld [vmem:[%s21620_s4 + $0x1e0] sm:$0x3]  ;;  %v13170_v18 = vpack.c.bf16 %v14554_v6, %v14553_v7  ;;  %v14463_v7 = vunpack.i.l.bf16 %v17987_v49  ;;  %v14579_v28 = vunpack.i.h.bf16 %v18182_v14 }
 0x41d   :  { %v18310_v50 = vpop.permute.xlu0 %14616  ;;  %14891 = vrot.lane.b32.xlu1 %v22158_v20, %s15494_s3  ;;  %2701 = vmatmul.mubr.f32.gmra.mrb[138].mxu1 %v10022_v41  ;;  %v22172_v41 = vld [vmem:[#allocation146_spill] sm:$0xff]  ;;  %v14578_v33 = vunpack.i.l.bf16 %v18182_v14  ;;  %v10015_v14 = vld [vmem:[%s21620_s4 + $0x178] sm:$0xff] }
 0x41e   :  { %v18308_v48 = vpop.permute.xlu1 %2929  ;;  %13073 = vmatprep.subr.bf16.mxu1 %v22062_v31  ;;  %3081 = vmatmul.mubr.f32.gmra.mrb[178].mxu0 %v10051_v36  ;;  %v22173_v10 = vpack.c.bf16 %v22171_v29, %v22172_v41  ;;  %v14563_v36 = vunpack.i.l.bf16 %v18190_v53  ;;  %v14584_v29 = vunpack.i.h.bf16 %v18237_v58  ;;  %v14583_v41 = vunpack.i.l.bf16 %v18237_v58 }
 0x41f   :  { %13075 = vmatpush3.bf16.msra.mxu1 %v13074_v25  ;;  %13146 = vmatpush3.bf16.msra.mxu0 %v22161_v11  ;;  %v22175_v11 = vld [vmem:[#allocation70_spill] sm:$0xff] }
 0x420   :  { %14876 = vrot.lane.b32.xlu0 %v22162_v46, %s15494_s3  ;;  %13148 = vmatprep.subr.bf16.mxu0 %v22165_v30  ;;  %v13109_v30 = vpack.c.bf16 %v14449_v12, %v14448_v56  ;;  %v14479_v56 = vunpack.i.h.bf16 %v18037_v40 }
 0x421   :  { %v18337_v16 = vpop.permute.xlu0 %14626  ;;  %2705 = vmatprep.mubr.f32.mxu1 %v10026_v8  ;;  %3085 = vmatprep.mubr.f32.mxu0 %v10055_v32  ;;  %v14569_v8 = vunpack.i.h.bf16 %v18159_v9  ;;  %v14568_v32 = vunpack.i.l.bf16 %v18159_v9  ;;  %v10012_v9 = vld [vmem:[%s21620_s4 + $0x160] sm:$0xff] }
 0x422   :  { %v18327_v13 = vpop.permute.xlu1 %14621  ;;  %14901 = vrot.lane.b32.xlu1 %v22166_v37, %s15494_s3  ;;  %2706 = vmatmul.mubr.f32.gmra.mrb[140].mxu1 %v10025_v60  ;;  %v22176_v60 = vpack.c.bf16 %v22174_v23, %v22175_v11  ;;  %v13178_v23 = vpack.c.bf16 %v14584_v29, %v14583_v41  ;;  %v14599_v11 = vunpack.i.h.bf16 %v18232_v1  ;;  %v14603_v29 = vunpack.i.l.bf16 %v18283_v26 }
 0x423   :  { %12070 = vmatprep.subr.mxu1 %v21855_v44  ;;  %3086 = vmatmul.mubr.f32.gmra.mrb[180].mxu0 %v10054_v0  ;;  %v14464_v0 = vunpack.i.h.bf16 %v17987_v49  ;;  %v10072_v49 = vld [vmem:[%s21620_s4 + $0x2c0] sm:$0xff] }
 0x424   :  { %12071 = vmatpush3.msk.msra.mxu1 %vm2017_vm3, %v18143_v15  ;;  %13150 = vmatpush3.bf16.msra.mxu0 %v22169_v35  ;;  %v10057_v15 = vld [vmem:[%s21620_s4 + $0x288] sm:$0x3]  ;;  %v13174_v35 = vpack.c.bf16 %v14569_v8, %v14568_v32  ;;  %v14478_v32 = vunpack.i.l.bf16 %v18037_v40  ;;  %v22181_v40 = vld [vmem:[#allocation142_spill] sm:$0xff] }
 0x425   :  { %v18360_v19 = vpop.permute.xlu0 %14636  ;;  %14886 = vrot.lane.b32.xlu0 %v22170_v63, %s15494_s3  ;;  %13152 = vmatprep.subr.bf16.mxu0 %v22173_v10  ;;  %v22179_v10 = vld [vmem:[#allocation131_spill] sm:$0xff]  ;;  %v13112_v12 = vpack.c.bf16 %v14464_v0, %v14463_v7 }
 0x426   :  { %v18348_v17 = vpop.permute.xlu1 %14631  ;;  %2710 = vmatprep.mubr.f32.mxu1 %v10029_v59  ;;  %3090 = vmatprep.mubr.f32.mxu0 %v10058_v2  ;;  %v13172_v59 = vpack.c.bf16 %v14564_v55, %v14563_v36  ;;  %v22178_v2 = vld [vmem:[#allocation55_spill] sm:$0xff]  ;;  %v13176_v55 = vpack.c.bf16 %v14579_v28, %v14578_v33  ;;  %v22180_v36 = vld [vmem:[#allocation66_spill] sm:$0xff]  ;;  %v13115_v0 = vpack.c.bf16 %v14479_v56, %v14478_v32  ;;  %v22182_v28 = vld [vmem:[#allocation77_spill] sm:$0xff]  ;;  %v14493_v33 = vunpack.i.l.bf16 %v18033_v62 }
 0x427   :  { %3984 = vrot.lane.b32.xlu1 %v22119_v43, %s15495_s25  ;;  %2711 = vmatmul.mubr.f32.gmra.mrb[142].mxu1 %v10028_v3  ;;  %v14509_v32 = vunpack.i.h.bf16 %v18078_v5 }
 0x428   :  { %3091 = vmatmul.mubr.f32.gmra.mrb[182].mxu0 %v10057_v15  ;;  %12072 = vmatprep.mubr.msk.f32.mxu1 %vm15492_vm0, %v21855_v44  ;;  %v10071_v15 = vld [vmem:[%s21620_s4 + $0x2b8] sm:$0xff] }
 0x429   :  { %v18385_v53 = vpop.permute.xlu0 %14646  ;;  %13154 = vmatpush3.bf16.msra.mxu0 %v22176_v60  ;;  %14896 = vrot.lane.b32.xlu0 %v22177_v27, %s15494_s3  ;;  %v14598_v60 = vunpack.i.l.bf16 %v18232_v1 }
 0x42a   :  { %v18376_v25 = vpop.permute.xlu1 %14641  ;;  %13171 = vmatprep.subr.bf16.mxu0 %v13170_v18  ;;  %13108 = vmatprep.subr.bf16.mxu1 %v22062_v31  ;;  %v14594_v18 = vunpack.i.h.bf16 %v18257_v4 }
 0x42b   :  { %3313 = vmatprep.mubr.f32.mxu0 %v10069_v61  ;;  %14911 = vrot.lane.b32.xlu1 %v22178_v2, %s15494_s3  ;;  %v14593_v61 = vunpack.i.l.bf16 %v18257_v4  ;;  %v10018_v4 = vld [vmem:[%s21620_s4 + $0x190] sm:$0xff]  ;;  %v13182_v41 = vpack.c.bf16 %v14599_v11, %v14598_v60  ;;  %v14623_v11 = vunpack.i.l.bf16 %v18327_v13 }
 0x42c   :  { %12073 = vmatmul.mubr.msk.f32.vlgmr.msra.gmra.mrb[102].mxu1 %vm1995_vm4, %v10012_v9  ;;  %3314 = vmatmul.mubr.f32.vlgmr.msra.gmra.mrb[184].mxu0 %v10068_v34  ;;  %v10075_v9 = vld [vmem:[%s21620_s4 + $0x2d8] sm:$0xff]  ;;  %v10074_v34 = vld [vmem:[%s21620_s4 + $0x2d0] sm:$0xff] }
 0x42d   :  { %v18408_v3 = vpop.permute.xlu0 %14656  ;;  %13110 = vmatpush3.bf16.msra.mxu1 %v13109_v30  ;;  %13173 = vmatpush3.bf16.msra.mxu0 %v13172_v59  ;;  %v14494_v59 = vunpack.i.h.bf16 %v18033_v62  ;;  %v13180_v7 = vpack.c.bf16 %v14594_v18, %v14593_v61  ;;  %v22183_v62 = vld [vmem:[#allocation153_spill] sm:$0xff]  ;;  %v14508_v61 = vunpack.i.l.bf16 %v18078_v5  ;;  %v10081_v5 = vld [vmem:[%s21620_s4 + $0x308] sm:$0xff] }
 0x42e   :  { %v18402_v6 = vpop.permute.xlu1 %14651  ;;  %14906 = vrot.lane.b32.xlu0 %v22179_v10, %s15494_s3  ;;  %13175 = vmatprep.subr.bf16.mxu0 %v13174_v35  ;;  %v14604_v35 = vunpack.i.h.bf16 %v18283_v26  ;;  %v10021_v26 = vld [vmem:[%s21620_s4 + $0x1a8] sm:$0xff] }
 0x42f   :  { %12075 = vmatprep.mubr.msk.f32.mxu1 %vm15492_vm0, %v21855_v44  ;;  %13111 = vmatprep.subr.bf16.mxu1 %v22062_v31 }
 0x430   :  { %3318 = vmatprep.mubr.f32.mxu0 %v10072_v49  ;;  %14921 = vrot.lane.b32.xlu1 %v22180_v36, %s15494_s3  ;;  %v14619_v49 = vunpack.i.h.bf16 %v18310_v50  ;;  %v13184_v18 = vpack.c.bf16 %v14604_v35, %v14603_v29  ;;  %v14644_v35 = vunpack.i.h.bf16 %v18376_v25  ;;  %v14643_v29 = vunpack.i.l.bf16 %v18376_v25  ;;  %v10027_v25 = vld [vmem:[%s21620_s4 + $0x1d8] sm:$0xff] }
 0x431   :  { %v18431_v8 = vpop.permute.xlu0 %14666  ;;  %12076 = vmatmul.mubr.msk.f32.gmra.mrb[104].mxu1 %vm1995_vm4, %v10015_v14  ;;  %3319 = vmatmul.mubr.f32.gmra.mrb[186].mxu0 %v10071_v15  ;;  %v14618_v14 = vunpack.i.l.bf16 %v18310_v50  ;;  %v10078_v15 = vld [vmem:[%s21620_s4 + $0x2f0] sm:$0xff]  ;;  %v10077_v50 = vld [vmem:[%s21620_s4 + $0x2e8] sm:$0xff] }
 0x432   :  { %v18426_v58 = vpop.permute.xlu1 %14661  ;;  %13113 = vmatpush3.bf16.msra.mxu1 %v13112_v12  ;;  %13177 = vmatpush3.bf16.msra.mxu0 %v13176_v55  ;;  %v13118_v55 = vpack.c.bf16 %v14494_v59, %v14493_v33  ;;  %v13121_v59 = vpack.c.bf16 %v14509_v32, %v14508_v61 }
 0x433   :  { %14916 = vrot.lane.b32.xlu0 %v22181_v40, %s15494_s3  ;;  %13179 = vmatprep.subr.bf16.mxu0 %v13178_v23  ;;  %v14624_v23 = vunpack.i.h.bf16 %v18327_v13  ;;  %v13186_v60 = vpack.c.bf16 %v14619_v49, %v14618_v14  ;;  %v10024_v13 = vld [vmem:[%s21620_s4 + $0x1c0] sm:$0xff]  ;;  %v14659_v14 = vunpack.i.h.bf16 %v18408_v3  ;;  %v14663_v61 = vunpack.i.l.bf16 %v18426_v58 }
 0x434   :  { %12078 = vmatprep.mubr.msk.f32.mxu1 %vm15492_vm0, %v21855_v44  ;;  %13114 = vmatprep.subr.bf16.mxu1 %v22062_v31 }
 0x435   :  { %v18455_v1 = vpop.permute.xlu0 %14676  ;;  %3323 = vmatprep.mubr.f32.mxu0 %v10075_v9  ;;  %14931 = vrot.lane.b32.xlu1 %v22182_v28, %s15494_s3 }
 0x436   :  { %v18450_v30 = vpop.permute.xlu1 %14671  ;;  %12079 = vmatmul.mubr.msk.f32.gmra.mrb[106].mxu1 %vm1995_vm4, %v10018_v4  ;;  %3324 = vmatmul.mubr.f32.gmra.mrb[188].mxu0 %v10074_v34  ;;  %v14639_v4 = vunpack.i.h.bf16 %v18360_v19  ;;  %v14638_v34 = vunpack.i.l.bf16 %v18360_v19  ;;  %v10080_v19 = vld [vmem:[%s21620_s4 + $0x300] sm:$0xff] }
 0x437   :  { %13116 = vmatpush3.bf16.msra.mxu1 %v13115_v0  ;;  %13181 = vmatpush3.bf16.msra.mxu0 %v13180_v7  ;;  %v13188_v7 = vpack.c.bf16 %v14624_v23, %v14623_v11  ;;  %v10087_v11 = vld [vmem:[%s21620_s4 + $0x338] sm:$0x3] }
 0x438   :  { %14926 = vrot.lane.b32.xlu0 %v22183_v62, %s15494_s3  ;;  %13183 = vmatprep.subr.bf16.mxu0 %v13182_v41  ;;  %v13190_v41 = vpack.c.bf16 %v14639_v4, %v14638_v34  ;;  %v14678_v4 = vunpack.i.l.bf16 %v18455_v1  ;;  %v22184_v34 = vld [vmem:[#allocation163_spill] sm:$0xff] }
 0x439   :  { %v18479_v56 = vpop.permute.xlu0 %14686  ;;  %12081 = vmatprep.mubr.msk.f32.mxu1 %vm15492_vm0, %v21855_v44  ;;  %13117 = vmatprep.subr.bf16.mxu1 %v22062_v31 }
 0x43a   :  { %v18469_v12 = vpop.permute.xlu1 %14681  ;;  %3328 = vmatprep.mubr.f32.mxu0 %v10078_v15  ;;  %14941 = vrot.lane.b32.xlu1 %v22146_v47, %s15495_s25  ;;  %v14658_v15 = vunpack.i.l.bf16 %v18408_v3 }
 0x43b   :  { %12082 = vmatmul.mubr.msk.f32.gmra.mrb[108].mxu1 %vm1995_vm4, %v10021_v26  ;;  %3329 = vmatmul.mubr.f32.gmra.mrb[190].mxu0 %v10077_v50  ;;  %v10084_v26 = vld [vmem:[%s21620_s4 + $0x320] sm:$0xff]  ;;  %v10083_v50 = vld [vmem:[%s21620_s4 + $0x318] sm:$0xff] }
 0x43c   :  { %13119 = vmatpush3.bf16.msra.mxu1 %v13118_v55  ;;  %13185 = vmatpush3.bf16.msra.mxu0 %v13184_v18  ;;  %v13192_v55 = vpack.c.bf16 %v14644_v35, %v14643_v29  ;;  %v14664_v18 = vunpack.i.h.bf16 %v18426_v58  ;;  %v13194_v23 = vpack.c.bf16 %v14659_v14, %v14658_v15  ;;  %v10030_v58 = vld [vmem:[%s21620_s4 + $0x1f0] sm:$0x3] }
 0x43d   :  { %v18498_v0 = vpop.permute.xlu0 %14696  ;;  %14936 = vrot.lane.b32.xlu0 %v22135_v39, %s15495_s25  ;;  %13187 = vmatprep.subr.bf16.mxu0 %v13186_v60  ;;  %v14679_v60 = vunpack.i.h.bf16 %v18455_v1 }
 0x43e   :  { %v18491_v9 = vpop.permute.xlu1 %14691  ;;  %12084 = vmatprep.mubr.msk.f32.mxu1 %vm15492_vm0, %v21855_v44  ;;  %13120 = vmatprep.subr.bf16.mxu1 %v22062_v31  ;;  %v14698_v35 = vunpack.i.l.bf16 %v18498_v0 }
 0x43f   :  { %3333 = vmatprep.mubr.f32.mxu0 %v10081_v5  ;;  %14951 = vrot.lane.b32.xlu1 %v22154_v22, %s15495_s25  ;;  %v10086_v5 = vld [vmem:[%s21620_s4 + $0x330] sm:$0x3]  ;;  %v13198_v29 = vpack.c.bf16 %v14679_v60, %v14678_v4  ;;  %v10097_v60 = vld [vmem:[%s21620_s4 + $0x348] sm:$0xff] }
 0x440   :  { %12085 = vmatmul.mubr.msk.f32.gmra.mrb[110].mxu1 %vm1995_vm4, %v10024_v13  ;;  %3334 = vmatmul.mubr.f32.gmra.mrb[192].mxu0 %v10080_v19  ;;  %v13196_v13 = vpack.c.bf16 %v14664_v18, %v14663_v61  ;;  %v14684_v19 = vunpack.i.h.bf16 %v18469_v12 }
 0x441   :  { %v14707_v49 = vpop.permute.xlu0 %14706  ;;  %13122 = vmatpush3.bf16.msra.mxu1 %v13121_v59  ;;  %13189 = vmatpush3.bf16.msra.mxu0 %v13188_v7  ;;  %v14683_v59 = vunpack.i.l.bf16 %v18469_v12  ;;  %v14699_v7 = vunpack.i.h.bf16 %v18498_v0 }
 0x442   :  { %v18513_v33 = vpop.permute.xlu1 %14701  ;;  %14946 = vrot.lane.b32.xlu0 %v22142_v38, %s15495_s25  ;;  %13191 = vmatprep.subr.bf16.mxu0 %v13190_v41  ;;  %v10041_v41 = vld [vmem:[%s21620_s4 + $0x208] sm:$0xff]  ;;  %v14709_v12 = vunpack.i.h.bf16 %v14707_v49  ;;  %v14708_v14 = vunpack.i.l.bf16 %v14707_v49  ;;  %v10098_v49 = vld [vmem:[%s21620_s4 + $0x350] sm:$0xff] }
 0x443   :  { %12087 = vmatprep.mubr.msk.f32.mxu1 %vm15492_vm0, %v21855_v44  ;;  %12113 = vmatprep.subr.mxu1 %v21855_v44  ;;  %v13200_v0 = vpack.c.bf16 %v14684_v19, %v14683_v59  ;;  %v13264_v18 = vpack.c.bf16 %v14699_v7, %v14698_v35  ;;  %v22192_v59 = vld [vmem:[#allocation171_spill] sm:$0xff]  ;;  %v10047_v35 = vld [vmem:[%s21620_s4 + $0x238] sm:$0xff] }
 0x444   :  { %3338 = vmatprep.mubr.f32.mxu0 %v10084_v26  ;;  %14961 = vrot.lane.b32.xlu1 %v22162_v46, %s15495_s25  ;;  %v22186_v26 = vld [vmem:[#allocation173_spill] sm:$0xff]  ;;  %v22193_v7 = vld [vmem:[#allocation167_spill] sm:$0xff] }
 0x445   :  { %v18538_v32 = vpop.permute.xlu0 %14716  ;;  %12088 = vmatmul.mubr.msk.f32.gmra.mrb[112].mxu1 %vm1995_vm4, %v10027_v25  ;;  %3339 = vmatmul.mubr.f32.gmra.mrb[194].mxu0 %v10083_v50  ;;  %v22187_v25 = vld [vmem:[#allocation161_spill] sm:$0xff] }
 0x446   :  { %v18534_v3 = vpop.permute.xlu1 %14711  ;;  %12114 = vmatpush3.msk.msra.mxu1 %vm2017_vm3, %v18308_v48  ;;  %13193 = vmatpush3.bf16.msra.mxu0 %v13192_v55  ;;  %v22188_v50 = vld [vmem:[#allocation157_spill] sm:$0xff]  ;;  %v14719_v4 = vunpack.i.h.bf16 %v18538_v32 }
 0x447   :  { %14956 = vrot.lane.b32.xlu0 %v22184_v34, %s15494_s3  ;;  %13195 = vmatprep.subr.bf16.mxu0 %v13194_v23  ;;  %v22189_v55 = vpack.c.bf16 %v22187_v25, %v22188_v50  ;;  %v13266_v23 = vpack.c.bf16 %v14709_v12, %v14708_v14  ;;  %v10100_v14 = vld [vmem:[%s21620_s4 + $0x360] sm:$0xff] }
 0x448   :  { %12090 = vmatprep.mubr.msk.f32.mxu1 %vm15492_vm0, %v21855_v44  ;;  %3343 = vmatprep.mubr.f32.mxu0 %v10087_v11  ;;  %v10044_v11 = vld [vmem:[%s21620_s4 + $0x220] sm:$0xff] }
 0x449   :  { %v18560_v1 = vpop.permute.xlu0 %14726  ;;  %4364 = vrot.lane.b32.xlu1 %v22119_v43, %s15496_s0  ;;  %12091 = vmatmul.mubr.msk.f32.gmra.mrb[114].mxu1 %vm1995_vm4, %v10030_v58  ;;  %v14718_v58 = vunpack.i.l.bf16 %v18538_v32  ;;  %v22194_v32 = vpack.c.bf16 %v22192_v59, %v22193_v7 }
 0x44a   :  { %v18562_v48 = vpop.permute.xlu1 %14721  ;;  %3344 = vmatmul.mubr.f32.gmra.mrb[196].mxu0 %v10086_v5  ;;  %12115 = vmatprep.mubr.msk.f32.mxu1 %vm15492_vm0, %v21855_v44  ;;  %v14728_v12 = vunpack.i.l.bf16 %v18560_v1 }
 0x44b   :  { %22185 = vst [vmem:[#allocation17_spill] sm:$0xff] %v18562_v48  ;;  %13197 = vmatpush3.bf16.msra.mxu0 %v13196_v13  ;;  %14966 = vrot.lane.b32.xlu0 %v22150_v54, %s15495_s25  ;;  %v10101_v13 = vld [vmem:[%s21620_s4 + $0x368] sm:$0xff] }
 0x44c   :  { %13199 = vmatprep.subr.bf16.mxu0 %v13198_v29  ;;  %13155 = vmatprep.subr.bf16.mxu1 %v22062_v31  ;;  %v22195_v29 = vld [vmem:[#allocation181_spill] sm:$0xff] }
 0x44d   :  { %v18579_v15 = vpop.permute.xlu0 %14736  ;;  %14971 = vrot.lane.b32.xlu1 %v22186_v26, %s15494_s3  ;;  %12116 = vmatmul.mubr.msk.f32.vlgmr.msra.gmra.mrb[102].mxu1 %vm1995_vm4, %v10041_v41  ;;  %v14729_v41 = vunpack.i.h.bf16 %v18560_v1 }
 0x44e   :  { %13157 = vmatpush3.bf16.msra.mxu1 %v22189_v55  ;;  %12118 = vmatprep.mubr.msk.f32.mxu1 %vm15492_vm0, %v21855_v44  ;;  %v18592_v61 = vpop.permute.xlu1 %14731  ;;  %v14739_v7 = vunpack.i.h.bf16 %v18579_v15 }
 0x44f   :  { %22190 = vst [vmem:[#allocation107_spill] sm:$0xff] %v18592_v61  ;;  %13201 = vmatpush3.bf16.msra.mxu0 %v13200_v0  ;;  %14976 = vrot.lane.b32.xlu0 %v22170_v63, %s15495_s25  ;;  %v13268_v0 = vpack.c.bf16 %v14719_v4, %v14718_v58  ;;  %v13270_v4 = vpack.c.bf16 %v14729_v41, %v14728_v12  ;;  %v10050_v58 = vld [vmem:[%s21620_s4 + $0x250] sm:$0xff] }
 0x450   :  { %13265 = vmatprep.subr.bf16.mxu0 %v13264_v18  ;;  %13158 = vmatprep.subr.bf16.mxu1 %v22062_v31  ;;  %v22197_v18 = vld [vmem:[#allocation182_spill] sm:$0xff] }
 0x451   :  { %v18605_v5 = vpop.permute.xlu0 %14746  ;;  %3735 = vmatprep.mubr.f32.mxu0 %v10098_v49  ;;  %14981 = vrot.lane.b32.xlu1 %v22158_v20, %s15495_s25  ;;  %v22198_v49 = vld [vmem:[#allocation177_spill] sm:$0xff] }
 0x452   :  { %12119 = vmatmul.mubr.msk.f32.gmra.mrb[104].mxu1 %vm1995_vm4, %v10044_v11  ;;  %3736 = vmatmul.mubr.f32.vlgmr.msra.gmra.mrb[198].mxu0 %v10097_v60  ;;  %v18613_v19 = vpop.permute.xlu1 %14741  ;;  %v10104_v11 = vld [vmem:[%s21620_s4 + $0x380] sm:$0xff] }
 0x453   :  { %22191 = vst [vmem:[#allocation102_spill] sm:$0xff] %v18613_v19  ;;  %13160 = vmatpush3.bf16.msra.mxu1 %v22194_v32  ;;  %13267 = vmatpush3.bf16.msra.mxu0 %v13266_v23  ;;  %v22199_v23 = vpack.c.bf16 %v22197_v18, %v22198_v49  ;;  %v14738_v32 = vunpack.i.l.bf16 %v18579_v15  ;;  %v10053_v18 = vld [vmem:[%s21620_s4 + $0x268] sm:$0xff] }
 0x454   :  { %14986 = vrot.lane.b32.xlu0 %v22195_v29, %s15494_s3  ;;  %12121 = vmatprep.mubr.msk.f32.mxu1 %vm15492_vm0, %v21855_v44 }
 0x455   :  { %v18630_v25 = vpop.permute.xlu0 %3604  ;;  %13161 = vmatprep.subr.bf16.mxu1 %v22062_v31  ;;  %3740 = vmatprep.mubr.f32.mxu0 %v10101_v13  ;;  %v10103_v13 = vld [vmem:[%s21620_s4 + $0x378] sm:$0xff] }
 0x456   :  { %14991 = vrot.lane.b32.xlu1 %v22177_v27, %s15495_s25  ;;  %12122 = vmatmul.mubr.msk.f32.gmra.mrb[106].mxu1 %vm1995_vm4, %v10047_v35  ;;  %v18636_v1 = vpop.permute.xlu1 %14751  ;;  %v22201_v35 = vld [vmem:[#allocation191_spill] sm:$0xff] }
 0x457   :  { %22196 = vst [vmem:[#allocation141_spill] sm:$0xff] %v18636_v1  ;;  %13163 = vmatpush3.bf16.msra.mxu1 %v22199_v23  ;;  %3741 = vmatmul.mubr.f32.gmra.mrb[200].mxu0 %v10100_v14  ;;  %v10107_v14 = vld [vmem:[%s21620_s4 + $0x398] sm:$0xff] }
 0x458   :  { %v10599_v50 = vpop.f32.mrb[88].mxu1  ;;  %13269 = vmatprep.subr.bf16.mxu0 %v13268_v0  ;;  %14996 = vrot.lane.b32.xlu0 %v22166_v37, %s15495_s25  ;;  %v22202_v0 = vld [vmem:[#allocation192_spill] sm:$0xff] }
 0x459   :  { %v10600_v55 = vpop.f32.mrb[89].mxu1  ;;  %v18654_v59 = vpop.permute.xlu0 %14756  ;;  %12124 = vmatprep.mubr.msk.f32.mxu1 %vm15492_vm0, %v21855_v44  ;;  %13164 = vmatprep.subr.bf16.mxu1 %v22062_v31 }
 0x45a   :  { %v18644_v60 = vadd.f32 %v10600_v55, %v10599_v50  ;;  %3745 = vmatprep.mubr.f32.mxu0 %v10104_v11  ;;  %15001 = vrot.lane.b32.xlu1 %v22201_v35, %s15494_s3  ;;  %v18663_v41 = vpop.permute.xlu1 %14761  ;;  %v22203_v50 = vld [vmem:[#allocation187_spill] sm:$0xff]  ;;  %v14749_v11 = vunpack.i.h.bf16 %v18605_v5 }
 0x45b   :  { %12125 = vmatmul.mubr.msk.f32.gmra.mrb[108].mxu1 %vm1995_vm4, %v10050_v58  ;;  %3746 = vmatmul.mubr.f32.gmra.mrb[202].mxu0 %v10103_v13  ;;  %v22204_v55 = vpack.c.bf16 %v22202_v0, %v22203_v50  ;;  %v14748_v58 = vunpack.i.l.bf16 %v18605_v5  ;;  %v13272_v13 = vpack.c.bf16 %v14739_v7, %v14738_v32  ;;  %v22206_v0 = vld [vmem:[#allocation202_spill] sm:$0xff]  ;;  %v22207_v50 = vld [vmem:[#allocation197_spill] sm:$0xff]  ;;  %v10110_v7 = vld [vmem:[%s21620_s4 + $0x3b0] sm:$0xff] }
 0x45c   :  { %22200 = vst [vmem:[#allocation31_spill] sm:$0xff] %v18644_v60  ;;  %13271 = vmatpush3.bf16.msra.mxu0 %v13270_v4  ;;  %15006 = vrot.lane.b32.xlu0 %v22179_v10, %s15495_s25  ;;  %v10106_v4 = vld [vmem:[%s21620_s4 + $0x390] sm:$0xff]  ;;  %v22211_v60 = vld [vmem:[#allocation201_spill] sm:$0xff] }
 0x45d   :  { %v10602_v12 = vpop.f32.mrb[90].mxu1  ;;  %13166 = vmatpush3.bf16.msra.mxu1 %v22204_v55  ;;  %v18675_v49 = vpop.permute.xlu0 %14766  ;;  %12127 = vmatprep.mubr.msk.f32.mxu1 %vm15492_vm0, %v21855_v44  ;;  %v22208_v55 = vpack.c.bf16 %v22206_v0, %v22207_v50  ;;  %v10113_v0 = vld [vmem:[%s21620_s4 + $0x3c8] sm:$0xff] }
 0x45e   :  { %v10603_v15 = vpop.f32.mrb[91].mxu1  ;;  %13167 = vmatprep.subr.bf16.mxu1 %v22062_v31  ;;  %3750 = vmatprep.mubr.f32.mxu0 %v10107_v14  ;;  %v14768_v1 = vunpack.i.l.bf16 %v18675_v49 }
 0x45f   :  { %v18677_v23 = vadd.f32 %v10603_v15, %v10602_v12  ;;  %v18689_v12 = vpop.permute.xlu1 %14771  ;;  %15011 = vrot.lane.b32.xlu1 %v22178_v2, %s15495_s25  ;;  %12128 = vmatmul.mubr.msk.f32.gmra.mrb[110].mxu1 %vm1995_vm4, %v10053_v18  ;;  %v10056_v18 = vld [vmem:[%s21620_s4 + $0x280] sm:$0xff] }
 0x460   :  { %3751 = vmatmul.mubr.f32.gmra.mrb[204].mxu0 %v10106_v4  ;;  %13273 = vmatprep.subr.bf16.mxu0 %v13272_v13  ;;  %v10109_v4 = vld [vmem:[%s21620_s4 + $0x3a8] sm:$0xff]  ;;  %v14758_v13 = vunpack.i.l.bf16 %v18654_v59 }
 0x461   :  { %22205 = vst [vmem:[#allocation26_spill] sm:$0xff] %v18677_v23  ;;  %v10605_v15 = vpop.f32.mrb[92].mxu1  ;;  %13169 = vmatpush3.bf16.msra.mxu1 %v22208_v55  ;;  %v18700_v32 = vpop.permute.xlu0 %14776  ;;  %v13274_v23 = vpack.c.bf16 %v14749_v11, %v14748_v58  ;;  %15016 = vrot.lane.b32.xlu0 %v22211_v60, %s15494_s3  ;;  %v14759_v58 = vunpack.i.h.bf16 %v18654_v59  ;;  %v10059_v59 = vld [vmem:[%s21620_s4 + $0x298] sm:$0x3] }
 0x462   :  { %v10606_v5 = vpop.f32.mrb[93].mxu1  ;;  %22209 = vst [vmem:[#allocation117_spill] sm:$0xff] %v18700_v32  ;;  %12130 = vmatprep.mubr.msk.f32.mxu1 %vm15492_vm0, %v21855_v44  ;;  %12156 = vmatprep.subr.mxu1 %v21855_v44  ;;  %v14769_v32 = vunpack.i.h.bf16 %v18675_v49  ;;  %v14773_v49 = vunpack.i.l.bf16 %v18689_v12 }
 0x463   :  { %v18702_v14 = vadd.f32 %v10606_v5, %v10605_v15  ;;  %v18715_v15 = vpop.permute.xlu1 %14781  ;;  %3755 = vmatprep.mubr.f32.mxu0 %v10110_v7  ;;  %15021 = vrot.lane.b32.xlu1 %v22181_v40, %s15495_s25  ;;  %v10112_v7 = vld [vmem:[%s21620_s4 + $0x3c0] sm:$0xff] }
 0x464   :  { %12131 = vmatmul.mubr.msk.f32.gmra.mrb[112].mxu1 %vm1995_vm4, %v10056_v18  ;;  %3756 = vmatmul.mubr.f32.gmra.mrb[206].mxu0 %v10109_v4  ;;  %v14764_v18 = vunpack.i.h.bf16 %v18663_v41  ;;  %v14763_v4 = vunpack.i.l.bf16 %v18663_v41  ;;  %v13276_v41 = vpack.c.bf16 %v14759_v58, %v14758_v13  ;;  %v10115_v58 = vld [vmem:[%s21620_s4 + $0x3d8] sm:$0x3]  ;;  %v14774_v13 = vunpack.i.h.bf16 %v18689_v12 }
 0x465   :  { %22210 = vst [vmem:[#allocation112_spill] sm:$0xff] %v18702_v14  ;;  %v10608_v11 = vpop.f32.mrb[94].mxu1  ;;  %v18725_v50 = vpop.permute.xlu0 %14786  ;;  %12157 = vmatpush3.msk.msra.mxu1 %vm2017_vm3, %v22119_v43  ;;  %13275 = vmatpush3.bf16.msra.mxu0 %v13274_v23  ;;  %v10116_v43 = vld [vmem:[%s21620_s4 + $0x3e0] sm:$0x3]  ;;  %v13280_v12 = vpack.c.bf16 %v14769_v32, %v14768_v1 }
 0x466   :  { %v10609_v5 = vpop.f32.mrb[95].mxu1  ;;  %15026 = vrot.lane.b32.xlu0 %v22180_v36, %s15495_s25  ;;  %12133 = vmatprep.mubr.msk.f32.mxu1 %vm15492_vm0, %v21855_v44  ;;  %v13278_v61 = vpack.c.bf16 %v14764_v18, %v14763_v4  ;;  %v22215_v4 = vld [vmem:[#allocation205_spill] sm:$0xff] }
 0x467   :  { %v18727_v55 = vadd.f32 %v10609_v5, %v10608_v11  ;;  %v18746_v23 = vpop.permute.xlu1 %14791  ;;  %v14544_v5 = vunpack.i.h.bf16 %v18145_v42  ;;  %3760 = vmatprep.mubr.f32.mxu0 %v10113_v0  ;;  %15031 = vrot.lane.b32.xlu1 %v22183_v62, %s15495_s25 }
 0x468   :  { %22213 = vst [vmem:[#allocation41_spill] sm:$0xff] %v18746_v23  ;;  %12134 = vmatmul.mubr.msk.f32.gmra.mrb[114].mxu1 %vm1995_vm4, %v10059_v59  ;;  %3761 = vmatmul.mubr.f32.gmra.mrb[208].mxu0 %v10112_v7  ;;  %v14549_v59 = vunpack.i.h.bf16 %v18109_v57  ;;  %v14548_v7 = vunpack.i.l.bf16 %v18109_v57  ;;  %v13282_v57 = vpack.c.bf16 %v14774_v13, %v14773_v49 }
 0x469   :  { %22212 = vst [vmem:[#allocation65_spill] sm:$0xff] %v18727_v55  ;;  %v10611_v11 = vpop.f32.mrb[96].mxu1  ;;  %v14543_v55 = vunpack.i.l.bf16 %v18145_v42  ;;  %v18755_v19 = vpop.permute.xlu0 %14796  ;;  %12158 = vmatprep.mubr.msk.f32.mxu1 %vm15492_vm0, %v21855_v44  ;;  %3765 = vmatprep.mubr.f32.mxu0 %v10116_v43  ;;  %v10070_v42 = vld [vmem:[%s21620_s4 + $0x2b0] sm:$0xff] }
 0x46a   :  { %v10612_v14 = vpop.f32.mrb[97].mxu1  ;;  %15036 = vrot.lane.b32.xlu0 %v22182_v28, %s15495_s25  ;;  %13202 = vmatprep.subr.bf16.mxu1 %v22062_v31  ;;  %v14798_v13 = vunpack.i.l.bf16 %v18755_v19 }
 0x46b   :  { %v18757_v23 = vadd.f32 %v10612_v14, %v10611_v11  ;;  %v18772_v14 = vpop.permute.xlu1 %14801  ;;  %v13203_v18 = vpack.c.bf16 %v14544_v5, %v14543_v55  ;;  %5039 = vrot.lane.b32.xlu1 %v22215_v4, %s15494_s3  ;;  %13277 = vmatprep.subr.bf16.mxu0 %v13276_v41  ;;  %v14784_v11 = vunpack.i.h.bf16 %v18715_v15  ;;  %v10073_v55 = vld [vmem:[%s21620_s4 + $0x2c8] sm:$0xff]  ;;  %v14559_v5 = vunpack.i.h.bf16 %v18125_v24 }
 0x46c   :  { %12159 = vmatmul.mubr.msk.f32.vlgmr.msra.gmra.mrb[102].mxu1 %vm1995_vm4, %v10070_v42  ;;  %3766 = vmatmul.mubr.f32.gmra.mrb[210].mxu0 %v10115_v58  ;;  %v14558_v41 = vunpack.i.l.bf16 %v18125_v24  ;;  %v14788_v42 = vunpack.i.l.bf16 %v18725_v50 }
 0x46d   :  { %22214 = vst [vmem:[#allocation36_spill] sm:$0xff] %v18757_v23  ;;  %v10614_v0 = vpop.f32.mrb[98].mxu1  ;;  %v14783_v23 = vunpack.i.l.bf16 %v18715_v15  ;;  %v18781_v28 = vpop.permute.xlu0 %14806  ;;  %13204 = vmatpush3.bf16.msra.mxu1 %v13203_v18  ;;  %13279 = vmatpush3.bf16.msra.mxu0 %v13278_v61  ;;  %v13206_v15 = vpack.c.bf16 %v14549_v59, %v14548_v7  ;;  %v14789_v61 = vunpack.i.h.bf16 %v18725_v50  ;;  %v14574_v50 = vunpack.i.h.bf16 %v18210_v51 }
 0x46e   :  { %v10615_v43 = vpop.f32.mrb[99].mxu1  ;;  %15041 = vrot.lane.b32.xlu0 %v22135_v39, %s15496_s0  ;;  %12161 = vmatprep.mubr.msk.f32.mxu1 %vm15492_vm0, %v21855_v44  ;;  %v14799_v39 = vunpack.i.h.bf16 %v18755_v19  ;;  %v13209_v59 = vpack.c.bf16 %v14559_v5, %v14558_v41  ;;  %v14573_v19 = vunpack.i.l.bf16 %v18210_v51  ;;  %v14804_v18 = vunpack.i.h.bf16 %v18772_v14  ;;  %v10079_v51 = vld [vmem:[%s21620_s4 + $0x2f8] sm:$0xff] }
 0x46f   :  { %v18783_v48 = vadd.f32 %v10615_v43, %v10614_v0  ;;  %v14812_v1 = vpop.permute.xlu1 %14811  ;;  %13205 = vmatprep.subr.bf16.mxu1 %v22062_v31  ;;  %15046 = vrot.lane.b32.xlu1 %v22146_v47, %s15496_s0  ;;  %v13284_v24 = vpack.c.bf16 %v14784_v11, %v14783_v23  ;;  %v10076_v47 = vld [vmem:[%s21620_s4 + $0x2e0] sm:$0xff]  ;;  %v13286_v7 = vpack.c.bf16 %v14789_v61, %v14788_v42  ;;  %v14803_v43 = vunpack.i.l.bf16 %v18772_v14 }
 0x470   :  { %12162 = vmatmul.mubr.msk.f32.gmra.mrb[104].mxu1 %vm1995_vm4, %v10073_v55  ;;  %13281 = vmatprep.subr.bf16.mxu0 %v13280_v12  ;;  %v13288_v12 = vpack.c.bf16 %v14799_v39, %v14798_v13  ;;  %v14814_v11 = vunpack.i.h.bf16 %v14812_v1  ;;  %v14588_v14 = vunpack.i.l.bf16 %v18206_v52  ;;  %v13212_v5 = vpack.c.bf16 %v14574_v50, %v14573_v19  ;;  %v10156_v50 = vld [vmem:[%s21620_s4 + $0x4a0] sm:$0xff] }
 0x471   :  { %v10617_v32 = vpop.f32.mrb[100].mxu1  ;;  %v14817_v49 = vpop.permute.xlu0 %14816  ;;  %13207 = vmatpush3.bf16.msra.mxu1 %v13206_v15  ;;  %13283 = vmatpush3.bf16.msra.mxu0 %v13282_v57  ;;  %v14813_v57 = vunpack.i.l.bf16 %v14812_v1  ;;  %v13290_v41 = vpack.c.bf16 %v14804_v18, %v14803_v43  ;;  %v14609_v39 = vunpack.i.h.bf16 %v18252_v45  ;;  %v14608_v13 = vunpack.i.l.bf16 %v18252_v45 }
 0x472   :  { %v10618_v58 = vpop.f32.mrb[101].mxu1  ;;  %15051 = vrot.lane.b32.xlu0 %v22184_v34, %s15495_s25  ;;  %12164 = vmatprep.mubr.msk.f32.mxu1 %vm15492_vm0, %v21855_v44  ;;  %v14819_v1 = vunpack.i.h.bf16 %v14817_v49  ;;  %v14614_v18 = vunpack.i.h.bf16 %v18279_v21  ;;  %v14613_v43 = vunpack.i.l.bf16 %v18279_v21  ;;  %v10099_v21 = vld [vmem:[%s21620_s4 + $0x358] sm:$0xff] }
 0x473   :  { %v18802_v0 = vadd.f32 %v10618_v58, %v10617_v32  ;;  %v18812_v23 = vpop.permute.xlu1 %14821  ;;  %13208 = vmatprep.subr.bf16.mxu1 %v22062_v31  ;;  %15056 = vrot.lane.b32.xlu1 %v22142_v38, %s15496_s0  ;;  %v14589_v38 = vunpack.i.h.bf16 %v18206_v52  ;;  %v14818_v32 = vunpack.i.l.bf16 %v14817_v49  ;;  %v13292_v61 = vpack.c.bf16 %v14814_v11, %v14813_v57  ;;  %v10082_v52 = vld [vmem:[%s21620_s4 + $0x310] sm:$0xff]  ;;  %v22216_v49 = vld [vmem:[#allocation82_spill] sm:$0xff]  ;;  %v22219_v57 = vld [vmem:[#allocation5_spill] sm:$0xff] }
 0x474   :  { %12165 = vmatmul.mubr.msk.f32.gmra.mrb[106].mxu1 %vm1995_vm4, %v10076_v47  ;;  %13285 = vmatprep.subr.bf16.mxu0 %v13284_v24  ;;  %v13217_v45 = vpack.c.bf16 %v14609_v39, %v14608_v13  ;;  %v22217_v47 = vld [vmem:[#allocation78_spill] sm:$0xff]  ;;  %v14628_v11 = vunpack.i.l.bf16 %v18337_v16  ;;  %v22225_v13 = vld [vmem:[#allocation13_spill] sm:$0xff] }
 0x475   :  { %v18821_v55 = vpop.permute.xlu0 %14826  ;;  %13210 = vmatpush3.bf16.msra.mxu1 %v13209_v59  ;;  %12167 = vmatprep.mubr.msk.f32.mxu1 %vm15492_vm0, %v21855_v44  ;;  %v13215_v42 = vpack.c.bf16 %v14589_v38, %v14588_v14  ;;  %v13294_v58 = vpack.c.bf16 %v14819_v1, %v14818_v32  ;;  %v22218_v59 = vpack.c.bf16 %v22216_v49, %v22217_v47  ;;  %v14654_v49 = vunpack.i.h.bf16 %v18402_v6 }
 0x476   :  { %15061 = vrot.lane.b32.xlu0 %v22154_v22, %s15496_s0  ;;  %13211 = vmatprep.subr.bf16.mxu1 %v22062_v31  ;;  %v13219_v32 = vpack.c.bf16 %v14614_v18, %v14613_v43  ;;  %v14653_v47 = vunpack.i.l.bf16 %v18402_v6  ;;  %v14668_v18 = vunpack.i.l.bf16 %v18431_v8  ;;  %v22231_v6 = vld [vmem:[#allocation22_spill] sm:$0xff] }
 0x477   :  { %15066 = vrot.lane.b32.xlu1 %v22186_v26, %s15495_s25  ;;  %13287 = vmatpush3.bf16.msra.mxu0 %v13286_v7  ;;  %v18835_v15 = vpop.permute.xlu1 %14836  ;;  %v10155_v7 = vld [vmem:[%s21620_s4 + $0x498] sm:$0xff] }
 0x478   :  { %12168 = vmatmul.mubr.msk.f32.gmra.mrb[108].mxu1 %vm1995_vm4, %v10079_v51  ;;  %13289 = vmatprep.subr.bf16.mxu0 %v13288_v12  ;;  %v14629_v12 = vunpack.i.h.bf16 %v18337_v16  ;;  %v22220_v51 = vld [vmem:[#allocation2_spill] sm:$0xff]  ;;  %v10158_v16 = vld [vmem:[%s21620_s4 + $0x4b0] sm:$0xff] }
 0x479   :  { %13213 = vmatpush3.bf16.msra.mxu1 %v13212_v5  ;;  %12170 = vmatprep.mubr.msk.f32.mxu1 %vm15492_vm0, %v21855_v44  ;;  %v18843_v22 = vpop.permute.xlu0 %14831  ;;  %v22221_v38 = vpack.c.bf16 %v22219_v57, %v22220_v51  ;;  %v22222_v5 = vld [vmem:[#allocation90_spill] sm:$0xff]  ;;  %v14674_v57 = vunpack.i.h.bf16 %v18450_v30  ;;  %v14673_v51 = vunpack.i.l.bf16 %v18450_v30  ;;  %v10105_v30 = vld [vmem:[%s21620_s4 + $0x388] sm:$0xff] }
 0x47a   :  { %15071 = vrot.lane.b32.xlu0 %v22162_v46, %s15496_s0  ;;  %13214 = vmatprep.subr.bf16.mxu1 %v22062_v31  ;;  %v10085_v46 = vld [vmem:[%s21620_s4 + $0x328] sm:$0xff] }
 0x47b   :  { %15076 = vrot.lane.b32.xlu1 %v22150_v54, %s15496_s0  ;;  %13291 = vmatpush3.bf16.msra.mxu0 %v13290_v41  ;;  %v18850_v24 = vpop.permute.xlu1 %14846  ;;  %v22223_v41 = vld [vmem:[#allocation86_spill] sm:$0xff] }
 0x47c   :  { %12171 = vmatmul.mubr.msk.f32.gmra.mrb[110].mxu1 %vm1995_vm4, %v10082_v52  ;;  %13293 = vmatprep.subr.bf16.mxu0 %v13292_v61  ;;  %v22224_v1 = vpack.c.bf16 %v22222_v5, %v22223_v41  ;;  %v14634_v61 = vunpack.i.h.bf16 %v18348_v17  ;;  %v14633_v52 = vunpack.i.l.bf16 %v18348_v17  ;;  %v22234_v41 = vld [vmem:[#allocation108_spill] sm:$0xff] }
 0x47d   :  { %13216 = vmatpush3.bf16.msra.mxu1 %v13215_v42  ;;  %12173 = vmatprep.mubr.msk.f32.mxu1 %vm15492_vm0, %v21855_v44  ;;  %v14649_v42 = vunpack.i.h.bf16 %v18385_v53 }
 0x47e   :  { %15081 = vrot.lane.b32.xlu0 %v22195_v29, %s15495_s25  ;;  %12199 = vmatprep.subr.mxu1 %v21855_v44  ;;  %v18863_v54 = vpop.permute.xlu0 %14841 }
 0x47f   :  { %15086 = vrot.lane.b32.xlu1 %v22170_v63, %s15496_s0  ;;  %13295 = vmatpush3.bf16.msra.mxu0 %v13294_v58  ;;  %v10088_v63 = vld [vmem:[%s21620_s4 + $0x340] sm:$0x3]  ;;  %v14648_v58 = vunpack.i.l.bf16 %v18385_v53  ;;  %v13223_v53 = vpack.c.bf16 %v14634_v61, %v14633_v52  ;;  %v14694_v61 = vunpack.i.h.bf16 %v18491_v9  ;;  %v14693_v52 = vunpack.i.l.bf16 %v18491_v9 }
 0x480   :  { %12174 = vmatmul.mubr.msk.f32.gmra.mrb[112].mxu1 %vm1995_vm4, %v10085_v46  ;;  %13312 = vmatprep.subr.bf16.mxu0 %v22218_v59  ;;  %v18874_v19 = vpop.permute.xlu1 %14856  ;;  %v22226_v46 = vld [vmem:[#allocation9_spill] sm:$0xff]  ;;  %v22228_v59 = vld [vmem:[#allocation98_spill] sm:$0xff] }
 0x481   :  { %12200 = vmatpush3.msk.msra.mxu1 %vm2017_vm3, %v18630_v25  ;;  %12176 = vmatprep.mubr.msk.f32.mxu1 %vm15492_vm0, %v21855_v44  ;;  %v13225_v43 = vpack.c.bf16 %v14649_v42, %v14648_v58  ;;  %v14704_v42 = vunpack.i.h.bf16 %v18513_v33  ;;  %v14703_v58 = vunpack.i.l.bf16 %v18513_v33  ;;  %v10108_v9 = vld [vmem:[%s21620_s4 + $0x3a0] sm:$0xff] }
 0x482   :  { %13218 = vmatprep.subr.bf16.mxu1 %v13217_v45  ;;  %15091 = vrot.lane.b32.xlu0 %v22158_v20, %s15496_s0  ;;  %v10159_v20 = vld [vmem:[%s21620_s4 + $0x4b8] sm:$0xff]  ;;  %v22227_v45 = vpack.c.bf16 %v22225_v13, %v22226_v46  ;;  %v22238_v13 = vld [vmem:[#allocation27_spill] sm:$0xff]  ;;  %v22240_v33 = vld [vmem:[#allocation118_spill] sm:$0xff] }
 0x483   :  { %15096 = vrot.lane.b32.xlu1 %v22201_v35, %s15495_s25  ;;  %4495 = vmatprep.mubr.f32.mxu0 %v10156_v50  ;;  %v18892_v25 = vpop.permute.xlu0 %14851  ;;  %v22229_v50 = vld [vmem:[#allocation94_spill] sm:$0xff] }
 0x484   :  { %12177 = vmatmul.mubr.msk.f32.gmra.mrb[114].mxu1 %vm1995_vm4, %v10088_v63  ;;  %4496 = vmatmul.mubr.f32.vlgmr.msra.gmra.mrb[212].mxu0 %v10155_v7  ;;  %v22230_v63 = vpack.c.bf16 %v22228_v59, %v22229_v50  ;;  %v14669_v7 = vunpack.i.h.bf16 %v18431_v8  ;;  %v10161_v8 = vld [vmem:[%s21620_s4 + $0x4c8] sm:$0xff]  ;;  %v13235_v59 = vpack.c.bf16 %v14694_v61, %v14693_v52  ;;  %v14714_v50 = vunpack.i.h.bf16 %v18534_v3  ;;  %v22252_v52 = vld [vmem:[#allocation102_spill] sm:$0xff] }
 0x485   :  { %12201 = vmatprep.mubr.msk.f32.mxu1 %vm15492_vm0, %v21855_v44  ;;  %13314 = vmatpush3.bf16.msra.mxu0 %v22221_v38  ;;  %v18911_v14 = vpop.permute.xlu1 %14866 }
 0x486   :  { %15101 = vrot.lane.b32.xlu0 %v22177_v27, %s15496_s0  ;;  %13316 = vmatprep.subr.bf16.mxu0 %v22224_v1  ;;  %v13221_v27 = vpack.c.bf16 %v14629_v12, %v14628_v11  ;;  %v10102_v12 = vld [vmem:[%s21620_s4 + $0x370] sm:$0xff]  ;;  %v13229_v5 = vpack.c.bf16 %v14669_v7, %v14668_v18  ;;  %v22235_v1 = vld [vmem:[#allocation103_spill] sm:$0xff]  ;;  %v22243_v18 = vld [vmem:[#allocation17_spill] sm:$0xff] }
 0x487   :  { %15106 = vrot.lane.b32.xlu1 %v22166_v37, %s15496_s0  ;;  %4500 = vmatprep.mubr.f32.mxu0 %v10159_v20  ;;  %v10162_v37 = vld [vmem:[%s21620_s4 + $0x4d0] sm:$0xff] }
 0x488   :  { %12202 = vmatmul.mubr.msk.f32.vlgmr.msra.gmra.mrb[102].mxu1 %vm1995_vm4, %v10099_v21  ;;  %4501 = vmatmul.mubr.f32.gmra.mrb[214].mxu0 %v10158_v16  ;;  %v18925_v39 = vpop.permute.xlu0 %14861  ;;  %v13227_v21 = vpack.c.bf16 %v14654_v49, %v14653_v47  ;;  %v14689_v16 = vunpack.i.h.bf16 %v18479_v56  ;;  %v10164_v47 = vld [vmem:[%s21620_s4 + $0x4e0] sm:$0xff] }
 0x489   :  { %13220 = vmatpush3.bf16.msra.mxu1 %v13219_v32  ;;  %13318 = vmatpush3.bf16.msra.mxu0 %v22227_v45  ;;  %v22236_v32 = vpack.c.bf16 %v22234_v41, %v22235_v1  ;;  %v10165_v45 = vld [vmem:[%s21620_s4 + $0x4e8] sm:$0xff]  ;;  %v10167_v41 = vld [vmem:[%s21620_s4 + $0x4f8] sm:$0xff] }
 0x48a   :  { %13222 = vmatprep.subr.bf16.mxu1 %v13221_v27  ;;  %15111 = vrot.lane.b32.xlu0 %v22211_v60, %s15495_s25  ;;  %v18935_v17 = vpop.permute.xlu1 %14881  ;;  %v22237_v27 = vld [vmem:[#allocation32_spill] sm:$0xff] }
 0x48b   :  { %15116 = vrot.lane.b32.xlu1 %v22179_v10, %s15496_s0  ;;  %13320 = vmatprep.subr.bf16.mxu0 %v22230_v63  ;;  %v22232_v10 = vld [vmem:[#allocation18_spill] sm:$0xff]  ;;  %v22239_v46 = vpack.c.bf16 %v22237_v27, %v22238_v13  ;;  %v14713_v63 = vunpack.i.l.bf16 %v18534_v3  ;;  %v10111_v3 = vld [vmem:[%s21620_s4 + $0x3b8] sm:$0xff]  ;;  %v10114_v27 = vld [vmem:[%s21620_s4 + $0x3d0] sm:$0xff] }
 0x48c   :  { %12204 = vmatprep.mubr.msk.f32.mxu1 %vm15492_vm0, %v21855_v44  ;;  %4505 = vmatprep.mubr.f32.mxu0 %v10162_v37  ;;  %v22233_v11 = vpack.c.bf16 %v22231_v6, %v22232_v10  ;;  %v22244_v6 = vld [vmem:[#allocation77_spill] sm:$0xff]  ;;  %v13237_v10 = vpack.c.bf16 %v14704_v42, %v14703_v58  ;;  %v14744_v42 = vunpack.i.h.bf16 %v22252_v52 }
 0x48d   :  { %13224 = vmatpush3.bf16.msra.mxu1 %v13223_v53  ;;  %v18954_v20 = vpop.permute.xlu0 %14871  ;;  %4506 = vmatmul.mubr.f32.gmra.mrb[216].mxu0 %v10161_v8  ;;  %v22241_v53 = vld [vmem:[#allocation113_spill] sm:$0xff] }
 0x48e   :  { %13322 = vmatpush3.bf16.msra.mxu0 %v22233_v11  ;;  %13226 = vmatprep.subr.bf16.mxu1 %v13225_v43  ;;  %v22242_v49 = vpack.c.bf16 %v22240_v33, %v22241_v53  ;;  %v14724_v43 = vunpack.i.h.bf16 %v22243_v18  ;;  %v22246_v11 = vld [vmem:[#allocation37_spill] sm:$0xff] }
 0x48f   :  { %15121 = vrot.lane.b32.xlu0 %v22178_v2, %s15496_s0  ;;  %12205 = vmatmul.mubr.msk.f32.gmra.mrb[104].mxu1 %vm1995_vm4, %v10102_v12  ;;  %v18966_v38 = vpop.permute.xlu1 %14891  ;;  %v14688_v2 = vunpack.i.l.bf16 %v18479_v56  ;;  %v13231_v56 = vpack.c.bf16 %v14674_v57, %v14673_v51  ;;  %v14723_v12 = vunpack.i.l.bf16 %v22243_v18  ;;  %v22248_v51 = vld [vmem:[#allocation128_spill] sm:$0xff]  ;;  %v10171_v13 = vld [vmem:[%s21620_s4 + $0x518] sm:$0xff] }
 0x490   :  { %15126 = vrot.lane.b32.xlu1 %v22181_v40, %s15496_s0  ;;  %13324 = vmatprep.subr.bf16.mxu0 %v22236_v32  ;;  %v22251_v32 = vld [vmem:[#allocation107_spill] sm:$0xff]  ;;  %v22257_v33 = vld [vmem:[#allocation133_spill] sm:$0xff] }
 0x491   :  { %12207 = vmatprep.mubr.msk.f32.mxu1 %vm15492_vm0, %v21855_v44  ;;  %13228 = vmatpush3.bf16.msra.mxu1 %v13227_v21  ;;  %v10168_v21 = vld [vmem:[%s21620_s4 + $0x500] sm:$0xff]  ;;  %v13241_v61 = vpack.c.bf16 %v14724_v43, %v14723_v12  ;;  %v10117_v12 = vld [vmem:[%s21620_s4 + $0x3e8] sm:$0x3] }
 0x492   :  { %13230 = vmatprep.subr.bf16.mxu1 %v13229_v5  ;;  %v18980_v40 = vpop.permute.xlu0 %14876  ;;  %13326 = vmatpush3.bf16.msra.mxu0 %v22239_v46  ;;  %v13239_v5 = vpack.c.bf16 %v14714_v50, %v14713_v63  ;;  %v22253_v46 = vld [vmem:[#allocation52_spill] sm:$0xff] }
 0x493   :  { %15131 = vrot.lane.b32.xlu0 %v22180_v36, %s15496_s0  ;;  %12208 = vmatmul.mubr.msk.f32.gmra.mrb[106].mxu1 %vm1995_vm4, %v10105_v30  ;;  %v13233_v36 = vpack.c.bf16 %v14689_v16, %v14688_v2  ;;  %v22249_v16 = vld [vmem:[#allocation123_spill] sm:$0xff]  ;;  %v14734_v30 = vunpack.i.h.bf16 %v22251_v32 }
 0x494   :  { %5419 = vrot.lane.b32.xlu1 %v22215_v4, %s15495_s25  ;;  %12210 = vmatprep.mubr.msk.f32.mxu1 %vm15492_vm0, %v21855_v44  ;;  %v19000_v37 = vpop.permute.xlu1 %14901  ;;  %v22250_v2 = vpack.c.bf16 %v22248_v51, %v22249_v16  ;;  %v22263_v16 = vld [vmem:[#allocation149_spill] sm:$0xff] }
 0x495   :  { %13232 = vmatpush3.bf16.msra.mxu1 %v13231_v56  ;;  %13328 = vmatprep.subr.bf16.mxu0 %v22242_v49  ;;  %v14733_v56 = vunpack.i.l.bf16 %v22251_v32  ;;  %v10170_v49 = vld [vmem:[%s21620_s4 + $0x510] sm:$0xff]  ;;  %v22266_v32 = vld [vmem:[#allocation117_spill] sm:$0xff] }
 0x496   :  { %13234 = vmatprep.subr.bf16.mxu1 %v13233_v36  ;;  %4510 = vmatprep.mubr.f32.mxu0 %v10165_v45  ;;  %v22254_v36 = vld [vmem:[#allocation47_spill] sm:$0xff]  ;;  %v22256_v45 = vld [vmem:[#allocation138_spill] sm:$0xff] }
 0x497   :  { %15136 = vrot.lane.b32.xlu0 %v22183_v62, %s15496_s0  ;;  %12211 = vmatmul.mubr.msk.f32.gmra.mrb[108].mxu1 %vm1995_vm4, %v10108_v9  ;;  %v19013_v7 = vpop.permute.xlu0 %14886  ;;  %v22245_v62 = vld [vmem:[#allocation42_spill] sm:$0xff]  ;;  %v22255_v9 = vpack.c.bf16 %v22253_v46, %v22254_v36  ;;  %v22258_v53 = vpack.c.bf16 %v22256_v45, %v22257_v33  ;;  %v14864_v46 = vunpack.i.h.bf16 %v18925_v39  ;;  %v14863_v36 = vunpack.i.l.bf16 %v18925_v39  ;;  %v10185_v45 = vld [vmem:[%s21620_s4 + $0x548] sm:$0xff] }
 0x498   :  { %15141 = vrot.lane.b32.xlu1 %v22244_v6, %s15496_s0  ;;  %4511 = vmatmul.mubr.f32.gmra.mrb[218].mxu0 %v10164_v47  ;;  %v22247_v8 = vpack.c.bf16 %v22245_v62, %v22246_v11  ;;  %v10174_v6 = vld [vmem:[%s21620_s4 + $0x530] sm:$0x3]  ;;  %v14859_v62 = vunpack.i.h.bf16 %v18874_v19  ;;  %v14858_v11 = vunpack.i.l.bf16 %v18874_v19  ;;  %v10173_v19 = vld [vmem:[%s21620_s4 + $0x528] sm:$0x3] }
 0x499   :  { %13236 = vmatpush3.bf16.msra.mxu1 %v13235_v59  ;;  %v19028_v57 = vpop.permute.xlu1 %3984  ;;  %12213 = vmatprep.mubr.msk.f32.mxu1 %vm15492_vm0, %v21855_v44  ;;  %v22259_v59 = vld [vmem:[#allocation141_spill] sm:$0xff] }
 0x49a   :  { %13330 = vmatpush3.bf16.msra.mxu0 %v22247_v8  ;;  %13238 = vmatprep.subr.bf16.mxu1 %v13237_v10  ;;  %v14754_v50 = vunpack.i.h.bf16 %v22259_v59  ;;  %v14753_v63 = vunpack.i.l.bf16 %v22259_v59  ;;  %v22261_v8 = vld [vmem:[#allocation57_spill] sm:$0xff] }
 0x49b   :  { %13332 = vmatprep.subr.bf16.mxu0 %v22250_v2  ;;  %15146 = vrot.lane.b32.xlu0 %v22184_v34, %s15496_s0  ;;  %v19040_v1 = vpop.permute.xlu0 %14896  ;;  %v14743_v34 = vunpack.i.l.bf16 %v22252_v52  ;;  %v22264_v2 = vld [vmem:[#allocation144_spill] sm:$0xff]  ;;  %v22269_v59 = vld [vmem:[#allocation73_spill] sm:$0xff] }
 0x49c   :  { %12214 = vmatmul.mubr.msk.f32.gmra.mrb[110].mxu1 %vm1995_vm4, %v10111_v3  ;;  %4515 = vmatprep.mubr.f32.mxu0 %v10168_v21  ;;  %v13247_v51 = vpack.c.bf16 %v14754_v50, %v14753_v63  ;;  %v22270_v50 = vld [vmem:[#allocation68_spill] sm:$0xff] }
 0x49d   :  { %15151 = vrot.lane.b32.xlu1 %v22186_v26, %s15496_s0  ;;  %13240 = vmatpush3.bf16.msra.mxu1 %v13239_v5  ;;  %v19049_v58 = vpop.permute.xlu1 %14911  ;;  %v13243_v26 = vpack.c.bf16 %v14734_v30, %v14733_v56  ;;  %v22265_v5 = vpack.c.bf16 %v22263_v16, %v22264_v2  ;;  %v14779_v30 = vunpack.i.h.bf16 %v22266_v32  ;;  %v14778_v56 = vunpack.i.l.bf16 %v22266_v32  ;;  %v22274_v16 = vld [vmem:[#allocation10_spill] sm:$0xff]  ;;  %v10129_v2 = vld [vmem:[%s21620_s4 + $0x408] sm:$0xff] }
 0x49e   :  { %4516 = vmatmul.mubr.f32.gmra.mrb[220].mxu0 %v10167_v41  ;;  %13242 = vmatprep.subr.bf16.mxu1 %v13241_v61  ;;  %v22267_v61 = vld [vmem:[#allocation31_spill] sm:$0xff]  ;;  %v22271_v63 = vpack.c.bf16 %v22269_v59, %v22270_v50  ;;  %v14879_v32 = vunpack.i.h.bf16 %v18980_v40  ;;  %v14889_v50 = vunpack.i.h.bf16 %v19013_v7 }
 0x49f   :  { %13334 = vmatpush3.bf16.msra.mxu0 %v22255_v9  ;;  %15156 = vrot.lane.b32.xlu0 %v22195_v29, %s15496_s0  ;;  %v13245_v29 = vpack.c.bf16 %v14744_v42, %v14743_v34  ;;  %v10126_v34 = vld [vmem:[%s21620_s4 + $0x3f0] sm:$0xff]  ;;  %v13358_v9 = vpack.c.bf16 %v14859_v62, %v14858_v11  ;;  %v13250_v39 = vpack.c.bf16 %v14779_v30, %v14778_v56  ;;  %v22273_v62 = vld [vmem:[#allocation41_spill] sm:$0xff]  ;;  %v14878_v30 = vunpack.i.l.bf16 %v18980_v40  ;;  %v10133_v40 = vld [vmem:[%s21620_s4 + $0x428] sm:$0xff] }
 0x4a0   :  { %13336 = vmatprep.subr.bf16.mxu0 %v22258_v53  ;;  %12216 = vmatprep.mubr.msk.f32.mxu1 %vm15492_vm0, %v21855_v44  ;;  %v19070_v47 = vpop.permute.xlu0 %14906  ;;  %v14869_v53 = vunpack.i.h.bf16 %v18911_v14  ;;  %v14793_v11 = vunpack.i.l.bf16 %v22273_v62 }
 0x4a1   :  { %12217 = vmatmul.mubr.msk.f32.gmra.mrb[112].mxu1 %vm1995_vm4, %v10114_v27  ;;  %4520 = vmatprep.mubr.f32.mxu0 %v10171_v13  ;;  %v10670_v43 = vpop.f32.mrb[116].mxu1 }
 0x4a2   :  { %15161 = vrot.lane.b32.xlu1 %v22201_v35, %s15496_s0  ;;  %13244 = vmatpush3.bf16.msra.mxu1 %v13243_v26  ;;  %v19077_v18 = vpop.permute.xlu1 %14921  ;;  %v10671_v10 = vpop.f32.mrb[117].mxu1  ;;  %v22260_v35 = vld [vmem:[#allocation62_spill] sm:$0xff]  ;;  %v22268_v26 = vld [vmem:[#allocation87_spill] sm:$0xff] }
 0x4a3   :  { %4521 = vmatmul.mubr.f32.gmra.mrb[222].mxu0 %v10170_v49  ;;  %13246 = vmatprep.subr.bf16.mxu1 %v13245_v29  ;;  %v22262_v3 = vpack.c.bf16 %v22260_v35, %v22261_v8  ;;  %v10672_v21 = vadd.f32 %v10671_v10, %v10670_v43  ;;  %v14868_v49 = vunpack.i.l.bf16 %v18911_v14  ;;  %v10184_v29 = vld [vmem:[%s21620_s4 + $0x540] sm:$0xff]  ;;  %v14794_v14 = vunpack.i.h.bf16 %v22273_v62  ;;  %v10130_v35 = vld [vmem:[%s21620_s4 + $0x410] sm:$0xff]  ;;  %v22279_v62 = vld [vmem:[#allocation65_spill] sm:$0xff] }
 0x4a4   :  { %15166 = vrot.lane.b32.xlu0 %v22211_v60, %s15496_s0  ;;  %12219 = vmatprep.mubr.msk.f32.mxu1 %vm15492_vm0, %v21855_v44  ;;  %v10127_v60 = vld [vmem:[%s21620_s4 + $0x3f8] sm:$0xff] }
 0x4a5   :  { %13338 = vmatpush3.bf16.msra.mxu0 %v22262_v3  ;;  %v19100_v41 = vpop.permute.xlu0 %14916  ;;  %12220 = vmatmul.mubr.msk.f32.gmra.mrb[114].mxu1 %vm1995_vm4, %v10117_v12  ;;  %v19109_v52 = vadd.f32 %v10672_v21, %v22267_v61  ;;  %v10673_v42 = vpop.f32.mrb[118].mxu1  ;;  %v22272_v12 = vld [vmem:[#allocation26_spill] sm:$0xff]  ;;  %v13360_v3 = vpack.c.bf16 %v14864_v46, %v14863_v36  ;;  %v14874_v21 = vunpack.i.h.bf16 %v18954_v20  ;;  %v13362_v56 = vpack.c.bf16 %v14869_v53, %v14868_v49  ;;  %v22277_v49 = vld [vmem:[#allocation19_spill] sm:$0xff] }
 0x4a6   :  { %13340 = vmatprep.subr.bf16.mxu0 %v22265_v5  ;;  %4525 = vmatprep.mubr.f32.mxu0 %v10174_v6  ;;  %v10674_v13 = vpop.f32.mrb[119].mxu1  ;;  %v14808_v46 = vunpack.i.l.bf16 %v18781_v28 }
 0x4a7   :  { %5799 = vrot.lane.b32.xlu1 %v22215_v4, %s15496_s0  ;;  %13248 = vmatpush3.bf16.msra.mxu1 %v13247_v51  ;;  %v19116_v27 = vpop.permute.xlu1 %14931  ;;  %v10675_v33 = vadd.f32 %v10674_v13, %v10673_v42  ;;  %v14873_v51 = vunpack.i.l.bf16 %v18954_v20  ;;  %v22276_v20 = vld [vmem:[#allocation112_spill] sm:$0xff]  ;;  %v14809_v13 = vunpack.i.h.bf16 %v18781_v28  ;;  %v10188_v28 = vld [vmem:[%s21620_s4 + $0x560] sm:$0xff] }
 0x4a8   :  { %4526 = vmatmul.mubr.f32.gmra.mrb[224].mxu0 %v10173_v19  ;;  %15171 = vrot.lane.b32.xlu0 %v22268_v26, %s15494_s3 }
 0x4a9   :  { %13342 = vmatpush3.bf16.msra.mxu0 %v22271_v63  ;;  %4115 = vmatprep.mubr.f32.mxu1 %v10127_v60  ;;  %v19136_v6 = vadd.f32 %v10675_v33, %v22272_v12  ;;  %v10676_v10 = vpop.f32.mrb[120].mxu1  ;;  %v22275_v60 = vld [vmem:[#allocation95_spill] sm:$0xff]  ;;  %v14883_v33 = vunpack.i.l.bf16 %v18935_v17  ;;  %v13364_v53 = vpack.c.bf16 %v14874_v21, %v14873_v51  ;;  %v14888_v63 = vunpack.i.l.bf16 %v19013_v7 }
 0x4aa   :  { %13359 = vmatprep.subr.bf16.mxu0 %v13358_v9  ;;  %4116 = vmatmul.mubr.f32.vlgmr.msra.gmra.mrb[144].mxu1 %v10126_v34  ;;  %v19133_v43 = vpop.permute.xlu0 %14926  ;;  %v10677_v8 = vpop.f32.mrb[121].mxu1  ;;  %v13253_v34 = vpack.c.bf16 %v14794_v14, %v14793_v11 }
 0x4ab   :  { %13249 = vmatprep.subr.bf16.mxu1 %v22062_v31  ;;  %4748 = vmatprep.mubr.f32.mxu0 %v10185_v45  ;;  %v10678_v19 = vadd.f32 %v10677_v8, %v10676_v10  ;;  %v14884_v45 = vunpack.i.h.bf16 %v18935_v17  ;;  %v10132_v17 = vld [vmem:[%s21620_s4 + $0x420] sm:$0xff]  ;;  %v10187_v10 = vld [vmem:[%s21620_s4 + $0x558] sm:$0xff]  ;;  %v14824_v8 = vunpack.i.h.bf16 %v18812_v23 }
 0x4ac   :  { %15176 = vrot.lane.b32.xlu1 %v22274_v16, %s15494_s3  ;;  %13251 = vmatpush3.bf16.msra.mxu1 %v13250_v39  ;;  %v19151_v5 = vpop.permute.xlu1 %14941  ;;  %v13366_v39 = vpack.c.bf16 %v14879_v32, %v14878_v30  ;;  %v14893_v32 = vunpack.i.l.bf16 %v18966_v38  ;;  %v22280_v30 = vld [vmem:[#allocation28_spill] sm:$0xff] }
 0x4ad   :  { %4749 = vmatmul.mubr.f32.vlgmr.msra.gmra.mrb[226].mxu0 %v10184_v29  ;;  %15181 = vrot.lane.b32.xlu0 %v22275_v60, %s15494_s3  ;;  %v19158_v61 = vadd.f32 %v10678_v19, %v22276_v20  ;;  %v10679_v42 = vpop.f32.mrb[122].mxu1  ;;  %v22278_v29 = vld [vmem:[#allocation104_spill] sm:$0xff]  ;;  %v14894_v19 = vunpack.i.h.bf16 %v18966_v38  ;;  %v10136_v20 = vld [vmem:[%s21620_s4 + $0x440] sm:$0xff]  ;;  %v10135_v38 = vld [vmem:[%s21620_s4 + $0x438] sm:$0xff] }
 0x4ae   :  { %13361 = vmatpush3.bf16.msra.mxu0 %v13360_v3  ;;  %4120 = vmatprep.mubr.f32.mxu1 %v10130_v35  ;;  %v10680_v9 = vpop.f32.mrb[123].mxu1  ;;  %v13256_v35 = vpack.c.bf16 %v14809_v13, %v14808_v46  ;;  %v13368_v3 = vpack.c.bf16 %v14884_v45, %v14883_v33  ;;  %v22281_v46 = vld [vmem:[#allocation36_spill] sm:$0xff]  ;;  %v22282_v45 = vld [vmem:[#allocation114_spill] sm:$0xff] }
 0x4af   :  { %13363 = vmatprep.subr.bf16.mxu0 %v13362_v56  ;;  %4121 = vmatmul.mubr.f32.gmra.mrb[146].mxu1 %v10129_v2  ;;  %v19165_v36 = vpop.permute.xlu0 %14936  ;;  %v10681_v59 = vadd.f32 %v10680_v9, %v10679_v42  ;;  %v14823_v2 = vunpack.i.l.bf16 %v18812_v23  ;;  %v13370_v56 = vpack.c.bf16 %v14889_v50, %v14888_v63  ;;  %v10191_v42 = vld [vmem:[%s21620_s4 + $0x578] sm:$0xff]  ;;  %v14898_v23 = vunpack.i.l.bf16 %v19040_v1 }
 0x4b0   :  { %13252 = vmatprep.subr.bf16.mxu1 %v22062_v31  ;;  %15186 = vrot.lane.b32.xlu1 %v22277_v49, %s15494_s3  ;;  %v14828_v50 = vunpack.i.l.bf16 %v18821_v55  ;;  %v13372_v63 = vpack.c.bf16 %v14894_v19, %v14893_v32  ;;  %v22284_v32 = vld [vmem:[#allocation124_spill] sm:$0xff] }
 0x4b1   :  { %13254 = vmatpush3.bf16.msra.mxu1 %v13253_v34  ;;  %15191 = vrot.lane.b32.xlu0 %v22278_v29, %s15494_s3  ;;  %v19182_v12 = vpop.permute.xlu1 %14951  ;;  %v19188_v14 = vadd.f32 %v10681_v59, %v22279_v62  ;;  %v10682_v7 = vpop.f32.mrb[124].mxu1  ;;  %v14899_v34 = vunpack.i.h.bf16 %v19040_v1  ;;  %v10190_v1 = vld [vmem:[%s21620_s4 + $0x570] sm:$0xff]  ;;  %v14829_v59 = vunpack.i.h.bf16 %v18821_v55  ;;  %v22283_v62 = vld [vmem:[#allocation38_spill] sm:$0xff] }
 0x4b2   :  { %13365 = vmatpush3.bf16.msra.mxu0 %v13364_v53  ;;  %4125 = vmatprep.mubr.f32.mxu1 %v10133_v40  ;;  %v10683_v11 = vpop.f32.mrb[125].mxu1  ;;  %v10194_v55 = vld [vmem:[%s21620_s4 + $0x590] sm:$0xff] }
 0x4b3   :  { %13367 = vmatprep.subr.bf16.mxu0 %v13366_v39  ;;  %4753 = vmatprep.mubr.f32.mxu0 %v10188_v28  ;;  %v10684_v51 = vadd.f32 %v10683_v11, %v10682_v7  ;;  %v13259_v28 = vpack.c.bf16 %v14824_v8, %v14823_v2  ;;  %v13374_v7 = vpack.c.bf16 %v14899_v34, %v14898_v23  ;;  %v10139_v11 = vld [vmem:[%s21620_s4 + $0x458] sm:$0xff]  ;;  %v14914_v23 = vunpack.i.h.bf16 %v19049_v58 }
 0x4b4   :  { %4126 = vmatmul.mubr.f32.gmra.mrb[148].mxu1 %v10132_v17  ;;  %13255 = vmatprep.subr.bf16.mxu1 %v22062_v31  ;;  %v19192_v21 = vpop.permute.xlu0 %14946  ;;  %v14904_v17 = vunpack.i.h.bf16 %v19000_v37 }
 0x4b5   :  { %4754 = vmatmul.mubr.f32.gmra.mrb[228].mxu0 %v10187_v10  ;;  %15196 = vrot.lane.b32.xlu1 %v22280_v30, %s15494_s3  ;;  %v19213_v40 = vadd.f32 %v10684_v51, %v22281_v46  ;;  %v10685_v9 = vpop.f32.mrb[126].mxu1  ;;  %v14903_v10 = vunpack.i.l.bf16 %v19000_v37  ;;  %v14908_v37 = vunpack.i.l.bf16 %v19070_v47  ;;  %v10138_v51 = vld [vmem:[%s21620_s4 + $0x450] sm:$0xff] }
 0x4b6   :  { %13257 = vmatpush3.bf16.msra.mxu1 %v13256_v35  ;;  %13369 = vmatpush3.bf16.msra.mxu0 %v13368_v3  ;;  %v19210_v13 = vpop.permute.xlu1 %14961  ;;  %v10686_v33 = vpop.f32.mrb[127].mxu1  ;;  %v14909_v3 = vunpack.i.h.bf16 %v19070_v47  ;;  %v22285_v46 = vld [vmem:[#allocation48_spill] sm:$0xff] }
 0x4b7   :  { %13371 = vmatprep.subr.bf16.mxu0 %v13370_v56  ;;  %15201 = vrot.lane.b32.xlu0 %v22282_v45, %s15494_s3  ;;  %v10687_v53 = vadd.f32 %v10686_v33, %v10685_v9  ;;  %v10197_v33 = vld [vmem:[%s21620_s4 + $0x5a8] sm:$0xff] }
 0x4b8   :  { %4130 = vmatprep.mubr.f32.mxu1 %v10136_v20  ;;  %4758 = vmatprep.mubr.f32.mxu0 %v10191_v42  ;;  %v13262_v20 = vpack.c.bf16 %v14829_v59, %v14828_v50  ;;  %v13376_v42 = vpack.c.bf16 %v14904_v17, %v14903_v10  ;;  %v13378_v9 = vpack.c.bf16 %v14909_v3, %v14908_v37  ;;  %v22286_v59 = vld [vmem:[#allocation134_spill] sm:$0xff]  ;;  %v14923_v10 = vunpack.i.l.bf16 %v19077_v18  ;;  %v10145_v37 = vld [vmem:[%s21620_s4 + $0x488] sm:$0x3] }
 0x4b9   :  { %4131 = vmatmul.mubr.f32.gmra.mrb[150].mxu1 %v10135_v38  ;;  %13258 = vmatprep.subr.bf16.mxu1 %v22062_v31  ;;  %v19223_v39 = vpop.permute.xlu0 %14956  ;;  %v19236_v35 = vadd.f32 %v10687_v53, %v18783_v48  ;;  %v10688_v8 = vpop.f32.mrb[128].mxu1  ;;  %v10193_v48 = vld [vmem:[%s21620_s4 + $0x588] sm:$0xff]  ;;  %v14913_v38 = vunpack.i.l.bf16 %v19049_v58  ;;  %v10196_v50 = vld [vmem:[%s21620_s4 + $0x5a0] sm:$0xff] }
 0x4ba   :  { %4759 = vmatmul.mubr.f32.gmra.mrb[230].mxu0 %v10190_v1  ;;  %15206 = vrot.lane.b32.xlu1 %v22283_v62, %s15494_s3  ;;  %v10689_v19 = vpop.f32.mrb[129].mxu1  ;;  %v10142_v1 = vld [vmem:[%s21620_s4 + $0x470] sm:$0xff]  ;;  %v10141_v58 = vld [vmem:[%s21620_s4 + $0x468] sm:$0xff] }
 0x4bb   :  { %13260 = vmatpush3.bf16.msra.mxu1 %v13259_v28  ;;  %13373 = vmatpush3.bf16.msra.mxu0 %v13372_v63  ;;  %v19243_v2 = vpop.permute.xlu1 %4364  ;;  %v10690_v56 = vadd.f32 %v10689_v19, %v10688_v8  ;;  %v14918_v28 = vunpack.i.l.bf16 %v19100_v41  ;;  %v13380_v17 = vpack.c.bf16 %v14914_v23, %v14913_v38  ;;  %v22287_v8 = vld [vmem:[#allocation58_spill] sm:$0xff]  ;;  %v22288_v19 = vld [vmem:[#allocation145_spill] sm:$0xff]  ;;  %v14933_v23 = vunpack.i.l.bf16 %v19116_v27 }
 0x4bc   :  { %13375 = vmatprep.subr.bf16.mxu0 %v13374_v7  ;;  %15211 = vrot.lane.b32.xlu0 %v22284_v32, %s15494_s3 }
 0x4bd   :  { %4135 = vmatprep.mubr.f32.mxu1 %v10139_v11  ;;  %4763 = vmatprep.mubr.f32.mxu0 %v10194_v55  ;;  %v19250_v47 = vpop.permute.xlu0 %14966  ;;  %v19254_v34 = vadd.f32 %v10690_v56, %v18802_v0  ;;  %v14919_v0 = vunpack.i.h.bf16 %v19100_v41  ;;  %v14924_v41 = vunpack.i.h.bf16 %v19077_v18  ;;  %v14929_v11 = vunpack.i.h.bf16 %v19133_v43  ;;  %v10200_v18 = vld [vmem:[%s21620_s4 + $0x5c0] sm:$0xff] }
 0x4be   :  { %4136 = vmatmul.mubr.f32.gmra.mrb[152].mxu1 %v10138_v51  ;;  %13261 = vmatprep.subr.bf16.mxu1 %v22062_v31  ;;  %v14928_v55 = vunpack.i.l.bf16 %v19133_v43  ;;  %v10144_v43 = vld [vmem:[%s21620_s4 + $0x480] sm:$0x3]  ;;  %v10199_v51 = vld [vmem:[%s21620_s4 + $0x5b8] sm:$0xff]  ;;  %v14834_v56 = vunpack.i.h.bf16 %v18843_v22 }
 0x4bf   :  { %4764 = vmatmul.mubr.f32.gmra.mrb[232].mxu0 %v10193_v48  ;;  %15216 = vrot.lane.b32.xlu1 %v22285_v46, %s15494_s3  ;;  %v19266_v53 = vpop.permute.xlu1 %14971  ;;  %v13382_v3 = vpack.c.bf16 %v14919_v0, %v14918_v28  ;;  %v22289_v0 = vld [vmem:[#allocation164_spill] sm:$0xff]  ;;  %v22290_v28 = vld [vmem:[#allocation69_spill] sm:$0xff] }
 0x4c0   :  { %13263 = vmatpush3.bf16.msra.mxu1 %v13262_v20  ;;  %13377 = vmatpush3.bf16.msra.mxu0 %v13376_v42  ;;  %v14833_v20 = vunpack.i.l.bf16 %v18843_v22  ;;  %v14934_v42 = vunpack.i.h.bf16 %v19116_v27  ;;  %v13386_v38 = vpack.c.bf16 %v14929_v11, %v14928_v55  ;;  %v10203_v22 = vld [vmem:[%s21620_s4 + $0x5d8] sm:$0x3]  ;;  %v10128_v27 = vld [vmem:[%s21620_s4 + $0x400] sm:$0xff]  ;;  %v14944_v55 = vunpack.i.h.bf16 %v19151_v5 }
 0x4c1   :  { %13379 = vmatprep.subr.bf16.mxu0 %v13378_v9  ;;  %15221 = vrot.lane.b32.xlu0 %v22286_v59, %s15494_s3  ;;  %v19278_v63 = vpop.permute.xlu0 %14976 }
 0x4c2   :  { %4140 = vmatprep.mubr.f32.mxu1 %v10142_v1  ;;  %4768 = vmatprep.mubr.f32.mxu0 %v10197_v33  ;;  %v14939_v1 = vunpack.i.h.bf16 %v19165_v36  ;;  %v14938_v33 = vunpack.i.l.bf16 %v19165_v36  ;;  %v10202_v36 = vld [vmem:[%s21620_s4 + $0x5d0] sm:$0x3] }
 0x4c3   :  { %4141 = vmatmul.mubr.f32.gmra.mrb[154].mxu1 %v10141_v58  ;;  %12242 = vmatprep.subr.mxu1 %v21855_v44  ;;  %v19283_v7 = vpop.permute.xlu1 %14981 }
 0x4c4   :  { %4769 = vmatmul.mubr.f32.gmra.mrb[234].mxu0 %v10196_v50  ;;  %15226 = vrot.lane.b32.xlu1 %v22287_v8, %s15494_s3  ;;  %v13297_v50 = vpack.c.bf16 %v14834_v56, %v14833_v20  ;;  %v10131_v56 = vld [vmem:[%s21620_s4 + $0x418] sm:$0xff] }
 0x4c5   :  { %12243 = vmatpush3.msk.msra.mxu1 %vm2017_vm3, %v19028_v57  ;;  %13381 = vmatpush3.bf16.msra.mxu0 %v13380_v17  ;;  %v13384_v57 = vpack.c.bf16 %v14924_v41, %v14923_v10  ;;  %v14839_v17 = vunpack.i.h.bf16 %v18835_v15  ;;  %v14838_v41 = vunpack.i.l.bf16 %v18835_v15  ;;  %v13388_v10 = vpack.c.bf16 %v14934_v42, %v14933_v23  ;;  %v10214_v15 = vld [vmem:[%s21620_s4 + $0x5f0] sm:$0xff] }
 0x4c6   :  { %13383 = vmatprep.subr.bf16.mxu0 %v13382_v3  ;;  %15231 = vrot.lane.b32.xlu0 %v22288_v19, %s15494_s3  ;;  %v19305_v48 = vpop.permute.xlu0 %14986  ;;  %v14943_v3 = vunpack.i.l.bf16 %v19151_v5  ;;  %v22292_v5 = vld [vmem:[#allocation174_spill] sm:$0xff]  ;;  %v14844_v42 = vunpack.i.h.bf16 %v18863_v54  ;;  %v14843_v23 = vunpack.i.l.bf16 %v18863_v54  ;;  %v10217_v54 = vld [vmem:[%s21620_s4 + $0x608] sm:$0xff] }
 0x4c7   :  { %4145 = vmatprep.mubr.f32.mxu1 %v10145_v37  ;;  %4773 = vmatprep.mubr.f32.mxu0 %v10200_v18  ;;  %v13405_v37 = vpack.c.bf16 %v14939_v1, %v14938_v33  ;;  %v14949_v18 = vunpack.i.h.bf16 %v19192_v21  ;;  %v14954_v33 = vunpack.i.h.bf16 %v19182_v12 }
 0x4c8   :  { %4146 = vmatmul.mubr.f32.gmra.mrb[156].mxu1 %v10144_v43  ;;  %4774 = vmatmul.mubr.f32.gmra.mrb[236].mxu0 %v10199_v51  ;;  %v19311_v9 = vpop.permute.xlu1 %14991  ;;  %v14948_v43 = vunpack.i.l.bf16 %v19192_v21  ;;  %v22291_v51 = vld [vmem:[#allocation156_spill] sm:$0xff]  ;;  %v10213_v21 = vld [vmem:[%s21620_s4 + $0x5e8] sm:$0xff] }
 0x4c9   :  { %15236 = vrot.lane.b32.xlu1 %v22289_v0, %s15494_s3  ;;  %13385 = vmatpush3.bf16.msra.mxu0 %v13384_v57  ;;  %v13300_v57 = vpack.c.bf16 %v14839_v17, %v14838_v41  ;;  %v22293_v17 = vld [vmem:[#allocation79_spill] sm:$0xff]  ;;  %v10134_v41 = vld [vmem:[%s21620_s4 + $0x430] sm:$0xff] }
 0x4ca   :  { %13387 = vmatprep.subr.bf16.mxu0 %v13386_v38  ;;  %15241 = vrot.lane.b32.xlu0 %v22290_v28, %s15494_s3  ;;  %v19328_v58 = vpop.permute.xlu0 %14996  ;;  %v13407_v38 = vpack.c.bf16 %v14944_v55, %v14943_v3  ;;  %v13303_v55 = vpack.c.bf16 %v14844_v42, %v14843_v23  ;;  %v14978_v42 = vunpack.i.l.bf16 %v19278_v63  ;;  %v10137_v23 = vld [vmem:[%s21620_s4 + $0x448] sm:$0xff] }
 0x4cb   :  { %12244 = vmatprep.mubr.msk.f32.mxu1 %vm15492_vm0, %v21855_v44  ;;  %13296 = vmatprep.subr.bf16.mxu1 %v22062_v31 }
 0x4cc   :  { %4778 = vmatprep.mubr.f32.mxu0 %v10203_v22  ;;  %12245 = vmatmul.mubr.msk.f32.vlgmr.msra.gmra.mrb[102].mxu1 %vm1995_vm4, %v10128_v27  ;;  %v19336_v11 = vpop.permute.xlu1 %15001  ;;  %v14953_v22 = vunpack.i.l.bf16 %v19182_v12  ;;  %v13409_v27 = vpack.c.bf16 %v14949_v18, %v14948_v43  ;;  %v14848_v18 = vunpack.i.l.bf16 %v18850_v24 }
 0x4cd   :  { %13298 = vmatpush3.bf16.msra.mxu1 %v13297_v50  ;;  %4779 = vmatmul.mubr.f32.gmra.mrb[238].mxu0 %v10202_v36  ;;  %v14964_v36 = vunpack.i.h.bf16 %v19210_v13  ;;  %v14963_v50 = vunpack.i.l.bf16 %v19210_v13  ;;  %v10216_v13 = vld [vmem:[%s21620_s4 + $0x600] sm:$0xff] }
 0x4ce   :  { %15246 = vrot.lane.b32.xlu1 %v22291_v51, %s15494_s3  ;;  %13389 = vmatpush3.bf16.msra.mxu0 %v13388_v10  ;;  %v19355_v20 = vpop.permute.xlu0 %15006  ;;  %v22294_v10 = vld [vmem:[#allocation184_spill] sm:$0xff]  ;;  %v13411_v43 = vpack.c.bf16 %v14954_v33, %v14953_v22 }
 0x4cf   :  { %13406 = vmatprep.subr.bf16.mxu0 %v13405_v37  ;;  %15251 = vrot.lane.b32.xlu0 %v22292_v5, %s15494_s3  ;;  %v14849_v37 = vunpack.i.h.bf16 %v18850_v24  ;;  %v10220_v24 = vld [vmem:[%s21620_s4 + $0x620] sm:$0xff] }
 0x4d0   :  { %12247 = vmatprep.mubr.msk.f32.mxu1 %vm15492_vm0, %v21855_v44  ;;  %13299 = vmatprep.subr.bf16.mxu1 %v22062_v31 }
 0x4d1   :  { %5170 = vmatprep.mubr.f32.mxu0 %v10214_v15  ;;  %12248 = vmatmul.mubr.msk.f32.gmra.mrb[104].mxu1 %vm1995_vm4, %v10131_v56  ;;  %v19363_v1 = vpop.permute.xlu1 %15011  ;;  %v14969_v15 = vunpack.i.h.bf16 %v19250_v47  ;;  %v14968_v56 = vunpack.i.l.bf16 %v19250_v47  ;;  %v13306_v22 = vpack.c.bf16 %v14849_v37, %v14848_v18 }
 0x4d2   :  { %13301 = vmatpush3.bf16.msra.mxu1 %v13300_v57  ;;  %5171 = vmatmul.mubr.f32.vlgmr.msra.gmra.mrb[240].mxu0 %v10213_v21  ;;  %v13413_v21 = vpack.c.bf16 %v14964_v36, %v14963_v50  ;;  %v14979_v57 = vunpack.i.h.bf16 %v19278_v63  ;;  %v10219_v63 = vld [vmem:[%s21620_s4 + $0x618] sm:$0xff]  ;;  %v14854_v36 = vunpack.i.h.bf16 %v18892_v25  ;;  %v14853_v50 = vunpack.i.l.bf16 %v18892_v25  ;;  %v22295_v25 = vld [vmem:[#allocation194_spill] sm:$0xff] }
 0x4d3   :  { %15256 = vrot.lane.b32.xlu1 %v22293_v17, %s15494_s3  ;;  %13408 = vmatpush3.bf16.msra.mxu0 %v13407_v38  ;;  %v19377_v12 = vpop.permute.xlu0 %15016 }
 0x4d4   :  { %13410 = vmatprep.subr.bf16.mxu0 %v13409_v27  ;;  %15261 = vrot.lane.b32.xlu0 %v22294_v10, %s15494_s3  ;;  %v13417_v37 = vpack.c.bf16 %v14979_v57, %v14978_v42  ;;  %v13309_v42 = vpack.c.bf16 %v14854_v36, %v14853_v50 }
 0x4d5   :  { %12250 = vmatprep.mubr.msk.f32.mxu1 %vm15492_vm0, %v21855_v44  ;;  %13302 = vmatprep.subr.bf16.mxu1 %v22062_v31  ;;  %v19387_v3 = vpop.permute.xlu1 %15021 }
 0x4d6   :  { %5175 = vmatprep.mubr.f32.mxu0 %v10217_v54  ;;  %12251 = vmatmul.mubr.msk.f32.gmra.mrb[106].mxu1 %vm1995_vm4, %v10134_v41  ;;  %v13415_v54 = vpack.c.bf16 %v14969_v15, %v14968_v56  ;;  %v10223_v15 = vld [vmem:[%s21620_s4 + $0x638] sm:$0xff] }
 0x4d7   :  { %13304 = vmatpush3.bf16.msra.mxu1 %v13303_v55  ;;  %5176 = vmatmul.mubr.f32.gmra.mrb[242].mxu0 %v10216_v13  ;;  %v14984_v13 = vunpack.i.h.bf16 %v19283_v7  ;;  %v14983_v55 = vunpack.i.l.bf16 %v19283_v7  ;;  %v10140_v7 = vld [vmem:[%s21620_s4 + $0x460] sm:$0xff] }
 0x4d8   :  { %15266 = vrot.lane.b32.xlu1 %v22268_v26, %s15495_s25  ;;  %13412 = vmatpush3.bf16.msra.mxu0 %v13411_v43  ;;  %v19404_v47 = vpop.permute.xlu0 %15026  ;;  %v14994_v43 = vunpack.i.h.bf16 %v19311_v9 }
 0x4d9   :  { %13414 = vmatprep.subr.bf16.mxu0 %v13413_v21  ;;  %15271 = vrot.lane.b32.xlu0 %v22274_v16, %s15495_s25  ;;  %v19411_v38 = vpop.permute.xlu1 %15031  ;;  %v10812_v33 = vpop.f32.mrb[170].mxu0  ;;  %v14993_v21 = vunpack.i.l.bf16 %v19311_v9  ;;  %v10222_v9 = vld [vmem:[%s21620_s4 + $0x630] sm:$0xff] }
 0x4da   :  { %12253 = vmatprep.mubr.msk.f32.mxu1 %vm15492_vm0, %v21855_v44  ;;  %13305 = vmatprep.subr.bf16.mxu1 %v22062_v31  ;;  %v10813_v27 = vpop.f32.mrb[171].mxu0 }
 0x4db   :  { %5180 = vmatprep.mubr.f32.mxu0 %v10220_v24  ;;  %12254 = vmatmul.mubr.msk.f32.gmra.mrb[108].mxu1 %vm1995_vm4, %v10137_v23  ;;  %v10814_v41 = vadd.f32 %v10813_v27, %v10812_v33  ;;  %v13419_v23 = vpack.c.bf16 %v14984_v13, %v14983_v55  ;;  %v14998_v33 = vunpack.i.l.bf16 %v19328_v58  ;;  %v13421_v36 = vpack.c.bf16 %v14994_v43, %v14993_v21  ;;  %v10143_v13 = vld [vmem:[%s21620_s4 + $0x478] sm:$0xff] }
 0x4dc   :  { %13307 = vmatpush3.bf16.msra.mxu1 %v13306_v22  ;;  %5181 = vmatmul.mubr.f32.gmra.mrb[244].mxu0 %v10219_v63  ;;  %v19421_v18 = vpop.permute.xlu0 %15036  ;;  %v14999_v63 = vunpack.i.h.bf16 %v19328_v58  ;;  %v10226_v58 = vld [vmem:[%s21620_s4 + $0x650] sm:$0xff] }
 0x4dd   :  { %15276 = vrot.lane.b32.xlu1 %v22295_v25, %s15494_s3  ;;  %13416 = vmatpush3.bf16.msra.mxu0 %v13415_v54  ;;  %v19433_v56 = vpop.permute.xlu1 %5039  ;;  %v15009_v54 = vunpack.i.h.bf16 %v19355_v20 }
 0x4de   :  { %22296 = vst [vmem:[#allocation127_spill] sm:$0xff] %v19433_v56  ;;  %13418 = vmatprep.subr.bf16.mxu0 %v13417_v37  ;;  %15281 = vrot.lane.b32.xlu0 %v22275_v60, %s15495_s25  ;;  %v10741_v57 = vpop.f32.mrb[130].mxu1  ;;  %v15008_v37 = vunpack.i.l.bf16 %v19355_v20  ;;  %v10225_v20 = vld [vmem:[%s21620_s4 + $0x648] sm:$0xff]  ;;  %v15023_v56 = vunpack.i.l.bf16 %v19387_v3 }
 0x4df   :  { %12256 = vmatprep.mubr.msk.f32.mxu1 %vm15492_vm0, %v21855_v44  ;;  %13308 = vmatprep.subr.bf16.mxu1 %v22062_v31  ;;  %v10742_v24 = vpop.f32.mrb[131].mxu1 }
 0x4e0   :  { %5185 = vmatprep.mubr.f32.mxu0 %v10223_v15  ;;  %12257 = vmatmul.mubr.msk.f32.gmra.mrb[110].mxu1 %vm1995_vm4, %v10140_v7  ;;  %v19446_v22 = vpop.permute.xlu0 %15041  ;;  %v10743_v27 = vadd.f32 %v10742_v24, %v10741_v57  ;;  %v22297_v15 = vld [vmem:[#allocation204_spill] sm:$0xff]  ;;  %v13423_v57 = vpack.c.bf16 %v14999_v63, %v14998_v33 }
 0x4e1   :  { %13310 = vmatpush3.bf16.msra.mxu1 %v13309_v42  ;;  %5186 = vmatmul.mubr.f32.gmra.mrb[246].mxu0 %v10222_v9  ;;  %v19448_v50 = vpop.permute.xlu1 %15046  ;;  %v15014_v42 = vunpack.i.h.bf16 %v19363_v1 }
 0x4e2   :  { %15286 = vrot.lane.b32.xlu1 %v22277_v49, %s15495_s25  ;;  %13420 = vmatpush3.bf16.msra.mxu0 %v13419_v23  ;;  %v13898_v55 = vadd.f32 %v19109_v52, %v10743_v27  ;;  %v10744_v43 = vpop.f32.mrb[132].mxu1  ;;  %v10815_v21 = vpop.f32.mrb[172].mxu0  ;;  %v15013_v27 = vunpack.i.l.bf16 %v19363_v1 }
 0x4e3   :  { %13422 = vmatprep.subr.bf16.mxu0 %v13421_v36  ;;  %15291 = vrot.lane.b32.xlu0 %v22297_v15, %s15494_s3  ;;  %v10745_v7 = vpop.f32.mrb[133].mxu1  ;;  %v10816_v9 = vpop.f32.mrb[173].mxu0  ;;  %v15024_v36 = vunpack.i.h.bf16 %v19387_v3  ;;  %v10146_v3 = vld [vmem:[%s21620_s4 + $0x490] sm:$0x3] }
 0x4e4   :  { %12259 = vmatprep.mubr.msk.f32.mxu1 %vm15492_vm0, %v21855_v44  ;;  %12285 = vmatprep.subr.mxu1 %v21855_v44  ;;  %v19470_v52 = vpop.permute.xlu0 %15051  ;;  %v19472_v24 = vadd.f32 %v13898_v55, %v10814_v41  ;;  %v10746_v23 = vadd.f32 %v10745_v7, %v10744_v43  ;;  %v10817_v33 = vadd.f32 %v10816_v9, %v10815_v21  ;;  %v10229_v41 = vld [vmem:[%s21620_s4 + $0x668] sm:$0xff] }
 0x4e5   :  { %22298 = vst [vmem:[#allocation122_spill] sm:$0xff] %v19470_v52  ;;  %5190 = vmatprep.mubr.f32.mxu0 %v10226_v58  ;;  %12260 = vmatmul.mubr.msk.f32.gmra.mrb[112].mxu1 %vm1995_vm4, %v10143_v13  ;;  %v19478_v63 = vpop.permute.xlu1 %15056  ;;  %v13425_v52 = vpack.c.bf16 %v15009_v54, %v15008_v37  ;;  %v13427_v21 = vpack.c.bf16 %v15014_v42, %v15013_v27 }
 0x4e6   :  { %12286 = vmatpush3.msk.msra.mxu1 %vm2017_vm3, %v19243_v2  ;;  %5191 = vmatmul.mubr.f32.gmra.mrb[248].mxu0 %v10225_v20  ;;  %v13914_v1 = vadd.f32 %v19136_v6, %v10746_v23  ;;  %v10747_v55 = vpop.f32.mrb[134].mxu1  ;;  %v10228_v2 = vld [vmem:[%s21620_s4 + $0x660] sm:$0xff]  ;;  %v15029_v20 = vunpack.i.h.bf16 %v19404_v47  ;;  %v13429_v7 = vpack.c.bf16 %v15024_v36, %v15023_v56  ;;  %v15034_v23 = vunpack.i.h.bf16 %v19411_v38 }
 0x4e7   :  { %15296 = vrot.lane.b32.xlu1 %v22278_v29, %s15495_s25  ;;  %13424 = vmatpush3.bf16.msra.mxu0 %v13423_v57  ;;  %v10748_v54 = vpop.f32.mrb[135].mxu1  ;;  %v10818_v37 = vpop.f32.mrb[174].mxu0  ;;  %v10232_v56 = vld [vmem:[%s21620_s4 + $0x680] sm:$0x3] }
 0x4e8   :  { %13426 = vmatprep.subr.bf16.mxu0 %v13425_v52  ;;  %15301 = vrot.lane.b32.xlu0 %v22280_v30, %s15495_s25  ;;  %v19496_v6 = vpop.permute.xlu0 %15061  ;;  %v19498_v58 = vadd.f32 %v13914_v1, %v10817_v33  ;;  %v10749_v13 = vadd.f32 %v10748_v54, %v10747_v55  ;;  %v10819_v43 = vpop.f32.mrb[175].mxu0  ;;  %v15028_v52 = vunpack.i.l.bf16 %v19404_v47  ;;  %v15033_v33 = vunpack.i.l.bf16 %v19411_v38  ;;  %v10157_v47 = vld [vmem:[%s21620_s4 + $0x4a8] sm:$0xff] }
 0x4e9   :  { %12262 = vmatprep.mubr.msk.f32.mxu1 %vm15492_vm0, %v21855_v44  ;;  %5195 = vmatprep.mubr.f32.mxu0 %v10229_v41  ;;  %v19503_v9 = vpop.permute.xlu1 %15066  ;;  %v10820_v57 = vadd.f32 %v10819_v43, %v10818_v37  ;;  %v15044_v37 = vunpack.i.h.bf16 %v19446_v22 }
 0x4ea   :  { %22299 = vst [vmem:[#allocation152_spill] sm:$0xff] %v19503_v9  ;;  %12263 = vmatmul.mubr.msk.f32.gmra.mrb[114].mxu1 %vm1995_vm4, %v10146_v3  ;;  %5196 = vmatmul.mubr.f32.gmra.mrb[250].mxu0 %v10228_v2  ;;  %v13930_v42 = vadd.f32 %v19158_v61, %v10749_v13  ;;  %v10231_v61 = vld [vmem:[%s21620_s4 + $0x678] sm:$0x3]  ;;  %v13431_v2 = vpack.c.bf16 %v15029_v20, %v15028_v52  ;;  %v15043_v13 = vunpack.i.l.bf16 %v19446_v22  ;;  %v10160_v22 = vld [vmem:[%s21620_s4 + $0x4c0] sm:$0xff] }
 0x4eb   :  { %15306 = vrot.lane.b32.xlu1 %v22282_v45, %s15495_s25  ;;  %13428 = vmatpush3.bf16.msra.mxu0 %v13427_v21  ;;  %v10750_v27 = vpop.f32.mrb[136].mxu1  ;;  %v13433_v54 = vpack.c.bf16 %v15034_v23, %v15033_v33  ;;  %v15039_v21 = vunpack.i.h.bf16 %v19421_v18 }
 0x4ec   :  { %13430 = vmatprep.subr.bf16.mxu0 %v13429_v7  ;;  %15311 = vrot.lane.b32.xlu0 %v22283_v62, %s15495_s25  ;;  %v19523_v38 = vpop.permute.xlu0 %15071  ;;  %v19525_v36 = vadd.f32 %v13930_v42, %v10820_v57  ;;  %v10751_v41 = vpop.f32.mrb[137].mxu1  ;;  %v15038_v7 = vunpack.i.l.bf16 %v19421_v18  ;;  %v22300_v57 = vld [vmem:[#allocation160_spill] sm:$0xff]  ;;  %v22301_v42 = vld [vmem:[#allocation155_spill] sm:$0xff]  ;;  %v10243_v18 = vld [vmem:[%s21620_s4 + $0x698] sm:$0xff] }
 0x4ed   :  { %12287 = vmatprep.mubr.msk.f32.mxu1 %vm15492_vm0, %v21855_v44  ;;  %13343 = vmatprep.subr.bf16.mxu1 %v22062_v31  ;;  %v19530_v1 = vpop.permute.xlu1 %15076  ;;  %v10752_v55 = vadd.f32 %v10751_v41, %v10750_v27  ;;  %v10821_v3 = vpop.f32.mrb[176].mxu0  ;;  %v22302_v9 = vpack.c.bf16 %v22300_v57, %v22301_v42 }
 0x4ee   :  { %5200 = vmatprep.mubr.f32.mxu0 %v10232_v56  ;;  %12288 = vmatmul.mubr.msk.f32.vlgmr.msra.gmra.mrb[102].mxu1 %vm1995_vm4, %v10157_v47  ;;  %v10822_v43 = vpop.f32.mrb[177].mxu0  ;;  %v13452_v47 = vpack.c.bf16 %v15044_v37, %v15043_v13  ;;  %v13435_v41 = vpack.c.bf16 %v15039_v21, %v15038_v7  ;;  %v15059_v37 = vunpack.i.h.bf16 %v19478_v63  ;;  %v15058_v13 = vunpack.i.l.bf16 %v19478_v63  ;;  %v10163_v21 = vld [vmem:[%s21620_s4 + $0x4d8] sm:$0xff] }
 0x4ef   :  { %13345 = vmatpush3.bf16.msra.mxu1 %v22302_v9  ;;  %5201 = vmatmul.mubr.f32.gmra.mrb[252].mxu0 %v10231_v61  ;;  %v13946_v20 = vadd.f32 %v19188_v14, %v10752_v55  ;;  %v10823_v52 = vadd.f32 %v10822_v43, %v10821_v3  ;;  %v15049_v55 = vunpack.i.h.bf16 %v19448_v50  ;;  %v15048_v3 = vunpack.i.l.bf16 %v19448_v50  ;;  %v22304_v43 = vld [vmem:[#allocation166_spill] sm:$0xff] }
 0x4f0   :  { %15321 = vrot.lane.b32.xlu1 %v22285_v46, %s15495_s25  ;;  %13432 = vmatpush3.bf16.msra.mxu0 %v13431_v2  ;;  %v19549_v23 = vpop.permute.xlu0 %15081  ;;  %v10753_v33 = vpop.f32.mrb[138].mxu1 }
 0x4f1   :  { %13434 = vmatprep.subr.bf16.mxu0 %v13433_v54  ;;  %15316 = vrot.lane.b32.xlu0 %v22284_v32, %s15495_s25  ;;  %v19553_v14 = vpop.permute.xlu1 %15086  ;;  %v19555_v9 = vadd.f32 %v13946_v20, %v10823_v52  ;;  %v10754_v56 = vpop.f32.mrb[139].mxu1  ;;  %v22303_v54 = vld [vmem:[#allocation170_spill] sm:$0xff]  ;;  %v10242_v20 = vld [vmem:[%s21620_s4 + $0x690] sm:$0xff] }
 0x4f2   :  { %12290 = vmatprep.mubr.msk.f32.mxu1 %vm15492_vm0, %v21855_v44  ;;  %13346 = vmatprep.subr.bf16.mxu1 %v22062_v31  ;;  %v10755_v27 = vadd.f32 %v10754_v56, %v10753_v33  ;;  %v10824_v61 = vpop.f32.mrb[178].mxu0  ;;  %v22305_v57 = vpack.c.bf16 %v22303_v54, %v22304_v43  ;;  %v22307_v54 = vld [vmem:[#allocation176_spill] sm:$0xff] }
 0x4f3   :  { %12291 = vmatmul.mubr.msk.f32.gmra.mrb[104].mxu1 %vm1995_vm4, %v10160_v22  ;;  %5550 = vmatprep.mubr.f32.mxu0 %v10243_v18  ;;  %v10825_v2 = vpop.f32.mrb[179].mxu0  ;;  %v15064_v22 = vunpack.i.h.bf16 %v19496_v6 }
 0x4f4   :  { %13348 = vmatpush3.bf16.msra.mxu1 %v22305_v57  ;;  %15331 = vrot.lane.b32.xlu1 %v22289_v0, %s15495_s25  ;;  %v19573_v50 = vpop.permute.xlu0 %15091  ;;  %v13962_v7 = vadd.f32 %v19213_v40, %v10755_v27  ;;  %v10826_v42 = vadd.f32 %v10825_v2, %v10824_v61  ;;  %v15063_v40 = vunpack.i.l.bf16 %v19496_v6  ;;  %v13454_v27 = vpack.c.bf16 %v15049_v55, %v15048_v3  ;;  %v10246_v6 = vld [vmem:[%s21620_s4 + $0x6b0] sm:$0xff] }
 0x4f5   :  { %13436 = vmatpush3.bf16.msra.mxu0 %v13435_v41  ;;  %15326 = vrot.lane.b32.xlu0 %v22286_v59, %s15495_s25  ;;  %v19581_v52 = vpop.permute.xlu1 %15096  ;;  %v10756_v63 = vpop.f32.mrb[140].mxu1  ;;  %v13456_v2 = vpack.c.bf16 %v15059_v37, %v15058_v13  ;;  %v10166_v55 = vld [vmem:[%s21620_s4 + $0x4f0] sm:$0xff] }
 0x4f6   :  { %13453 = vmatprep.subr.bf16.mxu0 %v13452_v47  ;;  %12293 = vmatprep.mubr.msk.f32.mxu1 %vm15492_vm0, %v21855_v44  ;;  %v19587_v18 = vadd.f32 %v13962_v7, %v10826_v42  ;;  %v10757_v33 = vpop.f32.mrb[141].mxu1  ;;  %v10827_v56 = vpop.f32.mrb[180].mxu0  ;;  %v22306_v47 = vld [vmem:[#allocation180_spill] sm:$0xff]  ;;  %v13458_v13 = vpack.c.bf16 %v15064_v22, %v15063_v40 }
 0x4f7   :  { %13349 = vmatprep.subr.bf16.mxu1 %v22062_v31  ;;  %12294 = vmatmul.mubr.msk.f32.gmra.mrb[106].mxu1 %vm1995_vm4, %v10163_v21  ;;  %v10758_v61 = vadd.f32 %v10757_v33, %v10756_v63  ;;  %v10828_v41 = vpop.f32.mrb[181].mxu0  ;;  %v22308_v43 = vpack.c.bf16 %v22306_v47, %v22307_v54  ;;  %v10245_v21 = vld [vmem:[%s21620_s4 + $0x6a8] sm:$0xff]  ;;  %v15073_v63 = vunpack.i.l.bf16 %v19523_v38  ;;  %v15079_v54 = vunpack.i.h.bf16 %v19530_v1 }
 0x4f8   :  { %5551 = vmatmul.mubr.f32.vlgmr.msra.gmra.mrb[254].mxu0 %v10242_v20  ;;  %v19597_v57 = vpop.permute.xlu0 %15101  ;;  %v10829_v7 = vadd.f32 %v10828_v41, %v10827_v56  ;;  %15341 = vrot.lane.b32.xlu1 %v22288_v19, %s15495_s25  ;;  %v15074_v20 = vunpack.i.h.bf16 %v19523_v38  ;;  %v22310_v41 = vld [vmem:[#allocation186_spill] sm:$0xff]  ;;  %v15078_v38 = vunpack.i.l.bf16 %v19530_v1 }
 0x4f9   :  { %13351 = vmatpush3.bf16.msra.mxu1 %v22308_v43  ;;  %13455 = vmatpush3.bf16.msra.mxu0 %v13454_v27  ;;  %v19604_v3 = vpop.permute.xlu1 %15106  ;;  %v13978_v37 = vadd.f32 %v19236_v35, %v10758_v61  ;;  %v22309_v61 = vld [vmem:[#allocation190_spill] sm:$0xff]  ;;  %v10249_v43 = vld [vmem:[%s21620_s4 + $0x6c8] sm:$0xff] }
 0x4fa   :  { %15336 = vrot.lane.b32.xlu0 %v22287_v8, %s15495_s25  ;;  %12296 = vmatprep.mubr.msk.f32.mxu1 %vm15492_vm0, %v21855_v44  ;;  %v10759_v42 = vpop.f32.mrb[142].mxu1  ;;  %v22311_v47 = vpack.c.bf16 %v22309_v61, %v22310_v41  ;;  %v22313_v61 = vld [vmem:[#allocation196_spill] sm:$0xff] }
 0x4fb   :  { %13352 = vmatprep.subr.bf16.mxu1 %v22062_v31  ;;  %5555 = vmatprep.mubr.f32.mxu0 %v10246_v6  ;;  %v19617_v35 = vadd.f32 %v13978_v37, %v10829_v7  ;;  %v10760_v22 = vpop.f32.mrb[143].mxu1  ;;  %v10830_v40 = vpop.f32.mrb[182].mxu0  ;;  %v10169_v7 = vld [vmem:[%s21620_s4 + $0x508] sm:$0xff]  ;;  %v13460_v37 = vpack.c.bf16 %v15074_v20, %v15073_v63  ;;  %v15088_v20 = vunpack.i.l.bf16 %v19553_v14 }
 0x4fc   :  { %13457 = vmatprep.subr.bf16.mxu0 %v13456_v2  ;;  %12297 = vmatmul.mubr.msk.f32.gmra.mrb[108].mxu1 %vm1995_vm4, %v10166_v55  ;;  %v19620_v33 = vpop.permute.xlu0 %15111  ;;  %v10761_v56 = vadd.f32 %v10760_v22, %v10759_v42  ;;  %v10831_v27 = vpop.f32.mrb[183].mxu0  ;;  %v10248_v55 = vld [vmem:[%s21620_s4 + $0x6c0] sm:$0xff] }
 0x4fd   :  { %13354 = vmatpush3.bf16.msra.mxu1 %v22311_v47  ;;  %5556 = vmatmul.mubr.f32.gmra.mrb[0].mxu0 %v10245_v21  ;;  %v19630_v2 = vpop.permute.xlu1 %15116  ;;  %v10832_v6 = vadd.f32 %v10831_v27, %v10830_v40  ;;  %v13462_v40 = vpack.c.bf16 %v15079_v54, %v15078_v38  ;;  %v22312_v27 = vld [vmem:[#allocation200_spill] sm:$0xff]  ;;  %v10252_v47 = vld [vmem:[%s21620_s4 + $0x6e0] sm:$0xff]  ;;  %v15094_v54 = vunpack.i.h.bf16 %v19573_v50  ;;  %v15093_v38 = vunpack.i.l.bf16 %v19573_v50 }
 0x4fe   :  { %15351 = vrot.lane.b32.xlu1 %v22290_v28, %s15495_s25  ;;  %13459 = vmatpush3.bf16.msra.mxu0 %v13458_v13  ;;  %v13994_v1 = vadd.f32 %v19254_v34, %v10761_v56  ;;  %v15089_v34 = vunpack.i.h.bf16 %v19553_v14  ;;  %v22314_v41 = vpack.c.bf16 %v22312_v27, %v22313_v61  ;;  %v10172_v14 = vld [vmem:[%s21620_s4 + $0x520] sm:$0xff] }
 0x4ff   :  { %15346 = vrot.lane.b32.xlu0 %v22292_v5, %s15495_s25  ;;  %12299 = vmatprep.mubr.msk.f32.mxu1 %vm15492_vm0, %v21855_v44  ;;  %v10883_v21 = vpop.f32.mrb[184].mxu0 }
 0x500   :  { %13355 = vmatprep.subr.bf16.mxu1 %v22062_v31  ;;  %5560 = vmatprep.mubr.f32.mxu0 %v10249_v43  ;;  %v19648_v42 = vadd.f32 %v13994_v1, %v10832_v6  ;;  %v10884_v22 = vpop.f32.mrb[185].mxu0  ;;  %v10251_v43 = vld [vmem:[%s21620_s4 + $0x6d8] sm:$0xff]  ;;  %v13464_v1 = vpack.c.bf16 %v15089_v34, %v15088_v20  ;;  %v10254_v34 = vld [vmem:[%s21620_s4 + $0x6f0] sm:$0xff]  ;;  %v15104_v20 = vunpack.i.h.bf16 %v19597_v57 }
 0x501   :  { %v19646_v13 = vpop.permute.xlu0 %15121  ;;  %12300 = vmatmul.mubr.msk.f32.gmra.mrb[110].mxu1 %vm1995_vm4, %v10169_v7  ;;  %5561 = vmatmul.mubr.f32.gmra.mrb[2].mxu0 %v10248_v55  ;;  %v10885_v56 = vadd.f32 %v10884_v22, %v10883_v21  ;;  %v13466_v22 = vpack.c.bf16 %v15094_v54, %v15093_v38  ;;  %v15109_v54 = vunpack.i.h.bf16 %v19604_v3  ;;  %v15108_v38 = vunpack.i.l.bf16 %v19604_v3 }
 0x502   :  { %v19653_v63 = vpop.permute.xlu1 %15126  ;;  %13357 = vmatpush3.bf16.msra.mxu1 %v22314_v41  ;;  %15361 = vrot.lane.b32.xlu1 %v22294_v10, %s15495_s25  ;;  %v14959_v41 = vunpack.i.h.bf16 %v19223_v39 }
 0x503   :  { %13461 = vmatprep.subr.bf16.mxu0 %v13460_v37  ;;  %15356 = vrot.lane.b32.xlu0 %v22291_v51, %s15495_s25  ;;  %v19674_v6 = vadd.f32 %v19472_v24, %v10885_v56  ;;  %v10255_v24 = vld [vmem:[%s21620_s4 + $0x6f8] sm:$0xff]  ;;  %v22315_v56 = vld [vmem:[#allocation207_spill] sm:$0xff] }
 0x504   :  { %12302 = vmatprep.mubr.msk.f32.mxu1 %vm15492_vm0, %v21855_v44  ;;  %12328 = vmatprep.subr.mxu1 %v21855_v44  ;;  %v10886_v55 = vpop.f32.mrb[186].mxu0 }
 0x505   :  { %v19679_v7 = vpop.permute.xlu0 %15131  ;;  %5565 = vmatprep.mubr.f32.mxu0 %v10252_v47  ;;  %13463 = vmatpush3.bf16.msra.mxu0 %v13462_v40  ;;  %v10887_v50 = vpop.f32.mrb[187].mxu0  ;;  %v10175_v40 = vld [vmem:[%s21620_s4 + $0x538] sm:$0x3]  ;;  %v14958_v47 = vunpack.i.l.bf16 %v19223_v39  ;;  %v10186_v39 = vld [vmem:[%s21620_s4 + $0x550] sm:$0xff] }
 0x506   :  { %v19681_v37 = vpop.permute.xlu1 %5419  ;;  %12303 = vmatmul.mubr.msk.f32.gmra.mrb[112].mxu1 %vm1995_vm4, %v10172_v14  ;;  %5566 = vmatmul.mubr.f32.gmra.mrb[4].mxu0 %v10251_v43  ;;  %v10888_v21 = vadd.f32 %v10887_v50, %v10886_v55  ;;  %v10257_v55 = vld [vmem:[%s21620_s4 + $0x708] sm:$0xff] }
 0x507   :  { %12329 = vmatpush3.msk.msra.mxu1 %vm2017_vm3, %v22215_v4  ;;  %6474 = vrot.lane.b32.xlu1 %v22315_v56, %s15494_s3  ;;  %v15103_v4 = vunpack.i.l.bf16 %v19597_v57  ;;  %v10258_v57 = vld [vmem:[%s21620_s4 + $0x710] sm:$0xff]  ;;  %v13391_v50 = vpack.c.bf16 %v14959_v41, %v14958_v47  ;;  %v15123_v41 = vunpack.i.l.bf16 %v19646_v13 }
 0x508   :  { %15366 = vrot.lane.b32.xlu0 %v22293_v17, %s15495_s25  ;;  %12305 = vmatprep.mubr.msk.f32.mxu1 %vm15492_vm0, %v21855_v44  ;;  %v19706_v61 = vadd.f32 %v19498_v58, %v10888_v21  ;;  %v14973_v21 = vunpack.i.l.bf16 %v19266_v53 }
 0x509   :  { %v19703_v27 = vpop.permute.xlu0 %15136  ;;  %5570 = vmatprep.mubr.f32.mxu0 %v10255_v24  ;;  %13465 = vmatprep.subr.bf16.mxu0 %v13464_v1  ;;  %v10889_v14 = vpop.f32.mrb[188].mxu0  ;;  %v13468_v1 = vpack.c.bf16 %v15104_v20, %v15103_v4  ;;  %v14974_v24 = vunpack.i.h.bf16 %v19266_v53  ;;  %v15118_v20 = vunpack.i.l.bf16 %v19630_v2  ;;  %v10261_v53 = vld [vmem:[%s21620_s4 + $0x728] sm:$0x3] }
 0x50a   :  { %12306 = vmatmul.mubr.msk.f32.gmra.mrb[114].mxu1 %vm1995_vm4, %v10175_v40  ;;  %5571 = vmatmul.mubr.f32.gmra.mrb[6].mxu0 %v10254_v34  ;;  %v19716_v58 = vpop.permute.xlu1 %15141  ;;  %v10890_v43 = vpop.f32.mrb[189].mxu0  ;;  %v13470_v34 = vpack.c.bf16 %v15109_v54, %v15108_v38 }
 0x50b   :  { %15371 = vrot.lane.b32.xlu1 %v22295_v25, %s15495_s25  ;;  %13467 = vmatpush3.bf16.msra.mxu0 %v13466_v22  ;;  %v10891_v3 = vadd.f32 %v10890_v43, %v10889_v14  ;;  %v13394_v38 = vpack.c.bf16 %v14974_v24, %v14973_v21  ;;  %v15133_v24 = vunpack.i.l.bf16 %v19679_v7 }
 0x50c   :  { %15376 = vrot.lane.b32.xlu0 %v22268_v26, %s15496_s0  ;;  %12330 = vmatprep.mubr.msk.f32.mxu1 %vm15492_vm0, %v21855_v44  ;;  %v15119_v26 = vunpack.i.h.bf16 %v19630_v2  ;;  %v10189_v2 = vld [vmem:[%s21620_s4 + $0x568] sm:$0xff] }
 0x50d   :  { %13390 = vmatprep.subr.bf16.mxu1 %v22062_v31  ;;  %5575 = vmatprep.mubr.f32.mxu0 %v10258_v57  ;;  %v19733_v22 = vpop.permute.xlu0 %15146  ;;  %v19736_v40 = vadd.f32 %v19525_v36, %v10891_v3  ;;  %v15124_v36 = vunpack.i.h.bf16 %v19646_v13  ;;  %v14989_v57 = vunpack.i.h.bf16 %v19305_v48  ;;  %v14988_v13 = vunpack.i.l.bf16 %v19305_v48 }
 0x50e   :  { %12331 = vmatmul.mubr.msk.f32.vlgmr.msra.gmra.mrb[102].mxu1 %vm1995_vm4, %v10186_v39  ;;  %5576 = vmatmul.mubr.f32.gmra.mrb[8].mxu0 %v10257_v55  ;;  %v10892_v4 = vpop.f32.mrb[190].mxu0  ;;  %v13472_v39 = vpack.c.bf16 %v15119_v26, %v15118_v20  ;;  %v15129_v55 = vunpack.i.h.bf16 %v19653_v63  ;;  %v15128_v3 = vunpack.i.l.bf16 %v19653_v63  ;;  %v15134_v48 = vunpack.i.h.bf16 %v19679_v7  ;;  %v10192_v63 = vld [vmem:[%s21620_s4 + $0x580] sm:$0xff] }
 0x50f   :  { %13392 = vmatpush3.bf16.msra.mxu1 %v13391_v50  ;;  %15381 = vrot.lane.b32.xlu1 %v22274_v16, %s15496_s0  ;;  %v19748_v47 = vpop.permute.xlu1 %15151  ;;  %v10893_v14 = vpop.f32.mrb[191].mxu0  ;;  %v10260_v16 = vld [vmem:[%s21620_s4 + $0x720] sm:$0x3]  ;;  %v13474_v50 = vpack.c.bf16 %v15124_v36, %v15123_v41  ;;  %v15004_v26 = vunpack.i.h.bf16 %v19336_v11  ;;  %v15003_v20 = vunpack.i.l.bf16 %v19336_v11  ;;  %v15138_v36 = vunpack.i.l.bf16 %v19703_v27 }
 0x510   :  { %13469 = vmatprep.subr.bf16.mxu0 %v13468_v1  ;;  %15386 = vrot.lane.b32.xlu0 %v22297_v15, %s15495_s25  ;;  %v10894_v54 = vadd.f32 %v10893_v14, %v10892_v4  ;;  %v13397_v4 = vpack.c.bf16 %v14989_v57, %v14988_v13  ;;  %v13478_v14 = vpack.c.bf16 %v15134_v48, %v15133_v24  ;;  %v15143_v11 = vunpack.i.l.bf16 %v19716_v58 }
 0x511   :  { %12333 = vmatprep.mubr.msk.f32.mxu1 %vm15492_vm0, %v21855_v44  ;;  %13393 = vmatprep.subr.bf16.mxu1 %v22062_v31  ;;  %v19763_v43 = vpop.permute.xlu0 %15156  ;;  %v15018_v57 = vunpack.i.l.bf16 %v19377_v12 }
 0x512   :  { %5580 = vmatprep.mubr.f32.mxu0 %v10261_v53  ;;  %13471 = vmatpush3.bf16.msra.mxu0 %v13470_v34  ;;  %v19768_v1 = vadd.f32 %v19555_v9, %v10894_v54  ;;  %v15139_v53 = vunpack.i.h.bf16 %v19703_v27  ;;  %v10195_v27 = vld [vmem:[%s21620_s4 + $0x598] sm:$0xff]  ;;  %v13400_v54 = vpack.c.bf16 %v15004_v26, %v15003_v20 }
 0x513   :  { %12334 = vmatmul.mubr.msk.f32.gmra.mrb[104].mxu1 %vm1995_vm4, %v10189_v2  ;;  %5581 = vmatmul.mubr.f32.gmra.mrb[10].mxu0 %v10260_v16  ;;  %v10895_v21 = vpop.f32.mrb[192].mxu0  ;;  %v10271_v20 = vld [vmem:[%s21620_s4 + $0x738] sm:$0xff] }
 0x514   :  { %13395 = vmatpush3.bf16.msra.mxu1 %v13394_v38  ;;  %15391 = vrot.lane.b32.xlu1 %v22275_v60, %s15496_s0  ;;  %v19778_v34 = vpop.permute.xlu1 %15161  ;;  %v10896_v9 = vpop.f32.mrb[193].mxu0  ;;  %v13476_v60 = vpack.c.bf16 %v15129_v55, %v15128_v3  ;;  %v15019_v38 = vunpack.i.h.bf16 %v19377_v12  ;;  %v10198_v55 = vld [vmem:[%s21620_s4 + $0x5b0] sm:$0xff] }
 0x515   :  { %15396 = vrot.lane.b32.xlu0 %v22277_v49, %s15496_s0  ;;  %12336 = vmatprep.mubr.msk.f32.mxu1 %vm15492_vm0, %v21855_v44  ;;  %v10897_v7 = vadd.f32 %v10896_v9, %v10895_v21  ;;  %v15144_v49 = vunpack.i.h.bf16 %v19716_v58  ;;  %v10272_v21 = vld [vmem:[%s21620_s4 + $0x740] sm:$0xff]  ;;  %v22317_v9 = vld [vmem:[#allocation81_spill] sm:$0xff] }
 0x516   :  { %13396 = vmatprep.subr.bf16.mxu1 %v22062_v31  ;;  %13473 = vmatprep.subr.bf16.mxu0 %v13472_v39  ;;  %v19789_v41 = vpop.permute.xlu0 %15166 }
 0x517   :  { %12337 = vmatmul.mubr.msk.f32.gmra.mrb[106].mxu1 %vm1995_vm4, %v10192_v63  ;;  %13475 = vmatpush3.bf16.msra.mxu0 %v13474_v50  ;;  %v19795_v2 = vadd.f32 %v19587_v18, %v10897_v7  ;;  %v13403_v50 = vpack.c.bf16 %v15019_v38, %v15018_v57  ;;  %v22325_v38 = vld [vmem:[#allocation89_spill] sm:$0xff] }
 0x518   :  { %13398 = vmatpush3.bf16.msra.mxu1 %v13397_v4  ;;  %15401 = vrot.lane.b32.xlu1 %v22278_v29, %s15496_s0  ;;  %v10898_v16 = vpop.f32.mrb[194].mxu0  ;;  %v13480_v29 = vpack.c.bf16 %v15139_v53, %v15138_v36  ;;  %v22319_v4 = vld [vmem:[#allocation127_spill] sm:$0xff]  ;;  %v22320_v36 = vld [vmem:[#allocation122_spill] sm:$0xff] }
 0x519   :  { %15406 = vrot.lane.b32.xlu0 %v22280_v30, %s15496_s0  ;;  %12339 = vmatprep.mubr.msk.f32.mxu1 %vm15492_vm0, %v21855_v44  ;;  %v19806_v58 = vpop.permute.xlu1 %5799  ;;  %v10899_v18 = vpop.f32.mrb[195].mxu0  ;;  %v13482_v30 = vpack.c.bf16 %v15144_v49, %v15143_v11  ;;  %v15053_v49 = vunpack.i.l.bf16 %v22320_v36  ;;  %v22321_v11 = vld [vmem:[#allocation7_spill] sm:$0xff] }
 0x51a   :  { %13399 = vmatprep.subr.bf16.mxu1 %v22062_v31  ;;  %13477 = vmatprep.subr.bf16.mxu0 %v13476_v60  ;;  %v19811_v13 = vpop.permute.xlu0 %15171  ;;  %v10900_v39 = vadd.f32 %v10899_v18, %v10898_v16  ;;  %v10275_v60 = vld [vmem:[%s21620_s4 + $0x758] sm:$0xff]  ;;  %v22324_v18 = vld [vmem:[#allocation92_spill] sm:$0xff] }
 0x51b   :  { %12340 = vmatmul.mubr.msk.f32.gmra.mrb[108].mxu1 %vm1995_vm4, %v10195_v27  ;;  %13479 = vmatpush3.bf16.msra.mxu0 %v13478_v14  ;;  %v15054_v14 = vunpack.i.h.bf16 %v22320_v36  ;;  %v22322_v27 = vld [vmem:[#allocation4_spill] sm:$0xff]  ;;  %v22326_v57 = vpack.c.bf16 %v22324_v18, %v22325_v38  ;;  %v22335_v18 = vld [vmem:[#allocation21_spill] sm:$0xff]  ;;  %v10280_v38 = vld [vmem:[%s21620_s4 + $0x780] sm:$0xff] }
 0x51c   :  { %13401 = vmatpush3.bf16.msra.mxu1 %v13400_v54  ;;  %15416 = vrot.lane.b32.xlu1 %v22283_v62, %s15496_s0  ;;  %v19820_v12 = vadd.f32 %v19617_v35, %v10900_v39  ;;  %v22323_v16 = vpack.c.bf16 %v22321_v11, %v22322_v27  ;;  %v10218_v36 = vld [vmem:[%s21620_s4 + $0x610] sm:$0xff] }
 0x51d   :  { %15411 = vrot.lane.b32.xlu0 %v22282_v45, %s15496_s0  ;;  %12342 = vmatprep.mubr.msk.f32.mxu1 %vm15492_vm0, %v21855_v44  ;;  %v10901_v3 = vpop.f32.mrb[196].mxu0  ;;  %v10201_v45 = vld [vmem:[%s21620_s4 + $0x5c8] sm:$0xff] }
 0x51e   :  { %13402 = vmatprep.subr.bf16.mxu1 %v22062_v31  ;;  %13481 = vmatprep.subr.bf16.mxu0 %v13480_v29  ;;  %v19827_v48 = vpop.permute.xlu1 %15176  ;;  %v10902_v62 = vpop.f32.mrb[197].mxu0 }
 0x51f   :  { %12343 = vmatmul.mubr.msk.f32.gmra.mrb[110].mxu1 %vm1995_vm4, %v10198_v55  ;;  %13483 = vmatpush3.bf16.msra.mxu0 %v13482_v30  ;;  %v19830_v24 = vpop.permute.xlu0 %15181  ;;  %v10903_v35 = vadd.f32 %v10902_v62, %v10901_v3  ;;  %v10215_v30 = vld [vmem:[%s21620_s4 + $0x5f8] sm:$0xff] }
 0x520   :  { %13404 = vmatpush3.bf16.msra.mxu1 %v13403_v50  ;;  %15426 = vrot.lane.b32.xlu1 %v22289_v0, %s15496_s0  ;;  %v22316_v0 = vld [vmem:[#allocation84_spill] sm:$0xff]  ;;  %v13438_v50 = vpack.c.bf16 %v15054_v14, %v15053_v49 }
 0x521   :  { %15421 = vrot.lane.b32.xlu0 %v22284_v32, %s15496_s0  ;;  %12345 = vmatprep.mubr.msk.f32.mxu1 %vm15492_vm0, %v21855_v44  ;;  %v19845_v63 = vadd.f32 %v19648_v42, %v10903_v35  ;;  %v22318_v26 = vpack.c.bf16 %v22316_v0, %v22317_v9  ;;  %v10204_v42 = vld [vmem:[%s21620_s4 + $0x5e0] sm:$0x3]  ;;  %v22327_v35 = vld [vmem:[#allocation152_spill] sm:$0xff] }
 0x522   :  { %12371 = vmatprep.subr.mxu1 %v21855_v44  ;;  %v19854_v7 = vpop.permute.xlu1 %15186  ;;  %5930 = vmatprep.mubr.f32.mxu0 %v10272_v21  ;;  %v22328_v21 = vld [vmem:[#allocation15_spill] sm:$0xff]  ;;  %v22329_v0 = vld [vmem:[#allocation12_spill] sm:$0xff] }
 0x523   :  { %13500 = vmatprep.subr.bf16.mxu0 %v22318_v26  ;;  %12346 = vmatmul.mubr.msk.f32.gmra.mrb[112].mxu1 %vm1995_vm4, %v10201_v45  ;;  %v19857_v32 = vpop.permute.xlu0 %15191  ;;  %v15069_v45 = vunpack.i.h.bf16 %v22327_v35  ;;  %v22330_v9 = vpack.c.bf16 %v22328_v21, %v22329_v0  ;;  %v15098_v0 = vunpack.i.l.bf16 %v19581_v52 }
 0x524   :  { %12372 = vmatpush3.msk.msra.mxu1 %vm2017_vm3, %v22319_v4  ;;  %6854 = vrot.lane.b32.xlu1 %v22315_v56, %s15495_s25  ;;  %v22332_v4 = vld [vmem:[#allocation97_spill] sm:$0xff] }
 0x525   :  { %15431 = vrot.lane.b32.xlu0 %v22285_v46, %s15496_s0  ;;  %5931 = vmatmul.mubr.f32.vlgmr.msra.gmra.mrb[12].mxu0 %v10271_v20  ;;  %v10954_v53 = vpop.f32.mrb[198].mxu0  ;;  %v10274_v46 = vld [vmem:[%s21620_s4 + $0x750] sm:$0xff] }
 0x526   :  { %12348 = vmatprep.mubr.msk.f32.mxu1 %vm15492_vm0, %v21855_v44  ;;  %13502 = vmatpush3.bf16.msra.mxu0 %v22323_v16  ;;  %v10955_v54 = vpop.f32.mrb[199].mxu0  ;;  %v22331_v20 = vld [vmem:[#allocation100_spill] sm:$0xff] }
 0x527   :  { %12349 = vmatmul.mubr.msk.f32.gmra.mrb[114].mxu1 %vm1995_vm4, %v10204_v42  ;;  %13504 = vmatprep.subr.bf16.mxu0 %v22326_v57  ;;  %v19885_v29 = vpop.permute.xlu1 %15196  ;;  %v10956_v39 = vadd.f32 %v10955_v54, %v10954_v53  ;;  %v22333_v42 = vpack.c.bf16 %v22331_v20, %v22332_v4  ;;  %v22334_v54 = vld [vmem:[#allocation24_spill] sm:$0xff] }
 0x528   :  { %15436 = vrot.lane.b32.xlu1 %v22286_v59, %s15496_s0  ;;  %5935 = vmatprep.mubr.f32.mxu0 %v10275_v60  ;;  %v10278_v59 = vld [vmem:[%s21620_s4 + $0x770] sm:$0xff] }
 0x529   :  { %15441 = vrot.lane.b32.xlu0 %v22292_v5, %s15496_s0  ;;  %5936 = vmatmul.mubr.f32.gmra.mrb[14].mxu0 %v10274_v46  ;;  %v19894_v55 = vpop.permute.xlu0 %15201  ;;  %v19897_v3 = vadd.f32 %v19674_v6, %v10956_v39  ;;  %v15068_v5 = vunpack.i.l.bf16 %v22327_v35  ;;  %v10277_v6 = vld [vmem:[%s21620_s4 + $0x768] sm:$0xff]  ;;  %v15083_v46 = vunpack.i.l.bf16 %v19549_v23  ;;  %v22337_v39 = vld [vmem:[#allocation110_spill] sm:$0xff]  ;;  %v22343_v4 = vld [vmem:[#allocation120_spill] sm:$0xff] }
 0x52a   :  { %12373 = vmatprep.mubr.msk.f32.mxu1 %vm15492_vm0, %v21855_v44  ;;  %13437 = vmatprep.subr.bf16.mxu1 %v22062_v31  ;;  %v10957_v62 = vpop.f32.mrb[200].mxu0 }
 0x52b   :  { %13506 = vmatpush3.bf16.msra.mxu0 %v22330_v9  ;;  %12374 = vmatmul.mubr.msk.f32.vlgmr.msra.gmra.mrb[102].mxu1 %vm1995_vm4, %v10215_v30  ;;  %v10958_v26 = vpop.f32.mrb[201].mxu0  ;;  %v13441_v27 = vpack.c.bf16 %v15069_v45, %v15068_v5  ;;  %v22338_v30 = vld [vmem:[#allocation106_spill] sm:$0xff] }
 0x52c   :  { %13439 = vmatpush3.bf16.msra.mxu1 %v13438_v50  ;;  %13508 = vmatprep.subr.bf16.mxu0 %v22333_v42  ;;  %v19917_v60 = vpop.permute.xlu1 %15206  ;;  %v10959_v53 = vadd.f32 %v10958_v26, %v10957_v62  ;;  %v22339_v50 = vpack.c.bf16 %v22337_v39, %v22338_v30  ;;  %v22341_v9 = vld [vmem:[#allocation30_spill] sm:$0xff]  ;;  %v10283_v26 = vld [vmem:[%s21620_s4 + $0x798] sm:$0xff]  ;;  %v22344_v42 = vld [vmem:[#allocation116_spill] sm:$0xff] }
 0x52d   :  { %15446 = vrot.lane.b32.xlu1 %v22287_v8, %s15496_s0  ;;  %5940 = vmatprep.mubr.f32.mxu0 %v10278_v59  ;;  %v10281_v8 = vld [vmem:[%s21620_s4 + $0x788] sm:$0xff]  ;;  %v22350_v39 = vld [vmem:[#allocation126_spill] sm:$0xff] }
 0x52e   :  { %15451 = vrot.lane.b32.xlu0 %v22288_v19, %s15496_s0  ;;  %5941 = vmatmul.mubr.f32.gmra.mrb[16].mxu0 %v10277_v6  ;;  %v19926_v14 = vpop.permute.xlu0 %15211  ;;  %v19929_v49 = vadd.f32 %v19706_v61, %v10959_v53  ;;  %v10960_v11 = vpop.f32.mrb[202].mxu0  ;;  %v15084_v19 = vunpack.i.h.bf16 %v19549_v23  ;;  %v22336_v61 = vpack.c.bf16 %v22334_v54, %v22335_v18  ;;  %v10221_v23 = vld [vmem:[%s21620_s4 + $0x628] sm:$0xff]  ;;  %v22345_v53 = vpack.c.bf16 %v22343_v4, %v22344_v42  ;;  %v22347_v18 = vld [vmem:[#allocation40_spill] sm:$0xff] }
 0x52f   :  { %12376 = vmatprep.mubr.msk.f32.mxu1 %vm15492_vm0, %v21855_v44  ;;  %13440 = vmatprep.subr.bf16.mxu1 %v22062_v31  ;;  %v10961_v16 = vpop.f32.mrb[203].mxu0  ;;  %v15113_v54 = vunpack.i.l.bf16 %v19620_v33 }
 0x530   :  { %13510 = vmatpush3.bf16.msra.mxu0 %v22336_v61  ;;  %12377 = vmatmul.mubr.msk.f32.gmra.mrb[104].mxu1 %vm1995_vm4, %v10218_v36  ;;  %v10962_v57 = vadd.f32 %v10961_v16, %v10960_v11  ;;  %v13444_v5 = vpack.c.bf16 %v15084_v19, %v15083_v46  ;;  %v15114_v46 = vunpack.i.h.bf16 %v19620_v33 }
 0x531   :  { %13442 = vmatpush3.bf16.msra.mxu1 %v13441_v27  ;;  %13512 = vmatprep.subr.bf16.mxu0 %v22339_v50  ;;  %v19949_v59 = vpop.permute.xlu1 %15216 }
 0x532   :  { %15456 = vrot.lane.b32.xlu1 %v22294_v10, %s15496_s0  ;;  %5945 = vmatprep.mubr.f32.mxu0 %v10281_v8  ;;  %v19957_v62 = vadd.f32 %v19736_v40, %v10962_v57  ;;  %v10284_v10 = vld [vmem:[%s21620_s4 + $0x7a0] sm:$0xff]  ;;  %v15099_v40 = vunpack.i.h.bf16 %v19581_v52 }
 0x533   :  { %15461 = vrot.lane.b32.xlu0 %v22290_v28, %s15496_s0  ;;  %5946 = vmatmul.mubr.f32.gmra.mrb[18].mxu0 %v10280_v38  ;;  %v19961_v35 = vpop.permute.xlu0 %15221  ;;  %v10963_v45 = vpop.f32.mrb[204].mxu0  ;;  %v22340_v28 = vld [vmem:[#allocation34_spill] sm:$0xff]  ;;  %v10286_v38 = vld [vmem:[%s21620_s4 + $0x7b0] sm:$0xff] }
 0x534   :  { %12379 = vmatprep.mubr.msk.f32.mxu1 %vm15492_vm0, %v21855_v44  ;;  %13443 = vmatprep.subr.bf16.mxu1 %v22062_v31  ;;  %v10964_v21 = vpop.f32.mrb[205].mxu0  ;;  %v22342_v6 = vpack.c.bf16 %v22340_v28, %v22341_v9  ;;  %v10224_v52 = vld [vmem:[%s21620_s4 + $0x640] sm:$0xff]  ;;  %v13447_v19 = vpack.c.bf16 %v15099_v40, %v15098_v0  ;;  %v13450_v40 = vpack.c.bf16 %v15114_v46, %v15113_v54  ;;  %v10301_v54 = vld [vmem:[%s21620_s4 + $0x7e8] sm:$0xff] }
 0x535   :  { %12380 = vmatmul.mubr.msk.f32.gmra.mrb[106].mxu1 %vm1995_vm4, %v10221_v23  ;;  %v10965_v20 = vadd.f32 %v10964_v21, %v10963_v45  ;;  %5950 = vmatprep.mubr.f32.mxu0 %v10284_v10  ;;  %v22349_v57 = vld [vmem:[#allocation130_spill] sm:$0xff]  ;;  %v10227_v45 = vld [vmem:[%s21620_s4 + $0x658] sm:$0xff] }
 0x536   :  { %13514 = vmatpush3.bf16.msra.mxu0 %v22342_v6  ;;  %13445 = vmatpush3.bf16.msra.mxu1 %v13444_v5  ;;  %v19981_v36 = vpop.permute.xlu1 %15226  ;;  %v22351_v30 = vpack.c.bf16 %v22349_v57, %v22350_v39  ;;  %v22353_v0 = vld [vmem:[#allocation50_spill] sm:$0xff]  ;;  %v15178_v57 = vunpack.i.l.bf16 %v19827_v48 }
 0x537   :  { %13516 = vmatprep.subr.bf16.mxu0 %v22345_v53  ;;  %15466 = vrot.lane.b32.xlu1 %v22291_v51, %s15496_s0  ;;  %v19989_v11 = vadd.f32 %v19768_v1, %v10965_v20  ;;  %v10966_v27 = vpop.f32.mrb[206].mxu0  ;;  %v10287_v51 = vld [vmem:[%s21620_s4 + $0x7b8] sm:$0xff]  ;;  %v22356_v20 = vld [vmem:[#allocation136_spill] sm:$0xff] }
 0x538   :  { %15471 = vrot.lane.b32.xlu0 %v22295_v25, %s15496_s0  ;;  %5951 = vmatmul.mubr.f32.gmra.mrb[20].mxu0 %v10283_v26  ;;  %v19993_v8 = vpop.permute.xlu0 %15231  ;;  %v10967_v16 = vpop.f32.mrb[207].mxu0  ;;  %v22346_v25 = vld [vmem:[#allocation44_spill] sm:$0xff] }
 0x539   :  { %12382 = vmatprep.mubr.msk.f32.mxu1 %vm15492_vm0, %v21855_v44  ;;  %13446 = vmatprep.subr.bf16.mxu1 %v22062_v31  ;;  %v10968_v1 = vadd.f32 %v10967_v16, %v10966_v27  ;;  %v22348_v61 = vpack.c.bf16 %v22346_v25, %v22347_v18  ;;  %v22355_v26 = vld [vmem:[#allocation140_spill] sm:$0xff]  ;;  %v15174_v16 = vunpack.i.h.bf16 %v19811_v13  ;;  %v22362_v18 = vld [vmem:[#allocation147_spill] sm:$0xff] }
 0x53a   :  { %12383 = vmatmul.mubr.msk.f32.gmra.mrb[108].mxu1 %vm1995_vm4, %v10224_v52  ;;  %5955 = vmatprep.mubr.f32.mxu0 %v10287_v51  ;;  %v22357_v4 = vpack.c.bf16 %v22355_v26, %v22356_v20  ;;  %v10230_v52 = vld [vmem:[%s21620_s4 + $0x670] sm:$0xff]  ;;  %v15194_v26 = vunpack.i.h.bf16 %v19857_v32  ;;  %v15193_v20 = vunpack.i.l.bf16 %v19857_v32  ;;  %v10307_v32 = vld [vmem:[%s21620_s4 + $0x818] sm:$0xff] }
 0x53b   :  { %13518 = vmatpush3.bf16.msra.mxu0 %v22348_v61  ;;  %13448 = vmatpush3.bf16.msra.mxu1 %v13447_v19  ;;  %v20013_v50 = vpop.permute.xlu1 %15236  ;;  %v20016_v23 = vadd.f32 %v19795_v2, %v10968_v1  ;;  %v10969_v33 = vpop.f32.mrb[208].mxu0  ;;  %v22352_v2 = vld [vmem:[#allocation54_spill] sm:$0xff]  ;;  %v15173_v19 = vunpack.i.l.bf16 %v19811_v13  ;;  %v22358_v51 = vld [vmem:[#allocation64_spill] sm:$0xff]  ;;  %v22361_v13 = vld [vmem:[#allocation151_spill] sm:$0xff] }
 0x53c   :  { %13520 = vmatprep.subr.bf16.mxu0 %v22351_v30  ;;  %15476 = vrot.lane.b32.xlu1 %v22293_v17, %s15496_s0  ;;  %v20023_v5 = vpop.permute.xlu0 %15241  ;;  %v10970_v10 = vpop.f32.mrb[209].mxu0  ;;  %v10290_v17 = vld [vmem:[%s21620_s4 + $0x7d0] sm:$0x3]  ;;  %v22354_v28 = vpack.c.bf16 %v22352_v2, %v22353_v0  ;;  %v22363_v61 = vpack.c.bf16 %v22361_v13, %v22362_v18  ;;  %v10300_v2 = vld [vmem:[%s21620_s4 + $0x7e0] sm:$0xff]  ;;  %v15203_v13 = vunpack.i.l.bf16 %v19894_v55 }
 0x53d   :  { %15481 = vrot.lane.b32.xlu0 %v22297_v15, %s15496_s0  ;;  %5956 = vmatmul.mubr.f32.gmra.mrb[22].mxu0 %v10286_v38  ;;  %v10971_v21 = vadd.f32 %v10970_v10, %v10969_v33  ;;  %v10289_v15 = vld [vmem:[%s21620_s4 + $0x7c8] sm:$0x3]  ;;  %v22359_v1 = vld [vmem:[#allocation60_spill] sm:$0xff]  ;;  %v15179_v38 = vunpack.i.h.bf16 %v19827_v48  ;;  %v13546_v30 = vpack.c.bf16 %v15174_v16, %v15173_v19  ;;  %v15184_v33 = vunpack.i.h.bf16 %v19830_v24 }
 0x53e   :  { %12385 = vmatprep.mubr.msk.f32.mxu1 %vm15492_vm0, %v21855_v44  ;;  %13449 = vmatprep.subr.bf16.mxu1 %v22062_v31  ;;  %v22360_v46 = vpack.c.bf16 %v22358_v51, %v22359_v1  ;;  %v15148_v10 = vunpack.i.l.bf16 %v19733_v22  ;;  %v15199_v51 = vunpack.i.h.bf16 %v19885_v29  ;;  %v10247_v1 = vld [vmem:[%s21620_s4 + $0x6b8] sm:$0xff] }
 0x53f   :  { %13522 = vmatpush3.bf16.msra.mxu0 %v22354_v28  ;;  %12386 = vmatmul.mubr.msk.f32.gmra.mrb[110].mxu1 %vm1995_vm4, %v10227_v45  ;;  %v20041_v9 = vadd.f32 %v19820_v12, %v10971_v21  ;;  %v10972_v6 = vpop.f32.mrb[210].mxu0  ;;  %v15183_v45 = vunpack.i.l.bf16 %v19830_v24  ;;  %v22364_v21 = vld [vmem:[#allocation75_spill] sm:$0xff]  ;;  %v10304_v24 = vld [vmem:[%s21620_s4 + $0x800] sm:$0xff]  ;;  %v13548_v0 = vpack.c.bf16 %v15179_v38, %v15178_v57  ;;  %v15189_v28 = vunpack.i.h.bf16 %v19854_v7  ;;  %v10306_v38 = vld [vmem:[%s21620_s4 + $0x810] sm:$0xff] }
 0x540   :  { %13451 = vmatpush3.bf16.msra.mxu1 %v13450_v40  ;;  %13524 = vmatprep.subr.bf16.mxu0 %v22357_v4  ;;  %v20046_v42 = vpop.permute.xlu1 %15246  ;;  %v10973_v53 = vpop.f32.mrb[211].mxu0  ;;  %v22365_v40 = vld [vmem:[#allocation71_spill] sm:$0xff] }
 0x541   :  { %7234 = vrot.lane.b32.xlu1 %v22315_v56, %s15496_s0  ;;  %5960 = vmatprep.mubr.f32.mxu0 %v10290_v17  ;;  %v20053_v27 = vpop.permute.xlu0 %15251  ;;  %v10974_v12 = vadd.f32 %v10973_v53, %v10972_v6  ;;  %v22366_v17 = vpack.c.bf16 %v22364_v21, %v22365_v40  ;;  %v13550_v6 = vpack.c.bf16 %v15184_v33, %v15183_v45  ;;  %v15208_v33 = vunpack.i.l.bf16 %v19917_v60  ;;  %v10250_v45 = vld [vmem:[%s21620_s4 + $0x6d0] sm:$0xff] }
 0x542   :  { %5961 = vmatmul.mubr.f32.gmra.mrb[24].mxu0 %v10289_v15  ;;  %12388 = vmatprep.mubr.msk.f32.mxu1 %vm15492_vm0, %v21855_v44  ;;  %v10244_v15 = vld [vmem:[%s21620_s4 + $0x6a0] sm:$0xff]  ;;  %v15213_v21 = vunpack.i.l.bf16 %v19926_v14 }
 0x543   :  { %12414 = vmatprep.subr.mxu1 %v21855_v44  ;;  %13526 = vmatpush3.bf16.msra.mxu0 %v22360_v46  ;;  %v20067_v25 = vadd.f32 %v19845_v63, %v10974_v12  ;;  %v10233_v63 = vld [vmem:[%s21620_s4 + $0x688] sm:$0x3]  ;;  %v10303_v12 = vld [vmem:[%s21620_s4 + $0x7f8] sm:$0xff]  ;;  %v13554_v46 = vpack.c.bf16 %v15194_v26, %v15193_v20  ;;  %v15224_v26 = vunpack.i.h.bf16 %v19961_v35  ;;  %v15223_v20 = vunpack.i.l.bf16 %v19961_v35  ;;  %v10316_v35 = vld [vmem:[%s21620_s4 + $0x860] sm:$0xff] }
 0x544   :  { %12389 = vmatmul.mubr.msk.f32.gmra.mrb[112].mxu1 %vm1995_vm4, %v10230_v52  ;;  %13528 = vmatprep.subr.bf16.mxu0 %v22363_v61  ;;  %v15154_v52 = vunpack.i.h.bf16 %v19748_v47  ;;  %v15159_v61 = vunpack.i.h.bf16 %v19763_v43 }
 0x545   :  { %12415 = vmatpush3.msk.msra.mxu1 %vm2017_vm3, %v19681_v37  ;;  %12391 = vmatprep.mubr.msk.f32.mxu1 %vm15492_vm0, %v21855_v44  ;;  %v20082_v39 = vpop.permute.xlu1 %15256  ;;  %v15149_v37 = vunpack.i.h.bf16 %v19733_v22  ;;  %v15188_v22 = vunpack.i.l.bf16 %v19854_v7  ;;  %v15153_v7 = vunpack.i.l.bf16 %v19748_v47  ;;  %v15198_v47 = vunpack.i.l.bf16 %v19885_v29 }
 0x546   :  { %6183 = vmatprep.mubr.f32.mxu0 %v10301_v54  ;;  %13484 = vmatprep.subr.bf16.mxu1 %v22062_v31  ;;  %v20087_v48 = vpop.permute.xlu0 %15261  ;;  %v15204_v54 = vunpack.i.h.bf16 %v19894_v55  ;;  %v15158_v29 = vunpack.i.l.bf16 %v19763_v43  ;;  %v10310_v55 = vld [vmem:[%s21620_s4 + $0x830] sm:$0xff]  ;;  %v15209_v43 = vunpack.i.h.bf16 %v19917_v60  ;;  %v15163_v60 = vunpack.i.l.bf16 %v19778_v34 }
 0x547   :  { %13530 = vmatpush3.bf16.msra.mxu0 %v22366_v17  ;;  %v13485_v53 = vpack.c.bf16 %v15149_v37, %v15148_v10  ;;  %v13552_v19 = vpack.c.bf16 %v15189_v28, %v15188_v22  ;;  %v13488_v18 = vpack.c.bf16 %v15154_v52, %v15153_v7  ;;  %v15214_v10 = vunpack.i.h.bf16 %v19926_v14  ;;  %v10313_v14 = vld [vmem:[%s21620_s4 + $0x848] sm:$0xff]  ;;  %v10312_v7 = vld [vmem:[%s21620_s4 + $0x840] sm:$0xff] }
 0x548   :  { %12392 = vmatmul.mubr.msk.f32.gmra.mrb[114].mxu1 %vm1995_vm4, %v10233_v63  ;;  %13547 = vmatprep.subr.bf16.mxu0 %v13546_v30  ;;  %v13556_v30 = vpack.c.bf16 %v15199_v51, %v15198_v47  ;;  %v13558_v37 = vpack.c.bf16 %v15204_v54, %v15203_v13  ;;  %v13491_v40 = vpack.c.bf16 %v15159_v61, %v15158_v29  ;;  %v15164_v17 = vunpack.i.h.bf16 %v19778_v34  ;;  %v10253_v22 = vld [vmem:[%s21620_s4 + $0x6e8] sm:$0xff]  ;;  %v10256_v47 = vld [vmem:[%s21620_s4 + $0x700] sm:$0xff]  ;;  %v10315_v29 = vld [vmem:[%s21620_s4 + $0x858] sm:$0xff] }
 0x549   :  { %12416 = vmatprep.mubr.msk.f32.mxu1 %vm15492_vm0, %v21855_v44  ;;  %v15219_v28 = vunpack.i.h.bf16 %v19949_v59  ;;  %v15218_v34 = vunpack.i.l.bf16 %v19949_v59  ;;  %v15169_v59 = vunpack.i.h.bf16 %v19789_v41  ;;  %v15168_v52 = vunpack.i.l.bf16 %v19789_v41 }
 0x54a   :  { %6184 = vmatmul.mubr.f32.vlgmr.msra.gmra.mrb[26].mxu0 %v10300_v2  ;;  %v20110_v4 = vpop.permute.xlu1 %15266  ;;  %v10309_v2 = vld [vmem:[%s21620_s4 + $0x828] sm:$0xff]  ;;  %v15229_v51 = vunpack.i.h.bf16 %v19981_v36  ;;  %v15228_v41 = vunpack.i.l.bf16 %v19981_v36  ;;  %v13566_v54 = vpack.c.bf16 %v15224_v26, %v15223_v20  ;;  %v15234_v13 = vunpack.i.h.bf16 %v19993_v8 }
 0x54b   :  { %13549 = vmatpush3.bf16.msra.mxu0 %v13548_v0  ;;  %6188 = vmatprep.mubr.f32.mxu0 %v10304_v24  ;;  %v20117_v16 = vpop.permute.xlu0 %15271  ;;  %v13560_v0 = vpack.c.bf16 %v15209_v43, %v15208_v33  ;;  %v13497_v61 = vpack.c.bf16 %v15169_v59, %v15168_v52  ;;  %v15244_v43 = vunpack.i.h.bf16 %v20023_v5  ;;  %v15243_v33 = vunpack.i.l.bf16 %v20023_v5 }
 0x54c   :  { %12417 = vmatmul.mubr.msk.f32.vlgmr.msra.gmra.mrb[102].mxu1 %vm1995_vm4, %v10244_v15  ;;  %13551 = vmatprep.subr.bf16.mxu0 %v13550_v6  ;;  %v13562_v6 = vpack.c.bf16 %v15214_v10, %v15213_v21  ;;  %v15273_v59 = vunpack.i.l.bf16 %v20117_v16 }
 0x54d   :  { %13486 = vmatpush3.bf16.msra.mxu1 %v13485_v53  ;;  %12419 = vmatprep.mubr.msk.f32.mxu1 %vm15492_vm0, %v21855_v44  ;;  %v13494_v53 = vpack.c.bf16 %v15164_v17, %v15163_v60  ;;  %v15248_v17 = vunpack.i.l.bf16 %v20046_v42  ;;  %v10318_v60 = vld [vmem:[%s21620_s4 + $0x870] sm:$0x3] }
 0x54e   :  { %6189 = vmatmul.mubr.f32.gmra.mrb[28].mxu0 %v10303_v12  ;;  %13487 = vmatprep.subr.bf16.mxu1 %v22062_v31 }
 0x54f   :  { %13553 = vmatpush3.bf16.msra.mxu0 %v13552_v19  ;;  %6193 = vmatprep.mubr.f32.mxu0 %v10307_v32  ;;  %v20138_v57 = vpop.permute.xlu1 %15276  ;;  %v13564_v19 = vpack.c.bf16 %v15219_v28, %v15218_v34  ;;  %v10262_v28 = vld [vmem:[%s21620_s4 + $0x730] sm:$0x3] }
 0x550   :  { %12420 = vmatmul.mubr.msk.f32.gmra.mrb[104].mxu1 %vm1995_vm4, %v10247_v1  ;;  %13555 = vmatprep.subr.bf16.mxu0 %v13554_v46  ;;  %v20144_v63 = vpop.permute.xlu0 %15281 }
 0x551   :  { %13489 = vmatpush3.bf16.msra.mxu1 %v13488_v18  ;;  %12422 = vmatprep.mubr.msk.f32.mxu1 %vm15492_vm0, %v21855_v44  ;;  %v15233_v18 = vunpack.i.l.bf16 %v19993_v8  ;;  %v10319_v8 = vld [vmem:[%s21620_s4 + $0x878] sm:$0x3] }
 0x552   :  { %6194 = vmatmul.mubr.f32.gmra.mrb[30].mxu0 %v10306_v38  ;;  %13490 = vmatprep.subr.bf16.mxu1 %v22062_v31 }
 0x553   :  { %13557 = vmatpush3.bf16.msra.mxu0 %v13556_v30  ;;  %6198 = vmatprep.mubr.f32.mxu0 %v10310_v55  ;;  %v13568_v30 = vpack.c.bf16 %v15229_v51, %v15228_v41  ;;  %v13570_v21 = vpack.c.bf16 %v15234_v13, %v15233_v18  ;;  %v10333_v41 = vld [vmem:[%s21620_s4 + $0x8a8] sm:$0xff]  ;;  %v22367_v13 = vld [vmem:[#allocation162_spill] sm:$0xff] }
 0x554   :  { %12423 = vmatmul.mubr.msk.f32.gmra.mrb[106].mxu1 %vm1995_vm4, %v10250_v45  ;;  %13559 = vmatprep.subr.bf16.mxu0 %v13558_v37  ;;  %v20165_v24 = vpop.permute.xlu1 %15286  ;;  %v10259_v45 = vld [vmem:[%s21620_s4 + $0x718] sm:$0xff]  ;;  %v22368_v18 = vld [vmem:[#allocation158_spill] sm:$0xff] }
 0x555   :  { %13492 = vmatpush3.bf16.msra.mxu1 %v13491_v40  ;;  %12425 = vmatprep.mubr.msk.f32.mxu1 %vm15492_vm0, %v21855_v44  ;;  %v20174_v15 = vpop.permute.xlu0 %15291  ;;  %v15249_v40 = vunpack.i.h.bf16 %v20046_v42  ;;  %v15259_v42 = vunpack.i.h.bf16 %v20082_v39 }
 0x556   :  { %6199 = vmatmul.mubr.f32.gmra.mrb[32].mxu0 %v10309_v2  ;;  %13493 = vmatprep.subr.bf16.mxu1 %v22062_v31  ;;  %v10330_v2 = vld [vmem:[%s21620_s4 + $0x890] sm:$0xff] }
 0x557   :  { %13561 = vmatpush3.bf16.msra.mxu0 %v13560_v0  ;;  %6203 = vmatprep.mubr.f32.mxu0 %v10313_v14  ;;  %v11096_v12 = vpop.f32.mrb[212].mxu0  ;;  %v13572_v14 = vpack.c.bf16 %v15244_v43, %v15243_v33  ;;  %v15258_v0 = vunpack.i.l.bf16 %v20082_v39  ;;  %v13574_v34 = vpack.c.bf16 %v15249_v40, %v15248_v17  ;;  %v10336_v33 = vld [vmem:[%s21620_s4 + $0x8c0] sm:$0xff] }
 0x558   :  { %12426 = vmatmul.mubr.msk.f32.gmra.mrb[108].mxu1 %vm1995_vm4, %v10253_v22  ;;  %13563 = vmatprep.subr.bf16.mxu0 %v13562_v6  ;;  %v11097_v32 = vpop.f32.mrb[213].mxu0  ;;  %v15269_v22 = vunpack.i.h.bf16 %v20110_v4  ;;  %v15268_v6 = vunpack.i.l.bf16 %v20110_v4  ;;  %v10273_v4 = vld [vmem:[%s21620_s4 + $0x748] sm:$0xff] }
 0x559   :  { %13495 = vmatpush3.bf16.msra.mxu1 %v13494_v53  ;;  %12428 = vmatprep.mubr.msk.f32.mxu1 %vm15492_vm0, %v21855_v44  ;;  %v20195_v1 = vpop.permute.xlu1 %15296  ;;  %v20197_v46 = vadd.f32 %v11097_v32, %v11096_v12  ;;  %v13576_v20 = vpack.c.bf16 %v15259_v42, %v15258_v0  ;;  %v15274_v53 = vunpack.i.h.bf16 %v20117_v16  ;;  %v15284_v12 = vunpack.i.h.bf16 %v20144_v63  ;;  %v10329_v16 = vld [vmem:[%s21620_s4 + $0x888] sm:$0xff]  ;;  %v10279_v42 = vld [vmem:[%s21620_s4 + $0x778] sm:$0xff] }
 0x55a   :  { %6204 = vmatmul.mubr.f32.gmra.mrb[34].mxu0 %v10312_v7  ;;  %13496 = vmatprep.subr.bf16.mxu1 %v22062_v31  ;;  %v20202_v36 = vpop.permute.xlu0 %15301  ;;  %v13593_v7 = vpack.c.bf16 %v15269_v22, %v15268_v6  ;;  %v10339_v6 = vld [vmem:[%s21620_s4 + $0x8d8] sm:$0xff] }
 0x55b   :  { %13565 = vmatpush3.bf16.msra.mxu0 %v13564_v19  ;;  %6208 = vmatprep.mubr.f32.mxu0 %v10316_v35  ;;  %v11099_v38 = vpop.f32.mrb[214].mxu0  ;;  %v15283_v35 = vunpack.i.l.bf16 %v20144_v63  ;;  %v15289_v63 = vunpack.i.h.bf16 %v20165_v24  ;;  %v15304_v40 = vunpack.i.h.bf16 %v20202_v36  ;;  %v15303_v17 = vunpack.i.l.bf16 %v20202_v36  ;;  %v10335_v36 = vld [vmem:[%s21620_s4 + $0x8b8] sm:$0xff] }
 0x55c   :  { %12429 = vmatmul.mubr.msk.f32.gmra.mrb[110].mxu1 %vm1995_vm4, %v10256_v47  ;;  %13567 = vmatprep.subr.bf16.mxu0 %v13566_v54  ;;  %v11100_v55 = vpop.f32.mrb[215].mxu0  ;;  %v13595_v47 = vpack.c.bf16 %v15274_v53, %v15273_v59  ;;  %v15288_v54 = vunpack.i.l.bf16 %v20165_v24  ;;  %v10332_v24 = vld [vmem:[%s21620_s4 + $0x8a0] sm:$0xff]  ;;  %v22373_v59 = vld [vmem:[#allocation183_spill] sm:$0xff] }
 0x55d   :  { %13498 = vmatpush3.bf16.msra.mxu1 %v13497_v61  ;;  %12431 = vmatprep.mubr.msk.f32.mxu1 %vm15492_vm0, %v21855_v44  ;;  %v20218_v37 = vpop.permute.xlu1 %15306  ;;  %v20220_v10 = vadd.f32 %v11100_v55, %v11099_v38  ;;  %v22369_v61 = vpack.c.bf16 %v22367_v13, %v22368_v18  ;;  %v13597_v38 = vpack.c.bf16 %v15284_v12, %v15283_v35  ;;  %v15298_v55 = vunpack.i.l.bf16 %v20195_v1  ;;  %v10342_v13 = vld [vmem:[%s21620_s4 + $0x8f0] sm:$0xff] }
 0x55e   :  { %6209 = vmatmul.mubr.f32.gmra.mrb[36].mxu0 %v10315_v29  ;;  %12457 = vmatprep.subr.mxu1 %v21855_v44  ;;  %v20225_v5 = vpop.permute.xlu0 %15311  ;;  %v10276_v29 = vld [vmem:[%s21620_s4 + $0x760] sm:$0xff]  ;;  %v15308_v22 = vunpack.i.l.bf16 %v20218_v37 }
 0x55f   :  { %13569 = vmatpush3.bf16.msra.mxu0 %v13568_v30  ;;  %6213 = vmatprep.mubr.f32.mxu0 %v10319_v8  ;;  %v15299_v8 = vunpack.i.h.bf16 %v20195_v1  ;;  %v15313_v53 = vunpack.i.l.bf16 %v20225_v5 }
 0x560   :  { %12432 = vmatmul.mubr.msk.f32.gmra.mrb[112].mxu1 %vm1995_vm4, %v10259_v45  ;;  %13571 = vmatprep.subr.bf16.mxu0 %v13570_v21  ;;  %v11102_v39 = vpop.f32.mrb[216].mxu0  ;;  %v13599_v21 = vpack.c.bf16 %v15289_v63, %v15288_v54  ;;  %v10338_v63 = vld [vmem:[%s21620_s4 + $0x8d0] sm:$0xff] }
 0x561   :  { %12458 = vmatpush3.msk.msra.mxu1 %vm2017_vm3, %v19806_v58  ;;  %12434 = vmatprep.mubr.msk.f32.mxu1 %vm15492_vm0, %v21855_v44  ;;  %v11103_v52 = vpop.f32.mrb[217].mxu0 }
 0x562   :  { %6214 = vmatmul.mubr.f32.gmra.mrb[38].mxu0 %v10318_v60  ;;  %13531 = vmatprep.subr.bf16.mxu1 %v22062_v31  ;;  %v20246_v26 = vpop.permute.xlu1 %15321  ;;  %v20262_v19 = vadd.f32 %v11103_v52, %v11102_v39  ;;  %v22370_v60 = vld [vmem:[#allocation172_spill] sm:$0xff] }
 0x563   :  { %13573 = vmatpush3.bf16.msra.mxu0 %v13572_v14  ;;  %6605 = vmatprep.mubr.f32.mxu0 %v10330_v2  ;;  %v20248_v58 = vpop.permute.xlu0 %15316  ;;  %v22371_v2 = vld [vmem:[#allocation168_spill] sm:$0xff] }
 0x564   :  { %12435 = vmatmul.mubr.msk.f32.gmra.mrb[114].mxu1 %vm1995_vm4, %v10262_v28  ;;  %13575 = vmatprep.subr.bf16.mxu0 %v13574_v34  ;;  %v22372_v14 = vpack.c.bf16 %v22370_v60, %v22371_v2  ;;  %v13601_v28 = vpack.c.bf16 %v15299_v8, %v15298_v55  ;;  %v15309_v34 = vunpack.i.h.bf16 %v20218_v37  ;;  %v15314_v37 = vunpack.i.h.bf16 %v20225_v5  ;;  %v22377_v8 = vld [vmem:[#allocation188_spill] sm:$0xff]  ;;  %v10345_v60 = vld [vmem:[%s21620_s4 + $0x908] sm:$0xff] }
 0x565   :  { %12459 = vmatprep.mubr.msk.f32.mxu1 %vm15492_vm0, %v21855_v44 }
 0x566   :  { %v20260_v32 = vpop.permute.xlu1 %15331  ;;  %v13607_v18 = vpack.c.bf16 %v15314_v37, %v15313_v53 }
 0x567   :  { %13577 = vmatpush3.bf16.msra.mxu0 %v13576_v20  ;;  %v20267_v51 = vpop.permute.xlu0 %15326  ;;  %v13603_v20 = vpack.c.bf16 %v15304_v40, %v15303_v17  ;;  %v10341_v40 = vld [vmem:[%s21620_s4 + $0x8e8] sm:$0xff] }
 0x568   :  { %12460 = vmatmul.mubr.msk.f32.vlgmr.msra.gmra.mrb[102].mxu1 %vm1995_vm4, %v10273_v4  ;;  %13594 = vmatprep.subr.bf16.mxu0 %v13593_v7  ;;  %v22374_v4 = vld [vmem:[#allocation178_spill] sm:$0xff]  ;;  %v10282_v7 = vld [vmem:[%s21620_s4 + $0x790] sm:$0xff] }
 0x569   :  { %13533 = vmatpush3.bf16.msra.mxu1 %v22369_v61  ;;  %12462 = vmatprep.mubr.msk.f32.mxu1 %vm15492_vm0, %v21855_v44  ;;  %v22375_v52 = vpack.c.bf16 %v22373_v59, %v22374_v4  ;;  %v15324_v61 = vunpack.i.h.bf16 %v20246_v26  ;;  %v10344_v59 = vld [vmem:[%s21620_s4 + $0x900] sm:$0xff] }
 0x56a   :  { %6606 = vmatmul.mubr.f32.vlgmr.msra.gmra.mrb[40].mxu0 %v10329_v16  ;;  %13534 = vmatprep.subr.bf16.mxu1 %v22062_v31  ;;  %v20289_v30 = vpop.permute.xlu1 %15341  ;;  %v13605_v16 = vpack.c.bf16 %v15309_v34, %v15308_v22  ;;  %v22380_v34 = vld [vmem:[#allocation198_spill] sm:$0xff] }
 0x56b   :  { %13596 = vmatpush3.bf16.msra.mxu0 %v13595_v47  ;;  %6610 = vmatprep.mubr.f32.mxu0 %v10333_v41  ;;  %v11105_v43 = vpop.f32.mrb[218].mxu0  ;;  %v15319_v41 = vunpack.i.h.bf16 %v20248_v58  ;;  %v15318_v47 = vunpack.i.l.bf16 %v20248_v58  ;;  %v15344_v37 = vunpack.i.h.bf16 %v20289_v30  ;;  %v15343_v53 = vunpack.i.l.bf16 %v20289_v30  ;;  %v10348_v30 = vld [vmem:[%s21620_s4 + $0x920] sm:$0x3] }
 0x56c   :  { %12463 = vmatmul.mubr.msk.f32.gmra.mrb[104].mxu1 %vm1995_vm4, %v10276_v29  ;;  %13598 = vmatprep.subr.bf16.mxu0 %v13597_v38  ;;  %v20295_v1 = vpop.permute.xlu0 %15336  ;;  %v11106_v45 = vpop.f32.mrb[219].mxu0  ;;  %v15323_v29 = vunpack.i.l.bf16 %v20246_v26  ;;  %v22376_v38 = vld [vmem:[#allocation193_spill] sm:$0xff] }
 0x56d   :  { %13536 = vmatpush3.bf16.msra.mxu1 %v22372_v14  ;;  %12465 = vmatprep.mubr.msk.f32.mxu1 %vm15492_vm0, %v21855_v44  ;;  %v20307_v0 = vadd.f32 %v11106_v45, %v11105_v43  ;;  %v22378_v55 = vpack.c.bf16 %v22376_v38, %v22377_v8  ;;  %v15329_v45 = vunpack.i.h.bf16 %v20267_v51  ;;  %v15339_v14 = vunpack.i.h.bf16 %v20295_v1  ;;  %v10347_v8 = vld [vmem:[%s21620_s4 + $0x918] sm:$0x3] }
 0x56e   :  { %6611 = vmatmul.mubr.f32.gmra.mrb[42].mxu0 %v10332_v24  ;;  %13537 = vmatprep.subr.bf16.mxu1 %v22062_v31  ;;  %v10285_v24 = vld [vmem:[%s21620_s4 + $0x7a8] sm:$0xff] }
 0x56f   :  { %13600 = vmatpush3.bf16.msra.mxu0 %v13599_v21  ;;  %6615 = vmatprep.mubr.f32.mxu0 %v10336_v33  ;;  %v13609_v33 = vpack.c.bf16 %v15319_v41, %v15318_v47  ;;  %v15328_v21 = vunpack.i.l.bf16 %v20267_v51  ;;  %v13611_v51 = vpack.c.bf16 %v15324_v61, %v15323_v29  ;;  %v10291_v47 = vld [vmem:[%s21620_s4 + $0x7d8] sm:$0x3]  ;;  %v13617_v61 = vpack.c.bf16 %v15344_v37, %v15343_v53 }
 0x570   :  { %12466 = vmatmul.mubr.msk.f32.gmra.mrb[106].mxu1 %vm1995_vm4, %v10279_v42  ;;  %13602 = vmatprep.subr.bf16.mxu0 %v13601_v28  ;;  %v20319_v39 = vpop.permute.xlu1 %15351  ;;  %v15338_v42 = vunpack.i.l.bf16 %v20295_v1  ;;  %v22379_v28 = vld [vmem:[#allocation203_spill] sm:$0xff] }
 0x571   :  { %13539 = vmatpush3.bf16.msra.mxu1 %v22375_v52  ;;  %12468 = vmatprep.mubr.msk.f32.mxu1 %vm15492_vm0, %v21855_v44  ;;  %v20331_v12 = vpop.permute.xlu0 %15346  ;;  %v11108_v35 = vpop.f32.mrb[220].mxu0  ;;  %v22381_v22 = vpack.c.bf16 %v22379_v28, %v22380_v34  ;;  %v15239_v52 = vunpack.i.h.bf16 %v20013_v50  ;;  %v15353_v41 = vunpack.i.l.bf16 %v20319_v39 }
 0x572   :  { %6616 = vmatmul.mubr.f32.gmra.mrb[44].mxu0 %v10335_v36  ;;  %13540 = vmatprep.subr.bf16.mxu1 %v22062_v31  ;;  %v11109_v5 = vpop.f32.mrb[221].mxu0  ;;  %v10288_v36 = vld [vmem:[%s21620_s4 + $0x7c0] sm:$0xff] }
 0x573   :  { %13604 = vmatpush3.bf16.msra.mxu0 %v13603_v20  ;;  %6620 = vmatprep.mubr.f32.mxu0 %v10339_v6  ;;  %v20339_v54 = vadd.f32 %v11109_v5, %v11108_v35  ;;  %v13613_v20 = vpack.c.bf16 %v15329_v45, %v15328_v21  ;;  %v13615_v35 = vpack.c.bf16 %v15339_v14, %v15338_v42  ;;  %v15254_v42 = vunpack.i.h.bf16 %v20053_v27 }
 0x574   :  { %12469 = vmatmul.mubr.msk.f32.gmra.mrb[108].mxu1 %vm1995_vm4, %v10282_v7  ;;  %13606 = vmatprep.subr.bf16.mxu0 %v13605_v16  ;;  %v20345_v58 = vpop.permute.xlu1 %15361  ;;  %v15354_v16 = vunpack.i.h.bf16 %v20319_v39 }
 0x575   :  { %13542 = vmatpush3.bf16.msra.mxu1 %v22378_v55  ;;  %12471 = vmatprep.mubr.msk.f32.mxu1 %vm15492_vm0, %v21855_v44  ;;  %v20357_v43 = vpop.permute.xlu0 %15356 }
 0x576   :  { %6621 = vmatmul.mubr.f32.gmra.mrb[46].mxu0 %v10338_v63  ;;  %13543 = vmatprep.subr.bf16.mxu1 %v22062_v31  ;;  %v11111_v26 = vpop.f32.mrb[222].mxu0  ;;  %v15359_v39 = vunpack.i.h.bf16 %v20357_v43  ;;  %v15358_v29 = vunpack.i.l.bf16 %v20357_v43  ;;  %v10359_v43 = vld [vmem:[%s21620_s4 + $0x938] sm:$0xff]  ;;  %v13619_v45 = vpack.c.bf16 %v15354_v16, %v15353_v41 }
 0x577   :  { %13608 = vmatpush3.bf16.msra.mxu0 %v13607_v18  ;;  %6625 = vmatprep.mubr.f32.mxu0 %v10342_v13  ;;  %v11112_v17 = vpop.f32.mrb[223].mxu0  ;;  %v15238_v18 = vunpack.i.l.bf16 %v20013_v50 }
 0x578   :  { %12472 = vmatmul.mubr.msk.f32.gmra.mrb[110].mxu1 %vm1995_vm4, %v10285_v24  ;;  %13610 = vmatprep.subr.bf16.mxu0 %v13609_v33  ;;  %v20369_v2 = vadd.f32 %v11112_v17, %v11111_v26  ;;  %v13621_v28 = vpack.c.bf16 %v15359_v39, %v15358_v29 }
 0x579   :  { %13545 = vmatpush3.bf16.msra.mxu1 %v22381_v22  ;;  %12474 = vmatprep.mubr.msk.f32.mxu1 %vm15492_vm0, %v21855_v44  ;;  %v20381_v6 = vpop.permute.xlu1 %6474  ;;  %v13579_v14 = vpack.c.bf16 %v15239_v52, %v15238_v18 }
 0x57a   :  { %6626 = vmatmul.mubr.f32.gmra.mrb[48].mxu0 %v10341_v40  ;;  %12500 = vmatprep.subr.mxu1 %v21855_v44  ;;  %v20386_v1 = vpop.permute.xlu0 %15366  ;;  %v10302_v40 = vld [vmem:[%s21620_s4 + $0x7f0] sm:$0xff] }
 0x57b   :  { %13612 = vmatpush3.bf16.msra.mxu0 %v13611_v51  ;;  %6630 = vmatprep.mubr.f32.mxu0 %v10345_v60  ;;  %v11114_v4 = vpop.f32.mrb[224].mxu0  ;;  %v15369_v21 = vunpack.i.h.bf16 %v20386_v1  ;;  %v15368_v26 = vunpack.i.l.bf16 %v20386_v1 }
 0x57c   :  { %12475 = vmatmul.mubr.msk.f32.gmra.mrb[112].mxu1 %vm1995_vm4, %v10288_v36  ;;  %13614 = vmatprep.subr.bf16.mxu0 %v13613_v20  ;;  %v11115_v7 = vpop.f32.mrb[225].mxu0  ;;  %v15253_v20 = vunpack.i.l.bf16 %v20053_v27  ;;  %v10305_v27 = vld [vmem:[%s21620_s4 + $0x808] sm:$0xff] }
 0x57d   :  { %12501 = vmatpush3.msk.msra.mxu1 %vm2017_vm3, %v22315_v56  ;;  %12477 = vmatprep.mubr.msk.f32.mxu1 %vm15492_vm0, %v21855_v44  ;;  %v20405_v5 = vpop.permute.xlu1 %15371  ;;  %v11025_v63 = vpop.f32.mrb[144].mxu1  ;;  %v20407_v13 = vadd.f32 %v11115_v7, %v11114_v4  ;;  %v13623_v52 = vpack.c.bf16 %v15369_v21, %v15368_v26  ;;  %v15264_v7 = vunpack.i.h.bf16 %v20087_v48  ;;  %v15279_v21 = vunpack.i.h.bf16 %v20138_v57 }
 0x57e   :  { %6631 = vmatmul.mubr.f32.gmra.mrb[50].mxu0 %v10344_v59  ;;  %13578 = vmatprep.subr.bf16.mxu1 %v22062_v31  ;;  %v15377_v56 = vpop.permute.xlu0 %15376  ;;  %v11026_v38 = vpop.f32.mrb[145].mxu1  ;;  %v13582_v41 = vpack.c.bf16 %v15254_v42, %v15253_v20  ;;  %v15278_v26 = vunpack.i.l.bf16 %v20138_v57 }
 0x57f   :  { %13616 = vmatpush3.bf16.msra.mxu0 %v13615_v35  ;;  %6635 = vmatprep.mubr.f32.mxu0 %v10348_v30  ;;  %v11027_v55 = vadd.f32 %v11026_v38, %v11025_v63  ;;  %v15379_v50 = vunpack.i.h.bf16 %v15377_v56  ;;  %v15378_v24 = vunpack.i.l.bf16 %v15377_v56  ;;  %v10358_v63 = vld [vmem:[%s21620_s4 + $0x930] sm:$0xff] }
 0x580   :  { %12478 = vmatmul.mubr.msk.f32.gmra.mrb[114].mxu1 %vm1995_vm4, %v10291_v47  ;;  %13618 = vmatprep.subr.bf16.mxu0 %v13617_v61  ;;  %v11167_v33 = vpop.f32.mrb[226].mxu0 }
 0x581   :  { %12502 = vmatprep.mubr.msk.f32.mxu1 %vm15492_vm0, %v21855_v44  ;;  %v15382_v17 = vpop.permute.xlu1 %15381  ;;  %v13902_v60 = vadd.f32 %v19897_v3, %v11027_v55  ;;  %v11168_v51 = vpop.f32.mrb[227].mxu0  ;;  %v13640_v3 = vpack.c.bf16 %v15379_v50, %v15378_v24  ;;  %v10308_v24 = vld [vmem:[%s21620_s4 + $0x820] sm:$0xff] }
 0x582   :  { %6636 = vmatmul.mubr.f32.gmra.mrb[52].mxu0 %v10347_v8  ;;  %v20429_v34 = vpop.permute.xlu0 %15386  ;;  %v11028_v22 = vpop.f32.mrb[146].mxu1  ;;  %v11169_v36 = vadd.f32 %v11168_v51, %v11167_v33  ;;  %v15384_v37 = vunpack.i.h.bf16 %v15382_v17  ;;  %v15383_v53 = vunpack.i.l.bf16 %v15382_v17 }
 0x583   :  { %13620 = vmatpush3.bf16.msra.mxu0 %v13619_v45  ;;  %6985 = vmatprep.mubr.f32.mxu0 %v10359_v43  ;;  %v11029_v1 = vpop.f32.mrb[147].mxu1  ;;  %v13903_v59 = vadd.f32 %v13902_v60, %v20197_v46  ;;  %v15263_v46 = vunpack.i.l.bf16 %v20087_v48  ;;  %v10361_v60 = vld [vmem:[%s21620_s4 + $0x948] sm:$0xff] }
 0x584   :  { %12503 = vmatmul.mubr.msk.f32.vlgmr.msra.gmra.mrb[102].mxu1 %vm1995_vm4, %v10302_v40  ;;  %13622 = vmatprep.subr.bf16.mxu0 %v13621_v28  ;;  %v11030_v4 = vadd.f32 %v11029_v1, %v11028_v22  ;;  %v13642_v47 = vpack.c.bf16 %v15384_v37, %v15383_v53 }
 0x585   :  { %13580 = vmatpush3.bf16.msra.mxu1 %v13579_v14  ;;  %12505 = vmatprep.mubr.msk.f32.mxu1 %vm15492_vm0, %v21855_v44  ;;  %v20439_v30 = vadd.f32 %v13903_v59, %v11169_v36  ;;  %v13585_v45 = vpack.c.bf16 %v15264_v7, %v15263_v46  ;;  %v10365_v36 = vld [vmem:[%s21620_s4 + $0x968] sm:$0xff]  ;;  %v15294_v46 = vunpack.i.h.bf16 %v20174_v15 }
 0x586   :  { %13581 = vmatprep.subr.bf16.mxu1 %v22062_v31  ;;  %v15392_v35 = vpop.permute.xlu1 %15391  ;;  %v13918_v16 = vadd.f32 %v19929_v49, %v11030_v4  ;;  %v10362_v49 = vld [vmem:[%s21620_s4 + $0x950] sm:$0xff]  ;;  %v13588_v4 = vpack.c.bf16 %v15279_v21, %v15278_v26  ;;  %v10371_v26 = vld [vmem:[%s21620_s4 + $0x998] sm:$0xff] }
 0x587   :  { %13624 = vmatpush3.bf16.msra.mxu0 %v13623_v52  ;;  %v15394_v18 = vunpack.i.h.bf16 %v15392_v35  ;;  %v15393_v61 = vunpack.i.l.bf16 %v15392_v35  ;;  %v15397_v39 = vpop.permute.xlu0 %15396  ;;  %v11031_v29 = vpop.f32.mrb[148].mxu1  ;;  %v15293_v35 = vunpack.i.l.bf16 %v20174_v15 }
 0x588   :  { %12506 = vmatmul.mubr.msk.f32.gmra.mrb[104].mxu1 %vm1995_vm4, %v10305_v27  ;;  %13641 = vmatprep.subr.bf16.mxu0 %v13640_v3  ;;  %v15399_v48 = vunpack.i.h.bf16 %v15397_v39  ;;  %v15398_v56 = vunpack.i.l.bf16 %v15397_v39  ;;  %v11170_v38 = vpop.f32.mrb[228].mxu0  ;;  %v11032_v8 = vpop.f32.mrb[149].mxu1  ;;  %v13919_v55 = vadd.f32 %v13918_v16, %v20220_v10 }
 0x589   :  { %13583 = vmatpush3.bf16.msra.mxu1 %v13582_v41  ;;  %v13644_v50 = vpack.c.bf16 %v15394_v18, %v15393_v61  ;;  %12508 = vmatprep.mubr.msk.f32.mxu1 %vm15492_vm0, %v21855_v44  ;;  %v11033_v43 = vadd.f32 %v11032_v8, %v11031_v29  ;;  %v11171_v33 = vpop.f32.mrb[229].mxu0  ;;  %v10364_v41 = vld [vmem:[%s21620_s4 + $0x960] sm:$0xff] }
 0x58a   :  { %6986 = vmatmul.mubr.f32.vlgmr.msra.gmra.mrb[54].mxu0 %v10358_v63  ;;  %13584 = vmatprep.subr.bf16.mxu1 %v22062_v31  ;;  %v15402_v10 = vpop.permute.xlu1 %15401  ;;  %v11172_v40 = vadd.f32 %v11171_v33, %v11170_v38  ;;  %v13646_v17 = vpack.c.bf16 %v15399_v48, %v15398_v56  ;;  %v10368_v61 = vld [vmem:[%s21620_s4 + $0x980] sm:$0xff]  ;;  %v10314_v48 = vld [vmem:[%s21620_s4 + $0x850] sm:$0xff] }
 0x58b   :  { %13643 = vmatpush3.bf16.msra.mxu0 %v13642_v47  ;;  %6990 = vmatprep.mubr.f32.mxu0 %v10362_v49  ;;  %v15404_v51 = vunpack.i.h.bf16 %v15402_v10  ;;  %v15403_v14 = vunpack.i.l.bf16 %v15402_v10  ;;  %v15407_v42 = vpop.permute.xlu0 %15406  ;;  %v13934_v28 = vadd.f32 %v19957_v62, %v11033_v43  ;;  %v10311_v62 = vld [vmem:[%s21620_s4 + $0x838] sm:$0xff] }
 0x58c   :  { %12509 = vmatmul.mubr.msk.f32.gmra.mrb[106].mxu1 %vm1995_vm4, %v10308_v24  ;;  %13645 = vmatprep.subr.bf16.mxu0 %v13644_v50  ;;  %v15409_v57 = vunpack.i.h.bf16 %v15407_v42  ;;  %v15408_v22 = vunpack.i.l.bf16 %v15407_v42  ;;  %v20469_v20 = vadd.f32 %v13919_v55, %v11172_v40  ;;  %v11034_v37 = vpop.f32.mrb[150].mxu1  ;;  %v13591_v50 = vpack.c.bf16 %v15294_v46, %v15293_v35  ;;  %v10367_v24 = vld [vmem:[%s21620_s4 + $0x978] sm:$0xff] }
 0x58d   :  { %13586 = vmatpush3.bf16.msra.mxu1 %v13585_v45  ;;  %v13648_v53 = vpack.c.bf16 %v15404_v51, %v15403_v14  ;;  %12511 = vmatprep.mubr.msk.f32.mxu1 %vm15492_vm0, %v21855_v44  ;;  %v11173_v1 = vpop.f32.mrb[230].mxu0  ;;  %v11035_v59 = vpop.f32.mrb[151].mxu1  ;;  %v13935_v3 = vadd.f32 %v13934_v28, %v20262_v19  ;;  %v15333_v46 = vunpack.i.l.bf16 %v20260_v32 }
 0x58e   :  { %6991 = vmatmul.mubr.f32.gmra.mrb[56].mxu0 %v10361_v60  ;;  %13587 = vmatprep.subr.bf16.mxu1 %v22062_v31  ;;  %v15417_v52 = vpop.permute.xlu1 %15416  ;;  %v11036_v27 = vadd.f32 %v11035_v59, %v11034_v37  ;;  %v11174_v7 = vpop.f32.mrb[231].mxu0  ;;  %v13650_v16 = vpack.c.bf16 %v15409_v57, %v15408_v22  ;;  %v10370_v57 = vld [vmem:[%s21620_s4 + $0x990] sm:$0xff] }
 0x58f   :  { %6995 = vmatprep.mubr.f32.mxu0 %v10365_v36  ;;  %13647 = vmatpush3.bf16.msra.mxu0 %v13646_v17  ;;  %v15412_v47 = vpop.permute.xlu0 %15411  ;;  %v11175_v19 = vadd.f32 %v11174_v7, %v11173_v1  ;;  %v15419_v39 = vunpack.i.h.bf16 %v15417_v52  ;;  %v15418_v29 = vunpack.i.l.bf16 %v15417_v52  ;;  %v10317_v17 = vld [vmem:[%s21620_s4 + $0x868] sm:$0xff]  ;;  %v10374_v1 = vld [vmem:[%s21620_s4 + $0x9b0] sm:$0xff]  ;;  %v15334_v7 = vunpack.i.h.bf16 %v20260_v32 }
 0x590   :  { %12512 = vmatmul.mubr.msk.f32.gmra.mrb[108].mxu1 %vm1995_vm4, %v10311_v62  ;;  %13649 = vmatprep.subr.bf16.mxu0 %v13648_v53  ;;  %v15414_v63 = vunpack.i.h.bf16 %v15412_v47  ;;  %v15413_v18 = vunpack.i.l.bf16 %v15412_v47  ;;  %v13950_v15 = vadd.f32 %v19989_v11, %v11036_v27  ;;  %v10377_v32 = vld [vmem:[%s21620_s4 + $0x9c8] sm:$0x3] }
 0x591   :  { %13589 = vmatpush3.bf16.msra.mxu1 %v13588_v4  ;;  %12514 = vmatprep.mubr.msk.f32.mxu1 %vm15492_vm0, %v21855_v44  ;;  %v20493_v56 = vadd.f32 %v13935_v3, %v11175_v19  ;;  %v11037_v49 = vpop.f32.mrb[152].mxu1  ;;  %v13654_v40 = vpack.c.bf16 %v15419_v39, %v15418_v29  ;;  %v10320_v4 = vld [vmem:[%s21620_s4 + $0x880] sm:$0x3] }
 0x592   :  { %6996 = vmatmul.mubr.f32.gmra.mrb[58].mxu0 %v10364_v41  ;;  %13590 = vmatprep.subr.bf16.mxu1 %v22062_v31  ;;  %v13652_v38 = vpack.c.bf16 %v15414_v63, %v15413_v18  ;;  %v20496_v8 = vpop.permute.xlu1 %15426  ;;  %v11176_v11 = vpop.f32.mrb[232].mxu0  ;;  %v13951_v55 = vadd.f32 %v13950_v15, %v20307_v0 }
 0x593   :  { %7000 = vmatprep.mubr.f32.mxu0 %v10368_v61  ;;  %13651 = vmatpush3.bf16.msra.mxu0 %v13650_v16  ;;  %v15422_v43 = vpop.permute.xlu0 %15421  ;;  %v11038_v33 = vpop.f32.mrb[153].mxu1 }
 0x594   :  { %12515 = vmatmul.mubr.msk.f32.gmra.mrb[110].mxu1 %vm1995_vm4, %v10314_v48  ;;  %v15424_v45 = vunpack.i.h.bf16 %v15422_v43  ;;  %v15423_v21 = vunpack.i.l.bf16 %v15422_v43  ;;  %13653 = vmatprep.subr.bf16.mxu0 %v13652_v38  ;;  %v11039_v10 = vadd.f32 %v11038_v33, %v11037_v49  ;;  %v11177_v0 = vpop.f32.mrb[233].mxu0 }
 0x595   :  { %13592 = vmatpush3.bf16.msra.mxu1 %v13591_v50  ;;  %12517 = vmatprep.mubr.msk.f32.mxu1 %vm15492_vm0, %v21855_v44  ;;  %v11178_v60 = vadd.f32 %v11177_v0, %v11176_v11  ;;  %v13626_v11 = vpack.c.bf16 %v15334_v7, %v15333_v46  ;;  %v15348_v50 = vunpack.i.l.bf16 %v20331_v12 }
 0x596   :  { %7001 = vmatmul.mubr.f32.gmra.mrb[60].mxu0 %v10367_v24  ;;  %12543 = vmatprep.subr.mxu1 %v21855_v44  ;;  %v13656_v51 = vpack.c.bf16 %v15424_v45, %v15423_v21  ;;  %v20512_v14 = vpop.permute.xlu1 %6854  ;;  %v13966_v42 = vadd.f32 %v20016_v23, %v11039_v10  ;;  %v11040_v28 = vpop.f32.mrb[154].mxu1  ;;  %v10376_v24 = vld [vmem:[%s21620_s4 + $0x9c0] sm:$0x3] }
 0x597   :  { %7005 = vmatprep.mubr.f32.mxu0 %v10371_v26  ;;  %13655 = vmatpush3.bf16.msra.mxu0 %v13654_v40  ;;  %v15432_v22 = vpop.permute.xlu0 %15431  ;;  %v20518_v36 = vadd.f32 %v13951_v55, %v11178_v60  ;;  %v11179_v37 = vpop.f32.mrb[234].mxu0  ;;  %v15349_v55 = vunpack.i.h.bf16 %v20331_v12  ;;  %v10388_v12 = vld [vmem:[%s21620_s4 + $0x9e0] sm:$0xff] }
 0x598   :  { %12518 = vmatmul.mubr.msk.f32.gmra.mrb[112].mxu1 %vm1995_vm4, %v10317_v17  ;;  %v15434_v53 = vunpack.i.h.bf16 %v15432_v22  ;;  %v15433_v62 = vunpack.i.l.bf16 %v15432_v22  ;;  %13657 = vmatprep.subr.bf16.mxu0 %v13656_v51  ;;  %v11041_v23 = vpop.f32.mrb[155].mxu1  ;;  %v11180_v59 = vpop.f32.mrb[235].mxu0  ;;  %v13967_v3 = vadd.f32 %v13966_v42, %v20339_v54  ;;  %v10373_v54 = vld [vmem:[%s21620_s4 + $0x9a8] sm:$0xff]  ;;  %v15363_v22 = vunpack.i.l.bf16 %v20345_v58 }
 0x599   :  { %12544 = vmatpush3.msk.msra.mxu1 %vm2017_vm3, %v20381_v6  ;;  %12520 = vmatprep.mubr.msk.f32.mxu1 %vm15492_vm0, %v21855_v44  ;;  %v11042_v52 = vadd.f32 %v11041_v23, %v11040_v28  ;;  %v11181_v27 = vadd.f32 %v11180_v59, %v11179_v37  ;;  %v13629_v28 = vpack.c.bf16 %v15349_v55, %v15348_v50  ;;  %v10346_v50 = vld [vmem:[%s21620_s4 + $0x910] sm:$0xff] }
 0x59a   :  { %7006 = vmatmul.mubr.f32.gmra.mrb[62].mxu0 %v10370_v57  ;;  %v13658_v35 = vpack.c.bf16 %v15434_v53, %v15433_v62  ;;  %v15437_v16 = vpop.permute.xlu1 %15436  ;;  %13625 = vmatprep.subr.bf16.mxu1 %v22062_v31  ;;  %v15364_v57 = vunpack.i.h.bf16 %v20345_v58 }
 0x59b   :  { %7010 = vmatprep.mubr.f32.mxu0 %v10374_v1  ;;  %v15439_v6 = vunpack.i.h.bf16 %v15437_v16  ;;  %v15438_v41 = vunpack.i.l.bf16 %v15437_v16  ;;  %v20538_v47 = vpop.permute.xlu0 %15441  ;;  %v13982_v19 = vadd.f32 %v20041_v9, %v11042_v52  ;;  %v20541_v63 = vadd.f32 %v13967_v3, %v11181_v27  ;;  %v11043_v18 = vpop.f32.mrb[156].mxu1  ;;  %v10331_v9 = vld [vmem:[%s21620_s4 + $0x898] sm:$0xff]  ;;  %v10337_v1 = vld [vmem:[%s21620_s4 + $0x8c8] sm:$0xff]  ;;  %v10340_v16 = vld [vmem:[%s21620_s4 + $0x8e0] sm:$0xff] }
 0x59c   :  { %12521 = vmatmul.mubr.msk.f32.gmra.mrb[114].mxu1 %vm1995_vm4, %v10320_v4  ;;  %13659 = vmatpush3.bf16.msra.mxu0 %v13658_v35  ;;  %v11182_v61 = vpop.f32.mrb[236].mxu0  ;;  %v11044_v15 = vpop.f32.mrb[157].mxu1  ;;  %v13632_v4 = vpack.c.bf16 %v15364_v57, %v15363_v22  ;;  %v15374_v52 = vunpack.i.h.bf16 %v20405_v5  ;;  %v15373_v27 = vunpack.i.l.bf16 %v20405_v5  ;;  %v10397_v57 = vld [vmem:[%s21620_s4 + $0xa28] sm:$0xff] }
 0x59d   :  { %v13660_v39 = vpack.c.bf16 %v15439_v6, %v15438_v41  ;;  %12545 = vmatprep.mubr.msk.f32.mxu1 %vm15492_vm0, %v21855_v44  ;;  %v11045_v29 = vadd.f32 %v11044_v15, %v11043_v18  ;;  %v11183_v48 = vpop.f32.mrb[237].mxu0  ;;  %v13983_v49 = vadd.f32 %v13982_v19, %v20369_v2  ;;  %v15389_v18 = vunpack.i.h.bf16 %v20429_v34 }
 0x59e   :  { %7011 = vmatmul.mubr.f32.gmra.mrb[64].mxu0 %v10373_v54  ;;  %v11184_v38 = vadd.f32 %v11183_v48, %v11182_v61  ;;  %v13635_v19 = vpack.c.bf16 %v15374_v52, %v15373_v27 }
 0x59f   :  { %7015 = vmatprep.mubr.f32.mxu0 %v10377_v32  ;;  %v15447_v43 = vpop.permute.xlu1 %15446  ;;  %13661 = vmatprep.subr.bf16.mxu0 %v13660_v39  ;;  %v13998_v33 = vadd.f32 %v20067_v25, %v11045_v29  ;;  %v10334_v25 = vld [vmem:[%s21620_s4 + $0x8b0] sm:$0xff]  ;;  %v15388_v32 = vunpack.i.l.bf16 %v20429_v34 }
 0x5a0   :  { %12546 = vmatmul.mubr.msk.f32.vlgmr.msra.gmra.mrb[102].mxu1 %vm1995_vm4, %v10331_v9  ;;  %v15449_v45 = vunpack.i.h.bf16 %v15447_v43  ;;  %v15448_v2 = vunpack.i.l.bf16 %v15447_v43  ;;  %v15452_v21 = vpop.permute.xlu0 %15451  ;;  %v20560_v26 = vadd.f32 %v13983_v49, %v11184_v38  ;;  %v11185_v10 = vpop.f32.mrb[238].mxu0 }
 0x5a1   :  { %13627 = vmatpush3.bf16.msra.mxu1 %v13626_v11  ;;  %12548 = vmatprep.mubr.msk.f32.mxu1 %vm15492_vm0, %v21855_v44  ;;  %v15454_v0 = vunpack.i.h.bf16 %v15452_v21  ;;  %v15453_v40 = vunpack.i.l.bf16 %v15452_v21  ;;  %v11186_v17 = vpop.f32.mrb[239].mxu0  ;;  %v13999_v60 = vadd.f32 %v13998_v33, %v20407_v13  ;;  %v13638_v34 = vpack.c.bf16 %v15389_v18, %v15388_v32  ;;  %v10391_v33 = vld [vmem:[%s21620_s4 + $0x9f8] sm:$0xff] }
 0x5a2   :  { %7016 = vmatmul.mubr.f32.gmra.mrb[66].mxu0 %v10376_v24  ;;  %v13662_v51 = vpack.c.bf16 %v15449_v45, %v15448_v2  ;;  %13628 = vmatprep.subr.bf16.mxu1 %v22062_v31  ;;  %v11187_v42 = vadd.f32 %v11186_v17, %v11185_v10  ;;  %v10349_v2 = vld [vmem:[%s21620_s4 + $0x928] sm:$0x3]  ;;  %v15429_v10 = vunpack.i.h.bf16 %v20496_v8 }
 0x5a3   :  { %v13664_v37 = vpack.c.bf16 %v15454_v0, %v15453_v40  ;;  %7365 = vmatprep.mubr.f32.mxu0 %v10388_v12  ;;  %v15428_v12 = vunpack.i.l.bf16 %v20496_v8  ;;  %v10394_v0 = vld [vmem:[%s21620_s4 + $0xa10] sm:$0xff]  ;;  %v10360_v8 = vld [vmem:[%s21620_s4 + $0x940] sm:$0xff] }
 0x5a4   :  { %12549 = vmatmul.mubr.msk.f32.gmra.mrb[104].mxu1 %vm1995_vm4, %v10334_v25  ;;  %v20575_v53 = vpop.permute.xlu1 %15456  ;;  %13663 = vmatpush3.bf16.msra.mxu0 %v13662_v51  ;;  %v20577_v62 = vadd.f32 %v13999_v60, %v11187_v42  ;;  %v15444_v51 = vunpack.i.h.bf16 %v20538_v47  ;;  %v15443_v42 = vunpack.i.l.bf16 %v20538_v47  ;;  %v10363_v47 = vld [vmem:[%s21620_s4 + $0x958] sm:$0xff] }
 0x5a5   :  { %13630 = vmatpush3.bf16.msra.mxu1 %v13629_v28  ;;  %12551 = vmatprep.mubr.msk.f32.mxu1 %vm15492_vm0, %v21855_v44  ;;  %v15462_v13 = vpop.permute.xlu0 %15461  ;;  %v11238_v23 = vpop.f32.mrb[240].mxu0  ;;  %v13673_v60 = vpack.c.bf16 %v15429_v10, %v15428_v12 }
 0x5a6   :  { %13631 = vmatprep.subr.bf16.mxu1 %v22062_v31  ;;  %v15464_v58 = vunpack.i.h.bf16 %v15462_v13  ;;  %v15463_v59 = vunpack.i.l.bf16 %v15462_v13  ;;  %13665 = vmatprep.subr.bf16.mxu0 %v13664_v37  ;;  %v11239_v3 = vpop.f32.mrb[241].mxu0 }
 0x5a7   :  { %v11240_v7 = vadd.f32 %v11239_v3, %v11238_v23  ;;  %v13676_v23 = vpack.c.bf16 %v15444_v51, %v15443_v42  ;;  %v10396_v3 = vld [vmem:[%s21620_s4 + $0xa20] sm:$0xff] }
 0x5a8   :  { %v13666_v46 = vpack.c.bf16 %v15464_v58, %v15463_v59  ;;  %12552 = vmatmul.mubr.msk.f32.gmra.mrb[106].mxu1 %vm1995_vm4, %v10337_v1  ;;  %v15459_v58 = vunpack.i.h.bf16 %v20575_v53  ;;  %v15458_v59 = vunpack.i.l.bf16 %v20575_v53  ;;  %v10366_v53 = vld [vmem:[%s21620_s4 + $0x970] sm:$0xff] }
 0x5a9   :  { %13633 = vmatpush3.bf16.msra.mxu1 %v13632_v4  ;;  %v15467_v35 = vpop.permute.xlu1 %15466  ;;  %12554 = vmatprep.mubr.msk.f32.mxu1 %vm15492_vm0, %v21855_v44  ;;  %v20594_v54 = vadd.f32 %v20439_v30, %v11240_v7  ;;  %v10343_v30 = vld [vmem:[%s21620_s4 + $0x8f8] sm:$0xff] }
 0x5aa   :  { %v15469_v6 = vunpack.i.h.bf16 %v15467_v35  ;;  %v15468_v41 = vunpack.i.l.bf16 %v15467_v35  ;;  %13634 = vmatprep.subr.bf16.mxu1 %v22062_v31  ;;  %13667 = vmatpush3.bf16.msra.mxu0 %v13666_v46  ;;  %v11241_v5 = vpop.f32.mrb[242].mxu0  ;;  %v15472_v13 = vpop.permute.xlu0 %15471  ;;  %v13679_v7 = vpack.c.bf16 %v15459_v58, %v15458_v59  ;;  %v10407_v59 = vld [vmem:[%s21620_s4 + $0xa78] sm:$0x3] }
 0x5ab   :  { %v11242_v61 = vpop.f32.mrb[243].mxu0  ;;  %v15474_v46 = vunpack.i.h.bf16 %v15472_v13  ;;  %v15473_v35 = vunpack.i.l.bf16 %v15472_v13 }
 0x5ac   :  { %v13668_v15 = vpack.c.bf16 %v15469_v6, %v15468_v41  ;;  %12555 = vmatmul.mubr.msk.f32.gmra.mrb[108].mxu1 %vm1995_vm4, %v10340_v16  ;;  %v11243_v39 = vadd.f32 %v11242_v61, %v11241_v5  ;;  %v10399_v16 = vld [vmem:[%s21620_s4 + $0xa38] sm:$0xff] }
 0x5ad   :  { %13636 = vmatpush3.bf16.msra.mxu1 %v13635_v19  ;;  %12557 = vmatprep.mubr.msk.f32.mxu1 %vm15492_vm0, %v21855_v44  ;;  %v10369_v19 = vld [vmem:[%s21620_s4 + $0x988] sm:$0xff]  ;;  %v13682_v32 = vpack.c.bf16 %v15474_v46, %v15473_v35 }
 0x5ae   :  { %v15477_v9 = vpop.permute.xlu1 %15476  ;;  %13637 = vmatprep.subr.bf16.mxu1 %v22062_v31  ;;  %13669 = vmatprep.subr.bf16.mxu0 %v13668_v15  ;;  %v20607_v29 = vadd.f32 %v20469_v20, %v11243_v39  ;;  %v10387_v20 = vld [vmem:[%s21620_s4 + $0x9d8] sm:$0xff]  ;;  %v10402_v39 = vld [vmem:[%s21620_s4 + $0xa50] sm:$0xff] }
 0x5af   :  { %v15479_v48 = vunpack.i.h.bf16 %v15477_v9  ;;  %v15478_v49 = vunpack.i.l.bf16 %v15477_v9  ;;  %v11244_v38 = vpop.f32.mrb[244].mxu0  ;;  %v15482_v41 = vpop.permute.xlu0 %15481 }
 0x5b0   :  { %12558 = vmatmul.mubr.msk.f32.gmra.mrb[110].mxu1 %vm1995_vm4, %v10343_v30  ;;  %v11245_v11 = vpop.f32.mrb[245].mxu0  ;;  %v15484_v61 = vunpack.i.h.bf16 %v15482_v41  ;;  %v15483_v15 = vunpack.i.l.bf16 %v15482_v41  ;;  %v10406_v30 = vld [vmem:[%s21620_s4 + $0xa70] sm:$0x3] }
 0x5b1   :  { %v13670_v55 = vpack.c.bf16 %v15479_v48, %v15478_v49  ;;  %13639 = vmatpush3.bf16.msra.mxu1 %v13638_v34  ;;  %12560 = vmatprep.mubr.msk.f32.mxu1 %vm15492_vm0, %v21855_v44  ;;  %v11246_v24 = vadd.f32 %v11245_v11, %v11244_v38  ;;  %v10405_v34 = vld [vmem:[%s21620_s4 + $0xa68] sm:$0x3]  ;;  %v10375_v38 = vld [vmem:[%s21620_s4 + $0x9b8] sm:$0xff] }
 0x5b2   :  { %12586 = vmatprep.subr.mxu1 %v21855_v44  ;;  %v13685_v9 = vpack.c.bf16 %v15484_v61, %v15483_v15 }
 0x5b3   :  { %13671 = vmatpush3.bf16.msra.mxu0 %v13670_v55  ;;  %v20620_v43 = vadd.f32 %v20493_v56, %v11246_v24 }
 0x5b4   :  { %12561 = vmatmul.mubr.msk.f32.gmra.mrb[112].mxu1 %vm1995_vm4, %v10346_v50  ;;  %v11247_v45 = vpop.f32.mrb[246].mxu0  ;;  %v7235_v50 = vpop.permute.xlu1 %7234 }
 0x5b5   :  { %12587 = vmatpush3.msk.msra.mxu1 %vm2017_vm3, %v20512_v14  ;;  %12563 = vmatprep.mubr.msk.f32.mxu1 %vm15492_vm0, %v21855_v44  ;;  %v11248_v21 = vpop.f32.mrb[247].mxu0  ;;  %v10390_v14 = vld [vmem:[%s21620_s4 + $0x9f0] sm:$0xff] }
 0x5b6   :  { %7366 = vmatmul.mubr.f32.vlgmr.msra.gmra.mrb[68].mxu0 %v10387_v20  ;;  %13672 = vmatprep.subr.bf16.mxu1 %v22062_v31  ;;  %v11249_v56 = vadd.f32 %v11248_v21, %v11247_v45  ;;  %v10378_v20 = vld [vmem:[%s21620_s4 + $0x9d0] sm:$0x3]  ;;  %v10389_v21 = vld [vmem:[%s21620_s4 + $0x9e8] sm:$0xff] }
 0x5b7   :  { %7370 = vmatprep.mubr.f32.mxu0 %v10391_v33 }
 0x5b8   :  { %12564 = vmatmul.mubr.msk.f32.gmra.mrb[114].mxu1 %vm1995_vm4, %v10349_v2  ;;  %v20644_v40 = vadd.f32 %v20518_v36, %v11249_v56  ;;  %v10393_v36 = vld [vmem:[%s21620_s4 + $0xa08] sm:$0xff] }
 0x5b9   :  { %12588 = vmatprep.mubr.msk.f32.mxu1 %vm15492_vm0, %v21855_v44  ;;  %v11250_v25 = vpop.f32.mrb[248].mxu0 }
 0x5ba   :  { %7371 = vmatmul.mubr.f32.gmra.mrb[70].mxu0 %v10390_v14  ;;  %v11251_v17 = vpop.f32.mrb[249].mxu0 }
 0x5bb   :  { %7375 = vmatprep.mubr.f32.mxu0 %v10394_v0  ;;  %v11252_v28 = vadd.f32 %v11251_v17, %v11250_v25 }
 0x5bc   :  { %12589 = vmatmul.mubr.msk.f32.vlgmr.msra.gmra.mrb[102].mxu1 %vm1995_vm4, %v10360_v8 }
 0x5bd   :  { %13674 = vmatpush3.bf16.msra.mxu1 %v13673_v60  ;;  %12591 = vmatprep.mubr.msk.f32.mxu1 %vm15492_vm0, %v21855_v44  ;;  %v20666_v22 = vadd.f32 %v20541_v63, %v11252_v28  ;;  %v11253_v37 = vpop.f32.mrb[250].mxu0  ;;  %v10400_v63 = vld [vmem:[%s21620_s4 + $0xa40] sm:$0xff] }
 0x5be   :  { %7376 = vmatmul.mubr.f32.gmra.mrb[72].mxu0 %v10393_v36  ;;  %13675 = vmatprep.subr.bf16.mxu1 %v22062_v31  ;;  %v11254_v1 = vpop.f32.mrb[251].mxu0  ;;  %v10398_v36 = vld [vmem:[%s21620_s4 + $0xa30] sm:$0xff] }
 0x5bf   :  { %7380 = vmatprep.mubr.f32.mxu0 %v10397_v57  ;;  %v11255_v4 = vadd.f32 %v11254_v1, %v11253_v37  ;;  %v10401_v37 = vld [vmem:[%s21620_s4 + $0xa48] sm:$0xff] }
 0x5c0   :  { %12592 = vmatmul.mubr.msk.f32.gmra.mrb[104].mxu1 %vm1995_vm4, %v10363_v47 }
 0x5c1   :  { %13677 = vmatpush3.bf16.msra.mxu1 %v13676_v23  ;;  %12594 = vmatprep.mubr.msk.f32.mxu1 %vm15492_vm0, %v21855_v44  ;;  %v20684_v52 = vadd.f32 %v20560_v26, %v11255_v4  ;;  %v10403_v26 = vld [vmem:[%s21620_s4 + $0xa58] sm:$0xff]  ;;  %v10404_v23 = vld [vmem:[%s21620_s4 + $0xa60] sm:$0xff] }
 0x5c2   :  { %7381 = vmatmul.mubr.f32.gmra.mrb[74].mxu0 %v10396_v3  ;;  %13678 = vmatprep.subr.bf16.mxu1 %v22062_v31  ;;  %v11256_v27 = vpop.f32.mrb[252].mxu0 }
 0x5c3   :  { %7385 = vmatprep.mubr.f32.mxu0 %v10400_v63  ;;  %v11257_v6 = vpop.f32.mrb[253].mxu0 }
 0x5c4   :  { %12595 = vmatmul.mubr.msk.f32.gmra.mrb[106].mxu1 %vm1995_vm4, %v10366_v53  ;;  %v11258_v5 = vadd.f32 %v11257_v6, %v11256_v27 }
 0x5c5   :  { %13680 = vmatpush3.bf16.msra.mxu1 %v13679_v7  ;;  %12597 = vmatprep.mubr.msk.f32.mxu1 %vm15492_vm0, %v21855_v44 }
 0x5c6   :  { %7386 = vmatmul.mubr.f32.gmra.mrb[76].mxu0 %v10399_v16  ;;  %13681 = vmatprep.subr.bf16.mxu1 %v22062_v31  ;;  %v20701_v18 = vadd.f32 %v20577_v62, %v11258_v5  ;;  %v10372_v62 = vld [vmem:[%s21620_s4 + $0x9a0] sm:$0xff] }
 0x5c7   :  { %7390 = vmatprep.mubr.f32.mxu0 %v10403_v26 }
 0x5c8   :  { %12598 = vmatmul.mubr.msk.f32.gmra.mrb[108].mxu1 %vm1995_vm4, %v10369_v19 }
 0x5c9   :  { %13683 = vmatpush3.bf16.msra.mxu1 %v13682_v32  ;;  %12600 = vmatprep.mubr.msk.f32.mxu1 %vm15492_vm0, %v21855_v44 }
 0x5ca   :  { %7391 = vmatmul.mubr.f32.gmra.mrb[78].mxu0 %v10402_v39  ;;  %13684 = vmatprep.subr.bf16.mxu1 %v22062_v31 }
 0x5cb   :  { %7395 = vmatprep.mubr.f32.mxu0 %v10406_v30  ;;  %v11309_v48 = vpop.f32.mrb[254].mxu0 }
 0x5cc   :  { %12601 = vmatmul.mubr.msk.f32.gmra.mrb[110].mxu1 %vm1995_vm4, %v10372_v62  ;;  %v11310_v49 = vpop.f32.mrb[255].mxu0 }
 0x5cd   :  { %13686 = vmatpush3.bf16.msra.mxu1 %v13685_v9  ;;  %12603 = vmatprep.mubr.msk.f32.mxu1 %vm15492_vm0, %v21855_v44  ;;  %v11311_v11 = vadd.f32 %v11310_v49, %v11309_v48 }
 0x5ce   :  { %7396 = vmatmul.mubr.f32.gmra.mrb[80].mxu0 %v10405_v34  ;;  %12629 = vmatprep.subr.mxu1 %v21855_v44 }
 0x5cf   :  { %v13906_v55 = vadd.f32 %v20594_v54, %v11311_v11  ;;  %7767 = vmatprep.mubr.f32.mxu0 %v21855_v44 }
 0x5d0   :  { %12604 = vmatmul.mubr.msk.f32.gmra.mrb[112].mxu1 %vm1995_vm4, %v10375_v38  ;;  %v11312_v24 = vpop.f32.mrb[0].mxu0 }
 0x5d1   :  { %12630 = vmatpush3.msk.msra.mxu1 %vm2017_vm3, %v7235_v50  ;;  %12606 = vmatprep.mubr.msk.f32.mxu1 %vm15492_vm0, %v21855_v44  ;;  %v11313_v33 = vpop.f32.mrb[1].mxu0 }
 0x5d2   :  { %v11314_v45 = vadd.f32 %v11313_v33, %v11312_v24 }
 0x5d4   :  { %12607 = vmatmul.mubr.msk.f32.gmra.mrb[114].mxu1 %vm1995_vm4, %v10378_v20  ;;  %v13922_v54 = vadd.f32 %v20607_v29, %v11314_v45  ;;  %v11315_v2 = vpop.f32.mrb[2].mxu0  ;;  %v10392_v29 = vld [vmem:[%s21620_s4 + $0xa00] sm:$0xff] }
 0x5d5   :  { %12631 = vmatprep.mubr.msk.f32.mxu1 %vm15492_vm0, %v21855_v44  ;;  %v11316_v56 = vpop.f32.mrb[3].mxu0 }
 0x5d6   :  { %v11317_v10 = vadd.f32 %v11316_v56, %v11315_v2 }
 0x5d8   :  { %12632 = vmatmul.mubr.msk.f32.vlgmr.msra.gmra.mrb[102].mxu1 %vm1995_vm4, %v10389_v21  ;;  %v13938_v12 = vadd.f32 %v20620_v43, %v11317_v10  ;;  %v10395_v43 = vld [vmem:[%s21620_s4 + $0xa18] sm:$0xff] }
 0x5d9   :  { %12634 = vmatprep.mubr.msk.f32.mxu1 %vm15492_vm0, %v21855_v44  ;;  %v11318_v14 = vpop.f32.mrb[4].mxu0 }
 0x5da   :  { %v11319_v0 = vpop.f32.mrb[5].mxu0 }
 0x5db   :  { %v11320_v8 = vadd.f32 %v11319_v0, %v11318_v14 }
 0x5dc   :  { %12635 = vmatmul.mubr.msk.f32.gmra.mrb[104].mxu1 %vm1995_vm4, %v10392_v29 }
 0x5dd   :  { %12637 = vmatprep.mubr.msk.f32.mxu1 %vm15492_vm0, %v21855_v44  ;;  %v13954_v25 = vadd.f32 %v20644_v40, %v11320_v8  ;;  %v11321_v17 = vpop.f32.mrb[6].mxu0 }
 0x5de   :  { %v11322_v60 = vpop.f32.mrb[7].mxu0 }
 0x5df   :  { %v11323_v51 = vadd.f32 %v11322_v60, %v11321_v17 }
 0x5e0   :  { %12638 = vmatmul.mubr.msk.f32.gmra.mrb[106].mxu1 %vm1995_vm4, %v10395_v43 }
 0x5e1   :  { %12640 = vmatprep.mubr.msk.f32.mxu1 %vm15492_vm0, %v21855_v44  ;;  %v13970_v42 = vadd.f32 %v20666_v22, %v11323_v51  ;;  %v11324_v28 = vpop.f32.mrb[8].mxu0 }
 0x5e2   :  { %v11325_v40 = vpop.f32.mrb[9].mxu0 }
 0x5e3   :  { %v11326_v57 = vadd.f32 %v11325_v40, %v11324_v28 }
 0x5e4   :  { %12641 = vmatmul.mubr.msk.f32.gmra.mrb[108].mxu1 %vm1995_vm4, %v10398_v36 }
 0x5e5   :  { %12643 = vmatprep.mubr.msk.f32.mxu1 %vm15492_vm0, %v21855_v44  ;;  %v13986_v47 = vadd.f32 %v20684_v52, %v11326_v57 }
 0x5e6   :  { %v11327_v13 = vpop.f32.mrb[10].mxu0 }
 0x5e7   :  { %v11328_v22 = vpop.f32.mrb[11].mxu0 }
 0x5e8   :  { %12644 = vmatmul.mubr.msk.f32.gmra.mrb[110].mxu1 %vm1995_vm4, %v10401_v37  ;;  %v11329_v1 = vadd.f32 %v11328_v22, %v11327_v13 }
 0x5e9   :  { %12646 = vmatprep.mubr.msk.f32.mxu1 %vm15492_vm0, %v21855_v44 }
 0x5ea   :  { %v14002_v58 = vadd.f32 %v20701_v18, %v11329_v1 }
 0x5ec   :  { %12647 = vmatmul.mubr.msk.f32.gmra.mrb[112].mxu1 %vm1995_vm4, %v10404_v23 }
 0x5ed   :  { %12649 = vmatprep.mubr.msk.f32.mxu1 %vm15492_vm0, %v21855_v44 }
 0x5f0   :  { %12650 = vmatmul.mubr.msk.f32.gmra.mrb[114].mxu1 %vm1995_vm4, %v10407_v59 }
 0x5f1   :  { %7874 = vmatprep.mubr.f32.mxu1 %v21855_v44 }
 0x5f8   :  { %v11380_v3 = vpop.f32.mrb[12].mxu0 }
 0x5f9   :  { %v11381_v4 = vpop.f32.mrb[13].mxu0 }
 0x5fa   :  { %v11382_v63 = vadd.f32 %v11381_v4, %v11380_v3 }
 0x5fc   :  { %v13907_v53 = vadd.f32 %v13906_v55, %v11382_v63  ;;  %v11383_v52 = vpop.f32.mrb[14].mxu0 }
 0x5fd   :  { %v11384_v27 = vpop.f32.mrb[15].mxu0 }
 0x5fe   :  { %v11385_v7 = vadd.f32 %v11384_v27, %v11383_v52 }
 0x600   :  { %v13923_v46 = vadd.f32 %v13922_v54, %v11385_v7 }
 0x601   :  { %v11386_v35 = vpop.f32.mrb[16].mxu0 }
 0x602   :  { %v11387_v16 = vpop.f32.mrb[17].mxu0 }
 0x603   :  { %v11388_v6 = vadd.f32 %v11387_v16, %v11386_v35 }
 0x605   :  { %v13939_v41 = vadd.f32 %v13938_v12, %v11388_v6 }
 0x606   :  { %v11389_v26 = vpop.f32.mrb[18].mxu0 }
 0x607   :  { %v11390_v5 = vpop.f32.mrb[19].mxu0 }
 0x608   :  { %v11391_v19 = vadd.f32 %v11390_v5, %v11389_v26 }
 0x60a   :  { %v13955_v18 = vadd.f32 %v13954_v25, %v11391_v19 }
 0x60b   :  { %v11392_v32 = vpop.f32.mrb[20].mxu0 }
 0x60c   :  { %v11393_v61 = vpop.f32.mrb[21].mxu0 }
 0x60d   :  { %v11394_v15 = vadd.f32 %v11393_v61, %v11392_v32 }
 0x60f   :  { %v13971_v39 = vadd.f32 %v13970_v42, %v11394_v15 }
 0x610   :  { %v11395_v30 = vpop.f32.mrb[22].mxu0 }
 0x611   :  { %v11396_v62 = vpop.f32.mrb[23].mxu0 }
 0x612   :  { %v11397_v9 = vadd.f32 %v11396_v62, %v11395_v30 }
 0x614   :  { %v13987_v34 = vadd.f32 %v13986_v47, %v11397_v9 }
 0x615   :  { %v11398_v48 = vpop.f32.mrb[24].mxu0 }
 0x616   :  { %v11399_v49 = vpop.f32.mrb[25].mxu0 }
 0x617   :  { %v11400_v38 = vadd.f32 %v11399_v49, %v11398_v48 }
 0x619   :  { %v14003_v11 = vadd.f32 %v14002_v58, %v11400_v38 }
 0x61d   :  { %v11451_v55 = vpop.f32.mrb[26].mxu0 }
 0x61e   :  { %v11452_v50 = vpop.f32.mrb[27].mxu0 }
 0x61f   :  { %v11453_v24 = vadd.f32 %v11452_v50, %v11451_v55 }
 0x621   :  { %v13908_v20 = vadd.f32 %v13907_v53, %v11453_v24  ;;  %v11454_v33 = vpop.f32.mrb[28].mxu0 }
 0x622   :  { %v11455_v45 = vpop.f32.mrb[29].mxu0 }
 0x623   :  { %v11456_v54 = vadd.f32 %v11455_v45, %v11454_v33 }
 0x625   :  { %v13924_v2 = vadd.f32 %v13923_v46, %v11456_v54  ;;  %v11457_v21 = vpop.f32.mrb[30].mxu0 }
 0x626   :  { %v11458_v56 = vpop.f32.mrb[31].mxu0 }
 0x627   :  { %v11459_v10 = vadd.f32 %v11458_v56, %v11457_v21  ;;  %v7619_v56 = vld [vmem:[%s21621_s9 + $0x8] sm:$0xff] }
 0x629   :  { %v13940_v12 = vadd.f32 %v13939_v41, %v11459_v10  ;;  %v11460_v29 = vpop.f32.mrb[32].mxu0  ;;  %v7635_v10 = vld [vmem:[%s21621_s9 + $0x88] sm:$0xff] }
 0x62a   :  { %v11461_v14 = vpop.f32.mrb[33].mxu0 }
 0x62b   :  { %v11462_v0 = vadd.f32 %v11461_v14, %v11460_v29  ;;  %v13687_v29 = vpack.c.bf16 %v7635_v10, %v7619_v56  ;;  %v7637_v14 = vld [vmem:[%s21621_s9 + $0x98] sm:$0xff] }
 0x62d   :  { %v13956_v8 = vadd.f32 %v13955_v18, %v11462_v0  ;;  %v11463_v25 = vpop.f32.mrb[34].mxu0  ;;  %v7618_v0 = vld [vmem:[%s21621_s9] sm:$0xff]  ;;  %13688 = vmatprep.subr.bf16.mxu0 %v13687_v29 }
 0x62e   :  { %v11464_v43 = vpop.f32.mrb[35].mxu0 }
 0x62f   :  { %v11465_v17 = vadd.f32 %v11464_v43, %v11463_v25 }
 0x631   :  { %v13972_v60 = vadd.f32 %v13971_v39, %v11465_v17  ;;  %v11466_v51 = vpop.f32.mrb[36].mxu0 }
 0x632   :  { %v11467_v42 = vpop.f32.mrb[37].mxu0 }
 0x633   :  { %v11468_v36 = vadd.f32 %v11467_v42, %v11466_v51  ;;  %v7620_v51 = vld [vmem:[%s21621_s9 + $0x10] sm:$0xff] }
 0x634   :  { %v7636_v42 = vld [vmem:[%s21621_s9 + $0x90] sm:$0xff] }
 0x635   :  { %v13988_v28 = vadd.f32 %v13987_v34, %v11468_v36  ;;  %v11469_v40 = vpop.f32.mrb[38].mxu0 }
 0x636   :  { %v11470_v57 = vpop.f32.mrb[39].mxu0 }
 0x637   :  { %v11471_v47 = vadd.f32 %v11470_v57, %v11469_v40  ;;  %v7651_v57 = vld [vmem:[%s21621_s9 + $0x108] sm:$0xff] }
 0x639   :  { %v14004_v37 = vadd.f32 %v14003_v11, %v11471_v47  ;;  %v7667_v47 = vld [vmem:[%s21621_s9 + $0x188] sm:$0xff] }
 0x63d   :  { %v11522_v13 = vpop.f32.mrb[40].mxu0 }
 0x63e   :  { %v11523_v22 = vpop.f32.mrb[41].mxu0 }
 0x63f   :  { %v11524_v1 = vadd.f32 %v11523_v22, %v11522_v13  ;;  %v13691_v13 = vpack.c.bf16 %v7667_v47, %v7651_v57  ;;  %v7669_v22 = vld [vmem:[%s21621_s9 + $0x198] sm:$0xff] }
 0x641   :  { %v13909_v23 = vadd.f32 %v13908_v20, %v11524_v1  ;;  %v11525_v58 = vpop.f32.mrb[42].mxu0  ;;  %v7650_v1 = vld [vmem:[%s21621_s9 + $0x100] sm:$0xff] }
 0x642   :  { %v11526_v59 = vpop.f32.mrb[43].mxu0 }
 0x643   :  { %v11527_v3 = vadd.f32 %v11526_v59, %v11525_v58 }
 0x645   :  { %v13925_v4 = vadd.f32 %v13924_v2, %v11527_v3  ;;  %v11528_v63 = vpop.f32.mrb[44].mxu0 }
 0x646   :  { %v11529_v53 = vpop.f32.mrb[45].mxu0 }
 0x647   :  { %v11530_v52 = vadd.f32 %v11529_v53, %v11528_v63  ;;  %v7652_v63 = vld [vmem:[%s21621_s9 + $0x110] sm:$0xff] }
 0x648   :  { %v7668_v53 = vld [vmem:[%s21621_s9 + $0x190] sm:$0xff] }
 0x649   :  { %v13941_v27 = vadd.f32 %v13940_v12, %v11530_v52  ;;  %v11531_v7 = vpop.f32.mrb[46].mxu0  ;;  %v7621_v12 = vld [vmem:[%s21621_s9 + $0x18] sm:$0xff] }
 0x64a   :  { %v11532_v46 = vpop.f32.mrb[47].mxu0  ;;  %v13695_v17 = vpack.c.bf16 %v7637_v14, %v7621_v12 }
 0x64b   :  { %v11533_v35 = vadd.f32 %v11532_v46, %v11531_v7 }
 0x64c   :  { %13696 = vmatprep.subr.bf16.mxu1 %v13695_v17 }
 0x64d   :  { %v13957_v16 = vadd.f32 %v13956_v8, %v11533_v35  ;;  %v11534_v6 = vpop.f32.mrb[48].mxu0  ;;  %v7634_v8 = vld [vmem:[%s21621_s9 + $0x80] sm:$0xff] }
 0x64e   :  { %v11535_v41 = vpop.f32.mrb[49].mxu0 }
 0x64f   :  { %v11536_v26 = vadd.f32 %v11535_v41, %v11534_v6 }
 0x651   :  { %v13973_v5 = vadd.f32 %v13972_v60, %v11536_v26  ;;  %v11537_v19 = vpop.f32.mrb[50].mxu0  ;;  %v13689_v60 = vpack.c.bf16 %v7634_v8, %v7618_v0  ;;  %v7623_v26 = vld [vmem:[%s21621_s9 + $0x28] sm:$0xff] }
 0x652   :  { %v11538_v18 = vpop.f32.mrb[51].mxu0 }
 0x653   :  { %v11539_v32 = vadd.f32 %v11538_v18, %v11537_v19  ;;  %13690 = vmatpush1.bf16.msra.mxu0 %v13689_v60  ;;  %v7625_v19 = vld [vmem:[%s21621_s9 + $0x38] sm:$0xff] }
 0x654   :  { %13692 = vmatprep.subr.bf16.mxu0 %v13691_v13 }
 0x655   :  { %v13989_v61 = vadd.f32 %v13988_v28, %v11539_v32  ;;  %v11540_v15 = vpop.f32.mrb[52].mxu0  ;;  %v13697_v28 = vpack.c.bf16 %v7636_v42, %v7620_v51  ;;  %v7641_v32 = vld [vmem:[%s21621_s9 + $0xb8] sm:$0xff] }
 0x656   :  { %v11541_v39 = vpop.f32.mrb[53].mxu0 }
 0x657   :  { %v11542_v30 = vadd.f32 %v11541_v39, %v11540_v15  ;;  %13698 = vmatpush1.bf16.msra.mxu1 %v13697_v28  ;;  %v13711_v15 = vpack.c.bf16 %v7641_v32, %v7625_v19 }
 0x659   :  { %v14005_v62 = vadd.f32 %v14004_v37, %v11542_v30  ;;  %v7653_v37 = vld [vmem:[%s21621_s9 + $0x118] sm:$0xff] }
 0x65a   :  { %v13699_v3 = vpack.c.bf16 %v7669_v22, %v7653_v37 }
 0x65c   :  { %13700 = vmatprep.subr.bf16.mxu1 %v13699_v3 }
 0x65d   :  { %v11593_v9 = vpop.f32.mrb[54].mxu0 }
 0x65e   :  { %v11594_v34 = vpop.f32.mrb[55].mxu0 }
 0x65f   :  { %v11595_v48 = vadd.f32 %v11594_v34, %v11593_v9 }
 0x661   :  { %v20785_v49 = vadd.f32 %v13909_v23, %v11595_v48  ;;  %v11596_v38 = vpop.f32.mrb[56].mxu0  ;;  %v7666_v23 = vld [vmem:[%s21621_s9 + $0x180] sm:$0xff] }
 0x662   :  { %v11597_v11 = vpop.f32.mrb[57].mxu0 }
 0x663   :  { %v11598_v55 = vadd.f32 %v11597_v11, %v11596_v38 }
 0x665   :  { %v20787_v50 = vadd.f32 %v13925_v4, %v11598_v55  ;;  %v11599_v24 = vpop.f32.mrb[58].mxu0  ;;  %v13693_v4 = vpack.c.bf16 %v7666_v23, %v7650_v1 }
 0x666   :  { %v11600_v20 = vpop.f32.mrb[59].mxu0 }
 0x667   :  { %v11601_v33 = vadd.f32 %v11600_v20, %v11599_v24  ;;  %13694 = vmatpush1.bf16.msra.mxu0 %v13693_v4 }
 0x669   :  { %v20789_v45 = vadd.f32 %v13941_v27, %v11601_v33  ;;  %v11602_v54 = vpop.f32.mrb[60].mxu0  ;;  %v13701_v27 = vpack.c.bf16 %v7668_v53, %v7652_v63 }
 0x66a   :  { %v11603_v2 = vpop.f32.mrb[61].mxu0 }
 0x66b   :  { %v11604_v21 = vadd.f32 %v11603_v2, %v11602_v54  ;;  %13702 = vmatpush1.bf16.msra.mxu1 %v13701_v27 }
 0x66c   :  { %13712 = vmatprep.subr.bf16.mxu1 %v13711_v15 }
 0x66d   :  { %v13958_v25 = vadd.f32 %v13957_v16, %v11604_v21  ;;  %v11605_v43 = vpop.f32.mrb[62].mxu0 }
 0x66e   :  { %v11606_v36 = vpop.f32.mrb[63].mxu0 }
 0x66f   :  { %v11607_v40 = vadd.f32 %v11606_v36, %v11605_v43 }
 0x671   :  { %v13974_v58 = vadd.f32 %v13973_v5, %v11607_v40  ;;  %v11608_v59 = vpop.f32.mrb[64].mxu0  ;;  %v7639_v5 = vld [vmem:[%s21621_s9 + $0xa8] sm:$0xff] }
 0x672   :  { %v11609_v52 = vpop.f32.mrb[65].mxu0  ;;  %v13703_v18 = vpack.c.bf16 %v7639_v5, %v7623_v26 }
 0x673   :  { %v11610_v7 = vadd.f32 %v11609_v52, %v11608_v59 }
 0x674   :  { %13704 = vmatprep.subr.bf16.mxu0 %v13703_v18 }
 0x675   :  { %v13990_v46 = vadd.f32 %v13989_v61, %v11610_v7  ;;  %v11611_v35 = vpop.f32.mrb[66].mxu0 }
 0x676   :  { %v11612_v16 = vpop.f32.mrb[67].mxu0 }
 0x677   :  { %v11613_v6 = vadd.f32 %v11612_v16, %v11611_v35 }
 0x679   :  { %v14006_v41 = vadd.f32 %v14005_v62, %v11613_v6 }
 0x689   :  { %v11664_v61 = vpop.f32.mrb[68].mxu0 }
 0x68a   :  { %v11665_v39 = vpop.f32.mrb[69].mxu0 }
 0x68b   :  { %v11666_v30 = vadd.f32 %v11665_v39, %v11664_v61 }
 0x68d   :  { %v11667_v62 = vpop.f32.mrb[70].mxu0  ;;  %v13911_v9 = vadd.f32 %v20785_v49, %v11666_v30 }
 0x68e   :  { %v11668_v34 = vpop.f32.mrb[71].mxu0 }
 0x68f   :  { %v11669_v48 = vadd.f32 %v11668_v34, %v11667_v62 }
 0x691   :  { %v11670_v38 = vpop.f32.mrb[72].mxu0  ;;  %v13927_v11 = vadd.f32 %v20787_v50, %v11669_v48 }
 0x692   :  { %v11671_v55 = vpop.f32.mrb[73].mxu0 }
 0x693   :  { %v11672_v24 = vadd.f32 %v11671_v55, %v11670_v38 }
 0x695   :  { %v11673_v20 = vpop.f32.mrb[74].mxu0  ;;  %v13943_v33 = vadd.f32 %v20789_v45, %v11672_v24 }
 0x696   :  { %v11674_v54 = vpop.f32.mrb[75].mxu0 }
 0x697   :  { %v11675_v2 = vadd.f32 %v11674_v54, %v11673_v20 }
 0x699   :  { %v11676_v21 = vpop.f32.mrb[76].mxu0  ;;  %v13959_v56 = vadd.f32 %v13958_v25, %v11675_v2 }
 0x69a   :  { %v11677_v10 = vpop.f32.mrb[77].mxu0 }
 0x69b   :  { %v11678_v12 = vadd.f32 %v11677_v10, %v11676_v21 }
 0x69d   :  { %v11679_v29 = vpop.f32.mrb[78].mxu0  ;;  %v13975_v14 = vadd.f32 %v13974_v58, %v11678_v12 }
 0x69e   :  { %v11680_v0 = vpop.f32.mrb[79].mxu0 }
 0x69f   :  { %v11681_v49 = vadd.f32 %v11680_v0, %v11679_v29 }
 0x6a1   :  { %v11682_v8 = vpop.f32.mrb[80].mxu0  ;;  %v13991_v43 = vadd.f32 %v13990_v46, %v11681_v49 }
 0x6a2   :  { %v11683_v17 = vpop.f32.mrb[81].mxu0 }
 0x6a3   :  { %v11684_v60 = vadd.f32 %v11683_v17, %v11682_v8 }
 0x6a5   :  { %v14007_v50 = vadd.f32 %v14006_v41, %v11684_v60 }
 0x6ab   :  { %v7467_v51 = vpop.f32.mrb[102].mxu1 }
 0x6ac   :  { %v20854_v42 = vadd.f32 %v13911_v9, %v7467_v51  ;;  %v12633_v36 = vpop.f32.mrb[103].mxu1 }
 0x6ae   :  { %v7532_v25 = vmul.f32 %v20854_v42, %v20854_v42  ;;  %v7511_v57 = vsel %vm7510_vm5, %v20854_v42, 0.0 }
 0x6af   :  { %v7472_v45 = vpop.f32.mrb[104].mxu1 }
 0x6b0   :  { %v20858_v28 = vadd.f32 %v13927_v11, %v7472_v45  ;;  %v12636_v40 = vpop.f32.mrb[105].mxu1  ;;  %v7539_v1 = vsel %vm7510_vm5, %v7532_v25, 0.0 }
 0x6b2   :  { %v7512_v47 = vsel %vm7510_vm5, %v20858_v28, 0.0  ;;  %v7533_v37 = vmul.f32 %v20858_v28, %v20858_v28 }
 0x6b3   :  { %v7513_v13 = vadd.f32 %v7512_v47, %v7511_v57  ;;  %v7477_v22 = vpop.f32.mrb[106].mxu1 }
 0x6b4   :  { %v7540_v23 = vsel %vm7510_vm5, %v7533_v37, 0.0  ;;  %v20868_v58 = vadd.f32 %v13943_v33, %v7477_v22  ;;  %v12639_v59 = vpop.f32.mrb[107].mxu1 }
 0x6b5   :  { %v7541_v3 = vadd.f32 %v7540_v23, %v7539_v1 }
 0x6b6   :  { %v7514_v4 = vsel %vm7510_vm5, %v20868_v58, 0.0  ;;  %v7534_v63 = vmul.f32 %v20868_v58, %v20868_v58 }
 0x6b7   :  { %v7515_v53 = vadd.f32 %v7514_v4, %v7513_v13  ;;  %v7482_v52 = vpop.f32.mrb[108].mxu1 }
 0x6b8   :  { %v7542_v27 = vsel %vm7510_vm5, %v7534_v63, 0.0  ;;  %v20875_v7 = vadd.f32 %v13959_v56, %v7482_v52  ;;  %v12642_v46 = vpop.f32.mrb[109].mxu1 }
 0x6b9   :  { %v7543_v35 = vadd.f32 %v7542_v27, %v7541_v3  ;;  %v20893_v27 = vld [vmem:[%s21622_s6] ss:$0 sm:$0xff] }
 0x6ba   :  { %v7516_v16 = vsel %vm7510_vm5, %v20875_v7, 0.0  ;;  %v7535_v6 = vmul.f32 %v20875_v7, %v20875_v7 }
 0x6bb   :  { %v7517_v41 = vadd.f32 %v7516_v16, %v7515_v53  ;;  %v7487_v26 = vpop.f32.mrb[110].mxu1 }
 0x6bc   :  { %v7544_v5 = vsel %vm7510_vm5, %v7535_v6, 0.0  ;;  %v13976_v19 = vadd.f32 %v13975_v14, %v7487_v26  ;;  %v12645_v18 = vpop.f32.mrb[111].mxu1 }
 0x6bd   :  { %v7545_v32 = vadd.f32 %v7544_v5, %v7543_v35  ;;  %v7622_v5 = vld [vmem:[%s21621_s9 + $0x20] sm:$0xff] }
 0x6be   :  { %v7518_v61 = vsel %vm7510_vm5, %v13976_v19, 0.0  ;;  %v7536_v15 = vmul.f32 %v13976_v19, %v13976_v19 }
 0x6bf   :  { %v7519_v39 = vadd.f32 %v7518_v61, %v7517_v41  ;;  %v7492_v30 = vpop.f32.mrb[112].mxu1  ;;  %v7638_v61 = vld [vmem:[%s21621_s9 + $0xa0] sm:$0xff] }
 0x6c0   :  { %v7546_v62 = vsel %vm7510_vm5, %v7536_v15, 0.0  ;;  %v13992_v9 = vadd.f32 %v13991_v43, %v7492_v30  ;;  %v12648_v34 = vpop.f32.mrb[113].mxu1  ;;  %v7624_v15 = vld [vmem:[%s21621_s9 + $0x30] sm:$0xff]  ;;  %v7655_v30 = vld [vmem:[%s21621_s9 + $0x128] sm:$0xff] }
 0x6c1   :  { %v7547_v48 = vadd.f32 %v7546_v62, %v7545_v32  ;;  %v7657_v34 = vld [vmem:[%s21621_s9 + $0x138] sm:$0xff] }
 0x6c2   :  { %v7520_v38 = vsel %vm7510_vm5, %v13992_v9, 0.0  ;;  %v7537_v11 = vmul.f32 %v13992_v9, %v13992_v9 }
 0x6c3   :  { %v7521_v55 = vadd.f32 %v7520_v38, %v7519_v39  ;;  %v7497_v24 = vpop.f32.mrb[114].mxu1  ;;  %v7640_v39 = vld [vmem:[%s21621_s9 + $0xb0] sm:$0xff]  ;;  %v13705_v38 = vpack.c.bf16 %v7638_v61, %v7622_v5  ;;  %v7631_v61 = vld [vmem:[%s21621_s9 + $0x68] sm:$0xff] }
 0x6c4   :  { %v7548_v20 = vsel %vm7510_vm5, %v7537_v11, 0.0  ;;  %v14008_v33 = vadd.f32 %v14007_v50, %v7497_v24  ;;  %v12651_v54 = vpop.f32.mrb[115].mxu1  ;;  %v13713_v11 = vpack.c.bf16 %v7640_v39, %v7624_v15  ;;  %v7647_v15 = vld [vmem:[%s21621_s9 + $0xe8] sm:$0xff]  ;;  %v7633_v39 = vld [vmem:[%s21621_s9 + $0x78] sm:$0xff] }
 0x6c5   :  { %v7549_v2 = vadd.f32 %v7548_v20, %v7547_v48  ;;  %v7673_v48 = vld [vmem:[%s21621_s9 + $0x1b8] sm:$0xff] }
 0x6c6   :  { %v7523_v21 = vsel %vm7522_vm6, %v14008_v33, 0.0  ;;  %v7538_v56 = vmul.f32 %v14008_v33, %v14008_v33 }
 0x6c7   :  { %v7524_v10 = vadd.f32 %v7523_v21, %v7521_v55  ;;  %v7654_v55 = vld [vmem:[%s21621_s9 + $0x120] sm:$0xff]  ;;  %v7656_v21 = vld [vmem:[%s21621_s9 + $0x130] sm:$0xff] }
 0x6c8   :  { %v7550_v12 = vsel %vm7522_vm6, %v7538_v56, 0.0  ;;  %v7672_v56 = vld [vmem:[%s21621_s9 + $0x1b0] sm:$0xff] }
 0x6c9   :  { %v7525_v29 = vrot.slane %v7524_v10, 4  ;;  %v7551_v14 = vadd.f32 %v7550_v12, %v7549_v2  ;;  %v7670_v2 = vld [vmem:[%s21621_s9 + $0x1a0] sm:$0xff]  ;;  %v13715_v12 = vpack.c.bf16 %v7673_v48, %v7657_v34  ;;  %v13735_v34 = vpack.c.bf16 %v7647_v15, %v7631_v61 }
 0x6cb   :  { %v7526_v0 = vadd.f32 %v7525_v29, %v7524_v10  ;;  %v7552_v49 = vrot.slane %v7551_v14, 4  ;;  %v7627_v29 = vld [vmem:[%s21621_s9 + $0x48] sm:$0xff] }
 0x6cd   :  { %v7527_v8 = vrot.slane %v7526_v0, 2  ;;  %v7553_v43 = vadd.f32 %v7552_v49, %v7551_v14  ;;  %v7643_v14 = vld [vmem:[%s21621_s9 + $0xc8] sm:$0xff]  ;;  %v7645_v49 = vld [vmem:[%s21621_s9 + $0xd8] sm:$0xff] }
 0x6cf   :  { %v7528_v17 = vadd.f32 %v7527_v8, %v7526_v0  ;;  %v7554_v60 = vrot.slane %v7553_v43, 2  ;;  %v7629_v0 = vld [vmem:[%s21621_s9 + $0x58] sm:$0xff]  ;;  %v13709_v8 = vpack.c.bf16 %v7670_v2, %v7654_v55  ;;  %v7632_v55 = vld [vmem:[%s21621_s9 + $0x70] sm:$0xff] }
 0x6d0   :  { %v7665_v2 = vld [vmem:[%s21621_s9 + $0x178] sm:$0xff] }
 0x6d1   :  { %v7529_v51 = vrot.slane %v7528_v17, 1  ;;  %v7555_v36 = vadd.f32 %v7554_v60, %v7553_v43  ;;  %v13717_v43 = vpack.c.bf16 %v7672_v56, %v7656_v21  ;;  %v7681_v21 = vld [vmem:[%s21621_s9 + $0x1f8] sm:$0xff] }
 0x6d3   :  { %v7530_v45 = vadd.f32 %v7529_v51, %v7528_v17  ;;  %v7556_v25 = vrot.slane %v7555_v36, 1 }
 0x6d5   :  { %v7531_v40 = vmul.f32 0.02, %v7530_v45  ;;  %v7557_v50 = vadd.f32 %v7556_v25, %v7555_v36  ;;  %v13719_v45 = vpack.c.bf16 %v7643_v14, %v7627_v29  ;;  %v13727_v25 = vpack.c.bf16 %v7645_v49, %v7629_v0  ;;  %v7678_v0 = vld [vmem:[%s21621_s9 + $0x1e0] sm:$0xff]  ;;  %v7664_v49 = vld [vmem:[%s21621_s9 + $0x170] sm:$0xff] }
 0x6d6   :  { %v13747_v14 = vpack.c.bf16 %v7681_v21, %v7665_v2 }
 0x6d7   :  { %v7558_v57 = vmul.f32 0.02, %v7557_v50  ;;  %v7559_v47 = vmul.f32 %v7531_v40, %v7531_v40  ;;  %v7562_v37 = vsub.f32 %v20854_v42, %v7531_v40  ;;  %v7563_v13 = vsub.f32 %v20858_v28, %v7531_v40 }
 0x6d8   :  { %v7564_v22 = vsub.f32 %v20868_v58, %v7531_v40  ;;  %v7565_v1 = vsub.f32 %v20875_v7, %v7531_v40  ;;  %v7566_v23 = vsub.f32 %v13976_v19, %v7531_v40  ;;  %v7567_v59 = vsub.f32 %v13992_v9, %v7531_v40  ;;  %v20898_v58 = vld [vmem:[%s21623_s7] ss:$0 sm:$0xff]  ;;  %v7671_v9 = vld [vmem:[%s21621_s9 + $0x1a8] sm:$0xff] }
 0x6d9   :  { %v7560_v3 = vsub.f32 %v7558_v57, %v7559_v47  ;;  %v7568_v4 = vsub.f32 %v14008_v33, %v7531_v40  ;;  %v13707_v10 = vpack.c.bf16 %v7671_v9, %v7655_v30  ;;  %v7649_v30 = vld [vmem:[%s21621_s9 + $0xf8] sm:$0xff] }
 0x6da   :  { %v13743_v48 = vpack.c.bf16 %v7649_v30, %v7633_v39 }
 0x6db   :  { %v7561_v63 = vmax.f32 %v7560_v3, 0.0 }
 0x6dd   :  { %v7569_v53 = vadd.f32 1e-05, %v7561_v63 }
 0x6df   :  { %15487 = vrsqrt.f32 %v7569_v53 }
 0x6e9   :  { %v15488_v52 = vpop.eup %15487 }
 0x6ea   :  { %v7571_v42 = vmul.f32 %v15488_v52, %v7562_v37  ;;  %v7572_v46 = vmul.f32 %v15488_v52, %v7563_v13  ;;  %v7573_v28 = vmul.f32 %v15488_v52, %v7564_v22  ;;  %v7574_v35 = vmul.f32 %v15488_v52, %v7565_v1 }
 0x6eb   :  { %v7575_v7 = vmul.f32 %v15488_v52, %v7566_v23  ;;  %v7576_v16 = vmul.f32 %v15488_v52, %v7567_v59  ;;  %v20900_v6 = vmul.f32 %v15488_v52, %v7568_v4  ;;  %v7626_v52 = vld [vmem:[%s21621_s9 + $0x40] sm:$0xff] }
 0x6ec   :  { %v7584_v41 = vmul.f32 %v20893_v27, %v7571_v42  ;;  %v7585_v26 = vmul.f32 %v20893_v27, %v7572_v46  ;;  %v7586_v19 = vmul.f32 %v20893_v27, %v7573_v28  ;;  %v7587_v24 = vmul.f32 %v20893_v27, %v7574_v35  ;;  %v7628_v42 = vld [vmem:[%s21621_s9 + $0x50] sm:$0xff]  ;;  %v7659_v28 = vld [vmem:[%s21621_s9 + $0x148] sm:$0xff] }
 0x6ed   :  { %v7588_v17 = vmul.f32 %v20893_v27, %v7575_v7  ;;  %v7589_v40 = vmul.f32 %v20893_v27, %v7576_v16  ;;  %v7590_v37 = vmul.f32 %v20893_v27, %v20900_v6  ;;  %v7642_v27 = vld [vmem:[%s21621_s9 + $0xc0] sm:$0xff]  ;;  %v7644_v46 = vld [vmem:[%s21621_s9 + $0xd0] sm:$0xff]  ;;  %v7675_v35 = vld [vmem:[%s21621_s9 + $0x1c8] sm:$0xff] }
 0x6ee   :  { %v7597_v18 = vadd.f32 %v20898_v58, %v7584_v41  ;;  %v7598_v32 = vadd.f32 %v20898_v58, %v7585_v26  ;;  %v7599_v54 = vadd.f32 %v20898_v58, %v7586_v19  ;;  %v7600_v36 = vadd.f32 %v20898_v58, %v7587_v24  ;;  %v7677_v7 = vld [vmem:[%s21621_s9 + $0x1d8] sm:$0xff]  ;;  %v7658_v41 = vld [vmem:[%s21621_s9 + $0x140] sm:$0xff]  ;;  %v7648_v24 = vld [vmem:[%s21621_s9 + $0xf0] sm:$0xff] }
 0x6ef   :  { %v7601_v47 = vadd.f32 %v20898_v58, %v7588_v17  ;;  %v7602_v1 = vadd.f32 %v20898_v58, %v7589_v40  ;;  %v7603_v23 = vadd.f32 %v20898_v58, %v7590_v37  ;;  %v7661_v58 = vld [vmem:[%s21621_s9 + $0x158] sm:$0xff]  ;;  %v13721_v16 = vpack.c.bf16 %v7642_v27, %v7626_v52  ;;  %v7674_v26 = vld [vmem:[%s21621_s9 + $0x1c0] sm:$0xff] }
 0x6f0   :  { %v7604_v62 = vmul.f32 0.2, %v7597_v18  ;;  %v7605_v33 = vmul.f32 0.2, %v7598_v32  ;;  %v7606_v51 = vmul.f32 0.2, %v7599_v54  ;;  %v13729_v6 = vpack.c.bf16 %v7644_v46, %v7628_v42 }
 0x6f1   :  { %v7607_v57 = vmul.f32 0.2, %v7600_v36  ;;  %v7608_v22 = vmul.f32 0.2, %v7601_v47  ;;  %v7609_v3 = vmul.f32 0.2, %v7602_v1  ;;  %v13723_v5 = vpack.c.bf16 %v7675_v35, %v7659_v28 }
 0x6f2   :  { %v20935_v20 = vmax.f32 %v7597_v18, %v7604_v62  ;;  %v20966_v60 = vmax.f32 %v7598_v32, %v7605_v33  ;;  %v20976_v50 = vmax.f32 %v7599_v54, %v7606_v51  ;;  %v7610_v4 = vmul.f32 0.2, %v7603_v23  ;;  %v7660_v18 = vld [vmem:[%s21621_s9 + $0x150] sm:$0xff]  ;;  %v7663_v33 = vld [vmem:[%s21621_s9 + $0x168] sm:$0xff] }
 0x6f3   :  { %v20987_v13 = vmax.f32 %v7600_v36, %v7607_v57  ;;  %v20997_v59 = vmax.f32 %v7601_v47, %v7608_v22  ;;  %v21005_v63 = vmax.f32 %v7602_v1, %v7609_v3  ;;  %v13731_v19 = vpack.c.bf16 %v7677_v7, %v7661_v58  ;;  %v7676_v32 = vld [vmem:[%s21621_s9 + $0x1d0] sm:$0xff]  ;;  %v7679_v54 = vld [vmem:[%s21621_s9 + $0x1e8] sm:$0xff] }
 0x6f4   :  { %10418 = vmatmul.mubr.msk.f32.vlgmr.msra.gmra.mrb[82].mxu0 %vm7510_vm5, %v20935_v20  ;;  %10425 = vmatmul.mubr.msk.f32.vlgmr.msra.gmra.mrb[158].mxu1 %vm7510_vm5, %v20935_v20  ;;  %v21013_v53 = vmax.f32 %v7603_v23, %v7610_v4  ;;  %v13725_v62 = vpack.c.bf16 %v7674_v26, %v7658_v41  ;;  %v13733_v9 = vpack.c.bf16 %v7676_v32, %v7660_v18 }
 0x6f5   :  { %7773 = vmatprep.mubr.f32.mxu0 %v21855_v44  ;;  %7880 = vmatprep.mubr.f32.mxu1 %v21855_v44  ;;  %v13739_v29 = vpack.c.bf16 %v7679_v54, %v7663_v33 }
 0x6f6   :  { %13706 = vmatpush1.bf16.msra.mxu0 %v13705_v38  ;;  %13714 = vmatpush1.bf16.msra.mxu1 %v13713_v11  ;;  %v7630_v38 = vld [vmem:[%s21621_s9 + $0x60] sm:$0xff] }
 0x6f7   :  { %13708 = vmatprep.subr.bf16.mxu0 %v13707_v10  ;;  %13716 = vmatprep.subr.bf16.mxu1 %v13715_v12  ;;  %v7646_v11 = vld [vmem:[%s21621_s9 + $0xe0] sm:$0xff]  ;;  %v13745_v10 = vpack.c.bf16 %v7648_v24, %v7632_v55 }
 0x6f8   :  { %10419 = vmatmul.mubr.msk.f32.gmra.mrb[84].mxu0 %vm7510_vm5, %v20966_v60  ;;  %10426 = vmatmul.mubr.msk.f32.gmra.mrb[160].mxu1 %vm7510_vm5, %v20966_v60  ;;  %v13737_v56 = vpack.c.bf16 %v7646_v11, %v7630_v38  ;;  %v7662_v12 = vld [vmem:[%s21621_s9 + $0x160] sm:$0xff] }
 0x6f9   :  { %7779 = vmatprep.mubr.f32.mxu0 %v21855_v44  ;;  %7886 = vmatprep.mubr.f32.mxu1 %v21855_v44 }
 0x6fa   :  { %13710 = vmatpush1.bf16.msra.mxu0 %v13709_v8  ;;  %13718 = vmatpush1.bf16.msra.mxu1 %v13717_v43  ;;  %v7680_v8 = vld [vmem:[%s21621_s9 + $0x1f0] sm:$0xff]  ;;  %v13741_v43 = vpack.c.bf16 %v7678_v0, %v7662_v12 }
 0x6fb   :  { %13720 = vmatprep.subr.bf16.mxu0 %v13719_v45  ;;  %13728 = vmatprep.subr.bf16.mxu1 %v13727_v25  ;;  %v13749_v17 = vpack.c.bf16 %v7680_v8, %v7664_v49 }
 0x6fc   :  { %10420 = vmatmul.mubr.msk.f32.gmra.mrb[86].mxu0 %vm7510_vm5, %v20976_v50  ;;  %10427 = vmatmul.mubr.msk.f32.gmra.mrb[162].mxu1 %vm7510_vm5, %v20976_v50 }
 0x6fd   :  { %7785 = vmatprep.mubr.f32.mxu0 %v21855_v44  ;;  %7892 = vmatprep.mubr.f32.mxu1 %v21855_v44 }
 0x700   :  { %10421 = vmatmul.mubr.msk.f32.gmra.mrb[88].mxu0 %vm7510_vm5, %v20987_v13  ;;  %10428 = vmatmul.mubr.msk.f32.gmra.mrb[164].mxu1 %vm7510_vm5, %v20987_v13 }
 0x701   :  { %7791 = vmatprep.mubr.f32.mxu0 %v21855_v44  ;;  %7898 = vmatprep.mubr.f32.mxu1 %v21855_v44 }
 0x704   :  { %10422 = vmatmul.mubr.msk.f32.gmra.mrb[90].mxu0 %vm7510_vm5, %v20997_v59  ;;  %10429 = vmatmul.mubr.msk.f32.gmra.mrb[166].mxu1 %vm7510_vm5, %v20997_v59 }
 0x705   :  { %7797 = vmatprep.mubr.f32.mxu0 %v21855_v44  ;;  %7904 = vmatprep.mubr.f32.mxu1 %v21855_v44 }
 0x708   :  { %10423 = vmatmul.mubr.msk.f32.gmra.mrb[92].mxu0 %vm7510_vm5, %v21005_v63  ;;  %10430 = vmatmul.mubr.msk.f32.gmra.mrb[168].mxu1 %vm7510_vm5, %v21005_v63 }
 0x709   :  { %7803 = vmatprep.mubr.f32.mxu0 %v21855_v44  ;;  %7910 = vmatprep.mubr.f32.mxu1 %v21855_v44 }
 0x70c   :  { %10424 = vmatmul.mubr.msk.f32.gmra.mrb[94].mxu0 %vm7510_vm5, %v21013_v53  ;;  %10431 = vmatmul.mubr.msk.f32.gmra.mrb[170].mxu1 %vm7510_vm5, %v21013_v53 }
 0x70d   :  { %7981 = vmatprep.mubr.f32.mxu0 %v21855_v44  ;;  %8088 = vmatprep.mubr.f32.mxu1 %v21855_v44 }
 0x710   :  { %10432 = vmatmul.mubr.msk.f32.vlgmr.msra.gmra.mrb[96].mxu0 %vm7510_vm5, %v20935_v20  ;;  %10439 = vmatmul.mubr.msk.f32.vlgmr.msra.gmra.mrb[172].mxu1 %vm7510_vm5, %v20935_v20 }
 0x711   :  { %7987 = vmatprep.mubr.f32.mxu0 %v21855_v44  ;;  %8094 = vmatprep.mubr.f32.mxu1 %v21855_v44 }
 0x712   :  { %13722 = vmatpush1.bf16.msra.mxu0 %v13721_v16  ;;  %13730 = vmatpush1.bf16.msra.mxu1 %v13729_v6 }
 0x713   :  { %13724 = vmatprep.subr.bf16.mxu0 %v13723_v5  ;;  %13732 = vmatprep.subr.bf16.mxu1 %v13731_v19 }
 0x714   :  { %10433 = vmatmul.mubr.msk.f32.gmra.mrb[98].mxu0 %vm7510_vm5, %v20966_v60  ;;  %10440 = vmatmul.mubr.msk.f32.gmra.mrb[174].mxu1 %vm7510_vm5, %v20966_v60 }
 0x715   :  { %7993 = vmatprep.mubr.f32.mxu0 %v21855_v44  ;;  %8100 = vmatprep.mubr.f32.mxu1 %v21855_v44 }
 0x716   :  { %13726 = vmatpush1.bf16.msra.mxu0 %v13725_v62  ;;  %13734 = vmatpush1.bf16.msra.mxu1 %v13733_v9  ;;  %v10474_v62 = vld [vmem:[%s21624_s8 + $0x2] sm:$0x3]  ;;  %v10479_v9 = vld [vmem:[%s21624_s8 + $0x4] sm:$0x3] }
 0x717   :  { %13736 = vmatprep.subr.bf16.mxu0 %v13735_v34  ;;  %13744 = vmatprep.subr.bf16.mxu1 %v13743_v48 }
 0x718   :  { %10434 = vmatmul.mubr.msk.f32.gmra.mrb[100].mxu0 %vm7510_vm5, %v20976_v50  ;;  %10441 = vmatmul.mubr.msk.f32.gmra.mrb[176].mxu1 %vm7510_vm5, %v20976_v50 }
 0x719   :  { %7999 = vmatprep.mubr.f32.mxu0 %v21855_v44  ;;  %8106 = vmatprep.mubr.f32.mxu1 %v21855_v44 }
 0x71c   :  { %10435 = vmatmul.mubr.msk.f32.gmra.mrb[102].mxu0 %vm7510_vm5, %v20987_v13  ;;  %10442 = vmatmul.mubr.msk.f32.gmra.mrb[178].mxu1 %vm7510_vm5, %v20987_v13 }
 0x71d   :  { %8005 = vmatprep.mubr.f32.mxu0 %v21855_v44  ;;  %8112 = vmatprep.mubr.f32.mxu1 %v21855_v44 }
 0x720   :  { %10436 = vmatmul.mubr.msk.f32.gmra.mrb[104].mxu0 %vm7510_vm5, %v20997_v59  ;;  %10443 = vmatmul.mubr.msk.f32.gmra.mrb[180].mxu1 %vm7510_vm5, %v20997_v59 }
 0x721   :  { %8011 = vmatprep.mubr.f32.mxu0 %v21855_v44  ;;  %8118 = vmatprep.mubr.f32.mxu1 %v21855_v44 }
 0x724   :  { %10437 = vmatmul.mubr.msk.f32.gmra.mrb[106].mxu0 %vm7510_vm5, %v21005_v63  ;;  %10444 = vmatmul.mubr.msk.f32.gmra.mrb[182].mxu1 %vm7510_vm5, %v21005_v63 }
 0x725   :  { %8017 = vmatprep.mubr.f32.mxu0 %v21855_v44  ;;  %8124 = vmatprep.mubr.f32.mxu1 %v21855_v44 }
 0x728   :  { %10438 = vmatmul.mubr.msk.f32.gmra.mrb[108].mxu0 %vm7510_vm5, %v21013_v53  ;;  %10445 = vmatmul.mubr.msk.f32.gmra.mrb[184].mxu1 %vm7510_vm5, %v21013_v53 }
 0x729   :  { %8195 = vmatprep.mubr.f32.mxu0 %v21855_v44  ;;  %8302 = vmatprep.mubr.f32.mxu1 %v21855_v44 }
 0x72c   :  { %10446 = vmatmul.mubr.msk.f32.vlgmr.msra.gmra.mrb[110].mxu0 %vm7510_vm5, %v20935_v20  ;;  %10453 = vmatmul.mubr.msk.f32.vlgmr.msra.gmra.mrb[186].mxu1 %vm7510_vm5, %v20935_v20 }
 0x72d   :  { %8201 = vmatprep.mubr.f32.mxu0 %v21855_v44  ;;  %8308 = vmatprep.mubr.f32.mxu1 %v21855_v44 }
 0x72e   :  { %13738 = vmatpush1.bf16.msra.mxu0 %v13737_v56  ;;  %13746 = vmatpush1.bf16.msra.mxu1 %v13745_v10 }
 0x72f   :  { %13740 = vmatprep.subr.bf16.mxu0 %v13739_v29  ;;  %13748 = vmatprep.subr.bf16.mxu1 %v13747_v14 }
 0x730   :  { %10447 = vmatmul.mubr.msk.f32.gmra.mrb[112].mxu0 %vm7510_vm5, %v20966_v60  ;;  %10454 = vmatmul.mubr.msk.f32.gmra.mrb[188].mxu1 %vm7510_vm5, %v20966_v60 }
 0x731   :  { %8207 = vmatprep.mubr.f32.mxu0 %v21855_v44  ;;  %8314 = vmatprep.mubr.f32.mxu1 %v21855_v44 }
 0x732   :  { %13742 = vmatpush1.bf16.msra.mxu0 %v13741_v43  ;;  %13750 = vmatpush1.bf16.msra.mxu1 %v13749_v17 }
 0x733   :  { %13769 = vmatprep.subr.bf16.mxu1 %v22062_v31  ;;  %13751 = vmatprep.subr.bf16.mxu0 %v22062_v31 }
 0x734   :  { %10448 = vmatmul.mubr.msk.f32.gmra.mrb[114].mxu0 %vm7510_vm5, %v20976_v50  ;;  %10455 = vmatmul.mubr.msk.f32.gmra.mrb[190].mxu1 %vm7510_vm5, %v20976_v50 }
 0x735   :  { %8213 = vmatprep.mubr.f32.mxu0 %v21855_v44  ;;  %8320 = vmatprep.mubr.f32.mxu1 %v21855_v44 }
 0x738   :  { %10449 = vmatmul.mubr.msk.f32.gmra.mrb[116].mxu0 %vm7510_vm5, %v20987_v13  ;;  %10456 = vmatmul.mubr.msk.f32.gmra.mrb[192].mxu1 %vm7510_vm5, %v20987_v13 }
 0x739   :  { %8219 = vmatprep.mubr.f32.mxu0 %v21855_v44  ;;  %8326 = vmatprep.mubr.f32.mxu1 %v21855_v44 }
 0x73c   :  { %10450 = vmatmul.mubr.msk.f32.gmra.mrb[118].mxu0 %vm7510_vm5, %v20997_v59  ;;  %10457 = vmatmul.mubr.msk.f32.gmra.mrb[194].mxu1 %vm7510_vm5, %v20997_v59 }
 0x73d   :  { %8225 = vmatprep.mubr.f32.mxu0 %v21855_v44  ;;  %8332 = vmatprep.mubr.f32.mxu1 %v21855_v44 }
 0x740   :  { %10451 = vmatmul.mubr.msk.f32.gmra.mrb[120].mxu0 %vm7510_vm5, %v21005_v63  ;;  %10458 = vmatmul.mubr.msk.f32.gmra.mrb[196].mxu1 %vm7510_vm5, %v21005_v63 }
 0x741   :  { %8231 = vmatprep.mubr.f32.mxu0 %v21855_v44  ;;  %8338 = vmatprep.mubr.f32.mxu1 %v21855_v44 }
 0x744   :  { %10452 = vmatmul.mubr.msk.f32.gmra.mrb[122].mxu0 %vm7510_vm5, %v21013_v53  ;;  %10459 = vmatmul.mubr.msk.f32.gmra.mrb[198].mxu1 %vm7510_vm5, %v21013_v53 }
 0x745   :  { %8409 = vmatprep.mubr.f32.mxu0 %v21855_v44  ;;  %8516 = vmatprep.mubr.f32.mxu1 %v21855_v44 }
 0x748   :  { %10460 = vmatmul.mubr.msk.f32.vlgmr.msra.gmra.mrb[124].mxu0 %vm7510_vm5, %v20935_v20  ;;  %10467 = vmatmul.mubr.msk.f32.vlgmr.msra.gmra.mrb[200].mxu1 %vm7510_vm5, %v20935_v20 }
 0x749   :  { %8415 = vmatprep.mubr.f32.mxu0 %v21855_v44  ;;  %8522 = vmatprep.mubr.f32.mxu1 %v21855_v44 }
 0x74c   :  { %10461 = vmatmul.mubr.msk.f32.gmra.mrb[126].mxu0 %vm7510_vm5, %v20966_v60  ;;  %10468 = vmatmul.mubr.msk.f32.gmra.mrb[202].mxu1 %vm7510_vm5, %v20966_v60 }
 0x74d   :  { %8421 = vmatprep.mubr.f32.mxu0 %v21855_v44  ;;  %8528 = vmatprep.mubr.f32.mxu1 %v21855_v44 }
 0x750   :  { %10462 = vmatmul.mubr.msk.f32.gmra.mrb[128].mxu0 %vm7510_vm5, %v20976_v50  ;;  %10469 = vmatmul.mubr.msk.f32.gmra.mrb[204].mxu1 %vm7510_vm5, %v20976_v50 }
 0x751   :  { %8427 = vmatprep.mubr.f32.mxu0 %v21855_v44  ;;  %8534 = vmatprep.mubr.f32.mxu1 %v21855_v44 }
 0x754   :  { %10463 = vmatmul.mubr.msk.f32.gmra.mrb[130].mxu0 %vm7510_vm5, %v20987_v13  ;;  %10470 = vmatmul.mubr.msk.f32.gmra.mrb[206].mxu1 %vm7510_vm5, %v20987_v13 }
 0x755   :  { %8433 = vmatprep.mubr.f32.mxu0 %v21855_v44  ;;  %8540 = vmatprep.mubr.f32.mxu1 %v21855_v44 }
 0x758   :  { %10464 = vmatmul.mubr.msk.f32.gmra.mrb[132].mxu0 %vm7510_vm5, %v20997_v59  ;;  %10471 = vmatmul.mubr.msk.f32.gmra.mrb[208].mxu1 %vm7510_vm5, %v20997_v59 }
 0x759   :  { %8439 = vmatprep.mubr.f32.mxu0 %v21855_v44  ;;  %8546 = vmatprep.mubr.f32.mxu1 %v21855_v44 }
 0x75c   :  { %10465 = vmatmul.mubr.msk.f32.gmra.mrb[134].mxu0 %vm7510_vm5, %v21005_v63  ;;  %10472 = vmatmul.mubr.msk.f32.gmra.mrb[210].mxu1 %vm7510_vm5, %v21005_v63 }
 0x75d   :  { %8445 = vmatprep.mubr.f32.mxu0 %v21855_v44  ;;  %8552 = vmatprep.mubr.f32.mxu1 %v21855_v44 }
 0x760   :  { %10466 = vmatmul.mubr.msk.f32.gmra.mrb[136].mxu0 %vm7510_vm5, %v21013_v53  ;;  %10473 = vmatmul.mubr.msk.f32.gmra.mrb[212].mxu1 %vm7510_vm5, %v21013_v53 }
 0x761   :  { %12666 = vmatprep.mubr.msk.f32.mxu0 %vm15492_vm0, %v21855_v44  ;;  %12700 = vmatprep.mubr.msk.f32.mxu1 %vm15492_vm0, %v21855_v44 }
 0x7c7   :  { %v21235_v20 = vpop.f32.mrb[82].mxu0  ;;  %v7876_v60 = vpop.f32.mrb[158].mxu1 }
 0x7c8   :  { %v7771_v51 = vpop.f32.mrb[83].mxu0  ;;  %v21237_v36 = vpop.f32.mrb[159].mxu1 }
 0x7cb   :  { %v7775_v45 = vpop.f32.mrb[84].mxu0  ;;  %v7882_v25 = vpop.f32.mrb[160].mxu1 }
 0x7cc   :  { %v13761_v40 = vpack.c.bf16 %v7775_v45, %v21235_v20  ;;  %v13770_v50 = vpack.c.bf16 %v7882_v25, %v7876_v60  ;;  %v7777_v57 = vpop.f32.mrb[85].mxu0  ;;  %v21240_v47 = vpop.f32.mrb[161].mxu1 }
 0x7cd   :  { %v13752_v37 = vpack.c.bf16 %v7777_v57, %v7771_v51  ;;  %v13779_v13 = vpack.c.bf16 %v21240_v47, %v21237_v36  ;;  %v8559_v51 = vld [vmem:[%s21624_s8] sm:$0x3] }
 0x7ce   :  { %13771 = vmatpush3.bf16.msra.mxu1 %v13770_v50 }
 0x7cf   :  { %v21244_v22 = vpop.f32.mrb[86].mxu0  ;;  %v7888_v1 = vpop.f32.mrb[162].mxu1  ;;  %13753 = vmatpush3.bf16.msra.mxu0 %v13752_v37  ;;  %13772 = vmatprep.subr.bf16.mxu1 %v22062_v31 }
 0x7d0   :  { %v7783_v23 = vpop.f32.mrb[87].mxu0  ;;  %v21247_v59 = vpop.f32.mrb[163].mxu1  ;;  %13754 = vmatprep.subr.bf16.mxu0 %v22062_v31 }
 0x7d3   :  { %v7787_v3 = vpop.f32.mrb[88].mxu0  ;;  %v7894_v4 = vpop.f32.mrb[164].mxu1 }
 0x7d4   :  { %v13764_v63 = vpack.c.bf16 %v7787_v3, %v21244_v22  ;;  %v13773_v53 = vpack.c.bf16 %v7894_v4, %v7888_v1  ;;  %v7789_v52 = vpop.f32.mrb[89].mxu0  ;;  %v21251_v27 = vpop.f32.mrb[165].mxu1 }
 0x7d5   :  { %v13755_v42 = vpack.c.bf16 %v7789_v52, %v7783_v23  ;;  %v13782_v46 = vpack.c.bf16 %v21251_v27, %v21247_v59  ;;  %v10485_v27 = vld [vmem:[%s21624_s8 + $0x8] sm:$0x3] }
 0x7d6   :  { %13774 = vmatpush3.bf16.msra.mxu1 %v13773_v53 }
 0x7d7   :  { %v7793_v28 = vpop.f32.mrb[90].mxu0  ;;  %v7900_v35 = vpop.f32.mrb[166].mxu1  ;;  %13756 = vmatpush3.bf16.msra.mxu0 %v13755_v42  ;;  %13775 = vmatprep.subr.bf16.mxu1 %v22062_v31  ;;  %v10482_v42 = vld [vmem:[%s21624_s8 + $0x6] sm:$0x3] }
 0x7d8   :  { %v7795_v58 = vpop.f32.mrb[91].mxu0  ;;  %v21256_v7 = vpop.f32.mrb[167].mxu1  ;;  %13757 = vmatprep.subr.bf16.mxu0 %v22062_v31 }
 0x7db   :  { %v7799_v16 = vpop.f32.mrb[92].mxu0  ;;  %v7906_v6 = vpop.f32.mrb[168].mxu1 }
 0x7dc   :  { %v13767_v41 = vpack.c.bf16 %v7799_v16, %v7793_v28  ;;  %v13776_v26 = vpack.c.bf16 %v7906_v6, %v7900_v35  ;;  %v7801_v5 = vpop.f32.mrb[93].mxu0  ;;  %v21259_v19 = vpop.f32.mrb[169].mxu1 }
 0x7dd   :  { %v13758_v18 = vpack.c.bf16 %v7801_v5, %v7795_v58  ;;  %v13785_v32 = vpack.c.bf16 %v21259_v19, %v21256_v7 }
 0x7de   :  { %13777 = vmatpush3.bf16.msra.mxu1 %v13776_v26 }
 0x7df   :  { %v7805_v61 = vpop.f32.mrb[94].mxu0  ;;  %v7912_v15 = vpop.f32.mrb[170].mxu1  ;;  %13759 = vmatpush3.bf16.msra.mxu0 %v13758_v18  ;;  %12698 = vmatprep.subr.mxu1 %v21855_v44 }
 0x7e0   :  { %v7807_v39 = vpop.f32.mrb[95].mxu0  ;;  %v21264_v30 = vpop.f32.mrb[171].mxu1  ;;  %12664 = vmatprep.subr.mxu0 %v21855_v44 }
 0x7e2   :  { %12699 = vmatpush3.msk.msra.mxu1 %vm2017_vm3, %v7912_v15 }
 0x7e3   :  { %v7983_v34 = vpop.f32.mrb[96].mxu0  ;;  %v21274_v48 = vpop.f32.mrb[172].mxu1  ;;  %12665 = vmatpush3.msk.msra.mxu0 %vm2017_vm3, %v7807_v39  ;;  %13787 = vmatprep.subr.bf16.mxu1 %v22062_v31 }
 0x7e4   :  { %v21278_v38 = vpop.f32.mrb[97].mxu0  ;;  %v21280_v11 = vpop.f32.mrb[173].mxu1  ;;  %13760 = vmatprep.subr.bf16.mxu0 %v22062_v31  ;;  %12667 = vmatmul.mubr.msk.f32.vlgmr.msra.gmra.mrb[138].mxu0 %vm8562_vm7, %v10474_v62 }
 0x7e5   :  { %13762 = vmatpush3.bf16.msra.mxu0 %v13761_v40  ;;  %12701 = vmatmul.mubr.msk.f32.vlgmr.msra.gmra.mrb[214].mxu1 %vm8562_vm7, %v10479_v9 }
 0x7e6   :  { %13763 = vmatprep.subr.bf16.mxu0 %v22062_v31  ;;  %12683 = vmatprep.mubr.msk.f32.mxu0 %vm15492_vm0, %v21855_v44 }
 0x7e7   :  { %v7989_v55 = vpop.f32.mrb[98].mxu0  ;;  %v21288_v24 = vpop.f32.mrb[174].mxu1  ;;  %12734 = vmatprep.mubr.msk.f32.mxu1 %vm15492_vm0, %v21855_v44 }
 0x7e8   :  { %v13788_v33 = vpack.c.bf16 %v7989_v55, %v7983_v34  ;;  %v13806_v54 = vpack.c.bf16 %v21288_v24, %v21274_v48  ;;  %v21294_v2 = vpop.f32.mrb[99].mxu0  ;;  %v21296_v21 = vpop.f32.mrb[175].mxu1  ;;  %v10488_v24 = vld [vmem:[%s21624_s8 + $0xa] sm:$0x3] }
 0x7e9   :  { %v13797_v56 = vpack.c.bf16 %v21294_v2, %v21278_v38  ;;  %v13815_v10 = vpack.c.bf16 %v21296_v21, %v21280_v11  ;;  %13765 = vmatpush3.bf16.msra.mxu0 %v13764_v63 }
 0x7ea   :  { %13789 = vmatpush3.bf16.msra.mxu1 %v13788_v33  ;;  %13766 = vmatprep.subr.bf16.mxu0 %v22062_v31 }
 0x7eb   :  { %v7995_v12 = vpop.f32.mrb[100].mxu0  ;;  %v21303_v29 = vpop.f32.mrb[176].mxu1  ;;  %13790 = vmatprep.subr.bf16.mxu1 %v22062_v31 }
 0x7ec   :  { %v21306_v14 = vpop.f32.mrb[101].mxu0  ;;  %v21308_v0 = vpop.f32.mrb[177].mxu1 }
 0x7ed   :  { %13768 = vmatpush3.bf16.msra.mxu0 %v13767_v41 }
 0x7ee   :  { %12681 = vmatprep.subr.mxu0 %v21855_v44 }
 0x7ef   :  { %v8001_v49 = vpop.f32.mrb[102].mxu0  ;;  %v8108_v8 = vpop.f32.mrb[178].mxu1 }
 0x7f0   :  { %v13791_v43 = vpack.c.bf16 %v8001_v49, %v7995_v12  ;;  %v13809_v17 = vpack.c.bf16 %v8108_v8, %v21303_v29  ;;  %v21312_v20 = vpop.f32.mrb[103].mxu0  ;;  %v21314_v60 = vpop.f32.mrb[179].mxu1 }
 0x7f1   :  { %v13800_v45 = vpack.c.bf16 %v21312_v20, %v21306_v14  ;;  %v13818_v25 = vpack.c.bf16 %v21314_v60, %v21308_v0  ;;  %12682 = vmatpush3.msk.msra.mxu0 %vm2017_vm3, %v7805_v61 }
 0x7f2   :  { %13778 = vmatprep.subr.bf16.mxu0 %v22062_v31  ;;  %13792 = vmatpush3.bf16.msra.mxu1 %v13791_v43 }
 0x7f3   :  { %v8007_v40 = vpop.f32.mrb[104].mxu0  ;;  %v8114_v50 = vpop.f32.mrb[180].mxu1  ;;  %12684 = vmatmul.mubr.msk.f32.vlgmr.msra.gmra.mrb[140].mxu0 %vm8562_vm7, %v8559_v51  ;;  %13793 = vmatprep.subr.bf16.mxu1 %v22062_v31 }
 0x7f4   :  { %13780 = vmatpush3.bf16.msra.mxu0 %v13779_v13  ;;  %v8009_v57 = vpop.f32.mrb[105].mxu0  ;;  %v21330_v37 = vpop.f32.mrb[181].mxu1  ;;  %12717 = vmatprep.mubr.msk.f32.mxu0 %vm15492_vm0, %v21855_v44 }
 0x7f5   :  { %13781 = vmatprep.subr.bf16.mxu0 %v22062_v31 }
 0x7f7   :  { %v8013_v22 = vpop.f32.mrb[106].mxu0  ;;  %v8120_v1 = vpop.f32.mrb[182].mxu1 }
 0x7f8   :  { %v13794_v23 = vpack.c.bf16 %v8013_v22, %v8007_v40  ;;  %v13812_v3 = vpack.c.bf16 %v8120_v1, %v8114_v50  ;;  %13783 = vmatpush3.bf16.msra.mxu0 %v13782_v46  ;;  %v8015_v4 = vpop.f32.mrb[107].mxu0  ;;  %v21338_v63 = vpop.f32.mrb[183].mxu1 }
 0x7f9   :  { %v13803_v36 = vpack.c.bf16 %v8015_v4, %v8009_v57  ;;  %v13821_v47 = vpack.c.bf16 %v21338_v63, %v21330_v37  ;;  %13784 = vmatprep.subr.bf16.mxu0 %v22062_v31 }
 0x7fa   :  { %13795 = vmatpush3.bf16.msra.mxu1 %v13794_v23 }
 0x7fb   :  { %v8019_v13 = vpop.f32.mrb[108].mxu0  ;;  %v8126_v53 = vpop.f32.mrb[184].mxu1  ;;  %12732 = vmatprep.subr.mxu1 %v21855_v44 }
 0x7fc   :  { %13786 = vmatpush3.bf16.msra.mxu0 %v13785_v32  ;;  %v8021_v59 = vpop.f32.mrb[109].mxu0  ;;  %v21347_v52 = vpop.f32.mrb[185].mxu1 }
 0x7fd   :  { %12715 = vmatprep.subr.mxu0 %v21855_v44 }
 0x7fe   :  { %12733 = vmatpush3.msk.msra.mxu1 %vm2017_vm3, %v8019_v13 }
 0x7ff   :  { %v8197_v46 = vpop.f32.mrb[110].mxu0  ;;  %v21357_v28 = vpop.f32.mrb[186].mxu1  ;;  %13805 = vmatprep.subr.bf16.mxu1 %v22062_v31  ;;  %12735 = vmatmul.mubr.msk.f32.vlgmr.msra.gmra.mrb[216].mxu1 %vm8562_vm7, %v10485_v27  ;;  %v10503_v27 = vld [vmem:[%s21624_s8 + $0x14] sm:$0x3] }
 0x800   :  { %12716 = vmatpush3.msk.msra.mxu0 %vm2017_vm3, %v21264_v30  ;;  %v21363_v35 = vpop.f32.mrb[111].mxu0  ;;  %v21365_v58 = vpop.f32.mrb[187].mxu1  ;;  %13807 = vmatpush3.bf16.msra.mxu1 %v13806_v54  ;;  %v10491_v30 = vld [vmem:[%s21624_s8 + $0xc] sm:$0x3] }
 0x801   :  { %13796 = vmatprep.subr.bf16.mxu0 %v22062_v31  ;;  %12718 = vmatmul.mubr.msk.f32.vlgmr.msra.gmra.mrb[142].mxu0 %vm8562_vm7, %v10482_v42 }
 0x802   :  { %13798 = vmatpush3.bf16.msra.mxu0 %v13797_v56  ;;  %13808 = vmatprep.subr.bf16.mxu1 %v22062_v31 }
 0x803   :  { %v8203_v7 = vpop.f32.mrb[112].mxu0  ;;  %v21376_v16 = vpop.f32.mrb[188].mxu1  ;;  %13799 = vmatprep.subr.bf16.mxu0 %v22062_v31  ;;  %12768 = vmatprep.mubr.msk.f32.mxu1 %vm15492_vm0, %v21855_v44 }
 0x804   :  { %v13824_v6 = vpack.c.bf16 %v8203_v7, %v8197_v46  ;;  %v13842_v41 = vpack.c.bf16 %v21376_v16, %v21357_v28  ;;  %v21383_v26 = vpop.f32.mrb[113].mxu0  ;;  %v21385_v5 = vpop.f32.mrb[189].mxu1  ;;  %13810 = vmatpush3.bf16.msra.mxu1 %v13809_v17  ;;  %12751 = vmatprep.mubr.msk.f32.mxu0 %vm15492_vm0, %v21855_v44 }
 0x805   :  { %v13833_v19 = vpack.c.bf16 %v21383_v26, %v21363_v35  ;;  %v13851_v18 = vpack.c.bf16 %v21385_v5, %v21365_v58  ;;  %13811 = vmatprep.subr.bf16.mxu1 %v22062_v31 }
 0x806   :  { %13801 = vmatpush3.bf16.msra.mxu0 %v13800_v45  ;;  %v10497_v45 = vld [vmem:[%s21624_s8 + $0x10] sm:$0x3] }
 0x807   :  { %v8209_v32 = vpop.f32.mrb[114].mxu0  ;;  %v21394_v61 = vpop.f32.mrb[190].mxu1  ;;  %13802 = vmatprep.subr.bf16.mxu0 %v22062_v31 }
 0x808   :  { %v21397_v15 = vpop.f32.mrb[115].mxu0  ;;  %v21399_v39 = vpop.f32.mrb[191].mxu1  ;;  %13813 = vmatpush3.bf16.msra.mxu1 %v13812_v3 }
 0x809   :  { %12766 = vmatprep.subr.mxu1 %v21855_v44 }
 0x80a   :  { %13804 = vmatpush3.bf16.msra.mxu0 %v13803_v36 }
 0x80b   :  { %v8215_v62 = vpop.f32.mrb[116].mxu0  ;;  %v21405_v9 = vpop.f32.mrb[192].mxu1  ;;  %12749 = vmatprep.subr.mxu0 %v21855_v44 }
 0x80c   :  { %v13827_v34 = vpack.c.bf16 %v8215_v62, %v8209_v32  ;;  %v13845_v48 = vpack.c.bf16 %v21405_v9, %v21394_v61  ;;  %v21410_v38 = vpop.f32.mrb[117].mxu0  ;;  %v21412_v55 = vpop.f32.mrb[193].mxu1  ;;  %12767 = vmatpush3.msk.msra.mxu1 %vm2017_vm3, %v8126_v53 }
 0x80d   :  { %v13836_v33 = vpack.c.bf16 %v21410_v38, %v21397_v15  ;;  %v13854_v54 = vpack.c.bf16 %v21412_v55, %v21399_v39  ;;  %13823 = vmatprep.subr.bf16.mxu1 %v22062_v31  ;;  %12769 = vmatmul.mubr.msk.f32.vlgmr.msra.gmra.mrb[218].mxu1 %vm8562_vm7, %v10491_v30  ;;  %v10509_v39 = vld [vmem:[%s21624_s8 + $0x18] sm:$0x3]  ;;  %v10506_v55 = vld [vmem:[%s21624_s8 + $0x16] sm:$0x3] }
 0x80e   :  { %12750 = vmatpush3.msk.msra.mxu0 %vm2017_vm3, %v8021_v59  ;;  %13825 = vmatpush3.bf16.msra.mxu1 %v13824_v6  ;;  %v10500_v6 = vld [vmem:[%s21624_s8 + $0x12] sm:$0x3] }
 0x80f   :  { %13814 = vmatprep.subr.bf16.mxu0 %v22062_v31  ;;  %v8221_v2 = vpop.f32.mrb[118].mxu0  ;;  %v21426_v56 = vpop.f32.mrb[194].mxu1  ;;  %12752 = vmatmul.mubr.msk.f32.vlgmr.msra.gmra.mrb[144].mxu0 %vm8562_vm7, %v10488_v24 }
 0x810   :  { %13816 = vmatpush3.bf16.msra.mxu0 %v13815_v10  ;;  %v8223_v12 = vpop.f32.mrb[119].mxu0  ;;  %v21432_v29 = vpop.f32.mrb[195].mxu1  ;;  %13826 = vmatprep.subr.bf16.mxu1 %v22062_v31 }
 0x811   :  { %13817 = vmatprep.subr.bf16.mxu0 %v22062_v31  ;;  %12802 = vmatprep.mubr.msk.f32.mxu1 %vm15492_vm0, %v21855_v44 }
 0x812   :  { %13828 = vmatpush3.bf16.msra.mxu1 %v13827_v34  ;;  %12785 = vmatprep.mubr.msk.f32.mxu0 %vm15492_vm0, %v21855_v44 }
 0x813   :  { %v8227_v14 = vpop.f32.mrb[120].mxu0  ;;  %v8334_v49 = vpop.f32.mrb[196].mxu1  ;;  %13829 = vmatprep.subr.bf16.mxu1 %v22062_v31 }
 0x814   :  { %v13830_v11 = vpack.c.bf16 %v8227_v14, %v8221_v2  ;;  %v13848_v21 = vpack.c.bf16 %v8334_v49, %v21426_v56  ;;  %13819 = vmatpush3.bf16.msra.mxu0 %v13818_v25  ;;  %v8229_v10 = vpop.f32.mrb[121].mxu0  ;;  %v21445_v8 = vpop.f32.mrb[197].mxu1  ;;  %v10494_v25 = vld [vmem:[%s21624_s8 + $0xe] sm:$0x3]  ;;  %v10512_v56 = vld [vmem:[%s21624_s8 + $0x1a] sm:$0x3] }
 0x815   :  { %v13839_v43 = vpack.c.bf16 %v8229_v10, %v8223_v12  ;;  %v13857_v17 = vpack.c.bf16 %v21445_v8, %v21432_v29  ;;  %13820 = vmatprep.subr.bf16.mxu0 %v22062_v31  ;;  %v10518_v12 = vld [vmem:[%s21624_s8 + $0x1e] sm:$0x3] }
 0x816   :  { %13831 = vmatpush3.bf16.msra.mxu1 %v13830_v11 }
 0x817   :  { %v8233_v20 = vpop.f32.mrb[122].mxu0  ;;  %v8340_v51 = vpop.f32.mrb[198].mxu1  ;;  %12800 = vmatprep.subr.mxu1 %v21855_v44 }
 0x818   :  { %13822 = vmatpush3.bf16.msra.mxu0 %v13821_v47  ;;  %v8235_v0 = vpop.f32.mrb[123].mxu0  ;;  %v21454_v60 = vpop.f32.mrb[199].mxu1 }
 0x819   :  { %12783 = vmatprep.subr.mxu0 %v21855_v44 }
 0x81a   :  { %12801 = vmatpush3.msk.msra.mxu1 %vm2017_vm3, %v8233_v20 }
 0x81b   :  { %v8411_v40 = vpop.f32.mrb[124].mxu0  ;;  %v21464_v50 = vpop.f32.mrb[200].mxu1  ;;  %13841 = vmatprep.subr.bf16.mxu1 %v22062_v31  ;;  %12803 = vmatmul.mubr.msk.f32.vlgmr.msra.gmra.mrb[220].mxu1 %vm8562_vm7, %v10497_v45 }
 0x81c   :  { %12784 = vmatpush3.msk.msra.mxu0 %vm2017_vm3, %v21347_v52  ;;  %v21470_v57 = vpop.f32.mrb[125].mxu0  ;;  %v21472_v37 = vpop.f32.mrb[201].mxu1  ;;  %13843 = vmatpush3.bf16.msra.mxu1 %v13842_v41 }
 0x81d   :  { %13832 = vmatprep.subr.bf16.mxu0 %v22062_v31  ;;  %12786 = vmatmul.mubr.msk.f32.vlgmr.msra.gmra.mrb[146].mxu0 %vm8562_vm7, %v10494_v25 }
 0x81e   :  { %13834 = vmatpush3.bf16.msra.mxu0 %v13833_v19  ;;  %13844 = vmatprep.subr.bf16.mxu1 %v22062_v31 }
 0x81f   :  { %v8417_v22 = vpop.f32.mrb[126].mxu0  ;;  %v21483_v1 = vpop.f32.mrb[202].mxu1  ;;  %13835 = vmatprep.subr.bf16.mxu0 %v22062_v31  ;;  %12836 = vmatprep.mubr.msk.f32.mxu1 %vm15492_vm0, %v21855_v44 }
 0x820   :  { %v13860_v23 = vpack.c.bf16 %v8417_v22, %v8411_v40  ;;  %v13878_v3 = vpack.c.bf16 %v21483_v1, %v21464_v50  ;;  %v21490_v4 = vpop.f32.mrb[127].mxu0  ;;  %v21492_v63 = vpop.f32.mrb[203].mxu1  ;;  %13846 = vmatpush3.bf16.msra.mxu1 %v13845_v48  ;;  %12819 = vmatprep.mubr.msk.f32.mxu0 %vm15492_vm0, %v21855_v44 }
 0x821   :  { %v13869_v36 = vpack.c.bf16 %v21490_v4, %v21470_v57  ;;  %v13887_v47 = vpack.c.bf16 %v21492_v63, %v21472_v37  ;;  %13847 = vmatprep.subr.bf16.mxu1 %v22062_v31 }
 0x822   :  { %13837 = vmatpush3.bf16.msra.mxu0 %v13836_v33 }
 0x823   :  { %v8423_v13 = vpop.f32.mrb[128].mxu0  ;;  %v21507_v53 = vpop.f32.mrb[204].mxu1  ;;  %13838 = vmatprep.subr.bf16.mxu0 %v22062_v31 }
 0x824   :  { %v21510_v59 = vpop.f32.mrb[129].mxu0  ;;  %v21512_v52 = vpop.f32.mrb[205].mxu1  ;;  %13849 = vmatpush3.bf16.msra.mxu1 %v13848_v21 }
 0x825   :  { %12834 = vmatprep.subr.mxu1 %v21855_v44 }
 0x826   :  { %13840 = vmatpush3.bf16.msra.mxu0 %v13839_v43 }
 0x827   :  { %v8429_v42 = vpop.f32.mrb[130].mxu0  ;;  %v8536_v46 = vpop.f32.mrb[206].mxu1  ;;  %12817 = vmatprep.subr.mxu0 %v21855_v44 }
 0x828   :  { %v13863_v28 = vpack.c.bf16 %v8429_v42, %v8423_v13  ;;  %v13881_v35 = vpack.c.bf16 %v8536_v46, %v21507_v53  ;;  %v8431_v7 = vpop.f32.mrb[131].mxu0  ;;  %v21520_v16 = vpop.f32.mrb[207].mxu1  ;;  %12835 = vmatpush3.msk.msra.mxu1 %vm2017_vm3, %v8340_v51 }
 0x829   :  { %v13872_v41 = vpack.c.bf16 %v8431_v7, %v21510_v59  ;;  %v13890_v26 = vpack.c.bf16 %v21520_v16, %v21512_v52  ;;  %13859 = vmatprep.subr.bf16.mxu1 %v22062_v31  ;;  %12837 = vmatmul.mubr.msk.f32.vlgmr.msra.gmra.mrb[222].mxu1 %vm8562_vm7, %v10503_v27 }
 0x82a   :  { %12818 = vmatpush3.msk.msra.mxu0 %vm2017_vm3, %v8235_v0  ;;  %13861 = vmatpush3.bf16.msra.mxu1 %v13860_v23 }
 0x82b   :  { %13850 = vmatprep.subr.bf16.mxu0 %v22062_v31  ;;  %v8435_v19 = vpop.f32.mrb[132].mxu0  ;;  %v8542_v32 = vpop.f32.mrb[208].mxu1  ;;  %12820 = vmatmul.mubr.msk.f32.vlgmr.msra.gmra.mrb[148].mxu0 %vm8562_vm7, %v10500_v6 }
 0x82c   :  { %13852 = vmatpush3.bf16.msra.mxu0 %v13851_v18  ;;  %v8437_v61 = vpop.f32.mrb[133].mxu0  ;;  %v8544_v15 = vpop.f32.mrb[209].mxu1  ;;  %13862 = vmatprep.subr.bf16.mxu1 %v22062_v31 }
 0x82d   :  { %13853 = vmatprep.subr.bf16.mxu0 %v22062_v31  ;;  %12870 = vmatprep.mubr.msk.f32.mxu1 %vm15492_vm0, %v21855_v44 }
 0x82e   :  { %13864 = vmatpush3.bf16.msra.mxu1 %v13863_v28  ;;  %12853 = vmatprep.mubr.msk.f32.mxu0 %vm15492_vm0, %v21855_v44 }
 0x82f   :  { %v8441_v30 = vpop.f32.mrb[134].mxu0  ;;  %v8548_v62 = vpop.f32.mrb[210].mxu1  ;;  %13865 = vmatprep.subr.bf16.mxu1 %v22062_v31 }
 0x830   :  { %v13866_v9 = vpack.c.bf16 %v8441_v30, %v8435_v19  ;;  %v13884_v58 = vpack.c.bf16 %v8548_v62, %v8542_v32  ;;  %13855 = vmatpush3.bf16.msra.mxu0 %v13854_v54  ;;  %v8443_v5 = vpop.f32.mrb[135].mxu0  ;;  %v8550_v18 = vpop.f32.mrb[211].mxu1  ;;  %v10515_v54 = vld [vmem:[%s21624_s8 + $0x1c] sm:$0x3] }
 0x831   :  { %v13875_v34 = vpack.c.bf16 %v8443_v5, %v8437_v61  ;;  %v13893_v48 = vpack.c.bf16 %v8550_v18, %v8544_v15  ;;  %13856 = vmatprep.subr.bf16.mxu0 %v22062_v31  ;;  %v10521_v61 = vld [vmem:[%s21625_s10] ss:$0 sm:$0xff] }
 0x832   :  { %13867 = vmatpush3.bf16.msra.mxu1 %v13866_v9  ;;  %v9829_v9 = vlaneseq }
 0x833   :  { %v8447_v38 = vpop.f32.mrb[136].mxu0  ;;  %v8554_v24 = vpop.f32.mrb[212].mxu1  ;;  %12868 = vmatprep.subr.mxu1 %v21855_v44 }
 0x834   :  { %13858 = vmatpush3.bf16.msra.mxu0 %v13857_v17  ;;  %v8449_v33 = vpop.f32.mrb[137].mxu0  ;;  %v8556_v2 = vpop.f32.mrb[213].mxu1  ;;  %v9830_v5 = vand.u32 127, %v9829_v9 }
 0x835   :  { %12851 = vmatprep.subr.mxu0 %v21855_v44 }
 0x836   :  { %12869 = vmatpush3.msk.msra.mxu1 %vm2017_vm3, %v8447_v38  ;;  %vm9831_vm8 = vcmp.ge.s32.totalorder %v9830_v5, 32  ;;  %vm9832_vm9 = vcmp.lt.s32.totalorder %v9830_v5, 64 }
 0x837   :  { %13877 = vmatprep.subr.bf16.mxu1 %v22062_v31  ;;  %12871 = vmatmul.mubr.msk.f32.vlgmr.msra.gmra.mrb[224].mxu1 %vm8562_vm7, %v10509_v39  ;;  %vm9833_vm10 = vmand %vm9831_vm8, %vm9832_vm9 }
 0x838   :  { %12852 = vmatpush3.msk.msra.mxu0 %vm2017_vm3, %v21454_v60  ;;  %13879 = vmatpush3.bf16.msra.mxu1 %v13878_v3 }
 0x839   :  { %13868 = vmatprep.subr.bf16.mxu0 %v22062_v31  ;;  %12854 = vmatmul.mubr.msk.f32.vlgmr.msra.gmra.mrb[150].mxu0 %vm8562_vm7, %v10506_v55 }
 0x83a   :  { %13870 = vmatpush3.bf16.msra.mxu0 %v13869_v36  ;;  %13880 = vmatprep.subr.bf16.mxu1 %v22062_v31 }
 0x83b   :  { %13871 = vmatprep.subr.bf16.mxu0 %v22062_v31  ;;  %12887 = vmatprep.mubr.msk.f32.mxu0 %vm15492_vm0, %v21855_v44 }
 0x83c   :  { %13882 = vmatpush3.bf16.msra.mxu1 %v13881_v35  ;;  %12904 = vmatprep.mubr.msk.f32.mxu1 %vm15492_vm0, %v21855_v44 }
 0x83d   :  { %13883 = vmatprep.subr.bf16.mxu1 %v22062_v31 }
 0x83e   :  { %13873 = vmatpush3.bf16.msra.mxu0 %v13872_v41 }
 0x83f   :  { %13874 = vmatprep.subr.bf16.mxu0 %v22062_v31 }
 0x840   :  { %13885 = vmatpush3.bf16.msra.mxu1 %v13884_v58 }
 0x841   :  { %12902 = vmatprep.subr.mxu1 %v21855_v44 }
 0x842   :  { %13876 = vmatpush3.bf16.msra.mxu0 %v13875_v34 }
 0x843   :  { %12885 = vmatprep.subr.mxu0 %v21855_v44 }
 0x844   :  { %12903 = vmatpush3.msk.msra.mxu1 %vm2017_vm3, %v8554_v24 }
 0x845   :  { %12905 = vmatmul.mubr.msk.f32.vlgmr.msra.gmra.mrb[226].mxu1 %vm8562_vm7, %v10515_v54 }
 0x846   :  { %12886 = vmatpush3.msk.msra.mxu0 %vm2017_vm3, %v8449_v33 }
 0x847   :  { %13886 = vmatprep.subr.bf16.mxu0 %v22062_v31  ;;  %12888 = vmatmul.mubr.msk.f32.vlgmr.msra.gmra.mrb[152].mxu0 %vm8562_vm7, %v10512_v56 }
 0x848   :  { %13888 = vmatpush3.bf16.msra.mxu0 %v13887_v47  ;;  %12921 = vmatprep.mubr.msk.f32.mxu0 %vm15492_vm0, %v21855_v44 }
 0x849   :  { %13889 = vmatprep.subr.bf16.mxu0 %v22062_v31 }
 0x84c   :  { %13891 = vmatpush3.bf16.msra.mxu0 %v13890_v26 }
 0x84d   :  { %13892 = vmatprep.subr.bf16.mxu0 %v22062_v31 }
 0x850   :  { %13894 = vmatpush3.bf16.msra.mxu0 %v13893_v48 }
 0x851   :  { %12919 = vmatprep.subr.mxu0 %v21855_v44 }
 0x854   :  { %12920 = vmatpush3.msk.msra.mxu0 %vm2017_vm3, %v8556_v2 }
 0x855   :  { %12922 = vmatmul.mubr.msk.f32.vlgmr.msra.gmra.mrb[154].mxu0 %vm8562_vm7, %v10518_v12 }
 0x8b7   :  { %v8635_v29 = vpop.f32.mrb[138].mxu0 }
 0x8b8   :  { %v12668_v14 = vpop.f32.mrb[139].mxu0  ;;  %v8789_v49 = vpop.f32.mrb[214].mxu1 }
 0x8b9   :  { %v12702_v11 = vpop.f32.mrb[215].mxu1 }
 0x8c6   :  { %v8711_v21 = vpop.f32.mrb[140].mxu0 }
 0x8c7   :  { %v8712_v10 = vadd.f32 %v8711_v21, %v8635_v29  ;;  %v12685_v8 = vpop.f32.mrb[141].mxu0 }
 0x8c9   :  { %v8793_v43 = vadd.f32 %v8789_v49, %v8712_v10 }
 0x8d2   :  { %v8947_v31 = vpop.f32.mrb[216].mxu1 }
 0x8d3   :  { %v12736_v17 = vpop.f32.mrb[217].mxu1 }
 0x8d4   :  { %v8868_v20 = vpop.f32.mrb[142].mxu0 }
 0x8d5   :  { %v8872_v44 = vadd.f32 %v8868_v20, %v8793_v43  ;;  %v12719_v51 = vpop.f32.mrb[143].mxu0 }
 0x8d7   :  { %v8951_v0 = vadd.f32 %v8947_v31, %v8872_v44 }
 0x8e0   :  { %v9105_v60 = vpop.f32.mrb[218].mxu1 }
 0x8e1   :  { %v12770_v45 = vpop.f32.mrb[219].mxu1 }
 0x8e2   :  { %v9026_v25 = vpop.f32.mrb[144].mxu0 }
 0x8e3   :  { %v9030_v40 = vadd.f32 %v9026_v25, %v8951_v0  ;;  %v12753_v50 = vpop.f32.mrb[145].mxu0 }
 0x8e5   :  { %v9109_v57 = vadd.f32 %v9105_v60, %v9030_v40 }
 0x8ee   :  { %v9263_v37 = vpop.f32.mrb[220].mxu1 }
 0x8ef   :  { %v12804_v22 = vpop.f32.mrb[221].mxu1 }
 0x8f0   :  { %v9184_v1 = vpop.f32.mrb[146].mxu0 }
 0x8f1   :  { %v9188_v23 = vadd.f32 %v9184_v1, %v9109_v57  ;;  %v12787_v3 = vpop.f32.mrb[147].mxu0 }
 0x8f3   :  { %v9267_v4 = vadd.f32 %v9263_v37, %v9188_v23 }
 0x8fc   :  { %v9421_v63 = vpop.f32.mrb[222].mxu1 }
 0x8fd   :  { %v12838_v36 = vpop.f32.mrb[223].mxu1 }
 0x8fe   :  { %v9342_v47 = vpop.f32.mrb[148].mxu0 }
 0x8ff   :  { %v9346_v13 = vadd.f32 %v9342_v47, %v9267_v4  ;;  %v12821_v53 = vpop.f32.mrb[149].mxu0 }
 0x901   :  { %v9425_v59 = vadd.f32 %v9421_v63, %v9346_v13 }
 0x90a   :  { %v9579_v52 = vpop.f32.mrb[224].mxu1 }
 0x90b   :  { %v12872_v27 = vpop.f32.mrb[225].mxu1 }
 0x90c   :  { %v9500_v42 = vpop.f32.mrb[150].mxu0 }
 0x90d   :  { %v9504_v46 = vadd.f32 %v9500_v42, %v9425_v59  ;;  %v12855_v28 = vpop.f32.mrb[151].mxu0 }
 0x90f   :  { %v9583_v35 = vadd.f32 %v9579_v52, %v9504_v46 }
 0x918   :  { %v9737_v7 = vpop.f32.mrb[226].mxu1 }
 0x919   :  { %v12906_v16 = vpop.f32.mrb[227].mxu1 }
 0x91a   :  { %v9658_v6 = vpop.f32.mrb[152].mxu0 }
 0x91b   :  { %v9662_v41 = vadd.f32 %v9658_v6, %v9583_v35  ;;  %v12889_v26 = vpop.f32.mrb[153].mxu0 }
 0x91d   :  { %v9741_v19 = vadd.f32 %v9737_v7, %v9662_v41 }
 0x928   :  { %v9816_v32 = vpop.f32.mrb[154].mxu0 }
 0x929   :  { %v9820_v15 = vadd.f32 %v9816_v32, %v9741_v19  ;;  %v12923_v30 = vpop.f32.mrb[155].mxu0 }
 0x92b   :  { %v9828_v62 = vadd.f32 %v10521_v61, %v9820_v15 }
 0x92d   :  { %v9834_v58 = vmul.f32 1.442695, %v9828_v62 }
 0x92f   :  { %15489 = vpow2.f32 %v9834_v58 }
 0x939   :  { %v15490_v18 = vpop.eup %15489 }
 0x93a   :  { %v9836_v34 = vsel %vm9833_vm10, %v15490_v18, %v9828_v62 }
 0x93b   :  { %9837 = vst [vmem:[%s21626_s11] sm:$0x3] %v9836_v34 }

</bundles_post_ra>
